<compile_context>
chip_gen: v5e
topology: v5e:2x2
jax: 0.10.0
libtpu: 0.0.40
codegen_flags: <defaults>
</compile_context>

<pallas_src>
import functools

import jax
import jax.numpy as jnp
import numpy as np
from jax.experimental import pallas as pl
from jax.experimental.pallas import tpu as pltpu


# Layer geometry for the fixed 28x28 Omniglot input (forced by Linear(256)):
#   conv1: 28 -> 14, conv2: 14 -> 7, conv3: 7 -> 4, conv4: 4 -> 2.
_H_OUT = (14, 7, 4, 2)
_CH = 64
_EPS = 1e-3
_K1_PAD = 128          # conv1 contraction dim padded 9 -> 128 (lane-dense)


# ---------------------------------------------------------------------------
# In-kernel building blocks
# ---------------------------------------------------------------------------
def _bn_relu(y, g, n_pad, gamma, beta, nmask, inv_count):
    """BatchNorm2d (batch stats, biased var, eps=1e-3) + ReLU on a (M, C) slab.

    Rows are ordered (i, j, n) with the batch index n minor (M = g * n_pad).
    Statistics use a two-stage reduction: sum over the g spatial positions to
    (n_pad, C), then a masked sum over the batch (nmask zeroes batch-pad rows).
    Variance uses E[x^2] - E[x]^2 with f32 accumulation.
    """
    y3 = y.reshape(g, n_pad, _CH)
    s1 = jnp.sum(y3, axis=0)                      # (n_pad, C)
    s2 = jnp.sum(y3 * y3, axis=0)                 # (n_pad, C)
    mean = jnp.sum(s1 * nmask, axis=0, keepdims=True) * inv_count   # (1, C)
    ex2 = jnp.sum(s2 * nmask, axis=0, keepdims=True) * inv_count    # (1, C)
    var = ex2 - mean * mean
    scale = gamma * jax.lax.rsqrt(var + _EPS)     # (1, C)
    shift = beta - mean * scale
    return jnp.maximum(y * scale + shift, 0.0)


def _zero_border(ref, interior, n_pad):
    """Zero only the padding border frame of a (Hp, Wp, n_pad, C) scratch.

    The interior [1:1+interior, 1:1+interior] is fully overwritten later, so
    only the border rows/cols (the implicit conv zero-padding) need stores.
    """
    hp, wp = ref.shape[0], ref.shape[1]
    ref[0:1, :, :, :] = jnp.zeros((1, wp, n_pad, _CH), jnp.float32)
    ref[1 + interior:hp, :, :, :] = jnp.zeros(
        (hp - 1 - interior, wp, n_pad, _CH), jnp.float32)
    ref[1:1 + interior, 0:1, :, :] = jnp.zeros(
        (interior, 1, n_pad, _CH), jnp.float32)
    ref[1:1 + interior, 1 + interior:wp, :, :] = jnp.zeros(
        (interior, wp - 1 - interior, n_pad, _CH), jnp.float32)


def _conv_taps(src_ref, wc_ref, layer_idx, ho, n_pad):
    """Stride-2 3x3 conv as 9 accumulated (M, 64) @ (64, 64) matmuls.

    src_ref: (2*ho+2, 2*ho+2, n_pad, 64) zero-bordered input scratch.
    The buffer is read once and de-interleaved into four (H-parity, W-parity)
    slabs; every tap is then a contiguous static slice of one slab (no per-tap
    window reloads or strided selection).  Returns (ho*ho*n_pad, 64) f32 with
    rows ordered (i, j, n).
    """
    wo = ho
    hp = 2 * ho + 2
    c = _CH

    x = src_ref[...]                                       # (Hp, Hp, Np, C)
    # De-interleave H (rows 0,2,.. vs 1,3,..): leading-dim reshape + static idx.
    xh = x.reshape(ho + 1, 2, hp, n_pad, c)
    x_e = xh[:, 0]                                         # xp rows 0,2,...,2ho
    x_o = xh[:, 1]                                         # xp rows 1,3,...,2ho+1

    # De-interleave W of each H-parity slab (shared by all 3 kj taps).
    def wsplit(v):
        vw = v.reshape(ho + 1, wo + 1, 2, n_pad, c)
        return vw[:, :, 0], vw[:, :, 1]

    x_ee, x_eo = wsplit(x_e)
    x_oe, x_oo = wsplit(x_o)
    par = ((x_ee, x_eo), (x_oe, x_oo))
    # Tap offset k -> (parity, start) within the parity slab: row 2i+k.
    sel = ((0, 0), (1, 0), (0, 1))

    acc = None
    for ki in range(3):
        hpar, a0 = sel[ki]
        for kj in range(3):
            wpar, b0 = sel[kj]
            slab = par[hpar][wpar][a0:a0 + ho, b0:b0 + wo]   # (ho, wo, Np, C)
            slab = slab.reshape(ho * wo * n_pad, c)          # trivial retiling
            w_tap = wc_ref[layer_idx, ki * 3 + kj]           # (C, 64)
            part = jnp.dot(slab, w_tap, preferred_element_type=jnp.float32)
            acc = part if acc is None else acc + part
    return acc


def _omniglot_kernel(n_true, n_pad,
                     p1_ref, w1_ref, wc_ref, bn_ref, wl_ref, bl_ref,
                     out_ref, xp2_ref, xp3_ref, xp4_ref):
    # Tiny (n_pad, C) batch-validity mask for BN statistics, built in-kernel.
    nmask = (jax.lax.broadcasted_iota(jnp.int32, (n_pad, _CH), 0)
             < n_true).astype(jnp.float32)

    def bn_relu(y, layer, ho):
        g = ho * ho
        gamma = bn_ref[layer:layer + 1, :]
        beta = bn_ref[4 + layer:5 + layer, :]
        return _bn_relu(y, g, n_pad, gamma, beta, nmask, 1.0 / (n_true * g))

    # Zero only the padding borders; interiors are fully overwritten below.
    _zero_border(xp2_ref, _H_OUT[0], n_pad)
    _zero_border(xp3_ref, _H_OUT[1], n_pad)
    _zero_border(xp4_ref, _H_OUT[2], n_pad)

    # ---- conv1 + BN + ReLU: lane-dense im2col (M1, 128) @ (128, 64) ----
    h1 = _H_OUT[0]
    y = jnp.dot(p1_ref[...], w1_ref[...], preferred_element_type=jnp.float32)
    y = bn_relu(y, 0, h1)
    xp2_ref[1:1 + h1, 1:1 + h1, :, :] = y.reshape(h1, h1, n_pad, _CH)

    # ---- conv2..conv4 + BN + ReLU: in-VMEM 9-tap matmul accumulation ----
    plan = ((0, xp2_ref, _H_OUT[1], xp3_ref),
            (1, xp3_ref, _H_OUT[2], xp4_ref),
            (2, xp4_ref, _H_OUT[3], None))
    y = None
    for li, src_ref, ho, dst_ref in plan:
        y = _conv_taps(src_ref, wc_ref, li, ho, n_pad)
        y = bn_relu(y, 1 + li, ho)
        if dst_ref is not None:
            dst_ref[1:1 + ho, 1:1 + ho, :, :] = y.reshape(ho, ho, n_pad, _CH)

    # ---- flatten (PyTorch NCHW order folded into wl) + Linear (lane-dense) ----
    logits = None
    for p in range(4):                     # p = h*2 + w over the final 2x2 map
        blk = y[p * n_pad:(p + 1) * n_pad, :]                      # (Np, 64)
        part = jnp.dot(blk, wl_ref[p], preferred_element_type=jnp.float32)
        logits = part if logits is None else logits + part
    out_ref[...] = logits + bl_ref[...]


def _vmem_spec():
    return pl.BlockSpec(memory_space=pltpu.MemorySpace.VMEM)


# ---------------------------------------------------------------------------
# Wrapper: one pallas_call for the whole forward pass
# ---------------------------------------------------------------------------
def _omniglot_forward_impl(params, x):
    """x: (N, 1, 28, 28) float32 -> logits (N, num_classes)."""
    assert x.shape[1] == 1 and x.shape[2:] == (28, 28), x.shape
    n = x.shape[0]
    n_pad = ((n + 7) // 8) * 8            # sublane-aligned batch inside the kernel
    num_classes = params["logits"]["w"].shape[0]
    k_pad = max(128, ((num_classes + 127) // 128) * 128)   # lane-dense logits
    x = x.astype(jnp.float32)
    if n_pad != n:
        x = jnp.pad(x, ((0, n_pad - n), (0, 0), (0, 0), (0, 0)))

    # --- input-side im2col for conv1 only (later layers are done in-kernel) ---
    # TODO(synk): on v7x, pack conv1 taps lane-densely instead of padding 9->128
    #             if/when p1 becomes the VMEM-limiting buffer at large batch.
    h1 = _H_OUT[0]
    xpad = jnp.pad(x[:, 0], ((0, 0), (1, 1), (1, 1)))             # (Np, 30, 30)
    cols = [xpad[:, i:i + 2 * h1:2, j:j + 2 * h1:2]
            for i in range(3) for j in range(3)]                   # 9 x (Np, 14, 14)
    p1 = jnp.stack(cols, axis=-1)                                  # (Np, 14, 14, 9)
    p1 = jnp.transpose(p1, (1, 2, 0, 3)).reshape(h1 * h1 * n_pad, 9)
    p1 = jnp.pad(p1, ((0, 0), (0, _K1_PAD - 9)))                   # (M1, 128)

    # --- one-time weight layout prep (PyTorch layouts -> kernel layouts) ---
    # conv bias is intentionally dropped: batch-stat BN subtracts it exactly.
    w1 = params["conv1"]["w"].reshape(_CH, 9).T                    # (9, 64), tap-major
    w1 = jnp.pad(w1, ((0, _K1_PAD - 9), (0, 0)))                   # (128, 64)
    wc = jnp.stack(
        [params[f"conv{i}"]["w"].reshape(_CH, _CH, 9).transpose(2, 1, 0)
         for i in (2, 3, 4)], axis=0)                              # (3, 9, 64, 64)
    bn = jnp.concatenate(
        [jnp.stack([params[f"conv{i}"]["gamma"] for i in range(1, 5)]),
         jnp.stack([params[f"conv{i}"]["beta"] for i in range(1, 5)])],
        axis=0)                                                    # (8, 64)
    wl = params["logits"]["w"].reshape(num_classes, _CH, 4).transpose(2, 1, 0)
    wl = jnp.pad(wl, ((0, 0), (0, 0), (0, k_pad - num_classes)))   # (4, 64, Kp)
    bl = jnp.pad(params["logits"]["b"].reshape(1, num_classes),
                 ((0, 0), (0, k_pad - num_classes)))               # (1, Kp)

    kernel = functools.partial(_omniglot_kernel, n, n_pad)
    out = pl.pallas_call(
        kernel,
        out_shape=jax.ShapeDtypeStruct((n_pad, k_pad), jnp.float32),
        in_specs=[_vmem_spec()] * 6,
        out_specs=_vmem_spec(),
        scratch_shapes=[
            pltpu.VMEM((2 * _H_OUT[1] + 2, 2 * _H_OUT[1] + 2, n_pad, _CH), jnp.float32),
            pltpu.VMEM((2 * _H_OUT[2] + 2, 2 * _H_OUT[2] + 2, n_pad, _CH), jnp.float32),
            pltpu.VMEM((2 * _H_OUT[3] + 2, 2 * _H_OUT[3] + 2, n_pad, _CH), jnp.float32),
        ],
    )(p1, w1, wc, bn, wl, bl)
    return out[:n, :num_classes]


omniglot_forward = jax.jit(_omniglot_forward_impl)


# ---------------------------------------------------------------------------
# Parameters (PyTorch-compatible layouts/init) and a pure-JAX reference
# ---------------------------------------------------------------------------
def init_params(key, num_classes):
    params = {}
    for i in range(4):
        c_in = 1 if i == 0 else 64
        key, kw_, kb_ = jax.random.split(key, 3)
        bound = 1.0 / np.sqrt(c_in * 9)
        params[f"conv{i + 1}"] = dict(
            w=jax.random.uniform(kw_, (64, c_in, 3, 3), jnp.float32, -bound, bound),
            b=jax.random.uniform(kb_, (64,), jnp.float32, -bound, bound),
            gamma=jnp.ones((64,), jnp.float32),
            beta=jnp.zeros((64,), jnp.float32),
        )
    key, kw_, kb_ = jax.random.split(key, 3)
    bound = 1.0 / np.sqrt(256.0)
    params["logits"] = dict(
        w=jax.random.uniform(kw_, (num_classes, 256), jnp.float32, -bound, bound),
        b=jax.random.uniform(kb_, (num_classes,), jnp.float32, -bound, bound),
    )
    return params


def _reference_forward(params, x):
    """Pure-JAX reference implementing the PyTorch module exactly (incl. bias)."""
    for i in range(4):
        p = params[f"conv{i + 1}"]
        y = jax.lax.conv_general_dilated(
            x, p["w"], window_strides=(2, 2), padding=((1, 1), (1, 1)),
            dimension_numbers=("NCHW", "OIHW", "NCHW"),
        ) + p["b"][None, :, None, None]
        mean = jnp.mean(y, axis=(0, 2, 3), keepdims=True)
        var = jnp.mean((y - mean) ** 2, axis=(0, 2, 3), keepdims=True)
        y = (y - mean) * jax.lax.rsqrt(var + _EPS)
        y = y * p["gamma"][None, :, None, None] + p["beta"][None, :, None, None]
        x = jnp.maximum(y, 0.0)
    x = x.reshape(x.shape[0], -1)
    return x @ params["logits"]["w"].T + params["logits"]["b"][None, :]


if __name__ == "__main__":
    num_classes = 5
    key = jax.random.PRNGKey(0)
    key, kparam, kx = jax.random.split(key, 3)
    params = init_params(kparam, num_classes)
    # Omniglot input: (batch, 1, 28, 28) -- 28x28 is required by
    # Linear(in_features=256) after four stride-2 convs (28->14->7->4->2).
    x = jax.random.normal(kx, (2, 1, 28, 28), jnp.float32)

    out = jax.block_until_ready(omniglot_forward(params, x))
    assert out.shape == (2, num_classes), out.shape

    ref = jax.block_until_ready(_reference_forward(params, x))
    np.testing.assert_allclose(np.asarray(out), np.asarray(ref), rtol=2e-3, atol=2e-3)

    print("KERNEL_OK")
</pallas_src>

<mosaic_0001>
module attributes {stable_mosaic.version = 11 : i64} {
  func.func @_omniglot_kernel(%arg0: memref<1568x128xf32, #tpu.memory_space<vmem>>, %arg1: memref<128x64xf32, #tpu.memory_space<vmem>>, %arg2: memref<3x9x64x64xf32, #tpu.memory_space<vmem>>, %arg3: memref<8x64xf32, #tpu.memory_space<vmem>>, %arg4: memref<4x64x128xf32, #tpu.memory_space<vmem>>, %arg5: memref<1x128xf32, #tpu.memory_space<vmem>>, %arg6: memref<8x128xf32, #tpu.memory_space<vmem>>, %arg7: memref<16x16x8x64xf32, #tpu.memory_space<vmem>>, %arg8: memref<10x10x8x64xf32, #tpu.memory_space<vmem>>, %arg9: memref<6x6x8x64xf32, #tpu.memory_space<vmem>>) attributes {dimension_semantics = [], scalar_prefetch = 0 : i64, scratch_operands = 3 : i64, tpu.core_type = #tpu.core_type<tc>} {
    %0 = tpu.iota {dimensions = array<i32: 0>} : vector<8x64xi32>
    %c2_i32 = arith.constant 2 : i32
    %1 = vector.broadcast %c2_i32 : i32 to vector<8x64xi32>
    %2 = arith.cmpi slt, %0, %1 : vector<8x64xi32>
    %3 = arith.extui %2 : vector<8x64xi1> to vector<8x64xi32>
    %4 = arith.sitofp %3 : vector<8x64xi32> to vector<8x64xf32>
    %cst = arith.constant 0.000000e+00 : f32
    %5 = vector.broadcast %cst : f32 to vector<1x16x8x64xf32>
    %c0 = arith.constant 0 : index
    %c0_0 = arith.constant 0 : index
    %c0_1 = arith.constant 0 : index
    %c0_2 = arith.constant 0 : index
    %6 = vector.load %arg7[%c0, %c0_0, %c0_1, %c0_2] : memref<16x16x8x64xf32, #tpu.memory_space<vmem>>, vector<1x16x8x64xf32>
    tpu.vector_store %arg7[%c0, %c0_0, %c0_1, %c0_2], %5 {strides = array<i32>} : memref<16x16x8x64xf32, #tpu.memory_space<vmem>>, vector<1x16x8x64xf32>,
    %cst_3 = arith.constant 0.000000e+00 : f32
    %7 = vector.broadcast %cst_3 : f32 to vector<1x16x8x64xf32>
    %c15 = arith.constant 15 : index
    %c0_4 = arith.constant 0 : index
    %c0_5 = arith.constant 0 : index
    %c0_6 = arith.constant 0 : index
    %8 = vector.load %arg7[%c15, %c0_4, %c0_5, %c0_6] : memref<16x16x8x64xf32, #tpu.memory_space<vmem>>, vector<1x16x8x64xf32>
    tpu.vector_store %arg7[%c15, %c0_4, %c0_5, %c0_6], %7 {strides = array<i32>} : memref<16x16x8x64xf32, #tpu.memory_space<vmem>>, vector<1x16x8x64xf32>,
    %cst_7 = arith.constant 0.000000e+00 : f32
    %9 = vector.broadcast %cst_7 : f32 to vector<14x1x8x64xf32>
    %c1 = arith.constant 1 : index
    %c0_8 = arith.constant 0 : index
    %c0_9 = arith.constant 0 : index
    %c0_10 = arith.constant 0 : index
    %10 = vector.load %arg7[%c1, %c0_8, %c0_9, %c0_10] : memref<16x16x8x64xf32, #tpu.memory_space<vmem>>, vector<14x1x8x64xf32>
    tpu.vector_store %arg7[%c1, %c0_8, %c0_9, %c0_10], %9 {strides = array<i32>} : memref<16x16x8x64xf32, #tpu.memory_space<vmem>>, vector<14x1x8x64xf32>,
    %cst_11 = arith.constant 0.000000e+00 : f32
    %11 = vector.broadcast %cst_11 : f32 to vector<14x1x8x64xf32>
    %c1_12 = arith.constant 1 : index
    %c15_13 = arith.constant 15 : index
    %c0_14 = arith.constant 0 : index
    %c0_15 = arith.constant 0 : index
    %12 = vector.load %arg7[%c1_12, %c15_13, %c0_14, %c0_15] : memref<16x16x8x64xf32, #tpu.memory_space<vmem>>, vector<14x1x8x64xf32>
    tpu.vector_store %arg7[%c1_12, %c15_13, %c0_14, %c0_15], %11 {strides = array<i32>} : memref<16x16x8x64xf32, #tpu.memory_space<vmem>>, vector<14x1x8x64xf32>,
    %cst_16 = arith.constant 0.000000e+00 : f32
    %13 = vector.broadcast %cst_16 : f32 to vector<1x10x8x64xf32>
    %c0_17 = arith.constant 0 : index
    %c0_18 = arith.constant 0 : index
    %c0_19 = arith.constant 0 : index
    %c0_20 = arith.constant 0 : index
    %14 = vector.load %arg8[%c0_17, %c0_18, %c0_19, %c0_20] : memref<10x10x8x64xf32, #tpu.memory_space<vmem>>, vector<1x10x8x64xf32>
    tpu.vector_store %arg8[%c0_17, %c0_18, %c0_19, %c0_20], %13 {strides = array<i32>} : memref<10x10x8x64xf32, #tpu.memory_space<vmem>>, vector<1x10x8x64xf32>,
    %cst_21 = arith.constant 0.000000e+00 : f32
    %15 = vector.broadcast %cst_21 : f32 to vector<2x10x8x64xf32>
    %c8 = arith.constant 8 : index
    %c0_22 = arith.constant 0 : index
    %c0_23 = arith.constant 0 : index
    %c0_24 = arith.constant 0 : index
    %16 = vector.load %arg8[%c8, %c0_22, %c0_23, %c0_24] : memref<10x10x8x64xf32, #tpu.memory_space<vmem>>, vector<2x10x8x64xf32>
    tpu.vector_store %arg8[%c8, %c0_22, %c0_23, %c0_24], %15 {strides = array<i32>} : memref<10x10x8x64xf32, #tpu.memory_space<vmem>>, vector<2x10x8x64xf32>,
    %cst_25 = arith.constant 0.000000e+00 : f32
    %17 = vector.broadcast %cst_25 : f32 to vector<7x1x8x64xf32>
    %c1_26 = arith.constant 1 : index
    %c0_27 = arith.constant 0 : index
    %c0_28 = arith.constant 0 : index
    %c0_29 = arith.constant 0 : index
    %18 = vector.load %arg8[%c1_26, %c0_27, %c0_28, %c0_29] : memref<10x10x8x64xf32, #tpu.memory_space<vmem>>, vector<7x1x8x64xf32>
    tpu.vector_store %arg8[%c1_26, %c0_27, %c0_28, %c0_29], %17 {strides = array<i32>} : memref<10x10x8x64xf32, #tpu.memory_space<vmem>>, vector<7x1x8x64xf32>,
    %cst_30 = arith.constant 0.000000e+00 : f32
    %19 = vector.broadcast %cst_30 : f32 to vector<7x2x8x64xf32>
    %c1_31 = arith.constant 1 : index
    %c8_32 = arith.constant 8 : index
    %c0_33 = arith.constant 0 : index
    %c0_34 = arith.constant 0 : index
    %20 = vector.load %arg8[%c1_31, %c8_32, %c0_33, %c0_34] : memref<10x10x8x64xf32, #tpu.memory_space<vmem>>, vector<7x2x8x64xf32>
    tpu.vector_store %arg8[%c1_31, %c8_32, %c0_33, %c0_34], %19 {strides = array<i32>} : memref<10x10x8x64xf32, #tpu.memory_space<vmem>>, vector<7x2x8x64xf32>,
    %cst_35 = arith.constant 0.000000e+00 : f32
    %21 = vector.broadcast %cst_35 : f32 to vector<1x6x8x64xf32>
    %c0_36 = arith.constant 0 : index
    %c0_37 = arith.constant 0 : index
    %c0_38 = arith.constant 0 : index
    %c0_39 = arith.constant 0 : index
    %22 = vector.load %arg9[%c0_36, %c0_37, %c0_38, %c0_39] : memref<6x6x8x64xf32, #tpu.memory_space<vmem>>, vector<1x6x8x64xf32>
    tpu.vector_store %arg9[%c0_36, %c0_37, %c0_38, %c0_39], %21 {strides = array<i32>} : memref<6x6x8x64xf32, #tpu.memory_space<vmem>>, vector<1x6x8x64xf32>,
    %cst_40 = arith.constant 0.000000e+00 : f32
    %23 = vector.broadcast %cst_40 : f32 to vector<1x6x8x64xf32>
    %c5 = arith.constant 5 : index
    %c0_41 = arith.constant 0 : index
    %c0_42 = arith.constant 0 : index
    %c0_43 = arith.constant 0 : index
    %24 = vector.load %arg9[%c5, %c0_41, %c0_42, %c0_43] : memref<6x6x8x64xf32, #tpu.memory_space<vmem>>, vector<1x6x8x64xf32>
    tpu.vector_store %arg9[%c5, %c0_41, %c0_42, %c0_43], %23 {strides = array<i32>} : memref<6x6x8x64xf32, #tpu.memory_space<vmem>>, vector<1x6x8x64xf32>,
    %cst_44 = arith.constant 0.000000e+00 : f32
    %25 = vector.broadcast %cst_44 : f32 to vector<4x1x8x64xf32>
    %c1_45 = arith.constant 1 : index
    %c0_46 = arith.constant 0 : index
    %c0_47 = arith.constant 0 : index
    %c0_48 = arith.constant 0 : index
    %26 = vector.load %arg9[%c1_45, %c0_46, %c0_47, %c0_48] : memref<6x6x8x64xf32, #tpu.memory_space<vmem>>, vector<4x1x8x64xf32>
    tpu.vector_store %arg9[%c1_45, %c0_46, %c0_47, %c0_48], %25 {strides = array<i32>} : memref<6x6x8x64xf32, #tpu.memory_space<vmem>>, vector<4x1x8x64xf32>,
    %cst_49 = arith.constant 0.000000e+00 : f32
    %27 = vector.broadcast %cst_49 : f32 to vector<4x1x8x64xf32>
    %c1_50 = arith.constant 1 : index
    %c5_51 = arith.constant 5 : index
    %c0_52 = arith.constant 0 : index
    %c0_53 = arith.constant 0 : index
    %28 = vector.load %arg9[%c1_50, %c5_51, %c0_52, %c0_53] : memref<6x6x8x64xf32, #tpu.memory_space<vmem>>, vector<4x1x8x64xf32>
    tpu.vector_store %arg9[%c1_50, %c5_51, %c0_52, %c0_53], %27 {strides = array<i32>} : memref<6x6x8x64xf32, #tpu.memory_space<vmem>>, vector<4x1x8x64xf32>,
    %c0_54 = arith.constant 0 : index
    %c0_55 = arith.constant 0 : index
    %29 = vector.load %arg0[%c0_54, %c0_55] : memref<1568x128xf32, #tpu.memory_space<vmem>>, vector<1568x128xf32>
    %c0_56 = arith.constant 0 : index
    %c0_57 = arith.constant 0 : index
    %30 = vector.load %arg1[%c0_56, %c0_57] : memref<128x64xf32, #tpu.memory_space<vmem>>, vector<128x64xf32>
    %cst_58 = arith.constant dense<0.000000e+00> : vector<1568x64xf32>
    %31 = tpu.matmul %29, %30, %cst_58 {dimension_numbers = #tpu.dot_dimension_numbers<[1], [0], [0], [1], [0, 0, 1, 1], [], []>} : vector<1568x128xf32>, vector<128x64xf32>, vector<1568x64xf32> -> vector<1568x64xf32>
    %c0_59 = arith.constant 0 : index
    %c0_60 = arith.constant 0 : index
    %32 = vector.load %arg3[%c0_59, %c0_60] : memref<8x64xf32, #tpu.memory_space<vmem>>, vector<1x64xf32>
    %c4 = arith.constant 4 : index
    %c0_61 = arith.constant 0 : index
    %33 = vector.load %arg3[%c4, %c0_61] : memref<8x64xf32, #tpu.memory_space<vmem>>, vector<1x64xf32>
    %34 = vector.shape_cast %31 : vector<1568x64xf32> to vector<196x8x64xf32>
    %cst_62 = arith.constant dense<0.000000e+00> : vector<8x64xf32>
    %35 = vector.multi_reduction <add>, %34, %cst_62 [0] : vector<196x8x64xf32> to vector<8x64xf32>
    %36 = arith.mulf %34, %34 : vector<196x8x64xf32>
    %cst_63 = arith.constant dense<0.000000e+00> : vector<8x64xf32>
    %37 = vector.multi_reduction <add>, %36, %cst_63 [0] : vector<196x8x64xf32> to vector<8x64xf32>
    %38 = arith.mulf %35, %4 : vector<8x64xf32>
    %cst_64 = arith.constant dense<0.000000e+00> : vector<64xf32>
    %39 = vector.multi_reduction <add>, %38, %cst_64 [0] : vector<8x64xf32> to vector<64xf32>
    %40 = vector.shape_cast %39 : vector<64xf32> to vector<1x64xf32>
    %cst_65 = arith.constant 0.00255102036 : f32
    %41 = vector.broadcast %cst_65 : f32 to vector<1x64xf32>
    %42 = arith.mulf %40, %41 : vector<1x64xf32>
    %43 = arith.mulf %37, %4 : vector<8x64xf32>
    %cst_66 = arith.constant dense<0.000000e+00> : vector<64xf32>
    %44 = vector.multi_reduction <add>, %43, %cst_66 [0] : vector<8x64xf32> to vector<64xf32>
    %45 = vector.shape_cast %44 : vector<64xf32> to vector<1x64xf32>
    %cst_67 = arith.constant 0.00255102036 : f32
    %46 = vector.broadcast %cst_67 : f32 to vector<1x64xf32>
    %47 = arith.mulf %45, %46 : vector<1x64xf32>
    %48 = arith.mulf %42, %42 : vector<1x64xf32>
    %49 = arith.subf %47, %48 : vector<1x64xf32>
    %cst_68 = arith.constant 1.000000e-03 : f32
    %50 = vector.broadcast %cst_68 : f32 to vector<1x64xf32>
    %51 = arith.addf %49, %50 : vector<1x64xf32>
    %52 = math.rsqrt %51 : vector<1x64xf32>
    %53 = arith.mulf %32, %52 : vector<1x64xf32>
    %54 = arith.mulf %42, %53 : vector<1x64xf32>
    %55 = arith.subf %33, %54 : vector<1x64xf32>
    %56 = vector.broadcast %53 : vector<1x64xf32> to vector<1568x64xf32>
    %57 = arith.mulf %31, %56 : vector<1568x64xf32>
    %58 = vector.broadcast %55 : vector<1x64xf32> to vector<1568x64xf32>
    %59 = arith.addf %57, %58 : vector<1568x64xf32>
    %cst_69 = arith.constant 0.000000e+00 : f32
    %60 = vector.broadcast %cst_69 : f32 to vector<1568x64xf32>
    %61 = arith.maximumf %59, %60 : vector<1568x64xf32>
    %62 = vector.shape_cast %61 : vector<1568x64xf32> to vector<14x14x8x64xf32>
    %c1_70 = arith.constant 1 : index
    %c1_71 = arith.constant 1 : index
    %c0_72 = arith.constant 0 : index
    %c0_73 = arith.constant 0 : index
    %63 = vector.load %arg7[%c1_70, %c1_71, %c0_72, %c0_73] : memref<16x16x8x64xf32, #tpu.memory_space<vmem>>, vector<14x14x8x64xf32>
    tpu.vector_store %arg7[%c1_70, %c1_71, %c0_72, %c0_73], %62 {strides = array<i32>} : memref<16x16x8x64xf32, #tpu.memory_space<vmem>>, vector<14x14x8x64xf32>,
    %c0_74 = arith.constant 0 : index
    %c0_75 = arith.constant 0 : index
    %c0_76 = arith.constant 0 : index
    %c0_77 = arith.constant 0 : index
    %64 = vector.load %arg7[%c0_74, %c0_75, %c0_76, %c0_77] : memref<16x16x8x64xf32, #tpu.memory_space<vmem>>, vector<16x16x8x64xf32>
    %65 = vector.shape_cast %64 : vector<16x16x8x64xf32> to vector<8x2x16x8x64xf32>
    %66 = vector.extract_strided_slice %65 {offsets = [0, 0, 0, 0, 0], sizes = [8, 1, 16, 8, 64], strides = [1, 1, 1, 1, 1]} : vector<8x2x16x8x64xf32> to vector<8x1x16x8x64xf32>
    %67 = vector.shape_cast %66 : vector<8x1x16x8x64xf32> to vector<8x16x8x64xf32>
    %68 = vector.extract_strided_slice %65 {offsets = [0, 1, 0, 0, 0], sizes = [8, 1, 16, 8, 64], strides = [1, 1, 1, 1, 1]} : vector<8x2x16x8x64xf32> to vector<8x1x16x8x64xf32>
    %69 = vector.shape_cast %68 : vector<8x1x16x8x64xf32> to vector<8x16x8x64xf32>
    %70 = vector.shape_cast %67 : vector<8x16x8x64xf32> to vector<8x8x2x8x64xf32>
    %71 = vector.extract_strided_slice %70 {offsets = [0, 0, 0, 0, 0], sizes = [8, 8, 1, 8, 64], strides = [1, 1, 1, 1, 1]} : vector<8x8x2x8x64xf32> to vector<8x8x1x8x64xf32>
    %72 = vector.shape_cast %71 : vector<8x8x1x8x64xf32> to vector<8x8x8x64xf32>
    %73 = vector.extract_strided_slice %70 {offsets = [0, 0, 1, 0, 0], sizes = [8, 8, 1, 8, 64], strides = [1, 1, 1, 1, 1]} : vector<8x8x2x8x64xf32> to vector<8x8x1x8x64xf32>
    %74 = vector.shape_cast %73 : vector<8x8x1x8x64xf32> to vector<8x8x8x64xf32>
    %75 = vector.shape_cast %69 : vector<8x16x8x64xf32> to vector<8x8x2x8x64xf32>
    %76 = vector.extract_strided_slice %75 {offsets = [0, 0, 0, 0, 0], sizes = [8, 8, 1, 8, 64], strides = [1, 1, 1, 1, 1]} : vector<8x8x2x8x64xf32> to vector<8x8x1x8x64xf32>
    %77 = vector.shape_cast %76 : vector<8x8x1x8x64xf32> to vector<8x8x8x64xf32>
    %78 = vector.extract_strided_slice %75 {offsets = [0, 0, 1, 0, 0], sizes = [8, 8, 1, 8, 64], strides = [1, 1, 1, 1, 1]} : vector<8x8x2x8x64xf32> to vector<8x8x1x8x64xf32>
    %79 = vector.shape_cast %78 : vector<8x8x1x8x64xf32> to vector<8x8x8x64xf32>
    %80 = vector.extract_strided_slice %72 {offsets = [0, 0, 0, 0], sizes = [7, 7, 8, 64], strides = [1, 1, 1, 1]} : vector<8x8x8x64xf32> to vector<7x7x8x64xf32>
    %81 = vector.shape_cast %80 : vector<7x7x8x64xf32> to vector<392x64xf32>
    %c0_78 = arith.constant 0 : index
    %c0_79 = arith.constant 0 : index
    %c0_80 = arith.constant 0 : index
    %c0_81 = arith.constant 0 : index
    %82 = vector.load %arg2[%c0_78, %c0_79, %c0_80, %c0_81] : memref<3x9x64x64xf32, #tpu.memory_space<vmem>>, vector<1x1x64x64xf32>
    %83 = vector.shape_cast %82 : vector<1x1x64x64xf32> to vector<64x64xf32>
    %cst_82 = arith.constant dense<0.000000e+00> : vector<392x64xf32>
    %84 = tpu.matmul %81, %83, %cst_82 {dimension_numbers = #tpu.dot_dimension_numbers<[1], [0], [0], [1], [0, 0, 1, 1], [], []>} : vector<392x64xf32>, vector<64x64xf32>, vector<392x64xf32> -> vector<392x64xf32>
    %85 = vector.extract_strided_slice %74 {offsets = [0, 0, 0, 0], sizes = [7, 7, 8, 64], strides = [1, 1, 1, 1]} : vector<8x8x8x64xf32> to vector<7x7x8x64xf32>
    %86 = vector.shape_cast %85 : vector<7x7x8x64xf32> to vector<392x64xf32>
    %c0_83 = arith.constant 0 : index
    %c1_84 = arith.constant 1 : index
    %c0_85 = arith.constant 0 : index
    %c0_86 = arith.constant 0 : index
    %87 = vector.load %arg2[%c0_83, %c1_84, %c0_85, %c0_86] : memref<3x9x64x64xf32, #tpu.memory_space<vmem>>, vector<1x1x64x64xf32>
    %88 = vector.shape_cast %87 : vector<1x1x64x64xf32> to vector<64x64xf32>
    %cst_87 = arith.constant dense<0.000000e+00> : vector<392x64xf32>
    %89 = tpu.matmul %86, %88, %cst_87 {dimension_numbers = #tpu.dot_dimension_numbers<[1], [0], [0], [1], [0, 0, 1, 1], [], []>} : vector<392x64xf32>, vector<64x64xf32>, vector<392x64xf32> -> vector<392x64xf32>
    %90 = arith.addf %84, %89 : vector<392x64xf32>
    %91 = vector.extract_strided_slice %72 {offsets = [0, 1, 0, 0], sizes = [7, 7, 8, 64], strides = [1, 1, 1, 1]} : vector<8x8x8x64xf32> to vector<7x7x8x64xf32>
    %92 = vector.shape_cast %91 : vector<7x7x8x64xf32> to vector<392x64xf32>
    %c0_88 = arith.constant 0 : index
    %c2 = arith.constant 2 : index
    %c0_89 = arith.constant 0 : index
    %c0_90 = arith.constant 0 : index
    %93 = vector.load %arg2[%c0_88, %c2, %c0_89, %c0_90] : memref<3x9x64x64xf32, #tpu.memory_space<vmem>>, vector<1x1x64x64xf32>
    %94 = vector.shape_cast %93 : vector<1x1x64x64xf32> to vector<64x64xf32>
    %cst_91 = arith.constant dense<0.000000e+00> : vector<392x64xf32>
    %95 = tpu.matmul %92, %94, %cst_91 {dimension_numbers = #tpu.dot_dimension_numbers<[1], [0], [0], [1], [0, 0, 1, 1], [], []>} : vector<392x64xf32>, vector<64x64xf32>, vector<392x64xf32> -> vector<392x64xf32>
    %96 = arith.addf %90, %95 : vector<392x64xf32>
    %97 = vector.extract_strided_slice %77 {offsets = [0, 0, 0, 0], sizes = [7, 7, 8, 64], strides = [1, 1, 1, 1]} : vector<8x8x8x64xf32> to vector<7x7x8x64xf32>
    %98 = vector.shape_cast %97 : vector<7x7x8x64xf32> to vector<392x64xf32>
    %c0_92 = arith.constant 0 : index
    %c3 = arith.constant 3 : index
    %c0_93 = arith.constant 0 : index
    %c0_94 = arith.constant 0 : index
    %99 = vector.load %arg2[%c0_92, %c3, %c0_93, %c0_94] : memref<3x9x64x64xf32, #tpu.memory_space<vmem>>, vector<1x1x64x64xf32>
    %100 = vector.shape_cast %99 : vector<1x1x64x64xf32> to vector<64x64xf32>
    %cst_95 = arith.constant dense<0.000000e+00> : vector<392x64xf32>
    %101 = tpu.matmul %98, %100, %cst_95 {dimension_numbers = #tpu.dot_dimension_numbers<[1], [0], [0], [1], [0, 0, 1, 1], [], []>} : vector<392x64xf32>, vector<64x64xf32>, vector<392x64xf32> -> vector<392x64xf32>
    %102 = arith.addf %96, %101 : vector<392x64xf32>
    %103 = vector.extract_strided_slice %79 {offsets = [0, 0, 0, 0], sizes = [7, 7, 8, 64], strides = [1, 1, 1, 1]} : vector<8x8x8x64xf32> to vector<7x7x8x64xf32>
    %104 = vector.shape_cast %103 : vector<7x7x8x64xf32> to vector<392x64xf32>
    %c0_96 = arith.constant 0 : index
    %c4_97 = arith.constant 4 : index
    %c0_98 = arith.constant 0 : index
    %c0_99 = arith.constant 0 : index
    %105 = vector.load %arg2[%c0_96, %c4_97, %c0_98, %c0_99] : memref<3x9x64x64xf32, #tpu.memory_space<vmem>>, vector<1x1x64x64xf32>
    %106 = vector.shape_cast %105 : vector<1x1x64x64xf32> to vector<64x64xf32>
    %cst_100 = arith.constant dense<0.000000e+00> : vector<392x64xf32>
    %107 = tpu.matmul %104, %106, %cst_100 {dimension_numbers = #tpu.dot_dimension_numbers<[1], [0], [0], [1], [0, 0, 1, 1], [], []>} : vector<392x64xf32>, vector<64x64xf32>, vector<392x64xf32> -> vector<392x64xf32>
    %108 = arith.addf %102, %107 : vector<392x64xf32>
    %109 = vector.extract_strided_slice %77 {offsets = [0, 1, 0, 0], sizes = [7, 7, 8, 64], strides = [1, 1, 1, 1]} : vector<8x8x8x64xf32> to vector<7x7x8x64xf32>
    %110 = vector.shape_cast %109 : vector<7x7x8x64xf32> to vector<392x64xf32>
    %c0_101 = arith.constant 0 : index
    %c5_102 = arith.constant 5 : index
    %c0_103 = arith.constant 0 : index
    %c0_104 = arith.constant 0 : index
    %111 = vector.load %arg2[%c0_101, %c5_102, %c0_103, %c0_104] : memref<3x9x64x64xf32, #tpu.memory_space<vmem>>, vector<1x1x64x64xf32>
    %112 = vector.shape_cast %111 : vector<1x1x64x64xf32> to vector<64x64xf32>
    %cst_105 = arith.constant dense<0.000000e+00> : vector<392x64xf32>
    %113 = tpu.matmul %110, %112, %cst_105 {dimension_numbers = #tpu.dot_dimension_numbers<[1], [0], [0], [1], [0, 0, 1, 1], [], []>} : vector<392x64xf32>, vector<64x64xf32>, vector<392x64xf32> -> vector<392x64xf32>
    %114 = arith.addf %108, %113 : vector<392x64xf32>
    %115 = vector.extract_strided_slice %72 {offsets = [1, 0, 0, 0], sizes = [7, 7, 8, 64], strides = [1, 1, 1, 1]} : vector<8x8x8x64xf32> to vector<7x7x8x64xf32>
    %116 = vector.shape_cast %115 : vector<7x7x8x64xf32> to vector<392x64xf32>
    %c0_106 = arith.constant 0 : index
    %c6 = arith.constant 6 : index
    %c0_107 = arith.constant 0 : index
    %c0_108 = arith.constant 0 : index
    %117 = vector.load %arg2[%c0_106, %c6, %c0_107, %c0_108] : memref<3x9x64x64xf32, #tpu.memory_space<vmem>>, vector<1x1x64x64xf32>
    %118 = vector.shape_cast %117 : vector<1x1x64x64xf32> to vector<64x64xf32>
    %cst_109 = arith.constant dense<0.000000e+00> : vector<392x64xf32>
    %119 = tpu.matmul %116, %118, %cst_109 {dimension_numbers = #tpu.dot_dimension_numbers<[1], [0], [0], [1], [0, 0, 1, 1], [], []>} : vector<392x64xf32>, vector<64x64xf32>, vector<392x64xf32> -> vector<392x64xf32>
    %120 = arith.addf %114, %119 : vector<392x64xf32>
    %121 = vector.extract_strided_slice %74 {offsets = [1, 0, 0, 0], sizes = [7, 7, 8, 64], strides = [1, 1, 1, 1]} : vector<8x8x8x64xf32> to vector<7x7x8x64xf32>
    %122 = vector.shape_cast %121 : vector<7x7x8x64xf32> to vector<392x64xf32>
    %c0_110 = arith.constant 0 : index
    %c7 = arith.constant 7 : index
    %c0_111 = arith.constant 0 : index
    %c0_112 = arith.constant 0 : index
    %123 = vector.load %arg2[%c0_110, %c7, %c0_111, %c0_112] : memref<3x9x64x64xf32, #tpu.memory_space<vmem>>, vector<1x1x64x64xf32>
    %124 = vector.shape_cast %123 : vector<1x1x64x64xf32> to vector<64x64xf32>
    %cst_113 = arith.constant dense<0.000000e+00> : vector<392x64xf32>
    %125 = tpu.matmul %122, %124, %cst_113 {dimension_numbers = #tpu.dot_dimension_numbers<[1], [0], [0], [1], [0, 0, 1, 1], [], []>} : vector<392x64xf32>, vector<64x64xf32>, vector<392x64xf32> -> vector<392x64xf32>
    %126 = arith.addf %120, %125 : vector<392x64xf32>
    %127 = vector.extract_strided_slice %72 {offsets = [1, 1, 0, 0], sizes = [7, 7, 8, 64], strides = [1, 1, 1, 1]} : vector<8x8x8x64xf32> to vector<7x7x8x64xf32>
    %128 = vector.shape_cast %127 : vector<7x7x8x64xf32> to vector<392x64xf32>
    %c0_114 = arith.constant 0 : index
    %c8_115 = arith.constant 8 : index
    %c0_116 = arith.constant 0 : index
    %c0_117 = arith.constant 0 : index
    %129 = vector.load %arg2[%c0_114, %c8_115, %c0_116, %c0_117] : memref<3x9x64x64xf32, #tpu.memory_space<vmem>>, vector<1x1x64x64xf32>
    %130 = vector.shape_cast %129 : vector<1x1x64x64xf32> to vector<64x64xf32>
    %cst_118 = arith.constant dense<0.000000e+00> : vector<392x64xf32>
    %131 = tpu.matmul %128, %130, %cst_118 {dimension_numbers = #tpu.dot_dimension_numbers<[1], [0], [0], [1], [0, 0, 1, 1], [], []>} : vector<392x64xf32>, vector<64x64xf32>, vector<392x64xf32> -> vector<392x64xf32>
    %132 = arith.addf %126, %131 : vector<392x64xf32>
    %c1_119 = arith.constant 1 : index
    %c0_120 = arith.constant 0 : index
    %133 = vector.load %arg3[%c1_119, %c0_120] : memref<8x64xf32, #tpu.memory_space<vmem>>, vector<1x64xf32>
    %c5_121 = arith.constant 5 : index
    %c0_122 = arith.constant 0 : index
    %134 = vector.load %arg3[%c5_121, %c0_122] : memref<8x64xf32, #tpu.memory_space<vmem>>, vector<1x64xf32>
    %135 = vector.shape_cast %132 : vector<392x64xf32> to vector<49x8x64xf32>
    %cst_123 = arith.constant dense<0.000000e+00> : vector<8x64xf32>
    %136 = vector.multi_reduction <add>, %135, %cst_123 [0] : vector<49x8x64xf32> to vector<8x64xf32>
    %137 = arith.mulf %135, %135 : vector<49x8x64xf32>
    %cst_124 = arith.constant dense<0.000000e+00> : vector<8x64xf32>
    %138 = vector.multi_reduction <add>, %137, %cst_124 [0] : vector<49x8x64xf32> to vector<8x64xf32>
    %139 = arith.mulf %136, %4 : vector<8x64xf32>
    %cst_125 = arith.constant dense<0.000000e+00> : vector<64xf32>
    %140 = vector.multi_reduction <add>, %139, %cst_125 [0] : vector<8x64xf32> to vector<64xf32>
    %141 = vector.shape_cast %140 : vector<64xf32> to vector<1x64xf32>
    %cst_126 = arith.constant 0.0102040814 : f32
    %142 = vector.broadcast %cst_126 : f32 to vector<1x64xf32>
    %143 = arith.mulf %141, %142 : vector<1x64xf32>
    %144 = arith.mulf %138, %4 : vector<8x64xf32>
    %cst_127 = arith.constant dense<0.000000e+00> : vector<64xf32>
    %145 = vector.multi_reduction <add>, %144, %cst_127 [0] : vector<8x64xf32> to vector<64xf32>
    %146 = vector.shape_cast %145 : vector<64xf32> to vector<1x64xf32>
    %cst_128 = arith.constant 0.0102040814 : f32
    %147 = vector.broadcast %cst_128 : f32 to vector<1x64xf32>
    %148 = arith.mulf %146, %147 : vector<1x64xf32>
    %149 = arith.mulf %143, %143 : vector<1x64xf32>
    %150 = arith.subf %148, %149 : vector<1x64xf32>
    %cst_129 = arith.constant 1.000000e-03 : f32
    %151 = vector.broadcast %cst_129 : f32 to vector<1x64xf32>
    %152 = arith.addf %150, %151 : vector<1x64xf32>
    %153 = math.rsqrt %152 : vector<1x64xf32>
    %154 = arith.mulf %133, %153 : vector<1x64xf32>
    %155 = arith.mulf %143, %154 : vector<1x64xf32>
    %156 = arith.subf %134, %155 : vector<1x64xf32>
    %157 = vector.broadcast %154 : vector<1x64xf32> to vector<392x64xf32>
    %158 = arith.mulf %132, %157 : vector<392x64xf32>
    %159 = vector.broadcast %156 : vector<1x64xf32> to vector<392x64xf32>
    %160 = arith.addf %158, %159 : vector<392x64xf32>
    %cst_130 = arith.constant 0.000000e+00 : f32
    %161 = vector.broadcast %cst_130 : f32 to vector<392x64xf32>
    %162 = arith.maximumf %160, %161 : vector<392x64xf32>
    %163 = vector.shape_cast %162 : vector<392x64xf32> to vector<7x7x8x64xf32>
    %c1_131 = arith.constant 1 : index
    %c1_132 = arith.constant 1 : index
    %c0_133 = arith.constant 0 : index
    %c0_134 = arith.constant 0 : index
    %164 = vector.load %arg8[%c1_131, %c1_132, %c0_133, %c0_134] : memref<10x10x8x64xf32, #tpu.memory_space<vmem>>, vector<7x7x8x64xf32>
    tpu.vector_store %arg8[%c1_131, %c1_132, %c0_133, %c0_134], %163 {strides = array<i32>} : memref<10x10x8x64xf32, #tpu.memory_space<vmem>>, vector<7x7x8x64xf32>,
    %c0_135 = arith.constant 0 : index
    %c0_136 = arith.constant 0 : index
    %c0_137 = arith.constant 0 : index
    %c0_138 = arith.constant 0 : index
    %165 = vector.load %arg8[%c0_135, %c0_136, %c0_137, %c0_138] : memref<10x10x8x64xf32, #tpu.memory_space<vmem>>, vector<10x10x8x64xf32>
    %166 = vector.shape_cast %165 : vector<10x10x8x64xf32> to vector<5x2x10x8x64xf32>
    %167 = vector.extract_strided_slice %166 {offsets = [0, 0, 0, 0, 0], sizes = [5, 1, 10, 8, 64], strides = [1, 1, 1, 1, 1]} : vector<5x2x10x8x64xf32> to vector<5x1x10x8x64xf32>
    %168 = vector.shape_cast %167 : vector<5x1x10x8x64xf32> to vector<5x10x8x64xf32>
    %169 = vector.extract_strided_slice %166 {offsets = [0, 1, 0, 0, 0], sizes = [5, 1, 10, 8, 64], strides = [1, 1, 1, 1, 1]} : vector<5x2x10x8x64xf32> to vector<5x1x10x8x64xf32>
    %170 = vector.shape_cast %169 : vector<5x1x10x8x64xf32> to vector<5x10x8x64xf32>
    %171 = vector.shape_cast %168 : vector<5x10x8x64xf32> to vector<5x5x2x8x64xf32>
    %172 = vector.extract_strided_slice %171 {offsets = [0, 0, 0, 0, 0], sizes = [5, 5, 1, 8, 64], strides = [1, 1, 1, 1, 1]} : vector<5x5x2x8x64xf32> to vector<5x5x1x8x64xf32>
    %173 = vector.shape_cast %172 : vector<5x5x1x8x64xf32> to vector<5x5x8x64xf32>
    %174 = vector.extract_strided_slice %171 {offsets = [0, 0, 1, 0, 0], sizes = [5, 5, 1, 8, 64], strides = [1, 1, 1, 1, 1]} : vector<5x5x2x8x64xf32> to vector<5x5x1x8x64xf32>
    %175 = vector.shape_cast %174 : vector<5x5x1x8x64xf32> to vector<5x5x8x64xf32>
    %176 = vector.shape_cast %170 : vector<5x10x8x64xf32> to vector<5x5x2x8x64xf32>
    %177 = vector.extract_strided_slice %176 {offsets = [0, 0, 0, 0, 0], sizes = [5, 5, 1, 8, 64], strides = [1, 1, 1, 1, 1]} : vector<5x5x2x8x64xf32> to vector<5x5x1x8x64xf32>
    %178 = vector.shape_cast %177 : vector<5x5x1x8x64xf32> to vector<5x5x8x64xf32>
    %179 = vector.extract_strided_slice %176 {offsets = [0, 0, 1, 0, 0], sizes = [5, 5, 1, 8, 64], strides = [1, 1, 1, 1, 1]} : vector<5x5x2x8x64xf32> to vector<5x5x1x8x64xf32>
    %180 = vector.shape_cast %179 : vector<5x5x1x8x64xf32> to vector<5x5x8x64xf32>
    %181 = vector.extract_strided_slice %173 {offsets = [0, 0, 0, 0], sizes = [4, 4, 8, 64], strides = [1, 1, 1, 1]} : vector<5x5x8x64xf32> to vector<4x4x8x64xf32>
    %182 = vector.shape_cast %181 : vector<4x4x8x64xf32> to vector<128x64xf32>
    %c1_139 = arith.constant 1 : index
    %c0_140 = arith.constant 0 : index
    %c0_141 = arith.constant 0 : index
    %c0_142 = arith.constant 0 : index
    %183 = vector.load %arg2[%c1_139, %c0_140, %c0_141, %c0_142] : memref<3x9x64x64xf32, #tpu.memory_space<vmem>>, vector<1x1x64x64xf32>
    %184 = vector.shape_cast %183 : vector<1x1x64x64xf32> to vector<64x64xf32>
    %cst_143 = arith.constant dense<0.000000e+00> : vector<128x64xf32>
    %185 = tpu.matmul %182, %184, %cst_143 {dimension_numbers = #tpu.dot_dimension_numbers<[1], [0], [0], [1], [0, 0, 1, 1], [], []>} : vector<128x64xf32>, vector<64x64xf32>, vector<128x64xf32> -> vector<128x64xf32>
    %186 = vector.extract_strided_slice %175 {offsets = [0, 0, 0, 0], sizes = [4, 4, 8, 64], strides = [1, 1, 1, 1]} : vector<5x5x8x64xf32> to vector<4x4x8x64xf32>
    %187 = vector.shape_cast %186 : vector<4x4x8x64xf32> to vector<128x64xf32>
    %c1_144 = arith.constant 1 : index
    %c1_145 = arith.constant 1 : index
    %c0_146 = arith.constant 0 : index
    %c0_147 = arith.constant 0 : index
    %188 = vector.load %arg2[%c1_144, %c1_145, %c0_146, %c0_147] : memref<3x9x64x64xf32, #tpu.memory_space<vmem>>, vector<1x1x64x64xf32>
    %189 = vector.shape_cast %188 : vector<1x1x64x64xf32> to vector<64x64xf32>
    %cst_148 = arith.constant dense<0.000000e+00> : vector<128x64xf32>
    %190 = tpu.matmul %187, %189, %cst_148 {dimension_numbers = #tpu.dot_dimension_numbers<[1], [0], [0], [1], [0, 0, 1, 1], [], []>} : vector<128x64xf32>, vector<64x64xf32>, vector<128x64xf32> -> vector<128x64xf32>
    %191 = arith.addf %185, %190 : vector<128x64xf32>
    %192 = vector.extract_strided_slice %173 {offsets = [0, 1, 0, 0], sizes = [4, 4, 8, 64], strides = [1, 1, 1, 1]} : vector<5x5x8x64xf32> to vector<4x4x8x64xf32>
    %193 = vector.shape_cast %192 : vector<4x4x8x64xf32> to vector<128x64xf32>
    %c1_149 = arith.constant 1 : index
    %c2_150 = arith.constant 2 : index
    %c0_151 = arith.constant 0 : index
    %c0_152 = arith.constant 0 : index
    %194 = vector.load %arg2[%c1_149, %c2_150, %c0_151, %c0_152] : memref<3x9x64x64xf32, #tpu.memory_space<vmem>>, vector<1x1x64x64xf32>
    %195 = vector.shape_cast %194 : vector<1x1x64x64xf32> to vector<64x64xf32>
    %cst_153 = arith.constant dense<0.000000e+00> : vector<128x64xf32>
    %196 = tpu.matmul %193, %195, %cst_153 {dimension_numbers = #tpu.dot_dimension_numbers<[1], [0], [0], [1], [0, 0, 1, 1], [], []>} : vector<128x64xf32>, vector<64x64xf32>, vector<128x64xf32> -> vector<128x64xf32>
    %197 = arith.addf %191, %196 : vector<128x64xf32>
    %198 = vector.extract_strided_slice %178 {offsets = [0, 0, 0, 0], sizes = [4, 4, 8, 64], strides = [1, 1, 1, 1]} : vector<5x5x8x64xf32> to vector<4x4x8x64xf32>
    %199 = vector.shape_cast %198 : vector<4x4x8x64xf32> to vector<128x64xf32>
    %c1_154 = arith.constant 1 : index
    %c3_155 = arith.constant 3 : index
    %c0_156 = arith.constant 0 : index
    %c0_157 = arith.constant 0 : index
    %200 = vector.load %arg2[%c1_154, %c3_155, %c0_156, %c0_157] : memref<3x9x64x64xf32, #tpu.memory_space<vmem>>, vector<1x1x64x64xf32>
    %201 = vector.shape_cast %200 : vector<1x1x64x64xf32> to vector<64x64xf32>
    %cst_158 = arith.constant dense<0.000000e+00> : vector<128x64xf32>
    %202 = tpu.matmul %199, %201, %cst_158 {dimension_numbers = #tpu.dot_dimension_numbers<[1], [0], [0], [1], [0, 0, 1, 1], [], []>} : vector<128x64xf32>, vector<64x64xf32>, vector<128x64xf32> -> vector<128x64xf32>
    %203 = arith.addf %197, %202 : vector<128x64xf32>
    %204 = vector.extract_strided_slice %180 {offsets = [0, 0, 0, 0], sizes = [4, 4, 8, 64], strides = [1, 1, 1, 1]} : vector<5x5x8x64xf32> to vector<4x4x8x64xf32>
    %205 = vector.shape_cast %204 : vector<4x4x8x64xf32> to vector<128x64xf32>
    %c1_159 = arith.constant 1 : index
    %c4_160 = arith.constant 4 : index
    %c0_161 = arith.constant 0 : index
    %c0_162 = arith.constant 0 : index
    %206 = vector.load %arg2[%c1_159, %c4_160, %c0_161, %c0_162] : memref<3x9x64x64xf32, #tpu.memory_space<vmem>>, vector<1x1x64x64xf32>
    %207 = vector.shape_cast %206 : vector<1x1x64x64xf32> to vector<64x64xf32>
    %cst_163 = arith.constant dense<0.000000e+00> : vector<128x64xf32>
    %208 = tpu.matmul %205, %207, %cst_163 {dimension_numbers = #tpu.dot_dimension_numbers<[1], [0], [0], [1], [0, 0, 1, 1], [], []>} : vector<128x64xf32>, vector<64x64xf32>, vector<128x64xf32> -> vector<128x64xf32>
    %209 = arith.addf %203, %208 : vector<128x64xf32>
    %210 = vector.extract_strided_slice %178 {offsets = [0, 1, 0, 0], sizes = [4, 4, 8, 64], strides = [1, 1, 1, 1]} : vector<5x5x8x64xf32> to vector<4x4x8x64xf32>
    %211 = vector.shape_cast %210 : vector<4x4x8x64xf32> to vector<128x64xf32>
    %c1_164 = arith.constant 1 : index
    %c5_165 = arith.constant 5 : index
    %c0_166 = arith.constant 0 : index
    %c0_167 = arith.constant 0 : index
    %212 = vector.load %arg2[%c1_164, %c5_165, %c0_166, %c0_167] : memref<3x9x64x64xf32, #tpu.memory_space<vmem>>, vector<1x1x64x64xf32>
    %213 = vector.shape_cast %212 : vector<1x1x64x64xf32> to vector<64x64xf32>
    %cst_168 = arith.constant dense<0.000000e+00> : vector<128x64xf32>
    %214 = tpu.matmul %211, %213, %cst_168 {dimension_numbers = #tpu.dot_dimension_numbers<[1], [0], [0], [1], [0, 0, 1, 1], [], []>} : vector<128x64xf32>, vector<64x64xf32>, vector<128x64xf32> -> vector<128x64xf32>
    %215 = arith.addf %209, %214 : vector<128x64xf32>
    %216 = vector.extract_strided_slice %173 {offsets = [1, 0, 0, 0], sizes = [4, 4, 8, 64], strides = [1, 1, 1, 1]} : vector<5x5x8x64xf32> to vector<4x4x8x64xf32>
    %217 = vector.shape_cast %216 : vector<4x4x8x64xf32> to vector<128x64xf32>
    %c1_169 = arith.constant 1 : index
    %c6_170 = arith.constant 6 : index
    %c0_171 = arith.constant 0 : index
    %c0_172 = arith.constant 0 : index
    %218 = vector.load %arg2[%c1_169, %c6_170, %c0_171, %c0_172] : memref<3x9x64x64xf32, #tpu.memory_space<vmem>>, vector<1x1x64x64xf32>
    %219 = vector.shape_cast %218 : vector<1x1x64x64xf32> to vector<64x64xf32>
    %cst_173 = arith.constant dense<0.000000e+00> : vector<128x64xf32>
    %220 = tpu.matmul %217, %219, %cst_173 {dimension_numbers = #tpu.dot_dimension_numbers<[1], [0], [0], [1], [0, 0, 1, 1], [], []>} : vector<128x64xf32>, vector<64x64xf32>, vector<128x64xf32> -> vector<128x64xf32>
    %221 = arith.addf %215, %220 : vector<128x64xf32>
    %222 = vector.extract_strided_slice %175 {offsets = [1, 0, 0, 0], sizes = [4, 4, 8, 64], strides = [1, 1, 1, 1]} : vector<5x5x8x64xf32> to vector<4x4x8x64xf32>
    %223 = vector.shape_cast %222 : vector<4x4x8x64xf32> to vector<128x64xf32>
    %c1_174 = arith.constant 1 : index
    %c7_175 = arith.constant 7 : index
    %c0_176 = arith.constant 0 : index
    %c0_177 = arith.constant 0 : index
    %224 = vector.load %arg2[%c1_174, %c7_175, %c0_176, %c0_177] : memref<3x9x64x64xf32, #tpu.memory_space<vmem>>, vector<1x1x64x64xf32>
    %225 = vector.shape_cast %224 : vector<1x1x64x64xf32> to vector<64x64xf32>
    %cst_178 = arith.constant dense<0.000000e+00> : vector<128x64xf32>
    %226 = tpu.matmul %223, %225, %cst_178 {dimension_numbers = #tpu.dot_dimension_numbers<[1], [0], [0], [1], [0, 0, 1, 1], [], []>} : vector<128x64xf32>, vector<64x64xf32>, vector<128x64xf32> -> vector<128x64xf32>
    %227 = arith.addf %221, %226 : vector<128x64xf32>
    %228 = vector.extract_strided_slice %173 {offsets = [1, 1, 0, 0], sizes = [4, 4, 8, 64], strides = [1, 1, 1, 1]} : vector<5x5x8x64xf32> to vector<4x4x8x64xf32>
    %229 = vector.shape_cast %228 : vector<4x4x8x64xf32> to vector<128x64xf32>
    %c1_179 = arith.constant 1 : index
    %c8_180 = arith.constant 8 : index
    %c0_181 = arith.constant 0 : index
    %c0_182 = arith.constant 0 : index
    %230 = vector.load %arg2[%c1_179, %c8_180, %c0_181, %c0_182] : memref<3x9x64x64xf32, #tpu.memory_space<vmem>>, vector<1x1x64x64xf32>
    %231 = vector.shape_cast %230 : vector<1x1x64x64xf32> to vector<64x64xf32>
    %cst_183 = arith.constant dense<0.000000e+00> : vector<128x64xf32>
    %232 = tpu.matmul %229, %231, %cst_183 {dimension_numbers = #tpu.dot_dimension_numbers<[1], [0], [0], [1], [0, 0, 1, 1], [], []>} : vector<128x64xf32>, vector<64x64xf32>, vector<128x64xf32> -> vector<128x64xf32>
    %233 = arith.addf %227, %232 : vector<128x64xf32>
    %c2_184 = arith.constant 2 : index
    %c0_185 = arith.constant 0 : index
    %234 = vector.load %arg3[%c2_184, %c0_185] : memref<8x64xf32, #tpu.memory_space<vmem>>, vector<1x64xf32>
    %c6_186 = arith.constant 6 : index
    %c0_187 = arith.constant 0 : index
    %235 = vector.load %arg3[%c6_186, %c0_187] : memref<8x64xf32, #tpu.memory_space<vmem>>, vector<1x64xf32>
    %236 = vector.shape_cast %233 : vector<128x64xf32> to vector<16x8x64xf32>
    %cst_188 = arith.constant dense<0.000000e+00> : vector<8x64xf32>
    %237 = vector.multi_reduction <add>, %236, %cst_188 [0] : vector<16x8x64xf32> to vector<8x64xf32>
    %238 = arith.mulf %236, %236 : vector<16x8x64xf32>
    %cst_189 = arith.constant dense<0.000000e+00> : vector<8x64xf32>
    %239 = vector.multi_reduction <add>, %238, %cst_189 [0] : vector<16x8x64xf32> to vector<8x64xf32>
    %240 = arith.mulf %237, %4 : vector<8x64xf32>
    %cst_190 = arith.constant dense<0.000000e+00> : vector<64xf32>
    %241 = vector.multi_reduction <add>, %240, %cst_190 [0] : vector<8x64xf32> to vector<64xf32>
    %242 = vector.shape_cast %241 : vector<64xf32> to vector<1x64xf32>
    %cst_191 = arith.constant 3.125000e-02 : f32
    %243 = vector.broadcast %cst_191 : f32 to vector<1x64xf32>
    %244 = arith.mulf %242, %243 : vector<1x64xf32>
    %245 = arith.mulf %239, %4 : vector<8x64xf32>
    %cst_192 = arith.constant dense<0.000000e+00> : vector<64xf32>
    %246 = vector.multi_reduction <add>, %245, %cst_192 [0] : vector<8x64xf32> to vector<64xf32>
    %247 = vector.shape_cast %246 : vector<64xf32> to vector<1x64xf32>
    %cst_193 = arith.constant 3.125000e-02 : f32
    %248 = vector.broadcast %cst_193 : f32 to vector<1x64xf32>
    %249 = arith.mulf %247, %248 : vector<1x64xf32>
    %250 = arith.mulf %244, %244 : vector<1x64xf32>
    %251 = arith.subf %249, %250 : vector<1x64xf32>
    %cst_194 = arith.constant 1.000000e-03 : f32
    %252 = vector.broadcast %cst_194 : f32 to vector<1x64xf32>
    %253 = arith.addf %251, %252 : vector<1x64xf32>
    %254 = math.rsqrt %253 : vector<1x64xf32>
    %255 = arith.mulf %234, %254 : vector<1x64xf32>
    %256 = arith.mulf %244, %255 : vector<1x64xf32>
    %257 = arith.subf %235, %256 : vector<1x64xf32>
    %258 = vector.broadcast %255 : vector<1x64xf32> to vector<128x64xf32>
    %259 = arith.mulf %233, %258 : vector<128x64xf32>
    %260 = vector.broadcast %257 : vector<1x64xf32> to vector<128x64xf32>
    %261 = arith.addf %259, %260 : vector<128x64xf32>
    %cst_195 = arith.constant 0.000000e+00 : f32
    %262 = vector.broadcast %cst_195 : f32 to vector<128x64xf32>
    %263 = arith.maximumf %261, %262 : vector<128x64xf32>
    %264 = vector.shape_cast %263 : vector<128x64xf32> to vector<4x4x8x64xf32>
    %c1_196 = arith.constant 1 : index
    %c1_197 = arith.constant 1 : index
    %c0_198 = arith.constant 0 : index
    %c0_199 = arith.constant 0 : index
    %265 = vector.load %arg9[%c1_196, %c1_197, %c0_198, %c0_199] : memref<6x6x8x64xf32, #tpu.memory_space<vmem>>, vector<4x4x8x64xf32>
    tpu.vector_store %arg9[%c1_196, %c1_197, %c0_198, %c0_199], %264 {strides = array<i32>} : memref<6x6x8x64xf32, #tpu.memory_space<vmem>>, vector<4x4x8x64xf32>,
    %c0_200 = arith.constant 0 : index
    %c0_201 = arith.constant 0 : index
    %c0_202 = arith.constant 0 : index
    %c0_203 = arith.constant 0 : index
    %266 = vector.load %arg9[%c0_200, %c0_201, %c0_202, %c0_203] : memref<6x6x8x64xf32, #tpu.memory_space<vmem>>, vector<6x6x8x64xf32>
    %267 = vector.shape_cast %266 : vector<6x6x8x64xf32> to vector<3x2x6x8x64xf32>
    %268 = vector.extract_strided_slice %267 {offsets = [0, 0, 0, 0, 0], sizes = [3, 1, 6, 8, 64], strides = [1, 1, 1, 1, 1]} : vector<3x2x6x8x64xf32> to vector<3x1x6x8x64xf32>
    %269 = vector.shape_cast %268 : vector<3x1x6x8x64xf32> to vector<3x6x8x64xf32>
    %270 = vector.extract_strided_slice %267 {offsets = [0, 1, 0, 0, 0], sizes = [3, 1, 6, 8, 64], strides = [1, 1, 1, 1, 1]} : vector<3x2x6x8x64xf32> to vector<3x1x6x8x64xf32>
    %271 = vector.shape_cast %270 : vector<3x1x6x8x64xf32> to vector<3x6x8x64xf32>
    %272 = vector.shape_cast %269 : vector<3x6x8x64xf32> to vector<3x3x2x8x64xf32>
    %273 = vector.extract_strided_slice %272 {offsets = [0, 0, 0, 0, 0], sizes = [3, 3, 1, 8, 64], strides = [1, 1, 1, 1, 1]} : vector<3x3x2x8x64xf32> to vector<3x3x1x8x64xf32>
    %274 = vector.shape_cast %273 : vector<3x3x1x8x64xf32> to vector<3x3x8x64xf32>
    %275 = vector.extract_strided_slice %272 {offsets = [0, 0, 1, 0, 0], sizes = [3, 3, 1, 8, 64], strides = [1, 1, 1, 1, 1]} : vector<3x3x2x8x64xf32> to vector<3x3x1x8x64xf32>
    %276 = vector.shape_cast %275 : vector<3x3x1x8x64xf32> to vector<3x3x8x64xf32>
    %277 = vector.shape_cast %271 : vector<3x6x8x64xf32> to vector<3x3x2x8x64xf32>
    %278 = vector.extract_strided_slice %277 {offsets = [0, 0, 0, 0, 0], sizes = [3, 3, 1, 8, 64], strides = [1, 1, 1, 1, 1]} : vector<3x3x2x8x64xf32> to vector<3x3x1x8x64xf32>
    %279 = vector.shape_cast %278 : vector<3x3x1x8x64xf32> to vector<3x3x8x64xf32>
    %280 = vector.extract_strided_slice %277 {offsets = [0, 0, 1, 0, 0], sizes = [3, 3, 1, 8, 64], strides = [1, 1, 1, 1, 1]} : vector<3x3x2x8x64xf32> to vector<3x3x1x8x64xf32>
    %281 = vector.shape_cast %280 : vector<3x3x1x8x64xf32> to vector<3x3x8x64xf32>
    %282 = vector.extract_strided_slice %274 {offsets = [0, 0, 0, 0], sizes = [2, 2, 8, 64], strides = [1, 1, 1, 1]} : vector<3x3x8x64xf32> to vector<2x2x8x64xf32>
    %283 = vector.shape_cast %282 : vector<2x2x8x64xf32> to vector<32x64xf32>
    %c2_204 = arith.constant 2 : index
    %c0_205 = arith.constant 0 : index
    %c0_206 = arith.constant 0 : index
    %c0_207 = arith.constant 0 : index
    %284 = vector.load %arg2[%c2_204, %c0_205, %c0_206, %c0_207] : memref<3x9x64x64xf32, #tpu.memory_space<vmem>>, vector<1x1x64x64xf32>
    %285 = vector.shape_cast %284 : vector<1x1x64x64xf32> to vector<64x64xf32>
    %cst_208 = arith.constant dense<0.000000e+00> : vector<32x64xf32>
    %286 = tpu.matmul %283, %285, %cst_208 {dimension_numbers = #tpu.dot_dimension_numbers<[1], [0], [0], [1], [0, 0, 1, 1], [], []>} : vector<32x64xf32>, vector<64x64xf32>, vector<32x64xf32> -> vector<32x64xf32>
    %287 = vector.extract_strided_slice %276 {offsets = [0, 0, 0, 0], sizes = [2, 2, 8, 64], strides = [1, 1, 1, 1]} : vector<3x3x8x64xf32> to vector<2x2x8x64xf32>
    %288 = vector.shape_cast %287 : vector<2x2x8x64xf32> to vector<32x64xf32>
    %c2_209 = arith.constant 2 : index
    %c1_210 = arith.constant 1 : index
    %c0_211 = arith.constant 0 : index
    %c0_212 = arith.constant 0 : index
    %289 = vector.load %arg2[%c2_209, %c1_210, %c0_211, %c0_212] : memref<3x9x64x64xf32, #tpu.memory_space<vmem>>, vector<1x1x64x64xf32>
    %290 = vector.shape_cast %289 : vector<1x1x64x64xf32> to vector<64x64xf32>
    %cst_213 = arith.constant dense<0.000000e+00> : vector<32x64xf32>
    %291 = tpu.matmul %288, %290, %cst_213 {dimension_numbers = #tpu.dot_dimension_numbers<[1], [0], [0], [1], [0, 0, 1, 1], [], []>} : vector<32x64xf32>, vector<64x64xf32>, vector<32x64xf32> -> vector<32x64xf32>
    %292 = arith.addf %286, %291 : vector<32x64xf32>
    %293 = vector.extract_strided_slice %274 {offsets = [0, 1, 0, 0], sizes = [2, 2, 8, 64], strides = [1, 1, 1, 1]} : vector<3x3x8x64xf32> to vector<2x2x8x64xf32>
    %294 = vector.shape_cast %293 : vector<2x2x8x64xf32> to vector<32x64xf32>
    %c2_214 = arith.constant 2 : index
    %c2_215 = arith.constant 2 : index
    %c0_216 = arith.constant 0 : index
    %c0_217 = arith.constant 0 : index
    %295 = vector.load %arg2[%c2_214, %c2_215, %c0_216, %c0_217] : memref<3x9x64x64xf32, #tpu.memory_space<vmem>>, vector<1x1x64x64xf32>
    %296 = vector.shape_cast %295 : vector<1x1x64x64xf32> to vector<64x64xf32>
    %cst_218 = arith.constant dense<0.000000e+00> : vector<32x64xf32>
    %297 = tpu.matmul %294, %296, %cst_218 {dimension_numbers = #tpu.dot_dimension_numbers<[1], [0], [0], [1], [0, 0, 1, 1], [], []>} : vector<32x64xf32>, vector<64x64xf32>, vector<32x64xf32> -> vector<32x64xf32>
    %298 = arith.addf %292, %297 : vector<32x64xf32>
    %299 = vector.extract_strided_slice %279 {offsets = [0, 0, 0, 0], sizes = [2, 2, 8, 64], strides = [1, 1, 1, 1]} : vector<3x3x8x64xf32> to vector<2x2x8x64xf32>
    %300 = vector.shape_cast %299 : vector<2x2x8x64xf32> to vector<32x64xf32>
    %c2_219 = arith.constant 2 : index
    %c3_220 = arith.constant 3 : index
    %c0_221 = arith.constant 0 : index
    %c0_222 = arith.constant 0 : index
    %301 = vector.load %arg2[%c2_219, %c3_220, %c0_221, %c0_222] : memref<3x9x64x64xf32, #tpu.memory_space<vmem>>, vector<1x1x64x64xf32>
    %302 = vector.shape_cast %301 : vector<1x1x64x64xf32> to vector<64x64xf32>
    %cst_223 = arith.constant dense<0.000000e+00> : vector<32x64xf32>
    %303 = tpu.matmul %300, %302, %cst_223 {dimension_numbers = #tpu.dot_dimension_numbers<[1], [0], [0], [1], [0, 0, 1, 1], [], []>} : vector<32x64xf32>, vector<64x64xf32>, vector<32x64xf32> -> vector<32x64xf32>
    %304 = arith.addf %298, %303 : vector<32x64xf32>
    %305 = vector.extract_strided_slice %281 {offsets = [0, 0, 0, 0], sizes = [2, 2, 8, 64], strides = [1, 1, 1, 1]} : vector<3x3x8x64xf32> to vector<2x2x8x64xf32>
    %306 = vector.shape_cast %305 : vector<2x2x8x64xf32> to vector<32x64xf32>
    %c2_224 = arith.constant 2 : index
    %c4_225 = arith.constant 4 : index
    %c0_226 = arith.constant 0 : index
    %c0_227 = arith.constant 0 : index
    %307 = vector.load %arg2[%c2_224, %c4_225, %c0_226, %c0_227] : memref<3x9x64x64xf32, #tpu.memory_space<vmem>>, vector<1x1x64x64xf32>
    %308 = vector.shape_cast %307 : vector<1x1x64x64xf32> to vector<64x64xf32>
    %cst_228 = arith.constant dense<0.000000e+00> : vector<32x64xf32>
    %309 = tpu.matmul %306, %308, %cst_228 {dimension_numbers = #tpu.dot_dimension_numbers<[1], [0], [0], [1], [0, 0, 1, 1], [], []>} : vector<32x64xf32>, vector<64x64xf32>, vector<32x64xf32> -> vector<32x64xf32>
    %310 = arith.addf %304, %309 : vector<32x64xf32>
    %311 = vector.extract_strided_slice %279 {offsets = [0, 1, 0, 0], sizes = [2, 2, 8, 64], strides = [1, 1, 1, 1]} : vector<3x3x8x64xf32> to vector<2x2x8x64xf32>
    %312 = vector.shape_cast %311 : vector<2x2x8x64xf32> to vector<32x64xf32>
    %c2_229 = arith.constant 2 : index
    %c5_230 = arith.constant 5 : index
    %c0_231 = arith.constant 0 : index
    %c0_232 = arith.constant 0 : index
    %313 = vector.load %arg2[%c2_229, %c5_230, %c0_231, %c0_232] : memref<3x9x64x64xf32, #tpu.memory_space<vmem>>, vector<1x1x64x64xf32>
    %314 = vector.shape_cast %313 : vector<1x1x64x64xf32> to vector<64x64xf32>
    %cst_233 = arith.constant dense<0.000000e+00> : vector<32x64xf32>
    %315 = tpu.matmul %312, %314, %cst_233 {dimension_numbers = #tpu.dot_dimension_numbers<[1], [0], [0], [1], [0, 0, 1, 1], [], []>} : vector<32x64xf32>, vector<64x64xf32>, vector<32x64xf32> -> vector<32x64xf32>
    %316 = arith.addf %310, %315 : vector<32x64xf32>
    %317 = vector.extract_strided_slice %274 {offsets = [1, 0, 0, 0], sizes = [2, 2, 8, 64], strides = [1, 1, 1, 1]} : vector<3x3x8x64xf32> to vector<2x2x8x64xf32>
    %318 = vector.shape_cast %317 : vector<2x2x8x64xf32> to vector<32x64xf32>
    %c2_234 = arith.constant 2 : index
    %c6_235 = arith.constant 6 : index
    %c0_236 = arith.constant 0 : index
    %c0_237 = arith.constant 0 : index
    %319 = vector.load %arg2[%c2_234, %c6_235, %c0_236, %c0_237] : memref<3x9x64x64xf32, #tpu.memory_space<vmem>>, vector<1x1x64x64xf32>
    %320 = vector.shape_cast %319 : vector<1x1x64x64xf32> to vector<64x64xf32>
    %cst_238 = arith.constant dense<0.000000e+00> : vector<32x64xf32>
    %321 = tpu.matmul %318, %320, %cst_238 {dimension_numbers = #tpu.dot_dimension_numbers<[1], [0], [0], [1], [0, 0, 1, 1], [], []>} : vector<32x64xf32>, vector<64x64xf32>, vector<32x64xf32> -> vector<32x64xf32>
    %322 = arith.addf %316, %321 : vector<32x64xf32>
    %323 = vector.extract_strided_slice %276 {offsets = [1, 0, 0, 0], sizes = [2, 2, 8, 64], strides = [1, 1, 1, 1]} : vector<3x3x8x64xf32> to vector<2x2x8x64xf32>
    %324 = vector.shape_cast %323 : vector<2x2x8x64xf32> to vector<32x64xf32>
    %c2_239 = arith.constant 2 : index
    %c7_240 = arith.constant 7 : index
    %c0_241 = arith.constant 0 : index
    %c0_242 = arith.constant 0 : index
    %325 = vector.load %arg2[%c2_239, %c7_240, %c0_241, %c0_242] : memref<3x9x64x64xf32, #tpu.memory_space<vmem>>, vector<1x1x64x64xf32>
    %326 = vector.shape_cast %325 : vector<1x1x64x64xf32> to vector<64x64xf32>
    %cst_243 = arith.constant dense<0.000000e+00> : vector<32x64xf32>
    %327 = tpu.matmul %324, %326, %cst_243 {dimension_numbers = #tpu.dot_dimension_numbers<[1], [0], [0], [1], [0, 0, 1, 1], [], []>} : vector<32x64xf32>, vector<64x64xf32>, vector<32x64xf32> -> vector<32x64xf32>
    %328 = arith.addf %322, %327 : vector<32x64xf32>
    %329 = vector.extract_strided_slice %274 {offsets = [1, 1, 0, 0], sizes = [2, 2, 8, 64], strides = [1, 1, 1, 1]} : vector<3x3x8x64xf32> to vector<2x2x8x64xf32>
    %330 = vector.shape_cast %329 : vector<2x2x8x64xf32> to vector<32x64xf32>
    %c2_244 = arith.constant 2 : index
    %c8_245 = arith.constant 8 : index
    %c0_246 = arith.constant 0 : index
    %c0_247 = arith.constant 0 : index
    %331 = vector.load %arg2[%c2_244, %c8_245, %c0_246, %c0_247] : memref<3x9x64x64xf32, #tpu.memory_space<vmem>>, vector<1x1x64x64xf32>
    %332 = vector.shape_cast %331 : vector<1x1x64x64xf32> to vector<64x64xf32>
    %cst_248 = arith.constant dense<0.000000e+00> : vector<32x64xf32>
    %333 = tpu.matmul %330, %332, %cst_248 {dimension_numbers = #tpu.dot_dimension_numbers<[1], [0], [0], [1], [0, 0, 1, 1], [], []>} : vector<32x64xf32>, vector<64x64xf32>, vector<32x64xf32> -> vector<32x64xf32>
    %334 = arith.addf %328, %333 : vector<32x64xf32>
    %c3_249 = arith.constant 3 : index
    %c0_250 = arith.constant 0 : index
    %335 = vector.load %arg3[%c3_249, %c0_250] : memref<8x64xf32, #tpu.memory_space<vmem>>, vector<1x64xf32>
    %c7_251 = arith.constant 7 : index
    %c0_252 = arith.constant 0 : index
    %336 = vector.load %arg3[%c7_251, %c0_252] : memref<8x64xf32, #tpu.memory_space<vmem>>, vector<1x64xf32>
    %337 = vector.shape_cast %334 : vector<32x64xf32> to vector<4x8x64xf32>
    %cst_253 = arith.constant dense<0.000000e+00> : vector<8x64xf32>
    %338 = vector.multi_reduction <add>, %337, %cst_253 [0] : vector<4x8x64xf32> to vector<8x64xf32>
    %339 = arith.mulf %337, %337 : vector<4x8x64xf32>
    %cst_254 = arith.constant dense<0.000000e+00> : vector<8x64xf32>
    %340 = vector.multi_reduction <add>, %339, %cst_254 [0] : vector<4x8x64xf32> to vector<8x64xf32>
    %341 = arith.mulf %338, %4 : vector<8x64xf32>
    %cst_255 = arith.constant dense<0.000000e+00> : vector<64xf32>
    %342 = vector.multi_reduction <add>, %341, %cst_255 [0] : vector<8x64xf32> to vector<64xf32>
    %343 = vector.shape_cast %342 : vector<64xf32> to vector<1x64xf32>
    %cst_256 = arith.constant 1.250000e-01 : f32
    %344 = vector.broadcast %cst_256 : f32 to vector<1x64xf32>
    %345 = arith.mulf %343, %344 : vector<1x64xf32>
    %346 = arith.mulf %340, %4 : vector<8x64xf32>
    %cst_257 = arith.constant dense<0.000000e+00> : vector<64xf32>
    %347 = vector.multi_reduction <add>, %346, %cst_257 [0] : vector<8x64xf32> to vector<64xf32>
    %348 = vector.shape_cast %347 : vector<64xf32> to vector<1x64xf32>
    %cst_258 = arith.constant 1.250000e-01 : f32
    %349 = vector.broadcast %cst_258 : f32 to vector<1x64xf32>
    %350 = arith.mulf %348, %349 : vector<1x64xf32>
    %351 = arith.mulf %345, %345 : vector<1x64xf32>
    %352 = arith.subf %350, %351 : vector<1x64xf32>
    %cst_259 = arith.constant 1.000000e-03 : f32
    %353 = vector.broadcast %cst_259 : f32 to vector<1x64xf32>
    %354 = arith.addf %352, %353 : vector<1x64xf32>
    %355 = math.rsqrt %354 : vector<1x64xf32>
    %356 = arith.mulf %335, %355 : vector<1x64xf32>
    %357 = arith.mulf %345, %356 : vector<1x64xf32>
    %358 = arith.subf %336, %357 : vector<1x64xf32>
    %359 = vector.broadcast %356 : vector<1x64xf32> to vector<32x64xf32>
    %360 = arith.mulf %334, %359 : vector<32x64xf32>
    %361 = vector.broadcast %358 : vector<1x64xf32> to vector<32x64xf32>
    %362 = arith.addf %360, %361 : vector<32x64xf32>
    %cst_260 = arith.constant 0.000000e+00 : f32
    %363 = vector.broadcast %cst_260 : f32 to vector<32x64xf32>
    %364 = arith.maximumf %362, %363 : vector<32x64xf32>
    %365 = vector.extract_strided_slice %364 {offsets = [0, 0], sizes = [8, 64], strides = [1, 1]} : vector<32x64xf32> to vector<8x64xf32>
    %c0_261 = arith.constant 0 : index
    %c0_262 = arith.constant 0 : index
    %c0_263 = arith.constant 0 : index
    %366 = vector.load %arg4[%c0_261, %c0_262, %c0_263] : memref<4x64x128xf32, #tpu.memory_space<vmem>>, vector<1x64x128xf32>
    %367 = vector.shape_cast %366 : vector<1x64x128xf32> to vector<64x128xf32>
    %cst_264 = arith.constant dense<0.000000e+00> : vector<8x128xf32>
    %368 = tpu.matmul %365, %367, %cst_264 {dimension_numbers = #tpu.dot_dimension_numbers<[1], [0], [0], [1], [0, 0, 1, 1], [], []>} : vector<8x64xf32>, vector<64x128xf32>, vector<8x128xf32> -> vector<8x128xf32>
    %369 = vector.extract_strided_slice %364 {offsets = [8, 0], sizes = [8, 64], strides = [1, 1]} : vector<32x64xf32> to vector<8x64xf32>
    %c1_265 = arith.constant 1 : index
    %c0_266 = arith.constant 0 : index
    %c0_267 = arith.constant 0 : index
    %370 = vector.load %arg4[%c1_265, %c0_266, %c0_267] : memref<4x64x128xf32, #tpu.memory_space<vmem>>, vector<1x64x128xf32>
    %371 = vector.shape_cast %370 : vector<1x64x128xf32> to vector<64x128xf32>
    %cst_268 = arith.constant dense<0.000000e+00> : vector<8x128xf32>
    %372 = tpu.matmul %369, %371, %cst_268 {dimension_numbers = #tpu.dot_dimension_numbers<[1], [0], [0], [1], [0, 0, 1, 1], [], []>} : vector<8x64xf32>, vector<64x128xf32>, vector<8x128xf32> -> vector<8x128xf32>
    %373 = arith.addf %368, %372 : vector<8x128xf32>
    %374 = vector.extract_strided_slice %364 {offsets = [16, 0], sizes = [8, 64], strides = [1, 1]} : vector<32x64xf32> to vector<8x64xf32>
    %c2_269 = arith.constant 2 : index
    %c0_270 = arith.constant 0 : index
    %c0_271 = arith.constant 0 : index
    %375 = vector.load %arg4[%c2_269, %c0_270, %c0_271] : memref<4x64x128xf32, #tpu.memory_space<vmem>>, vector<1x64x128xf32>
    %376 = vector.shape_cast %375 : vector<1x64x128xf32> to vector<64x128xf32>
    %cst_272 = arith.constant dense<0.000000e+00> : vector<8x128xf32>
    %377 = tpu.matmul %374, %376, %cst_272 {dimension_numbers = #tpu.dot_dimension_numbers<[1], [0], [0], [1], [0, 0, 1, 1], [], []>} : vector<8x64xf32>, vector<64x128xf32>, vector<8x128xf32> -> vector<8x128xf32>
    %378 = arith.addf %373, %377 : vector<8x128xf32>
    %379 = vector.extract_strided_slice %364 {offsets = [24, 0], sizes = [8, 64], strides = [1, 1]} : vector<32x64xf32> to vector<8x64xf32>
    %c3_273 = arith.constant 3 : index
    %c0_274 = arith.constant 0 : index
    %c0_275 = arith.constant 0 : index
    %380 = vector.load %arg4[%c3_273, %c0_274, %c0_275] : memref<4x64x128xf32, #tpu.memory_space<vmem>>, vector<1x64x128xf32>
    %381 = vector.shape_cast %380 : vector<1x64x128xf32> to vector<64x128xf32>
    %cst_276 = arith.constant dense<0.000000e+00> : vector<8x128xf32>
    %382 = tpu.matmul %379, %381, %cst_276 {dimension_numbers = #tpu.dot_dimension_numbers<[1], [0], [0], [1], [0, 0, 1, 1], [], []>} : vector<8x64xf32>, vector<64x128xf32>, vector<8x128xf32> -> vector<8x128xf32>
    %383 = arith.addf %378, %382 : vector<8x128xf32>
    %c0_277 = arith.constant 0 : index
    %c0_278 = arith.constant 0 : index
    %384 = vector.load %arg5[%c0_277, %c0_278] : memref<1x128xf32, #tpu.memory_space<vmem>>, vector<1x128xf32>
    %385 = vector.broadcast %384 : vector<1x128xf32> to vector<8x128xf32>
    %386 = arith.addf %383, %385 : vector<8x128xf32>
    %c0_279 = arith.constant 0 : index
    %c0_280 = arith.constant 0 : index
    %387 = vector.load %arg6[%c0_279, %c0_280] : memref<8x128xf32, #tpu.memory_space<vmem>>, vector<8x128xf32>
    tpu.vector_store %arg6[%c0_279, %c0_280], %386 {strides = array<i32>} : memref<8x128xf32, #tpu.memory_space<vmem>>, vector<8x128xf32>,
    return
  }
}

</mosaic_0001>

<bundles_post_ra>
// kernel: _omniglot_forward_impl.1
= control target key start
LH: loop header
LB: loop body
LE: loop exit
PB: predicated region body
PF: predicated region fallthrough
CT: control target
= control target key end

     0   :  { %vm28_vm0 = vcmask 523264   ;;  %s14986_s1 = inlined_call_operand.vmem [shape: f32[128,64], index: 1, kind: input, shape index: {}]   ;;  %s14987_s0 = inlined_call_operand.vmem [shape: f32[1568,128], index: 0, kind: input, shape index: {}]   ;;  %s14988_s2 = inlined_call_operand.vmem [shape: f32[3,9,64,64], index: 2, kind: input, shape index: {}]   ;;  %s14989_s3 = inlined_call_operand.vmem [shape: f32[8,64], index: 3, kind: input, shape index: {}]   ;;  %s14990_s4 = inlined_call_operand.vmem [shape: f32[4,64,128], index: 4, kind: input, shape index: {}]   ;;  %s14991_s5 = inlined_call_operand.vmem [shape: f32[1,128], index: 5, kind: input, shape index: {}]   ;;  %s14992_s6 = inlined_call_operand.vmem [shape: f32[8,128], index: 6, kind: output, shape index: {}]  }
   0x1   :  { %v380_v0 = vld [vmem:[%s14986_s1 + $0x78] sm:$0xff]  ;;  %v379_v1 = vld [vmem:[%s14986_s1 + $0x70] sm:$0xff]  ;;  %v378_v2 = vld [vmem:[%s14986_s1 + $0x68] sm:$0xff] }
   0x2   :  { %381 = vmatpush.msra.mxu0 %v380_v0  ;;  %v377_v3 = vld [vmem:[%s14986_s1 + $0x60] sm:$0xff]  ;;  %v376_v4 = vld [vmem:[%s14986_s1 + $0x58] sm:$0xff]  ;;  %v375_v5 = vld [vmem:[%s14986_s1 + $0x50] sm:$0xff] }
   0x3   :  { %v374_v6 = vld [vmem:[%s14986_s1 + $0x48] sm:$0xff]  ;;  %v373_v7 = vld [vmem:[%s14986_s1 + $0x40] sm:$0xff]  ;;  %v372_v8 = vld [vmem:[%s14986_s1 + $0x38] sm:$0xff] }
   0x4   :  { %382 = vmatpush.msra.mxu0 %v379_v1  ;;  %v371_v9 = vld [vmem:[%s14986_s1 + $0x30] sm:$0xff]  ;;  %v370_v10 = vld [vmem:[%s14986_s1 + $0x28] sm:$0xff]  ;;  %v369_v11 = vld [vmem:[%s14986_s1 + $0x20] sm:$0xff] }
   0x5   :  { %v368_v12 = vld [vmem:[%s14986_s1 + $0x18] sm:$0xff]  ;;  %v367_v13 = vld [vmem:[%s14986_s1 + $0x10] sm:$0xff]  ;;  %v366_v14 = vld [vmem:[%s14986_s1 + $0x8] sm:$0xff] }
   0x6   :  { %383 = vmatpush.msra.mxu0 %v378_v2  ;;  %v365_v15 = vld [vmem:[%s14986_s1] sm:$0xff]  ;;  %v170_v17 = vld [vmem:[%s14987_s0 + $0x8] sm:$0xff]  ;;  %v171_v18 = vld [vmem:[%s14987_s0 + $0x10] sm:$0xff] }
   0x7   :  { %v169_v16 = vld [vmem:[%s14987_s0] sm:$0xff]  ;;  %v172_v19 = vld [vmem:[%s14987_s0 + $0x18] sm:$0xff]  ;;  %v174_v21 = vld [vmem:[%s14987_s0 + $0x28] sm:$0xff] }
   0x8   :  { %384 = vmatpush.msra.mxu0 %v377_v3  ;;  %v173_v20 = vld [vmem:[%s14987_s0 + $0x20] sm:$0xff]  ;;  %v175_v22 = vld [vmem:[%s14987_s0 + $0x30] sm:$0xff]  ;;  %v176_v23 = vld [vmem:[%s14987_s0 + $0x38] sm:$0xff] }
   0x9   :  { %v177_v24 = vld [vmem:[%s14987_s0 + $0x40] sm:$0xff]  ;;  %v178_v25 = vld [vmem:[%s14987_s0 + $0x48] sm:$0xff]  ;;  %v179_v26 = vld [vmem:[%s14987_s0 + $0x50] sm:$0xff] }
   0xa   :  { %385 = vmatpush.msra.mxu0 %v376_v4  ;;  %v180_v27 = vld [vmem:[%s14987_s0 + $0x58] sm:$0xff]  ;;  %v181_v28 = vld [vmem:[%s14987_s0 + $0x60] sm:$0xff]  ;;  %v182_v29 = vld [vmem:[%s14987_s0 + $0x68] sm:$0xff] }
   0xb   :  { %v183_v30 = vld [vmem:[%s14987_s0 + $0x70] sm:$0xff]  ;;  %v184_v31 = vld [vmem:[%s14987_s0 + $0x78] sm:$0xff]  ;;  %v185_v33 = vld [vmem:[%s14987_s0 + $0x80] sm:$0xff] }
   0xc   :  { %386 = vmatpush.msra.mxu0 %v375_v5  ;;  %v186_v35 = vld [vmem:[%s14987_s0 + $0x88] sm:$0xff]  ;;  %v187_v37 = vld [vmem:[%s14987_s0 + $0x90] sm:$0xff]  ;;  %v188_v39 = vld [vmem:[%s14987_s0 + $0x98] sm:$0xff] }
   0xd   :  { %v189_v41 = vld [vmem:[%s14987_s0 + $0xa0] sm:$0xff]  ;;  %v190_v43 = vld [vmem:[%s14987_s0 + $0xa8] sm:$0xff]  ;;  %v191_v45 = vld [vmem:[%s14987_s0 + $0xb0] sm:$0xff] }
   0xe   :  { %387 = vmatpush.msra.mxu0 %v374_v6  ;;  %v192_v47 = vld [vmem:[%s14987_s0 + $0xb8] sm:$0xff]  ;;  %v193_v49 = vld [vmem:[%s14987_s0 + $0xc0] sm:$0xff]  ;;  %v194_v51 = vld [vmem:[%s14987_s0 + $0xc8] sm:$0xff] }
   0xf   :  { %v195_v53 = vld [vmem:[%s14987_s0 + $0xd0] sm:$0xff]  ;;  %v196_v55 = vld [vmem:[%s14987_s0 + $0xd8] sm:$0xff]  ;;  %v197_v57 = vld [vmem:[%s14987_s0 + $0xe0] sm:$0xff] }
  0x10   :  { %388 = vmatpush.msra.mxu0 %v373_v7  ;;  %v198_v59 = vld [vmem:[%s14987_s0 + $0xe8] sm:$0xff]  ;;  %v199_v61 = vld [vmem:[%s14987_s0 + $0xf0] sm:$0xff]  ;;  %v200_v63 = vld [vmem:[%s14987_s0 + $0xf8] sm:$0xff] }
  0x11   :  { %v201_v1 = vld [vmem:[%s14987_s0 + $0x100] sm:$0xff]  ;;  %v202_v3 = vld [vmem:[%s14987_s0 + $0x108] sm:$0xff]  ;;  %v203_v5 = vld [vmem:[%s14987_s0 + $0x110] sm:$0xff] }
  0x12   :  { %389 = vmatpush.msra.mxu0 %v372_v8  ;;  %v204_v7 = vld [vmem:[%s14987_s0 + $0x118] sm:$0xff] }
  0x14   :  { %390 = vmatpush.msra.mxu0 %v371_v9  ;;  %v205_v9 = vld [vmem:[%s14987_s0 + $0x120] sm:$0xff] }
  0x16   :  { %391 = vmatpush.msra.mxu0 %v370_v10 }
  0x18   :  { %392 = vmatpush.msra.mxu0 %v369_v11  ;;  %v206_v11 = vld [vmem:[%s14987_s0 + $0x128] sm:$0xff] }
  0x1a   :  { %393 = vmatpush.msra.mxu0 %v368_v12 }
  0x1c   :  { %394 = vmatpush.msra.mxu0 %v367_v13  ;;  %v207_v13 = vld [vmem:[%s14987_s0 + $0x130] sm:$0xff] }
  0x1e   :  { %395 = vmatpush.msra.mxu0 %v366_v14 }
  0x20   :  { %396 = vmatpush.msra.mxu0 %v365_v15  ;;  %v208_v15 = vld [vmem:[%s14987_s0 + $0x138] sm:$0xff] }
  0x21   :  { %397 = vmatmul.f32.vlgmr.msra.gmra.mxu0 %v169_v16 }
  0x29   :  { %400 = vmatmul.f32.gmra.mxu0 %v170_v17  ;;  %v209_v17 = vld [vmem:[%s14987_s0 + $0x140] sm:$0xff] }
  0x31   :  { %403 = vmatmul.f32.gmra.mxu0 %v171_v18 }
  0x39   :  { %406 = vmatmul.f32.gmra.mxu0 %v172_v19  ;;  %v210_v19 = vld [vmem:[%s14987_s0 + $0x148] sm:$0xff] }
  0x41   :  { %409 = vmatmul.f32.gmra.mxu0 %v173_v20 }
  0x49   :  { %412 = vmatmul.f32.gmra.mxu0 %v174_v21  ;;  %v211_v21 = vld [vmem:[%s14987_s0 + $0x150] sm:$0xff] }
  0x51   :  { %415 = vmatmul.f32.gmra.mxu0 %v175_v22 }
  0x59   :  { %418 = vmatmul.f32.gmra.mxu0 %v176_v23  ;;  %v212_v23 = vld [vmem:[%s14987_s0 + $0x158] sm:$0xff] }
  0x61   :  { %421 = vmatmul.f32.gmra.mxu0 %v177_v24 }
  0x69   :  { %424 = vmatmul.f32.gmra.mxu0 %v178_v25  ;;  %v213_v25 = vld [vmem:[%s14987_s0 + $0x160] sm:$0xff] }
  0x71   :  { %427 = vmatmul.f32.gmra.mxu0 %v179_v26 }
  0x79   :  { %430 = vmatmul.f32.gmra.mxu0 %v180_v27  ;;  %v214_v27 = vld [vmem:[%s14987_s0 + $0x168] sm:$0xff] }
  0x81   :  { %433 = vmatmul.f32.gmra.mxu0 %v181_v28 }
  0x89   :  { %436 = vmatmul.f32.gmra.mxu0 %v182_v29  ;;  %v215_v29 = vld [vmem:[%s14987_s0 + $0x170] sm:$0xff] }
  0x91   :  { %439 = vmatmul.f32.gmra.mxu0 %v183_v30 }
  0x99   :  { %442 = vmatmul.f32.gmra.mxu0 %v184_v31  ;;  %v216_v31 = vld [vmem:[%s14987_s0 + $0x178] sm:$0xff] }
  0x9e   :  { %v9114_v32 = vpop.f32.mrf.mxu0 }
  0x9f   :  { %15267 = vst [vmem:[#allocation5_spill] sm:$0xff] %v9114_v32 }
  0xa1   :  { %445 = vmatmul.f32.gmra.mxu0 %v185_v33 }
  0xa6   :  { %v9119_v34 = vpop.f32.mrf.mxu0 }
  0xa7   :  { %15268 = vst [vmem:[#allocation6_spill] sm:$0xff] %v9119_v34 }
  0xa9   :  { %448 = vmatmul.f32.gmra.mxu0 %v186_v35  ;;  %v217_v35 = vld [vmem:[%s14987_s0 + $0x180] sm:$0xff] }
  0xae   :  { %v9124_v36 = vpop.f32.mrf.mxu0 }
  0xaf   :  { %15269 = vst [vmem:[#allocation7_spill] sm:$0xff] %v9124_v36 }
  0xb1   :  { %451 = vmatmul.f32.gmra.mxu0 %v187_v37 }
  0xb6   :  { %v9129_v38 = vpop.f32.mrf.mxu0 }
  0xb7   :  { %15270 = vst [vmem:[#allocation8_spill] sm:$0xff] %v9129_v38 }
  0xb9   :  { %454 = vmatmul.f32.gmra.mxu0 %v188_v39  ;;  %v218_v39 = vld [vmem:[%s14987_s0 + $0x188] sm:$0xff] }
  0xbe   :  { %v9134_v40 = vpop.f32.mrf.mxu0 }
  0xbf   :  { %15271 = vst [vmem:[#allocation9_spill] sm:$0xff] %v9134_v40 }
  0xc1   :  { %457 = vmatmul.f32.gmra.mxu0 %v189_v41 }
  0xc6   :  { %v9139_v42 = vpop.f32.mrf.mxu0 }
  0xc9   :  { %460 = vmatmul.f32.gmra.mxu0 %v190_v43  ;;  %v219_v43 = vld [vmem:[%s14987_s0 + $0x190] sm:$0xff] }
  0xce   :  { %v9144_v44 = vpop.f32.mrf.mxu0 }
  0xd1   :  { %463 = vmatmul.f32.gmra.mxu0 %v191_v45 }
  0xd6   :  { %v9149_v46 = vpop.f32.mrf.mxu0 }
  0xd9   :  { %466 = vmatmul.f32.gmra.mxu0 %v192_v47  ;;  %v220_v47 = vld [vmem:[%s14987_s0 + $0x198] sm:$0xff] }
  0xde   :  { %v9154_v48 = vpop.f32.mrf.mxu0 }
  0xdf   :  { %15272 = vst [vmem:[#allocation10_spill] sm:$0xff] %v9154_v48 }
  0xe1   :  { %469 = vmatmul.f32.gmra.mxu0 %v193_v49 }
  0xe6   :  { %v9159_v50 = vpop.f32.mrf.mxu0 }
  0xe9   :  { %472 = vmatmul.f32.gmra.mxu0 %v194_v51  ;;  %v221_v51 = vld [vmem:[%s14987_s0 + $0x1a0] sm:$0xff] }
  0xee   :  { %v9164_v52 = vpop.f32.mrf.mxu0 }
  0xf1   :  { %475 = vmatmul.f32.gmra.mxu0 %v195_v53 }
  0xf6   :  { %v9169_v54 = vpop.f32.mrf.mxu0 }
  0xf9   :  { %478 = vmatmul.f32.gmra.mxu0 %v196_v55  ;;  %v222_v55 = vld [vmem:[%s14987_s0 + $0x1a8] sm:$0xff] }
  0xfe   :  { %v9174_v56 = vpop.f32.mrf.mxu0 }
  0xff   :  { %15273 = vst [vmem:[#allocation11_spill] sm:$0xff] %v9174_v56 }
 0x101   :  { %481 = vmatmul.f32.gmra.mxu0 %v197_v57 }
 0x106   :  { %v9179_v58 = vpop.f32.mrf.mxu0 }
 0x109   :  { %484 = vmatmul.f32.gmra.mxu0 %v198_v59  ;;  %v223_v59 = vld [vmem:[%s14987_s0 + $0x1b0] sm:$0xff] }
 0x10e   :  { %v9184_v60 = vpop.f32.mrf.mxu0 }
 0x111   :  { %487 = vmatmul.f32.gmra.mxu0 %v199_v61 }
 0x116   :  { %v9189_v62 = vpop.f32.mrf.mxu0 }
 0x117   :  { %15274 = vst [vmem:[#allocation12_spill] sm:$0xff] %v9189_v62 }
 0x119   :  { %490 = vmatmul.f32.gmra.mxu0 %v200_v63  ;;  %v224_v63 = vld [vmem:[%s14987_s0 + $0x1b8] sm:$0xff] }
 0x11e   :  { %v9194_v0 = vpop.f32.mrf.mxu0 }
 0x11f   :  { %15275 = vst [vmem:[#allocation13_spill] sm:$0xff] %v9194_v0 }
 0x121   :  { %493 = vmatmul.f32.gmra.mxu0 %v201_v1 }
 0x126   :  { %v9199_v2 = vpop.f32.mrf.mxu0 }
 0x127   :  { %15276 = vst [vmem:[#allocation14_spill] sm:$0xff] %v9199_v2 }
 0x129   :  { %496 = vmatmul.f32.gmra.mxu0 %v202_v3  ;;  %v225_v3 = vld [vmem:[%s14987_s0 + $0x1c0] sm:$0xff] }
 0x12e   :  { %v9204_v4 = vpop.f32.mrf.mxu0 }
 0x12f   :  { %15277 = vst [vmem:[#allocation15_spill] sm:$0xff] %v9204_v4 }
 0x131   :  { %499 = vmatmul.f32.gmra.mxu0 %v203_v5 }
 0x136   :  { %v9209_v6 = vpop.f32.mrf.mxu0 }
 0x137   :  { %15278 = vst [vmem:[#allocation16_spill] sm:$0xff] %v9209_v6 }
 0x139   :  { %502 = vmatmul.f32.gmra.mxu0 %v204_v7  ;;  %v226_v7 = vld [vmem:[%s14987_s0 + $0x1c8] sm:$0xff] }
 0x13e   :  { %v9214_v8 = vpop.f32.mrf.mxu0 }
 0x13f   :  { %15279 = vst [vmem:[#allocation17_spill] sm:$0xff] %v9214_v8 }
 0x141   :  { %505 = vmatmul.f32.gmra.mxu0 %v205_v9 }
 0x146   :  { %v9219_v10 = vpop.f32.mrf.mxu0 }
 0x147   :  { %15280 = vst [vmem:[#allocation18_spill] sm:$0xff] %v9219_v10 }
 0x149   :  { %508 = vmatmul.f32.gmra.mxu0 %v206_v11  ;;  %v227_v11 = vld [vmem:[%s14987_s0 + $0x1d0] sm:$0xff] }
 0x14e   :  { %v9224_v12 = vpop.f32.mrf.mxu0 }
 0x14f   :  { %15281 = vst [vmem:[#allocation19_spill] sm:$0xff] %v9224_v12 }
 0x151   :  { %511 = vmatmul.f32.gmra.mxu0 %v207_v13 }
 0x156   :  { %v9229_v14 = vpop.f32.mrf.mxu0 }
 0x157   :  { %15282 = vst [vmem:[#allocation20_spill] sm:$0xff] %v9229_v14 }
 0x159   :  { %514 = vmatmul.f32.gmra.mxu0 %v208_v15  ;;  %v228_v15 = vld [vmem:[%s14987_s0 + $0x1d8] sm:$0xff] }
 0x15e   :  { %v9234_v16 = vpop.f32.mrf.mxu0 }
 0x15f   :  { %15283 = vst [vmem:[#allocation21_spill] sm:$0xff] %v9234_v16 }
 0x161   :  { %517 = vmatmul.f32.gmra.mxu0 %v209_v17 }
 0x166   :  { %v9239_v18 = vpop.f32.mrf.mxu0 }
 0x167   :  { %15284 = vst [vmem:[#allocation22_spill] sm:$0xff] %v9239_v18 }
 0x169   :  { %520 = vmatmul.f32.gmra.mxu0 %v210_v19  ;;  %v229_v19 = vld [vmem:[%s14987_s0 + $0x1e0] sm:$0xff] }
 0x16e   :  { %v9244_v20 = vpop.f32.mrf.mxu0 }
 0x16f   :  { %15285 = vst [vmem:[#allocation23_spill] sm:$0xff] %v9244_v20 }
 0x171   :  { %523 = vmatmul.f32.gmra.mxu0 %v211_v21 }
 0x176   :  { %v9249_v22 = vpop.f32.mrf.mxu0 }
 0x177   :  { %15286 = vst [vmem:[#allocation24_spill] sm:$0xff] %v9249_v22 }
 0x179   :  { %526 = vmatmul.f32.gmra.mxu0 %v212_v23  ;;  %v230_v23 = vld [vmem:[%s14987_s0 + $0x1e8] sm:$0xff] }
 0x17e   :  { %v9254_v24 = vpop.f32.mrf.mxu0 }
 0x17f   :  { %15287 = vst [vmem:[#allocation25_spill] sm:$0xff] %v9254_v24 }
 0x181   :  { %529 = vmatmul.f32.gmra.mxu0 %v213_v25 }
 0x186   :  { %v9259_v26 = vpop.f32.mrf.mxu0 }
 0x187   :  { %15288 = vst [vmem:[#allocation26_spill] sm:$0xff] %v9259_v26 }
 0x189   :  { %532 = vmatmul.f32.gmra.mxu0 %v214_v27  ;;  %v231_v27 = vld [vmem:[%s14987_s0 + $0x1f0] sm:$0xff] }
 0x18e   :  { %v9264_v28 = vpop.f32.mrf.mxu0 }
 0x18f   :  { %15289 = vst [vmem:[#allocation27_spill] sm:$0xff] %v9264_v28 }
 0x191   :  { %535 = vmatmul.f32.gmra.mxu0 %v215_v29 }
 0x196   :  { %v9269_v30 = vpop.f32.mrf.mxu0 }
 0x197   :  { %15290 = vst [vmem:[#allocation28_spill] sm:$0xff] %v9269_v30 }
 0x199   :  { %538 = vmatmul.f32.gmra.mxu0 %v216_v31  ;;  %v232_v31 = vld [vmem:[%s14987_s0 + $0x1f8] sm:$0xff] }
 0x19e   :  { %v9274_v33 = vpop.f32.mrf.mxu0 }
 0x19f   :  { %15291 = vst [vmem:[#allocation29_spill] sm:$0xff] %v9274_v33 }
 0x1a1   :  { %541 = vmatmul.f32.gmra.mxu0 %v217_v35 }
 0x1a6   :  { %v9279_v37 = vpop.f32.mrf.mxu0 }
 0x1a7   :  { %15292 = vst [vmem:[#allocation30_spill] sm:$0xff] %v9279_v37 }
 0x1a9   :  { %544 = vmatmul.f32.gmra.mxu0 %v218_v39  ;;  %v233_v39 = vld [vmem:[%s14987_s0 + $0x200] sm:$0xff] }
 0x1ae   :  { %v9284_v41 = vpop.f32.mrf.mxu0 }
 0x1af   :  { %15293 = vst [vmem:[#allocation31_spill] sm:$0xff] %v9284_v41 }
 0x1b1   :  { %547 = vmatmul.f32.gmra.mxu0 %v219_v43 }
 0x1b6   :  { %v9289_v45 = vpop.f32.mrf.mxu0 }
 0x1b7   :  { %15294 = vst [vmem:[#allocation32_spill] sm:$0xff] %v9289_v45 }
 0x1b9   :  { %550 = vmatmul.f32.gmra.mxu0 %v220_v47  ;;  %v234_v47 = vld [vmem:[%s14987_s0 + $0x208] sm:$0xff] }
 0x1be   :  { %v9294_v49 = vpop.f32.mrf.mxu0 }
 0x1bf   :  { %15295 = vst [vmem:[#allocation33_spill] sm:$0xff] %v9294_v49 }
 0x1c1   :  { %553 = vmatmul.f32.gmra.mxu0 %v221_v51 }
 0x1c6   :  { %v9299_v53 = vpop.f32.mrf.mxu0 }
 0x1c7   :  { %15296 = vst [vmem:[#allocation34_spill] sm:$0xff] %v9299_v53 }
 0x1c9   :  { %556 = vmatmul.f32.gmra.mxu0 %v222_v55  ;;  %v235_v55 = vld [vmem:[%s14987_s0 + $0x210] sm:$0xff] }
 0x1ce   :  { %v9304_v57 = vpop.f32.mrf.mxu0 }
 0x1cf   :  { %15297 = vst [vmem:[#allocation35_spill] sm:$0xff] %v9304_v57 }
 0x1d1   :  { %559 = vmatmul.f32.gmra.mxu0 %v223_v59 }
 0x1d6   :  { %v9309_v61 = vpop.f32.mrf.mxu0 }
 0x1d7   :  { %15298 = vst [vmem:[#allocation36_spill] sm:$0xff] %v9309_v61 }
 0x1d9   :  { %562 = vmatmul.f32.gmra.mxu0 %v224_v63  ;;  %v236_v63 = vld [vmem:[%s14987_s0 + $0x218] sm:$0xff] }
 0x1de   :  { %v9314_v1 = vpop.f32.mrf.mxu0 }
 0x1df   :  { %15299 = vst [vmem:[#allocation37_spill] sm:$0xff] %v9314_v1 }
 0x1e1   :  { %565 = vmatmul.f32.gmra.mxu0 %v225_v3 }
 0x1e6   :  { %v9319_v5 = vpop.f32.mrf.mxu0 }
 0x1e7   :  { %15300 = vst [vmem:[#allocation38_spill] sm:$0xff] %v9319_v5 }
 0x1e9   :  { %568 = vmatmul.f32.gmra.mxu0 %v226_v7  ;;  %v237_v7 = vld [vmem:[%s14987_s0 + $0x220] sm:$0xff] }
 0x1ee   :  { %v9324_v9 = vpop.f32.mrf.mxu0 }
 0x1ef   :  { %15301 = vst [vmem:[#allocation39_spill] sm:$0xff] %v9324_v9 }
 0x1f1   :  { %571 = vmatmul.f32.gmra.mxu0 %v227_v11 }
 0x1f6   :  { %v9329_v13 = vpop.f32.mrf.mxu0 }
 0x1f7   :  { %15302 = vst [vmem:[#allocation40_spill] sm:$0xff] %v9329_v13 }
 0x1f9   :  { %574 = vmatmul.f32.gmra.mxu0 %v228_v15  ;;  %v238_v15 = vld [vmem:[%s14987_s0 + $0x228] sm:$0xff] }
 0x1fe   :  { %v9334_v17 = vpop.f32.mrf.mxu0 }
 0x1ff   :  { %15303 = vst [vmem:[#allocation41_spill] sm:$0xff] %v9334_v17 }
 0x201   :  { %577 = vmatmul.f32.gmra.mxu0 %v229_v19 }
 0x206   :  { %v9339_v21 = vpop.f32.mrf.mxu0 }
 0x207   :  { %15304 = vst [vmem:[#allocation42_spill] sm:$0xff] %v9339_v21 }
 0x209   :  { %580 = vmatmul.f32.gmra.mxu0 %v230_v23  ;;  %v239_v23 = vld [vmem:[%s14987_s0 + $0x230] sm:$0xff] }
 0x20e   :  { %v9344_v25 = vpop.f32.mrf.mxu0 }
 0x20f   :  { %15305 = vst [vmem:[#allocation43_spill] sm:$0xff] %v9344_v25 }
 0x211   :  { %583 = vmatmul.f32.gmra.mxu0 %v231_v27 }
 0x216   :  { %v9349_v29 = vpop.f32.mrf.mxu0 }
 0x217   :  { %15306 = vst [vmem:[#allocation44_spill] sm:$0xff] %v9349_v29 }
 0x219   :  { %586 = vmatmul.f32.gmra.mxu0 %v232_v31  ;;  %v240_v31 = vld [vmem:[%s14987_s0 + $0x238] sm:$0xff] }
 0x21e   :  { %v9354_v35 = vpop.f32.mrf.mxu0 }
 0x21f   :  { %15307 = vst [vmem:[#allocation45_spill] sm:$0xff] %v9354_v35 }
 0x221   :  { %589 = vmatmul.f32.gmra.mxu0 %v233_v39 }
 0x226   :  { %v9359_v43 = vpop.f32.mrf.mxu0 }
 0x227   :  { %15308 = vst [vmem:[#allocation46_spill] sm:$0xff] %v9359_v43 }
 0x229   :  { %592 = vmatmul.f32.gmra.mxu0 %v234_v47  ;;  %v241_v47 = vld [vmem:[%s14987_s0 + $0x240] sm:$0xff] }
 0x22e   :  { %v9364_v51 = vpop.f32.mrf.mxu0 }
 0x22f   :  { %15309 = vst [vmem:[#allocation47_spill] sm:$0xff] %v9364_v51 }
 0x231   :  { %595 = vmatmul.f32.gmra.mxu0 %v235_v55 }
 0x236   :  { %v9369_v59 = vpop.f32.mrf.mxu0 }
 0x237   :  { %15310 = vst [vmem:[#allocation48_spill] sm:$0xff] %v9369_v59 }
 0x239   :  { %598 = vmatmul.f32.gmra.mxu0 %v236_v63  ;;  %v242_v63 = vld [vmem:[%s14987_s0 + $0x248] sm:$0xff] }
 0x23e   :  { %v9374_v3 = vpop.f32.mrf.mxu0 }
 0x23f   :  { %15311 = vst [vmem:[#allocation49_spill] sm:$0xff] %v9374_v3  ;;  %v993_v3 = vsel %vm28_vm0, %v9129_v38, 0.0 }
 0x241   :  { %601 = vmatmul.f32.gmra.mxu0 %v237_v7 }
 0x246   :  { %v9379_v11 = vpop.f32.mrf.mxu0 }
 0x247   :  { %15312 = vst [vmem:[#allocation50_spill] sm:$0xff] %v9379_v11 }
 0x249   :  { %604 = vmatmul.f32.gmra.mxu0 %v238_v15  ;;  %v243_v15 = vld [vmem:[%s14987_s0 + $0x250] sm:$0xff] }
 0x24e   :  { %v9384_v19 = vpop.f32.mrf.mxu0 }
 0x24f   :  { %15313 = vst [vmem:[#allocation51_spill] sm:$0xff] %v9384_v19 }
 0x251   :  { %607 = vmatmul.f32.gmra.mxu0 %v239_v23 }
 0x256   :  { %v9389_v27 = vpop.f32.mrf.mxu0 }
 0x257   :  { %15314 = vst [vmem:[#allocation52_spill] sm:$0xff] %v9389_v27  ;;  %v1382_v27 = vmul.f32 %v9129_v38, %v9129_v38 }
 0x259   :  { %610 = vmatmul.f32.gmra.mxu0 %v240_v31  ;;  %v244_v31 = vld [vmem:[%s14987_s0 + $0x258] sm:$0xff] }
 0x25e   :  { %v9394_v39 = vpop.f32.mrf.mxu0 }
 0x25f   :  { %15315 = vst [vmem:[#allocation53_spill] sm:$0xff] %v9394_v39  ;;  %v991_v39 = vsel %vm28_vm0, %v9124_v36, 0.0 }
 0x261   :  { %613 = vmatmul.f32.gmra.mxu0 %v241_v47 }
 0x266   :  { %v9399_v55 = vpop.f32.mrf.mxu0 }
 0x267   :  { %15316 = vst [vmem:[#allocation54_spill] sm:$0xff] %v9399_v55  ;;  %v1381_v55 = vmul.f32 %v9124_v36, %v9124_v36  ;;  %v332_v36 = vld [vmem:[%s14987_s0 + $0x518] sm:$0xff] }
 0x269   :  { %616 = vmatmul.f32.gmra.mxu0 %v242_v63  ;;  %v245_v63 = vld [vmem:[%s14987_s0 + $0x260] sm:$0xff] }
 0x26e   :  { %v9404_v7 = vpop.f32.mrf.mxu0 }
 0x26f   :  { %15317 = vst [vmem:[#allocation55_spill] sm:$0xff] %v9404_v7 }
 0x271   :  { %619 = vmatmul.f32.gmra.mxu0 %v243_v15  ;;  %v246_v15 = vld [vmem:[%s14987_s0 + $0x268] sm:$0xff] }
 0x276   :  { %v9409_v23 = vpop.f32.mrf.mxu0 }
 0x277   :  { %15318 = vst [vmem:[#allocation56_spill] sm:$0xff] %v9409_v23 }
 0x279   :  { %622 = vmatmul.f32.gmra.mxu0 %v244_v31  ;;  %v247_v31 = vld [vmem:[%s14987_s0 + $0x270] sm:$0xff] }
 0x27e   :  { %v9414_v47 = vpop.f32.mrf.mxu0 }
 0x27f   :  { %15319 = vst [vmem:[#allocation57_spill] sm:$0xff] %v9414_v47 }
 0x281   :  { %625 = vmatmul.f32.gmra.mxu0 %v245_v63  ;;  %v248_v63 = vld [vmem:[%s14987_s0 + $0x278] sm:$0xff] }
 0x286   :  { %v9419_v7 = vpop.f32.mrf.mxu0 }
 0x287   :  { %15320 = vst [vmem:[#allocation58_spill] sm:$0xff] %v9419_v7 }
 0x289   :  { %628 = vmatmul.f32.gmra.mxu0 %v246_v15  ;;  %v249_v15 = vld [vmem:[%s14987_s0 + $0x280] sm:$0xff] }
 0x28e   :  { %v9424_v23 = vpop.f32.mrf.mxu0 }
 0x28f   :  { %15321 = vst [vmem:[#allocation59_spill] sm:$0xff] %v9424_v23 }
 0x291   :  { %631 = vmatmul.f32.gmra.mxu0 %v247_v31  ;;  %v250_v31 = vld [vmem:[%s14987_s0 + $0x288] sm:$0xff] }
 0x296   :  { %v9429_v47 = vpop.f32.mrf.mxu0 }
 0x297   :  { %15322 = vst [vmem:[#allocation60_spill] sm:$0xff] %v9429_v47 }
 0x299   :  { %634 = vmatmul.f32.gmra.mxu0 %v248_v63  ;;  %v251_v63 = vld [vmem:[%s14987_s0 + $0x290] sm:$0xff] }
 0x29e   :  { %v9434_v7 = vpop.f32.mrf.mxu0 }
 0x29f   :  { %15323 = vst [vmem:[#allocation61_spill] sm:$0xff] %v9434_v7 }
 0x2a1   :  { %637 = vmatmul.f32.gmra.mxu0 %v249_v15  ;;  %v252_v15 = vld [vmem:[%s14987_s0 + $0x298] sm:$0xff] }
 0x2a6   :  { %v9439_v23 = vpop.f32.mrf.mxu0 }
 0x2a7   :  { %15324 = vst [vmem:[#allocation62_spill] sm:$0xff] %v9439_v23 }
 0x2a9   :  { %640 = vmatmul.f32.gmra.mxu0 %v250_v31  ;;  %v253_v31 = vld [vmem:[%s14987_s0 + $0x2a0] sm:$0xff] }
 0x2ae   :  { %v9444_v47 = vpop.f32.mrf.mxu0 }
 0x2af   :  { %15325 = vst [vmem:[#allocation63_spill] sm:$0xff] %v9444_v47 }
 0x2b1   :  { %643 = vmatmul.f32.gmra.mxu0 %v251_v63  ;;  %v254_v63 = vld [vmem:[%s14987_s0 + $0x2a8] sm:$0xff] }
 0x2b6   :  { %v9449_v7 = vpop.f32.mrf.mxu0 }
 0x2b7   :  { %15326 = vst [vmem:[#allocation64_spill] sm:$0xff] %v9449_v7 }
 0x2b9   :  { %646 = vmatmul.f32.gmra.mxu0 %v252_v15  ;;  %v255_v15 = vld [vmem:[%s14987_s0 + $0x2b0] sm:$0xff] }
 0x2be   :  { %v9454_v23 = vpop.f32.mrf.mxu0 }
 0x2bf   :  { %15327 = vst [vmem:[#allocation65_spill] sm:$0xff] %v9454_v23 }
 0x2c1   :  { %649 = vmatmul.f32.gmra.mxu0 %v253_v31  ;;  %v256_v31 = vld [vmem:[%s14987_s0 + $0x2b8] sm:$0xff] }
 0x2c6   :  { %v9459_v47 = vpop.f32.mrf.mxu0 }
 0x2c7   :  { %15328 = vst [vmem:[#allocation66_spill] sm:$0xff] %v9459_v47 }
 0x2c9   :  { %652 = vmatmul.f32.gmra.mxu0 %v254_v63  ;;  %v257_v63 = vld [vmem:[%s14987_s0 + $0x2c0] sm:$0xff] }
 0x2ce   :  { %v9464_v7 = vpop.f32.mrf.mxu0 }
 0x2cf   :  { %15329 = vst [vmem:[#allocation67_spill] sm:$0xff] %v9464_v7 }
 0x2d1   :  { %655 = vmatmul.f32.gmra.mxu0 %v255_v15  ;;  %v258_v15 = vld [vmem:[%s14987_s0 + $0x2c8] sm:$0xff] }
 0x2d6   :  { %v9469_v23 = vpop.f32.mrf.mxu0 }
 0x2d7   :  { %15330 = vst [vmem:[#allocation68_spill] sm:$0xff] %v9469_v23 }
 0x2d9   :  { %658 = vmatmul.f32.gmra.mxu0 %v256_v31  ;;  %v259_v31 = vld [vmem:[%s14987_s0 + $0x2d0] sm:$0xff] }
 0x2de   :  { %v9474_v47 = vpop.f32.mrf.mxu0 }
 0x2df   :  { %15331 = vst [vmem:[#allocation69_spill] sm:$0xff] %v9474_v47 }
 0x2e1   :  { %661 = vmatmul.f32.gmra.mxu0 %v257_v63  ;;  %v260_v63 = vld [vmem:[%s14987_s0 + $0x2d8] sm:$0xff] }
 0x2e6   :  { %v9479_v7 = vpop.f32.mrf.mxu0 }
 0x2e7   :  { %15332 = vst [vmem:[#allocation70_spill] sm:$0xff] %v9479_v7 }
 0x2e9   :  { %664 = vmatmul.f32.gmra.mxu0 %v258_v15  ;;  %v261_v15 = vld [vmem:[%s14987_s0 + $0x2e0] sm:$0xff] }
 0x2ee   :  { %v9484_v23 = vpop.f32.mrf.mxu0 }
 0x2ef   :  { %15333 = vst [vmem:[#allocation71_spill] sm:$0xff] %v9484_v23 }
 0x2f1   :  { %667 = vmatmul.f32.gmra.mxu0 %v259_v31  ;;  %v262_v31 = vld [vmem:[%s14987_s0 + $0x2e8] sm:$0xff] }
 0x2f6   :  { %v9489_v47 = vpop.f32.mrf.mxu0 }
 0x2f7   :  { %15334 = vst [vmem:[#allocation72_spill] sm:$0xff] %v9489_v47 }
 0x2f9   :  { %670 = vmatmul.f32.gmra.mxu0 %v260_v63  ;;  %v263_v63 = vld [vmem:[%s14987_s0 + $0x2f0] sm:$0xff] }
 0x2fe   :  { %v9494_v7 = vpop.f32.mrf.mxu0 }
 0x2ff   :  { %15335 = vst [vmem:[#allocation73_spill] sm:$0xff] %v9494_v7 }
 0x301   :  { %673 = vmatmul.f32.gmra.mxu0 %v261_v15  ;;  %v264_v15 = vld [vmem:[%s14987_s0 + $0x2f8] sm:$0xff] }
 0x306   :  { %v9499_v23 = vpop.f32.mrf.mxu0 }
 0x307   :  { %15336 = vst [vmem:[#allocation74_spill] sm:$0xff] %v9499_v23 }
 0x309   :  { %676 = vmatmul.f32.gmra.mxu0 %v262_v31  ;;  %v265_v31 = vld [vmem:[%s14987_s0 + $0x300] sm:$0xff] }
 0x30e   :  { %v9504_v47 = vpop.f32.mrf.mxu0 }
 0x30f   :  { %15337 = vst [vmem:[#allocation75_spill] sm:$0xff] %v9504_v47 }
 0x311   :  { %679 = vmatmul.f32.gmra.mxu0 %v263_v63  ;;  %v266_v63 = vld [vmem:[%s14987_s0 + $0x308] sm:$0xff] }
 0x316   :  { %v9509_v7 = vpop.f32.mrf.mxu0 }
 0x317   :  { %15338 = vst [vmem:[#allocation76_spill] sm:$0xff] %v9509_v7 }
 0x319   :  { %682 = vmatmul.f32.gmra.mxu0 %v264_v15  ;;  %v267_v15 = vld [vmem:[%s14987_s0 + $0x310] sm:$0xff] }
 0x31e   :  { %v9514_v23 = vpop.f32.mrf.mxu0 }
 0x31f   :  { %15339 = vst [vmem:[#allocation77_spill] sm:$0xff] %v9514_v23 }
 0x321   :  { %685 = vmatmul.f32.gmra.mxu0 %v265_v31  ;;  %v268_v31 = vld [vmem:[%s14987_s0 + $0x318] sm:$0xff] }
 0x326   :  { %v9519_v47 = vpop.f32.mrf.mxu0 }
 0x327   :  { %15340 = vst [vmem:[#allocation78_spill] sm:$0xff] %v9519_v47 }
 0x329   :  { %688 = vmatmul.f32.gmra.mxu0 %v266_v63  ;;  %v269_v63 = vld [vmem:[%s14987_s0 + $0x320] sm:$0xff] }
 0x32e   :  { %v9524_v7 = vpop.f32.mrf.mxu0 }
 0x32f   :  { %15341 = vst [vmem:[#allocation79_spill] sm:$0xff] %v9524_v7 }
 0x331   :  { %691 = vmatmul.f32.gmra.mxu0 %v267_v15  ;;  %v270_v15 = vld [vmem:[%s14987_s0 + $0x328] sm:$0xff] }
 0x336   :  { %v9529_v23 = vpop.f32.mrf.mxu0 }
 0x337   :  { %15342 = vst [vmem:[#allocation80_spill] sm:$0xff] %v9529_v23 }
 0x339   :  { %694 = vmatmul.f32.gmra.mxu0 %v268_v31  ;;  %v271_v31 = vld [vmem:[%s14987_s0 + $0x330] sm:$0xff] }
 0x33e   :  { %v9534_v47 = vpop.f32.mrf.mxu0 }
 0x33f   :  { %15343 = vst [vmem:[#allocation81_spill] sm:$0xff] %v9534_v47 }
 0x341   :  { %697 = vmatmul.f32.gmra.mxu0 %v269_v63  ;;  %v272_v63 = vld [vmem:[%s14987_s0 + $0x338] sm:$0xff] }
 0x346   :  { %v9539_v7 = vpop.f32.mrf.mxu0 }
 0x347   :  { %15344 = vst [vmem:[#allocation82_spill] sm:$0xff] %v9539_v7 }
 0x349   :  { %700 = vmatmul.f32.gmra.mxu0 %v270_v15  ;;  %v273_v15 = vld [vmem:[%s14987_s0 + $0x340] sm:$0xff] }
 0x34e   :  { %v9544_v23 = vpop.f32.mrf.mxu0 }
 0x34f   :  { %15345 = vst [vmem:[#allocation83_spill] sm:$0xff] %v9544_v23 }
 0x351   :  { %703 = vmatmul.f32.gmra.mxu0 %v271_v31  ;;  %v274_v31 = vld [vmem:[%s14987_s0 + $0x348] sm:$0xff] }
 0x356   :  { %v9549_v47 = vpop.f32.mrf.mxu0 }
 0x357   :  { %15346 = vst [vmem:[#allocation84_spill] sm:$0xff] %v9549_v47 }
 0x359   :  { %706 = vmatmul.f32.gmra.mxu0 %v272_v63  ;;  %v275_v63 = vld [vmem:[%s14987_s0 + $0x350] sm:$0xff] }
 0x35e   :  { %v9554_v7 = vpop.f32.mrf.mxu0 }
 0x35f   :  { %15347 = vst [vmem:[#allocation85_spill] sm:$0xff] %v9554_v7 }
 0x361   :  { %709 = vmatmul.f32.gmra.mxu0 %v273_v15  ;;  %v276_v15 = vld [vmem:[%s14987_s0 + $0x358] sm:$0xff] }
 0x366   :  { %v9559_v23 = vpop.f32.mrf.mxu0 }
 0x367   :  { %15348 = vst [vmem:[#allocation86_spill] sm:$0xff] %v9559_v23 }
 0x369   :  { %712 = vmatmul.f32.gmra.mxu0 %v274_v31  ;;  %v277_v31 = vld [vmem:[%s14987_s0 + $0x360] sm:$0xff] }
 0x36e   :  { %v9564_v47 = vpop.f32.mrf.mxu0 }
 0x36f   :  { %15349 = vst [vmem:[#allocation87_spill] sm:$0xff] %v9564_v47 }
 0x371   :  { %715 = vmatmul.f32.gmra.mxu0 %v275_v63  ;;  %v278_v63 = vld [vmem:[%s14987_s0 + $0x368] sm:$0xff] }
 0x376   :  { %v9569_v7 = vpop.f32.mrf.mxu0 }
 0x377   :  { %15350 = vst [vmem:[#allocation88_spill] sm:$0xff] %v9569_v7 }
 0x379   :  { %718 = vmatmul.f32.gmra.mxu0 %v276_v15  ;;  %v279_v15 = vld [vmem:[%s14987_s0 + $0x370] sm:$0xff] }
 0x37e   :  { %v9574_v23 = vpop.f32.mrf.mxu0 }
 0x37f   :  { %15351 = vst [vmem:[#allocation89_spill] sm:$0xff] %v9574_v23 }
 0x381   :  { %721 = vmatmul.f32.gmra.mxu0 %v277_v31  ;;  %v280_v31 = vld [vmem:[%s14987_s0 + $0x378] sm:$0xff] }
 0x386   :  { %v9579_v47 = vpop.f32.mrf.mxu0 }
 0x387   :  { %15352 = vst [vmem:[#allocation90_spill] sm:$0xff] %v9579_v47 }
 0x389   :  { %724 = vmatmul.f32.gmra.mxu0 %v278_v63  ;;  %v281_v63 = vld [vmem:[%s14987_s0 + $0x380] sm:$0xff] }
 0x38e   :  { %v9584_v7 = vpop.f32.mrf.mxu0 }
 0x38f   :  { %15353 = vst [vmem:[#allocation91_spill] sm:$0xff] %v9584_v7 }
 0x391   :  { %727 = vmatmul.f32.gmra.mxu0 %v279_v15  ;;  %v282_v15 = vld [vmem:[%s14987_s0 + $0x388] sm:$0xff] }
 0x396   :  { %v9589_v23 = vpop.f32.mrf.mxu0 }
 0x397   :  { %15354 = vst [vmem:[#allocation92_spill] sm:$0xff] %v9589_v23 }
 0x399   :  { %730 = vmatmul.f32.gmra.mxu0 %v280_v31  ;;  %v283_v31 = vld [vmem:[%s14987_s0 + $0x390] sm:$0xff] }
 0x39e   :  { %v9594_v47 = vpop.f32.mrf.mxu0 }
 0x39f   :  { %15355 = vst [vmem:[#allocation93_spill] sm:$0xff] %v9594_v47 }
 0x3a1   :  { %733 = vmatmul.f32.gmra.mxu0 %v281_v63  ;;  %v284_v63 = vld [vmem:[%s14987_s0 + $0x398] sm:$0xff] }
 0x3a6   :  { %v9599_v7 = vpop.f32.mrf.mxu0 }
 0x3a7   :  { %15356 = vst [vmem:[#allocation94_spill] sm:$0xff] %v9599_v7 }
 0x3a9   :  { %736 = vmatmul.f32.gmra.mxu0 %v282_v15  ;;  %v285_v15 = vld [vmem:[%s14987_s0 + $0x3a0] sm:$0xff] }
 0x3ae   :  { %v9604_v23 = vpop.f32.mrf.mxu0 }
 0x3af   :  { %15357 = vst [vmem:[#allocation95_spill] sm:$0xff] %v9604_v23 }
 0x3b1   :  { %739 = vmatmul.f32.gmra.mxu0 %v283_v31  ;;  %v286_v31 = vld [vmem:[%s14987_s0 + $0x3a8] sm:$0xff] }
 0x3b6   :  { %v9609_v47 = vpop.f32.mrf.mxu0 }
 0x3b7   :  { %15358 = vst [vmem:[#allocation96_spill] sm:$0xff] %v9609_v47 }
 0x3b9   :  { %742 = vmatmul.f32.gmra.mxu0 %v284_v63  ;;  %v287_v63 = vld [vmem:[%s14987_s0 + $0x3b0] sm:$0xff] }
 0x3be   :  { %v9614_v7 = vpop.f32.mrf.mxu0 }
 0x3bf   :  { %15359 = vst [vmem:[#allocation97_spill] sm:$0xff] %v9614_v7 }
 0x3c1   :  { %745 = vmatmul.f32.gmra.mxu0 %v285_v15  ;;  %v288_v15 = vld [vmem:[%s14987_s0 + $0x3b8] sm:$0xff] }
 0x3c6   :  { %v9619_v23 = vpop.f32.mrf.mxu0 }
 0x3c7   :  { %15360 = vst [vmem:[#allocation98_spill] sm:$0xff] %v9619_v23 }
 0x3c9   :  { %748 = vmatmul.f32.gmra.mxu0 %v286_v31  ;;  %v289_v31 = vld [vmem:[%s14987_s0 + $0x3c0] sm:$0xff] }
 0x3ce   :  { %v9624_v47 = vpop.f32.mrf.mxu0 }
 0x3cf   :  { %15361 = vst [vmem:[#allocation99_spill] sm:$0xff] %v9624_v47 }
 0x3d1   :  { %751 = vmatmul.f32.gmra.mxu0 %v287_v63  ;;  %v290_v63 = vld [vmem:[%s14987_s0 + $0x3c8] sm:$0xff] }
 0x3d6   :  { %v9629_v7 = vpop.f32.mrf.mxu0 }
 0x3d7   :  { %15362 = vst [vmem:[#allocation100_spill] sm:$0xff] %v9629_v7 }
 0x3d9   :  { %754 = vmatmul.f32.gmra.mxu0 %v288_v15  ;;  %v291_v15 = vld [vmem:[%s14987_s0 + $0x3d0] sm:$0xff] }
 0x3de   :  { %v9634_v23 = vpop.f32.mrf.mxu0 }
 0x3df   :  { %15363 = vst [vmem:[#allocation101_spill] sm:$0xff] %v9634_v23 }
 0x3e1   :  { %757 = vmatmul.f32.gmra.mxu0 %v289_v31  ;;  %v292_v31 = vld [vmem:[%s14987_s0 + $0x3d8] sm:$0xff] }
 0x3e6   :  { %v9639_v47 = vpop.f32.mrf.mxu0 }
 0x3e7   :  { %15364 = vst [vmem:[#allocation102_spill] sm:$0xff] %v9639_v47 }
 0x3e9   :  { %760 = vmatmul.f32.gmra.mxu0 %v290_v63  ;;  %v293_v63 = vld [vmem:[%s14987_s0 + $0x3e0] sm:$0xff] }
 0x3ee   :  { %v9644_v7 = vpop.f32.mrf.mxu0 }
 0x3ef   :  { %15365 = vst [vmem:[#allocation103_spill] sm:$0xff] %v9644_v7 }
 0x3f1   :  { %763 = vmatmul.f32.gmra.mxu0 %v291_v15  ;;  %v294_v15 = vld [vmem:[%s14987_s0 + $0x3e8] sm:$0xff] }
 0x3f6   :  { %v9649_v23 = vpop.f32.mrf.mxu0 }
 0x3f7   :  { %15366 = vst [vmem:[#allocation104_spill] sm:$0xff] %v9649_v23 }
 0x3f9   :  { %766 = vmatmul.f32.gmra.mxu0 %v292_v31  ;;  %v295_v31 = vld [vmem:[%s14987_s0 + $0x3f0] sm:$0xff] }
 0x3fe   :  { %v9654_v47 = vpop.f32.mrf.mxu0 }
 0x3ff   :  { %15367 = vst [vmem:[#allocation105_spill] sm:$0xff] %v9654_v47 }
 0x401   :  { %769 = vmatmul.f32.gmra.mxu0 %v293_v63  ;;  %v296_v63 = vld [vmem:[%s14987_s0 + $0x3f8] sm:$0xff] }
 0x406   :  { %v9659_v7 = vpop.f32.mrf.mxu0 }
 0x407   :  { %15368 = vst [vmem:[#allocation106_spill] sm:$0xff] %v9659_v7 }
 0x409   :  { %772 = vmatmul.f32.gmra.mxu0 %v294_v15  ;;  %v297_v15 = vld [vmem:[%s14987_s0 + $0x400] sm:$0xff] }
 0x40e   :  { %v9664_v23 = vpop.f32.mrf.mxu0 }
 0x40f   :  { %15369 = vst [vmem:[#allocation107_spill] sm:$0xff] %v9664_v23 }
 0x411   :  { %775 = vmatmul.f32.gmra.mxu0 %v295_v31  ;;  %v298_v31 = vld [vmem:[%s14987_s0 + $0x408] sm:$0xff] }
 0x416   :  { %v9669_v47 = vpop.f32.mrf.mxu0 }
 0x417   :  { %15370 = vst [vmem:[#allocation108_spill] sm:$0xff] %v9669_v47 }
 0x419   :  { %778 = vmatmul.f32.gmra.mxu0 %v296_v63  ;;  %v299_v63 = vld [vmem:[%s14987_s0 + $0x410] sm:$0xff] }
 0x41e   :  { %v9674_v7 = vpop.f32.mrf.mxu0 }
 0x41f   :  { %15371 = vst [vmem:[#allocation109_spill] sm:$0xff] %v9674_v7 }
 0x421   :  { %781 = vmatmul.f32.gmra.mxu0 %v297_v15  ;;  %v300_v15 = vld [vmem:[%s14987_s0 + $0x418] sm:$0xff] }
 0x426   :  { %v9679_v23 = vpop.f32.mrf.mxu0 }
 0x427   :  { %15372 = vst [vmem:[#allocation110_spill] sm:$0xff] %v9679_v23 }
 0x429   :  { %784 = vmatmul.f32.gmra.mxu0 %v298_v31  ;;  %v301_v31 = vld [vmem:[%s14987_s0 + $0x420] sm:$0xff] }
 0x42e   :  { %v9684_v47 = vpop.f32.mrf.mxu0 }
 0x42f   :  { %15373 = vst [vmem:[#allocation111_spill] sm:$0xff] %v9684_v47 }
 0x431   :  { %787 = vmatmul.f32.gmra.mxu0 %v299_v63  ;;  %v302_v63 = vld [vmem:[%s14987_s0 + $0x428] sm:$0xff] }
 0x436   :  { %v9689_v7 = vpop.f32.mrf.mxu0 }
 0x437   :  { %15374 = vst [vmem:[#allocation112_spill] sm:$0xff] %v9689_v7 }
 0x439   :  { %790 = vmatmul.f32.gmra.mxu0 %v300_v15  ;;  %v303_v15 = vld [vmem:[%s14987_s0 + $0x430] sm:$0xff] }
 0x43e   :  { %v9694_v23 = vpop.f32.mrf.mxu0 }
 0x43f   :  { %15375 = vst [vmem:[#allocation113_spill] sm:$0xff] %v9694_v23 }
 0x441   :  { %793 = vmatmul.f32.gmra.mxu0 %v301_v31  ;;  %v304_v31 = vld [vmem:[%s14987_s0 + $0x438] sm:$0xff] }
 0x446   :  { %v9699_v47 = vpop.f32.mrf.mxu0 }
 0x447   :  { %15376 = vst [vmem:[#allocation114_spill] sm:$0xff] %v9699_v47 }
 0x449   :  { %796 = vmatmul.f32.gmra.mxu0 %v302_v63  ;;  %v305_v63 = vld [vmem:[%s14987_s0 + $0x440] sm:$0xff] }
 0x44e   :  { %v9704_v7 = vpop.f32.mrf.mxu0 }
 0x44f   :  { %15377 = vst [vmem:[#allocation115_spill] sm:$0xff] %v9704_v7 }
 0x451   :  { %799 = vmatmul.f32.gmra.mxu0 %v303_v15  ;;  %v306_v15 = vld [vmem:[%s14987_s0 + $0x448] sm:$0xff] }
 0x456   :  { %v9709_v23 = vpop.f32.mrf.mxu0 }
 0x457   :  { %15378 = vst [vmem:[#allocation116_spill] sm:$0xff] %v9709_v23 }
 0x459   :  { %802 = vmatmul.f32.gmra.mxu0 %v304_v31  ;;  %v307_v31 = vld [vmem:[%s14987_s0 + $0x450] sm:$0xff] }
 0x45e   :  { %v9714_v47 = vpop.f32.mrf.mxu0 }
 0x45f   :  { %15379 = vst [vmem:[#allocation117_spill] sm:$0xff] %v9714_v47 }
 0x461   :  { %805 = vmatmul.f32.gmra.mxu0 %v305_v63  ;;  %v308_v63 = vld [vmem:[%s14987_s0 + $0x458] sm:$0xff] }
 0x466   :  { %v9719_v7 = vpop.f32.mrf.mxu0 }
 0x467   :  { %15380 = vst [vmem:[#allocation118_spill] sm:$0xff] %v9719_v7 }
 0x469   :  { %808 = vmatmul.f32.gmra.mxu0 %v306_v15  ;;  %v309_v15 = vld [vmem:[%s14987_s0 + $0x460] sm:$0xff] }
 0x46e   :  { %v9724_v23 = vpop.f32.mrf.mxu0 }
 0x46f   :  { %15381 = vst [vmem:[#allocation119_spill] sm:$0xff] %v9724_v23 }
 0x471   :  { %811 = vmatmul.f32.gmra.mxu0 %v307_v31  ;;  %v310_v31 = vld [vmem:[%s14987_s0 + $0x468] sm:$0xff] }
 0x476   :  { %v9729_v47 = vpop.f32.mrf.mxu0 }
 0x477   :  { %15382 = vst [vmem:[#allocation120_spill] sm:$0xff] %v9729_v47 }
 0x479   :  { %814 = vmatmul.f32.gmra.mxu0 %v308_v63  ;;  %v311_v63 = vld [vmem:[%s14987_s0 + $0x470] sm:$0xff] }
 0x47e   :  { %v9734_v7 = vpop.f32.mrf.mxu0 }
 0x47f   :  { %15383 = vst [vmem:[#allocation121_spill] sm:$0xff] %v9734_v7 }
 0x481   :  { %817 = vmatmul.f32.gmra.mxu0 %v309_v15  ;;  %v312_v15 = vld [vmem:[%s14987_s0 + $0x478] sm:$0xff] }
 0x486   :  { %v9739_v23 = vpop.f32.mrf.mxu0 }
 0x487   :  { %15384 = vst [vmem:[#allocation122_spill] sm:$0xff] %v9739_v23 }
 0x489   :  { %820 = vmatmul.f32.gmra.mxu0 %v310_v31  ;;  %v313_v31 = vld [vmem:[%s14987_s0 + $0x480] sm:$0xff] }
 0x48e   :  { %v9744_v47 = vpop.f32.mrf.mxu0 }
 0x48f   :  { %15385 = vst [vmem:[#allocation123_spill] sm:$0xff] %v9744_v47 }
 0x491   :  { %823 = vmatmul.f32.gmra.mxu0 %v311_v63  ;;  %v314_v63 = vld [vmem:[%s14987_s0 + $0x488] sm:$0xff] }
 0x496   :  { %v9749_v7 = vpop.f32.mrf.mxu0 }
 0x497   :  { %15386 = vst [vmem:[#allocation124_spill] sm:$0xff] %v9749_v7 }
 0x499   :  { %826 = vmatmul.f32.gmra.mxu0 %v312_v15  ;;  %v315_v15 = vld [vmem:[%s14987_s0 + $0x490] sm:$0xff] }
 0x49e   :  { %v9754_v23 = vpop.f32.mrf.mxu0 }
 0x49f   :  { %15387 = vst [vmem:[#allocation125_spill] sm:$0xff] %v9754_v23 }
 0x4a1   :  { %829 = vmatmul.f32.gmra.mxu0 %v313_v31  ;;  %v316_v31 = vld [vmem:[%s14987_s0 + $0x498] sm:$0xff] }
 0x4a6   :  { %v9759_v47 = vpop.f32.mrf.mxu0 }
 0x4a7   :  { %15388 = vst [vmem:[#allocation126_spill] sm:$0xff] %v9759_v47 }
 0x4a9   :  { %832 = vmatmul.f32.gmra.mxu0 %v314_v63  ;;  %v317_v63 = vld [vmem:[%s14987_s0 + $0x4a0] sm:$0xff] }
 0x4ae   :  { %v9764_v7 = vpop.f32.mrf.mxu0 }
 0x4af   :  { %15389 = vst [vmem:[#allocation127_spill] sm:$0xff] %v9764_v7 }
 0x4b1   :  { %835 = vmatmul.f32.gmra.mxu0 %v315_v15  ;;  %v318_v15 = vld [vmem:[%s14987_s0 + $0x4a8] sm:$0xff] }
 0x4b6   :  { %v9769_v23 = vpop.f32.mrf.mxu0 }
 0x4b7   :  { %15390 = vst [vmem:[#allocation128_spill] sm:$0xff] %v9769_v23 }
 0x4b9   :  { %838 = vmatmul.f32.gmra.mxu0 %v316_v31  ;;  %v319_v31 = vld [vmem:[%s14987_s0 + $0x4b0] sm:$0xff] }
 0x4be   :  { %v9774_v47 = vpop.f32.mrf.mxu0 }
 0x4bf   :  { %15391 = vst [vmem:[#allocation129_spill] sm:$0xff] %v9774_v47 }
 0x4c1   :  { %841 = vmatmul.f32.gmra.mxu0 %v317_v63  ;;  %v320_v63 = vld [vmem:[%s14987_s0 + $0x4b8] sm:$0xff] }
 0x4c6   :  { %v9779_v7 = vpop.f32.mrf.mxu0 }
 0x4c7   :  { %15392 = vst [vmem:[#allocation130_spill] sm:$0xff] %v9779_v7 }
 0x4c9   :  { %844 = vmatmul.f32.gmra.mxu0 %v318_v15  ;;  %v321_v15 = vld [vmem:[%s14987_s0 + $0x4c0] sm:$0xff] }
 0x4ce   :  { %v9784_v23 = vpop.f32.mrf.mxu0 }
 0x4cf   :  { %15393 = vst [vmem:[#allocation131_spill] sm:$0xff] %v9784_v23 }
 0x4d1   :  { %847 = vmatmul.f32.gmra.mxu0 %v319_v31  ;;  %v322_v31 = vld [vmem:[%s14987_s0 + $0x4c8] sm:$0xff] }
 0x4d6   :  { %v9789_v47 = vpop.f32.mrf.mxu0 }
 0x4d7   :  { %15394 = vst [vmem:[#allocation132_spill] sm:$0xff] %v9789_v47 }
 0x4d9   :  { %850 = vmatmul.f32.gmra.mxu0 %v320_v63  ;;  %v323_v63 = vld [vmem:[%s14987_s0 + $0x4d0] sm:$0xff] }
 0x4de   :  { %v9794_v7 = vpop.f32.mrf.mxu0 }
 0x4df   :  { %15395 = vst [vmem:[#allocation133_spill] sm:$0xff] %v9794_v7 }
 0x4e1   :  { %853 = vmatmul.f32.gmra.mxu0 %v321_v15  ;;  %v324_v15 = vld [vmem:[%s14987_s0 + $0x4d8] sm:$0xff] }
 0x4e6   :  { %v9799_v23 = vpop.f32.mrf.mxu0 }
 0x4e7   :  { %15396 = vst [vmem:[#allocation134_spill] sm:$0xff] %v9799_v23 }
 0x4e9   :  { %856 = vmatmul.f32.gmra.mxu0 %v322_v31  ;;  %v325_v31 = vld [vmem:[%s14987_s0 + $0x4e0] sm:$0xff] }
 0x4ee   :  { %v9804_v47 = vpop.f32.mrf.mxu0 }
 0x4ef   :  { %15397 = vst [vmem:[#allocation135_spill] sm:$0xff] %v9804_v47 }
 0x4f1   :  { %859 = vmatmul.f32.gmra.mxu0 %v323_v63  ;;  %v326_v63 = vld [vmem:[%s14987_s0 + $0x4e8] sm:$0xff] }
 0x4f6   :  { %v9809_v7 = vpop.f32.mrf.mxu0 }
 0x4f7   :  { %15398 = vst [vmem:[#allocation136_spill] sm:$0xff] %v9809_v7 }
 0x4f9   :  { %862 = vmatmul.f32.gmra.mxu0 %v324_v15  ;;  %v327_v15 = vld [vmem:[%s14987_s0 + $0x4f0] sm:$0xff] }
 0x4fe   :  { %v9814_v23 = vpop.f32.mrf.mxu0 }
 0x4ff   :  { %15399 = vst [vmem:[#allocation137_spill] sm:$0xff] %v9814_v23 }
 0x501   :  { %865 = vmatmul.f32.gmra.mxu0 %v325_v31  ;;  %v328_v31 = vld [vmem:[%s14987_s0 + $0x4f8] sm:$0xff] }
 0x506   :  { %v9819_v47 = vpop.f32.mrf.mxu0 }
 0x507   :  { %15400 = vst [vmem:[#allocation138_spill] sm:$0xff] %v9819_v47 }
 0x509   :  { %868 = vmatmul.f32.gmra.mxu0 %v326_v63  ;;  %v329_v63 = vld [vmem:[%s14987_s0 + $0x500] sm:$0xff] }
 0x50e   :  { %v9824_v7 = vpop.f32.mrf.mxu0 }
 0x50f   :  { %15401 = vst [vmem:[#allocation139_spill] sm:$0xff] %v9824_v7 }
 0x511   :  { %871 = vmatmul.f32.gmra.mxu0 %v327_v15  ;;  %v330_v15 = vld [vmem:[%s14987_s0 + $0x508] sm:$0xff] }
 0x516   :  { %v9829_v23 = vpop.f32.mrf.mxu0 }
 0x517   :  { %15402 = vst [vmem:[#allocation140_spill] sm:$0xff] %v9829_v23 }
 0x519   :  { %874 = vmatmul.f32.gmra.mxu0 %v328_v31  ;;  %v331_v31 = vld [vmem:[%s14987_s0 + $0x510] sm:$0xff] }
 0x51e   :  { %v9834_v47 = vpop.f32.mrf.mxu0 }
 0x51f   :  { %15403 = vst [vmem:[#allocation141_spill] sm:$0xff] %v9834_v47  ;;  %v1380_v47 = vmul.f32 %v9119_v34, %v9119_v34 }
 0x521   :  { %877 = vmatmul.f32.gmra.mxu0 %v329_v63  ;;  %v1379_v63 = vmul.f32 %v9114_v32, %v9114_v32 }
 0x523   :  { %v1575_v11 = vsel %vm28_vm0, %v1379_v63, 0.0  ;;  %v995_v63 = vsel %vm28_vm0, %v9134_v40, 0.0 }
 0x526   :  { %v9839_v7 = vpop.f32.mrf.mxu0 }
 0x527   :  { %15404 = vst [vmem:[#allocation142_spill] sm:$0xff] %v9839_v7  ;;  %v989_v7 = vsel %vm28_vm0, %v9119_v34, 0.0  ;;  %v1578_v34 = vsel %vm28_vm0, %v1381_v55, 0.0  ;;  %v1384_v55 = vmul.f32 %v9139_v42, %v9139_v42 }
 0x529   :  { %880 = vmatmul.f32.gmra.mxu0 %v330_v15  ;;  %v988_v15 = vsel %vm28_vm0, %v9114_v32, 0.0 }
 0x52a   :  { %v990_v19 = vadd.f32 %v989_v7, %v988_v15  ;;  %v1580_v7 = vsel %vm28_vm0, %v1382_v27, 0.0  ;;  %v1584_v27 = vsel %vm28_vm0, %v1384_v55, 0.0  ;;  %v333_v55 = vld [vmem:[%s14987_s0 + $0x520] sm:$0xff] }
 0x52c   :  { %v992_v59 = vadd.f32 %v991_v39, %v990_v19  ;;  %v1385_v19 = vmul.f32 %v9144_v44, %v9144_v44 }
 0x52e   :  { %v9844_v23 = vpop.f32.mrf.mxu0  ;;  %v994_v38 = vadd.f32 %v993_v3, %v992_v59  ;;  %v1586_v3 = vsel %vm28_vm0, %v1385_v19, 0.0 }
 0x52f   :  { %15405 = vst [vmem:[#allocation143_spill] sm:$0xff] %v9844_v23  ;;  %v1576_v23 = vsel %vm28_vm0, %v1380_v47, 0.0 }
 0x530   :  { %v1577_v32 = vadd.f32 %v1576_v23, %v1575_v11  ;;  %v997_v11 = vsel %vm28_vm0, %v9139_v42, 0.0  ;;  %v996_v23 = vadd.f32 %v995_v63, %v994_v38 }
 0x531   :  { %883 = vmatmul.f32.gmra.mxu0 %v331_v31  ;;  %v1383_v31 = vmul.f32 %v9134_v40, %v9134_v40  ;;  %v999_v40 = vsel %vm28_vm0, %v9144_v44, 0.0 }
 0x532   :  { %v1579_v15 = vadd.f32 %v1578_v34, %v1577_v32  ;;  %v1386_v32 = vmul.f32 %v9149_v46, %v9149_v46  ;;  %v998_v59 = vadd.f32 %v997_v11, %v996_v23  ;;  %v1388_v11 = vmul.f32 %v9159_v50, %v9159_v50 }
 0x533   :  { %v1582_v51 = vsel %vm28_vm0, %v1383_v31, 0.0  ;;  %v1001_v31 = vsel %vm28_vm0, %v9149_v46, 0.0 }
 0x534   :  { %v1581_v39 = vadd.f32 %v1580_v7, %v1579_v15  ;;  %v1000_v38 = vadd.f32 %v999_v40, %v998_v59  ;;  %v1588_v15 = vsel %vm28_vm0, %v1386_v32, 0.0  ;;  %v1005_v40 = vsel %vm28_vm0, %v9159_v50, 0.0 }
 0x535   :  { %v1592_v32 = vsel %vm28_vm0, %v1388_v11, 0.0  ;;  %v334_v11 = vld [vmem:[%s14987_s0 + $0x528] sm:$0xff] }
 0x536   :  { %v9870_v47 = vpop.f32.mrf.mxu0  ;;  %v1583_v34 = vadd.f32 %v1582_v51, %v1581_v39  ;;  %v1003_v51 = vsel %vm28_vm0, %v9154_v48, 0.0  ;;  %v1002_v39 = vadd.f32 %v1001_v31, %v1000_v38  ;;  %v1009_v38 = vsel %vm28_vm0, %v9169_v54, 0.0 }
 0x538   :  { %v1585_v7 = vadd.f32 %v1584_v27, %v1583_v34  ;;  %v1389_v27 = vmul.f32 %v9164_v52, %v9164_v52  ;;  %v1004_v59 = vadd.f32 %v1003_v51, %v1002_v39 }
 0x539   :  { %886 = vmatmul.f32.gmra.mxu0 %v332_v36  ;;  %v1387_v36 = vmul.f32 %v9154_v48, %v9154_v48  ;;  %v1007_v48 = vsel %vm28_vm0, %v9164_v52, 0.0 }
 0x53a   :  { %v1587_v19 = vadd.f32 %v1586_v3, %v1585_v7  ;;  %v1390_v3 = vmul.f32 %v9169_v54, %v9169_v54  ;;  %v1006_v7 = vadd.f32 %v1005_v40, %v1004_v59  ;;  %v1392_v40 = vmul.f32 %v9179_v58, %v9179_v58 }
 0x53b   :  { %v1590_v23 = vsel %vm28_vm0, %v1387_v36, 0.0  ;;  %v1594_v36 = vsel %vm28_vm0, %v1389_v27, 0.0 }
 0x53c   :  { %v1589_v34 = vadd.f32 %v1588_v15, %v1587_v19  ;;  %v1008_v51 = vadd.f32 %v1007_v48, %v1006_v7  ;;  %v1596_v39 = vsel %vm28_vm0, %v1390_v3, 0.0  ;;  %v1013_v48 = vsel %vm28_vm0, %v9179_v58, 0.0 }
 0x53d   :  { %v1600_v3 = vsel %vm28_vm0, %v1392_v40, 0.0  ;;  %v335_v40 = vld [vmem:[%s14987_s0 + $0x530] sm:$0xff] }
 0x53e   :  { %v9895_v63 = vpop.f32.mrf.mxu0  ;;  %v1591_v31 = vadd.f32 %v1590_v23, %v1589_v34  ;;  %v1011_v23 = vsel %vm28_vm0, %v9174_v56, 0.0  ;;  %v1010_v34 = vadd.f32 %v1009_v38, %v1008_v51  ;;  %v1017_v51 = vsel %vm28_vm0, %v9189_v62, 0.0 }
 0x53f   :  { %15406 = vst [vmem:[#allocation144_spill] sm:$0xff] %v9895_v63 }
 0x540   :  { %v1593_v15 = vadd.f32 %v1592_v32, %v1591_v31  ;;  %v1393_v32 = vmul.f32 %v9184_v60, %v9184_v60  ;;  %v1012_v7 = vadd.f32 %v1011_v23, %v1010_v34 }
 0x541   :  { %889 = vmatmul.f32.gmra.mxu0 %v333_v55  ;;  %v1391_v55 = vmul.f32 %v9174_v56, %v9174_v56  ;;  %v1015_v56 = vsel %vm28_vm0, %v9184_v60, 0.0 }
 0x542   :  { %v1595_v27 = vadd.f32 %v1594_v36, %v1593_v15  ;;  %v1394_v36 = vmul.f32 %v9189_v62, %v9189_v62  ;;  %v1014_v15 = vadd.f32 %v1013_v48, %v1012_v7  ;;  %v1396_v48 = vmul.f32 %v9199_v2, %v9199_v2 }
 0x543   :  { %v1598_v59 = vsel %vm28_vm0, %v1391_v55, 0.0  ;;  %v1602_v55 = vsel %vm28_vm0, %v1393_v32, 0.0 }
 0x544   :  { %v1597_v31 = vadd.f32 %v1596_v39, %v1595_v27  ;;  %v1016_v23 = vadd.f32 %v1015_v56, %v1014_v15  ;;  %v1604_v34 = vsel %vm28_vm0, %v1394_v36, 0.0  ;;  %v1021_v56 = vsel %vm28_vm0, %v9199_v2, 0.0 }
 0x545   :  { %v1608_v36 = vsel %vm28_vm0, %v1396_v48, 0.0  ;;  %v336_v48 = vld [vmem:[%s14987_s0 + $0x538] sm:$0xff] }
 0x546   :  { %v9920_v19 = vpop.f32.mrf.mxu0  ;;  %v1599_v38 = vadd.f32 %v1598_v59, %v1597_v31  ;;  %v1019_v59 = vsel %vm28_vm0, %v9194_v0, 0.0  ;;  %v1018_v31 = vadd.f32 %v1017_v51, %v1016_v23  ;;  %v1025_v23 = vsel %vm28_vm0, %v9209_v6, 0.0 }
 0x548   :  { %v1601_v39 = vadd.f32 %v1600_v3, %v1599_v38  ;;  %v1397_v3 = vmul.f32 %v9204_v4, %v9204_v4  ;;  %v1020_v15 = vadd.f32 %v1019_v59, %v1018_v31 }
 0x549   :  { %892 = vmatmul.f32.gmra.mxu0 %v334_v11  ;;  %v1395_v11 = vmul.f32 %v9194_v0, %v9194_v0  ;;  %v1023_v0 = vsel %vm28_vm0, %v9204_v4, 0.0  ;;  %v15502_v4 = vld [vmem:[#allocation132_spill] sm:$0xff] }
 0x54a   :  { %v1603_v32 = vadd.f32 %v1602_v55, %v1601_v39  ;;  %v1398_v55 = vmul.f32 %v9209_v6, %v9209_v6  ;;  %v1022_v39 = vadd.f32 %v1021_v56, %v1020_v15  ;;  %v1400_v56 = vmul.f32 %v9219_v10, %v9219_v10  ;;  %v15498_v6 = vld [vmem:[#allocation128_spill] sm:$0xff] }
 0x54b   :  { %v1606_v7 = vsel %vm28_vm0, %v1395_v11, 0.0  ;;  %v1610_v11 = vsel %vm28_vm0, %v1397_v3, 0.0 }
 0x54c   :  { %v1605_v38 = vadd.f32 %v1604_v34, %v1603_v32  ;;  %v1024_v59 = vadd.f32 %v1023_v0, %v1022_v39  ;;  %v1612_v31 = vsel %vm28_vm0, %v1398_v55, 0.0  ;;  %v1029_v0 = vsel %vm28_vm0, %v9219_v10, 0.0  ;;  %v15493_v10 = vld [vmem:[#allocation124_spill] sm:$0xff] }
 0x54d   :  { %v1616_v55 = vsel %vm28_vm0, %v1400_v56, 0.0  ;;  %v337_v56 = vld [vmem:[%s14987_s0 + $0x540] sm:$0xff] }
 0x54e   :  { %v9945_v27 = vpop.f32.mrf.mxu0  ;;  %v1607_v51 = vadd.f32 %v1606_v7, %v1605_v38  ;;  %v1027_v7 = vsel %vm28_vm0, %v9214_v8, 0.0  ;;  %v1026_v38 = vadd.f32 %v1025_v23, %v1024_v59  ;;  %v1033_v59 = vsel %vm28_vm0, %v9229_v14, 0.0 }
 0x550   :  { %v1609_v34 = vadd.f32 %v1608_v36, %v1607_v51  ;;  %v1401_v36 = vmul.f32 %v9224_v12, %v9224_v12  ;;  %v1028_v39 = vadd.f32 %v1027_v7, %v1026_v38 }
 0x551   :  { %895 = vmatmul.f32.gmra.mxu0 %v335_v40  ;;  %v1399_v40 = vmul.f32 %v9214_v8, %v9214_v8  ;;  %v1031_v8 = vsel %vm28_vm0, %v9224_v12, 0.0  ;;  %v15488_v12 = vld [vmem:[#allocation120_spill] sm:$0xff] }
 0x552   :  { %v1611_v3 = vadd.f32 %v1610_v11, %v1609_v34  ;;  %v1402_v11 = vmul.f32 %v9229_v14, %v9229_v14  ;;  %v1030_v34 = vadd.f32 %v1029_v0, %v1028_v39  ;;  %v1404_v0 = vmul.f32 %v9239_v18, %v9239_v18  ;;  %v15483_v14 = vld [vmem:[#allocation116_spill] sm:$0xff] }
 0x553   :  { %v1614_v15 = vsel %vm28_vm0, %v1399_v40, 0.0  ;;  %v1618_v40 = vsel %vm28_vm0, %v1401_v36, 0.0 }
 0x554   :  { %v1613_v51 = vadd.f32 %v1612_v31, %v1611_v3  ;;  %v1032_v7 = vadd.f32 %v1031_v8, %v1030_v34  ;;  %v1620_v38 = vsel %vm28_vm0, %v1402_v11, 0.0  ;;  %v1037_v8 = vsel %vm28_vm0, %v9239_v18, 0.0  ;;  %v15478_v18 = vld [vmem:[#allocation112_spill] sm:$0xff] }
 0x555   :  { %v1624_v11 = vsel %vm28_vm0, %v1404_v0, 0.0  ;;  %v338_v0 = vld [vmem:[%s14987_s0 + $0x548] sm:$0xff] }
 0x556   :  { %v9970_v32 = vpop.f32.mrf.mxu0  ;;  %v1615_v23 = vadd.f32 %v1614_v15, %v1613_v51  ;;  %v1035_v15 = vsel %vm28_vm0, %v9234_v16, 0.0  ;;  %v1034_v51 = vadd.f32 %v1033_v59, %v1032_v7  ;;  %v1041_v7 = vsel %vm28_vm0, %v9249_v22, 0.0 }
 0x558   :  { %v1617_v31 = vadd.f32 %v1616_v55, %v1615_v23  ;;  %v1405_v55 = vmul.f32 %v9244_v20, %v9244_v20  ;;  %v1036_v34 = vadd.f32 %v1035_v15, %v1034_v51 }
 0x559   :  { %898 = vmatmul.f32.gmra.mxu0 %v336_v48  ;;  %v1403_v48 = vmul.f32 %v9234_v16, %v9234_v16  ;;  %v1039_v16 = vsel %vm28_vm0, %v9244_v20, 0.0  ;;  %v15474_v20 = vld [vmem:[#allocation108_spill] sm:$0xff] }
 0x55a   :  { %v1619_v36 = vadd.f32 %v1618_v40, %v1617_v31  ;;  %v1406_v40 = vmul.f32 %v9249_v22, %v9249_v22  ;;  %v1038_v31 = vadd.f32 %v1037_v8, %v1036_v34  ;;  %v1408_v8 = vmul.f32 %v9259_v26, %v9259_v26  ;;  %v15469_v22 = vld [vmem:[#allocation104_spill] sm:$0xff] }
 0x55b   :  { %v1622_v39 = vsel %vm28_vm0, %v1403_v48, 0.0  ;;  %v1626_v48 = vsel %vm28_vm0, %v1405_v55, 0.0 }
 0x55c   :  { %v1621_v23 = vadd.f32 %v1620_v38, %v1619_v36  ;;  %v1040_v15 = vadd.f32 %v1039_v16, %v1038_v31  ;;  %v1628_v51 = vsel %vm28_vm0, %v1406_v40, 0.0  ;;  %v1045_v16 = vsel %vm28_vm0, %v9259_v26, 0.0  ;;  %v15465_v26 = vld [vmem:[#allocation100_spill] sm:$0xff] }
 0x55d   :  { %v1632_v40 = vsel %vm28_vm0, %v1408_v8, 0.0  ;;  %v339_v8 = vld [vmem:[%s14987_s0 + $0x550] sm:$0xff] }
 0x55e   :  { %v9995_v3 = vpop.f32.mrf.mxu0  ;;  %v1623_v59 = vadd.f32 %v1622_v39, %v1621_v23  ;;  %v1043_v39 = vsel %vm28_vm0, %v9254_v24, 0.0  ;;  %v1042_v23 = vadd.f32 %v1041_v7, %v1040_v15  ;;  %v1049_v15 = vsel %vm28_vm0, %v9269_v30, 0.0 }
 0x55f   :  { %15407 = vst [vmem:[#allocation145_spill] sm:$0xff] %v9995_v3 }
 0x560   :  { %v1625_v38 = vadd.f32 %v1624_v11, %v1623_v59  ;;  %v1409_v11 = vmul.f32 %v9264_v28, %v9264_v28  ;;  %v1044_v31 = vadd.f32 %v1043_v39, %v1042_v23 }
 0x561   :  { %901 = vmatmul.f32.gmra.mxu0 %v337_v56  ;;  %v1407_v56 = vmul.f32 %v9254_v24, %v9254_v24  ;;  %v1047_v24 = vsel %vm28_vm0, %v9264_v28, 0.0  ;;  %v15461_v28 = vld [vmem:[#allocation96_spill] sm:$0xff] }
 0x562   :  { %v1627_v55 = vadd.f32 %v1626_v48, %v1625_v38  ;;  %v1410_v48 = vmul.f32 %v9269_v30, %v9269_v30  ;;  %v1046_v38 = vadd.f32 %v1045_v16, %v1044_v31  ;;  %v1412_v16 = vmul.f32 %v9279_v37, %v9279_v37  ;;  %v15457_v30 = vld [vmem:[#allocation92_spill] sm:$0xff] }
 0x563   :  { %v1630_v34 = vsel %vm28_vm0, %v1407_v56, 0.0  ;;  %v1634_v56 = vsel %vm28_vm0, %v1409_v11, 0.0 }
 0x564   :  { %v1629_v59 = vadd.f32 %v1628_v51, %v1627_v55  ;;  %v1048_v39 = vadd.f32 %v1047_v24, %v1046_v38  ;;  %v1636_v23 = vsel %vm28_vm0, %v1410_v48, 0.0  ;;  %v1053_v24 = vsel %vm28_vm0, %v9279_v37, 0.0  ;;  %v15453_v37 = vld [vmem:[#allocation88_spill] sm:$0xff] }
 0x565   :  { %v1640_v48 = vsel %vm28_vm0, %v1412_v16, 0.0  ;;  %v340_v16 = vld [vmem:[%s14987_s0 + $0x558] sm:$0xff] }
 0x566   :  { %v10020_v36 = vpop.f32.mrf.mxu0  ;;  %v1631_v7 = vadd.f32 %v1630_v34, %v1629_v59  ;;  %v1051_v34 = vsel %vm28_vm0, %v9274_v33, 0.0  ;;  %v1050_v59 = vadd.f32 %v1049_v15, %v1048_v39  ;;  %v1057_v39 = vsel %vm28_vm0, %v9289_v45, 0.0 }
 0x568   :  { %v1633_v51 = vadd.f32 %v1632_v40, %v1631_v7  ;;  %v1413_v40 = vmul.f32 %v9284_v41, %v9284_v41  ;;  %v1052_v38 = vadd.f32 %v1051_v34, %v1050_v59 }
 0x569   :  { %904 = vmatmul.f32.gmra.mxu0 %v338_v0  ;;  %v1411_v0 = vmul.f32 %v9274_v33, %v9274_v33  ;;  %v1055_v33 = vsel %vm28_vm0, %v9284_v41, 0.0  ;;  %v15448_v41 = vld [vmem:[#allocation84_spill] sm:$0xff] }
 0x56a   :  { %v1635_v11 = vadd.f32 %v1634_v56, %v1633_v51  ;;  %v1414_v56 = vmul.f32 %v9289_v45, %v9289_v45  ;;  %v1054_v51 = vadd.f32 %v1053_v24, %v1052_v38  ;;  %v1416_v24 = vmul.f32 %v9299_v53, %v9299_v53  ;;  %v15444_v45 = vld [vmem:[#allocation80_spill] sm:$0xff] }
 0x56b   :  { %v1638_v31 = vsel %vm28_vm0, %v1411_v0, 0.0  ;;  %v1642_v0 = vsel %vm28_vm0, %v1413_v40, 0.0 }
 0x56c   :  { %v1637_v7 = vadd.f32 %v1636_v23, %v1635_v11  ;;  %v1056_v34 = vadd.f32 %v1055_v33, %v1054_v51  ;;  %v1644_v59 = vsel %vm28_vm0, %v1414_v56, 0.0  ;;  %v1061_v33 = vsel %vm28_vm0, %v9299_v53, 0.0  ;;  %v15440_v53 = vld [vmem:[#allocation76_spill] sm:$0xff] }
 0x56d   :  { %v1648_v56 = vsel %vm28_vm0, %v1416_v24, 0.0  ;;  %v341_v24 = vld [vmem:[%s14987_s0 + $0x560] sm:$0xff] }
 0x56e   :  { %v10045_v55 = vpop.f32.mrf.mxu0  ;;  %v1639_v15 = vadd.f32 %v1638_v31, %v1637_v7  ;;  %v1059_v31 = vsel %vm28_vm0, %v9294_v49, 0.0  ;;  %v1058_v7 = vadd.f32 %v1057_v39, %v1056_v34  ;;  %v1065_v34 = vsel %vm28_vm0, %v9309_v61, 0.0 }
 0x570   :  { %v1641_v23 = vadd.f32 %v1640_v48, %v1639_v15  ;;  %v1417_v48 = vmul.f32 %v9304_v57, %v9304_v57  ;;  %v1060_v51 = vadd.f32 %v1059_v31, %v1058_v7 }
 0x571   :  { %907 = vmatmul.f32.gmra.mxu0 %v339_v8  ;;  %v1415_v8 = vmul.f32 %v9294_v49, %v9294_v49  ;;  %v1063_v49 = vsel %vm28_vm0, %v9304_v57, 0.0  ;;  %v15436_v57 = vld [vmem:[#allocation72_spill] sm:$0xff] }
 0x572   :  { %v1643_v40 = vadd.f32 %v1642_v0, %v1641_v23  ;;  %v1418_v0 = vmul.f32 %v9309_v61, %v9309_v61  ;;  %v1062_v23 = vadd.f32 %v1061_v33, %v1060_v51  ;;  %v1420_v33 = vmul.f32 %v9319_v5, %v9319_v5  ;;  %v15431_v61 = vld [vmem:[#allocation68_spill] sm:$0xff] }
 0x573   :  { %v1646_v38 = vsel %vm28_vm0, %v1415_v8, 0.0  ;;  %v1650_v8 = vsel %vm28_vm0, %v1417_v48, 0.0 }
 0x574   :  { %v1645_v15 = vadd.f32 %v1644_v59, %v1643_v40  ;;  %v1064_v31 = vadd.f32 %v1063_v49, %v1062_v23  ;;  %v1652_v7 = vsel %vm28_vm0, %v1418_v0, 0.0  ;;  %v1069_v49 = vsel %vm28_vm0, %v9319_v5, 0.0  ;;  %v15427_v5 = vld [vmem:[#allocation64_spill] sm:$0xff] }
 0x575   :  { %v1656_v0 = vsel %vm28_vm0, %v1420_v33, 0.0  ;;  %v342_v33 = vld [vmem:[%s14987_s0 + $0x568] sm:$0xff] }
 0x576   :  { %v10070_v11 = vpop.f32.mrf.mxu0  ;;  %v1647_v39 = vadd.f32 %v1646_v38, %v1645_v15  ;;  %v1067_v38 = vsel %vm28_vm0, %v9314_v1, 0.0  ;;  %v1066_v15 = vadd.f32 %v1065_v34, %v1064_v31  ;;  %v1073_v31 = vsel %vm28_vm0, %v9329_v13, 0.0 }
 0x578   :  { %v1649_v59 = vadd.f32 %v1648_v56, %v1647_v39  ;;  %v1421_v56 = vmul.f32 %v9324_v9, %v9324_v9  ;;  %v1068_v23 = vadd.f32 %v1067_v38, %v1066_v15 }
 0x579   :  { %910 = vmatmul.f32.gmra.mxu0 %v340_v16  ;;  %v1419_v16 = vmul.f32 %v9314_v1, %v9314_v1  ;;  %v1071_v1 = vsel %vm28_vm0, %v9324_v9, 0.0  ;;  %v15423_v9 = vld [vmem:[#allocation60_spill] sm:$0xff] }
 0x57a   :  { %v1651_v48 = vadd.f32 %v1650_v8, %v1649_v59  ;;  %v1422_v8 = vmul.f32 %v9329_v13, %v9329_v13  ;;  %v1070_v59 = vadd.f32 %v1069_v49, %v1068_v23  ;;  %v1424_v49 = vmul.f32 %v9339_v21, %v9339_v21  ;;  %v15419_v13 = vld [vmem:[#allocation56_spill] sm:$0xff] }
 0x57b   :  { %v1654_v51 = vsel %vm28_vm0, %v1419_v16, 0.0  ;;  %v1658_v16 = vsel %vm28_vm0, %v1421_v56, 0.0 }
 0x57c   :  { %v1653_v39 = vadd.f32 %v1652_v7, %v1651_v48  ;;  %v1072_v38 = vadd.f32 %v1071_v1, %v1070_v59  ;;  %v1660_v15 = vsel %vm28_vm0, %v1422_v8, 0.0  ;;  %v1077_v1 = vsel %vm28_vm0, %v9339_v21, 0.0  ;;  %v15414_v21 = vld [vmem:[#allocation52_spill] sm:$0xff] }
 0x57d   :  { %v1664_v8 = vsel %vm28_vm0, %v1424_v49, 0.0  ;;  %v343_v49 = vld [vmem:[%s14987_s0 + $0x570] sm:$0xff] }
 0x57e   :  { %v10095_v40 = vpop.f32.mrf.mxu0  ;;  %v1655_v34 = vadd.f32 %v1654_v51, %v1653_v39  ;;  %v1075_v51 = vsel %vm28_vm0, %v9334_v17, 0.0  ;;  %v1074_v39 = vadd.f32 %v1073_v31, %v1072_v38  ;;  %v1081_v38 = vsel %vm28_vm0, %v9349_v29, 0.0 }
 0x57f   :  { %15408 = vst [vmem:[#allocation146_spill] sm:$0xff] %v10095_v40 }
 0x580   :  { %v1657_v7 = vadd.f32 %v1656_v0, %v1655_v34  ;;  %v1425_v0 = vmul.f32 %v9344_v25, %v9344_v25  ;;  %v1076_v59 = vadd.f32 %v1075_v51, %v1074_v39 }
 0x581   :  { %913 = vmatmul.f32.gmra.mxu0 %v341_v24  ;;  %v1423_v24 = vmul.f32 %v9334_v17, %v9334_v17  ;;  %v1079_v17 = vsel %vm28_vm0, %v9344_v25, 0.0  ;;  %v15410_v25 = vld [vmem:[#allocation48_spill] sm:$0xff] }
 0x582   :  { %v1659_v56 = vadd.f32 %v1658_v16, %v1657_v7  ;;  %v1426_v16 = vmul.f32 %v9349_v29, %v9349_v29  ;;  %v1078_v7 = vadd.f32 %v1077_v1, %v1076_v59  ;;  %v1428_v1 = vmul.f32 %v9359_v43, %v9359_v43 }
 0x583   :  { %v1662_v23 = vsel %vm28_vm0, %v1423_v24, 0.0  ;;  %v1666_v24 = vsel %vm28_vm0, %v1425_v0, 0.0 }
 0x584   :  { %v1661_v34 = vadd.f32 %v1660_v15, %v1659_v56  ;;  %v1080_v51 = vadd.f32 %v1079_v17, %v1078_v7  ;;  %v1668_v39 = vsel %vm28_vm0, %v1426_v16, 0.0  ;;  %v1085_v17 = vsel %vm28_vm0, %v9359_v43, 0.0  ;;  %v15411_v43 = vld [vmem:[#allocation49_spill] sm:$0xff] }
 0x585   :  { %v1672_v16 = vsel %vm28_vm0, %v1428_v1, 0.0  ;;  %v344_v1 = vld [vmem:[%s14987_s0 + $0x578] sm:$0xff] }
 0x586   :  { %v10120_v48 = vpop.f32.mrf.mxu0  ;;  %v1663_v31 = vadd.f32 %v1662_v23, %v1661_v34  ;;  %v1083_v23 = vsel %vm28_vm0, %v9354_v35, 0.0  ;;  %v1082_v34 = vadd.f32 %v1081_v38, %v1080_v51  ;;  %v1089_v51 = vsel %vm28_vm0, %v15410_v25, 0.0 }
 0x588   :  { %v1665_v15 = vadd.f32 %v1664_v8, %v1663_v31  ;;  %v15409_v8 = vld [vmem:[#allocation47_spill] sm:$0xff]  ;;  %v1084_v29 = vadd.f32 %v1083_v23, %v1082_v34 }
 0x589   :  { %916 = vmatmul.f32.gmra.mxu0 %v342_v33  ;;  %v1427_v33 = vmul.f32 %v9354_v35, %v9354_v35  ;;  %v1429_v31 = vmul.f32 %v15409_v8, %v15409_v8  ;;  %v1087_v35 = vsel %vm28_vm0, %v15409_v8, 0.0 }
 0x58a   :  { %v1667_v0 = vadd.f32 %v1666_v24, %v1665_v15  ;;  %v1430_v24 = vmul.f32 %v15410_v25, %v15410_v25  ;;  %v1086_v15 = vadd.f32 %v1085_v17, %v1084_v29  ;;  %v1091_v29 = vsel %vm28_vm0, %v15411_v43, 0.0 }
 0x58b   :  { %v1670_v59 = vsel %vm28_vm0, %v1427_v33, 0.0  ;;  %v1674_v33 = vsel %vm28_vm0, %v1429_v31, 0.0 }
 0x58c   :  { %v1669_v7 = vadd.f32 %v1668_v39, %v1667_v0  ;;  %v1088_v23 = vadd.f32 %v1087_v35, %v1086_v15  ;;  %v1676_v34 = vsel %vm28_vm0, %v1430_v24, 0.0 }
 0x58e   :  { %v10145_v56 = vpop.f32.mrf.mxu0  ;;  %v1671_v38 = vadd.f32 %v1670_v59, %v1669_v7  ;;  %v15412_v59 = vld [vmem:[#allocation50_spill] sm:$0xff]  ;;  %v1090_v7 = vadd.f32 %v1089_v51, %v1088_v23  ;;  %v1097_v23 = vsel %vm28_vm0, %v15414_v21, 0.0 }
 0x58f   :  { %v1432_v17 = vmul.f32 %v15412_v59, %v15412_v59  ;;  %v1093_v35 = vsel %vm28_vm0, %v15412_v59, 0.0  ;;  %v15415_v59 = vld [vmem:[#allocation53_spill] sm:$0xff] }
 0x590   :  { %v1673_v39 = vadd.f32 %v1672_v16, %v1671_v38  ;;  %v15413_v16 = vld [vmem:[#allocation51_spill] sm:$0xff]  ;;  %v1092_v8 = vadd.f32 %v1091_v29, %v1090_v7 }
 0x591   :  { %919 = vmatmul.f32.gmra.mxu0 %v343_v49  ;;  %v1431_v49 = vmul.f32 %v15411_v43, %v15411_v43  ;;  %v1433_v38 = vmul.f32 %v15413_v16, %v15413_v16  ;;  %v1680_v24 = vsel %vm28_vm0, %v1432_v17, 0.0  ;;  %v1095_v43 = vsel %vm28_vm0, %v15413_v16, 0.0  ;;  %v345_v17 = vld [vmem:[%s14987_s0 + $0x580] sm:$0xff] }
 0x592   :  { %v1675_v31 = vadd.f32 %v1674_v33, %v1673_v39  ;;  %v1434_v33 = vmul.f32 %v15414_v21, %v15414_v21  ;;  %v1094_v39 = vadd.f32 %v1093_v35, %v1092_v8  ;;  %v15417_v8 = vld [vmem:[#allocation54_spill] sm:$0xff] }
 0x593   :  { %v1678_v25 = vsel %vm28_vm0, %v1431_v49, 0.0  ;;  %v1682_v49 = vsel %vm28_vm0, %v1433_v38, 0.0  ;;  %v1436_v35 = vmul.f32 %v15417_v8, %v15417_v8 }
 0x594   :  { %v1677_v15 = vadd.f32 %v1676_v34, %v1675_v31  ;;  %v1096_v29 = vadd.f32 %v1095_v43, %v1094_v39  ;;  %v1684_v7 = vsel %vm28_vm0, %v1434_v33, 0.0  ;;  %v1101_v43 = vsel %vm28_vm0, %v15417_v8, 0.0  ;;  %v15420_v8 = vld [vmem:[#allocation57_spill] sm:$0xff] }
 0x595   :  { %v1688_v33 = vsel %vm28_vm0, %v1436_v35, 0.0  ;;  %v346_v35 = vld [vmem:[%s14987_s0 + $0x588] sm:$0xff] }
 0x596   :  { %v10170_v0 = vpop.f32.mrf.mxu0  ;;  %v1679_v51 = vadd.f32 %v1678_v25, %v1677_v15  ;;  %v1099_v25 = vsel %vm28_vm0, %v15415_v59, 0.0  ;;  %v1098_v15 = vadd.f32 %v1097_v23, %v1096_v29  ;;  %v1105_v29 = vsel %vm28_vm0, %v15419_v13, 0.0 }
 0x598   :  { %v1681_v34 = vadd.f32 %v1680_v24, %v1679_v51  ;;  %v15418_v24 = vld [vmem:[#allocation55_spill] sm:$0xff]  ;;  %v1100_v16 = vadd.f32 %v1099_v25, %v1098_v15 }
 0x599   :  { %922 = vmatmul.f32.gmra.mxu0 %v344_v1  ;;  %v1435_v1 = vmul.f32 %v15415_v59, %v15415_v59  ;;  %v1437_v51 = vmul.f32 %v15418_v24, %v15418_v24  ;;  %v1103_v59 = vsel %vm28_vm0, %v15418_v24, 0.0 }
 0x59a   :  { %v1683_v38 = vadd.f32 %v1682_v49, %v1681_v34  ;;  %v1438_v49 = vmul.f32 %v15419_v13, %v15419_v13  ;;  %v1102_v34 = vadd.f32 %v1101_v43, %v1100_v16  ;;  %v15421_v16 = vld [vmem:[#allocation58_spill] sm:$0xff] }
 0x59b   :  { %v1686_v21 = vsel %vm28_vm0, %v1435_v1, 0.0  ;;  %v1690_v1 = vsel %vm28_vm0, %v1437_v51, 0.0  ;;  %v1440_v43 = vmul.f32 %v15421_v16, %v15421_v16 }
 0x59c   :  { %v1685_v39 = vadd.f32 %v1684_v7, %v1683_v38  ;;  %v1104_v25 = vadd.f32 %v1103_v59, %v1102_v34  ;;  %v1692_v15 = vsel %vm28_vm0, %v1438_v49, 0.0  ;;  %v1109_v59 = vsel %vm28_vm0, %v15421_v16, 0.0  ;;  %v15424_v16 = vld [vmem:[#allocation61_spill] sm:$0xff] }
 0x59d   :  { %v1696_v49 = vsel %vm28_vm0, %v1440_v43, 0.0  ;;  %v347_v43 = vld [vmem:[%s14987_s0 + $0x590] sm:$0xff] }
 0x59e   :  { %v10195_v31 = vpop.f32.mrf.mxu0  ;;  %v1687_v23 = vadd.f32 %v1686_v21, %v1685_v39  ;;  %v1107_v21 = vsel %vm28_vm0, %v15420_v8, 0.0  ;;  %v1106_v39 = vadd.f32 %v1105_v29, %v1104_v25  ;;  %v1113_v25 = vsel %vm28_vm0, %v15423_v9, 0.0 }
 0x59f   :  { %15416 = vst [vmem:[#allocation147_spill] sm:$0xff] %v10195_v31 }
 0x5a0   :  { %v1689_v7 = vadd.f32 %v1688_v33, %v1687_v23  ;;  %v15422_v33 = vld [vmem:[#allocation59_spill] sm:$0xff]  ;;  %v1108_v24 = vadd.f32 %v1107_v21, %v1106_v39 }
 0x5a1   :  { %925 = vmatmul.f32.gmra.mxu0 %v345_v17  ;;  %v1439_v17 = vmul.f32 %v15420_v8, %v15420_v8  ;;  %v1441_v23 = vmul.f32 %v15422_v33, %v15422_v33  ;;  %v1111_v8 = vsel %vm28_vm0, %v15422_v33, 0.0 }
 0x5a2   :  { %v1691_v51 = vadd.f32 %v1690_v1, %v1689_v7  ;;  %v1442_v1 = vmul.f32 %v15423_v9, %v15423_v9  ;;  %v1110_v7 = vadd.f32 %v1109_v59, %v1108_v24  ;;  %v15425_v24 = vld [vmem:[#allocation62_spill] sm:$0xff] }
 0x5a3   :  { %v1694_v13 = vsel %vm28_vm0, %v1439_v17, 0.0  ;;  %v1698_v17 = vsel %vm28_vm0, %v1441_v23, 0.0  ;;  %v1444_v59 = vmul.f32 %v15425_v24, %v15425_v24 }
 0x5a4   :  { %v1693_v34 = vadd.f32 %v1692_v15, %v1691_v51  ;;  %v1112_v21 = vadd.f32 %v1111_v8, %v1110_v7  ;;  %v1700_v39 = vsel %vm28_vm0, %v1442_v1, 0.0  ;;  %v1117_v8 = vsel %vm28_vm0, %v15425_v24, 0.0  ;;  %v15428_v24 = vld [vmem:[#allocation65_spill] sm:$0xff] }
 0x5a5   :  { %v1704_v1 = vsel %vm28_vm0, %v1444_v59, 0.0  ;;  %v348_v59 = vld [vmem:[%s14987_s0 + $0x598] sm:$0xff] }
 0x5a6   :  { %v10220_v38 = vpop.f32.mrf.mxu0  ;;  %v1695_v29 = vadd.f32 %v1694_v13, %v1693_v34  ;;  %v1115_v13 = vsel %vm28_vm0, %v15424_v16, 0.0  ;;  %v1114_v34 = vadd.f32 %v1113_v25, %v1112_v21  ;;  %v1121_v21 = vsel %vm28_vm0, %v15427_v5, 0.0 }
 0x5a8   :  { %v1697_v15 = vadd.f32 %v1696_v49, %v1695_v29  ;;  %v15426_v49 = vld [vmem:[#allocation63_spill] sm:$0xff]  ;;  %v1116_v33 = vadd.f32 %v1115_v13, %v1114_v34 }
 0x5a9   :  { %928 = vmatmul.f32.gmra.mxu0 %v346_v35  ;;  %v1443_v35 = vmul.f32 %v15424_v16, %v15424_v16  ;;  %v1445_v29 = vmul.f32 %v15426_v49, %v15426_v49  ;;  %v1119_v16 = vsel %vm28_vm0, %v15426_v49, 0.0 }
 0x5aa   :  { %v1699_v23 = vadd.f32 %v1698_v17, %v1697_v15  ;;  %v1446_v17 = vmul.f32 %v15427_v5, %v15427_v5  ;;  %v1118_v15 = vadd.f32 %v1117_v8, %v1116_v33  ;;  %v15429_v33 = vld [vmem:[#allocation66_spill] sm:$0xff] }
 0x5ab   :  { %v1702_v9 = vsel %vm28_vm0, %v1443_v35, 0.0  ;;  %v1706_v35 = vsel %vm28_vm0, %v1445_v29, 0.0  ;;  %v1448_v8 = vmul.f32 %v15429_v33, %v15429_v33 }
 0x5ac   :  { %v1701_v7 = vadd.f32 %v1700_v39, %v1699_v23  ;;  %v1120_v13 = vadd.f32 %v1119_v16, %v1118_v15  ;;  %v1708_v34 = vsel %vm28_vm0, %v1446_v17, 0.0  ;;  %v1125_v16 = vsel %vm28_vm0, %v15429_v33, 0.0  ;;  %v15432_v33 = vld [vmem:[#allocation69_spill] sm:$0xff] }
 0x5ad   :  { %v1712_v17 = vsel %vm28_vm0, %v1448_v8, 0.0  ;;  %v349_v8 = vld [vmem:[%s14987_s0 + $0x5a0] sm:$0xff] }
 0x5ae   :  { %v10245_v51 = vpop.f32.mrf.mxu0  ;;  %v1703_v25 = vadd.f32 %v1702_v9, %v1701_v7  ;;  %v1123_v9 = vsel %vm28_vm0, %v15428_v24, 0.0  ;;  %v1122_v7 = vadd.f32 %v1121_v21, %v1120_v13  ;;  %v1129_v13 = vsel %vm28_vm0, %v15431_v61, 0.0 }
 0x5b0   :  { %v1705_v39 = vadd.f32 %v1704_v1, %v1703_v25  ;;  %v15430_v1 = vld [vmem:[#allocation67_spill] sm:$0xff]  ;;  %v1124_v49 = vadd.f32 %v1123_v9, %v1122_v7 }
 0x5b1   :  { %931 = vmatmul.f32.gmra.mxu0 %v347_v43  ;;  %v1447_v43 = vmul.f32 %v15428_v24, %v15428_v24  ;;  %v1449_v25 = vmul.f32 %v15430_v1, %v15430_v1  ;;  %v1127_v24 = vsel %vm28_vm0, %v15430_v1, 0.0 }
 0x5b2   :  { %v1707_v29 = vadd.f32 %v1706_v35, %v1705_v39  ;;  %v1450_v35 = vmul.f32 %v15431_v61, %v15431_v61  ;;  %v1126_v39 = vadd.f32 %v1125_v16, %v1124_v49  ;;  %v15434_v49 = vld [vmem:[#allocation70_spill] sm:$0xff] }
 0x5b3   :  { %v1710_v5 = vsel %vm28_vm0, %v1447_v43, 0.0  ;;  %v1714_v43 = vsel %vm28_vm0, %v1449_v25, 0.0  ;;  %v1452_v16 = vmul.f32 %v15434_v49, %v15434_v49 }
 0x5b4   :  { %v1709_v15 = vadd.f32 %v1708_v34, %v1707_v29  ;;  %v1128_v9 = vadd.f32 %v1127_v24, %v1126_v39  ;;  %v1716_v7 = vsel %vm28_vm0, %v1450_v35, 0.0  ;;  %v1133_v24 = vsel %vm28_vm0, %v15434_v49, 0.0  ;;  %v15437_v49 = vld [vmem:[#allocation73_spill] sm:$0xff] }
 0x5b5   :  { %v1720_v35 = vsel %vm28_vm0, %v1452_v16, 0.0  ;;  %v350_v16 = vld [vmem:[%s14987_s0 + $0x5a8] sm:$0xff] }
 0x5b6   :  { %v10270_v23 = vpop.f32.mrf.mxu0  ;;  %v1711_v21 = vadd.f32 %v1710_v5, %v1709_v15  ;;  %v1131_v5 = vsel %vm28_vm0, %v15432_v33, 0.0  ;;  %v1130_v15 = vadd.f32 %v1129_v13, %v1128_v9  ;;  %v1137_v9 = vsel %vm28_vm0, %v15436_v57, 0.0 }
 0x5b8   :  { %v1713_v34 = vadd.f32 %v1712_v17, %v1711_v21  ;;  %v15435_v17 = vld [vmem:[#allocation71_spill] sm:$0xff]  ;;  %v1132_v1 = vadd.f32 %v1131_v5, %v1130_v15 }
 0x5b9   :  { %934 = vmatmul.f32.gmra.mxu0 %v348_v59  ;;  %v1451_v59 = vmul.f32 %v15432_v33, %v15432_v33  ;;  %v1453_v21 = vmul.f32 %v15435_v17, %v15435_v17  ;;  %v1135_v33 = vsel %vm28_vm0, %v15435_v17, 0.0 }
 0x5ba   :  { %v1715_v25 = vadd.f32 %v1714_v43, %v1713_v34  ;;  %v1454_v43 = vmul.f32 %v15436_v57, %v15436_v57  ;;  %v1134_v34 = vadd.f32 %v1133_v24, %v1132_v1  ;;  %v15438_v1 = vld [vmem:[#allocation74_spill] sm:$0xff] }
 0x5bb   :  { %v1718_v61 = vsel %vm28_vm0, %v1451_v59, 0.0  ;;  %v1722_v59 = vsel %vm28_vm0, %v1453_v21, 0.0  ;;  %v1456_v24 = vmul.f32 %v15438_v1, %v15438_v1 }
 0x5bc   :  { %v1717_v39 = vadd.f32 %v1716_v7, %v1715_v25  ;;  %v1136_v5 = vadd.f32 %v1135_v33, %v1134_v34  ;;  %v1724_v15 = vsel %vm28_vm0, %v1454_v43, 0.0  ;;  %v1141_v33 = vsel %vm28_vm0, %v15438_v1, 0.0  ;;  %v15441_v1 = vld [vmem:[#allocation77_spill] sm:$0xff] }
 0x5bd   :  { %v1728_v43 = vsel %vm28_vm0, %v1456_v24, 0.0  ;;  %v351_v24 = vld [vmem:[%s14987_s0 + $0x5b0] sm:$0xff] }
 0x5be   :  { %v10295_v29 = vpop.f32.mrf.mxu0  ;;  %v1719_v13 = vadd.f32 %v1718_v61, %v1717_v39  ;;  %v1139_v61 = vsel %vm28_vm0, %v15437_v49, 0.0  ;;  %v1138_v39 = vadd.f32 %v1137_v9, %v1136_v5  ;;  %v1145_v5 = vsel %vm28_vm0, %v15440_v53, 0.0 }
 0x5bf   :  { %15433 = vst [vmem:[#allocation148_spill] sm:$0xff] %v10295_v29 }
 0x5c0   :  { %v1721_v7 = vadd.f32 %v1720_v35, %v1719_v13  ;;  %v15439_v35 = vld [vmem:[#allocation75_spill] sm:$0xff]  ;;  %v1140_v17 = vadd.f32 %v1139_v61, %v1138_v39 }
 0x5c1   :  { %937 = vmatmul.f32.gmra.mxu0 %v349_v8  ;;  %v1455_v8 = vmul.f32 %v15437_v49, %v15437_v49  ;;  %v1457_v13 = vmul.f32 %v15439_v35, %v15439_v35  ;;  %v1143_v49 = vsel %vm28_vm0, %v15439_v35, 0.0 }
 0x5c2   :  { %v1723_v21 = vadd.f32 %v1722_v59, %v1721_v7  ;;  %v1458_v59 = vmul.f32 %v15440_v53, %v15440_v53  ;;  %v1142_v7 = vadd.f32 %v1141_v33, %v1140_v17  ;;  %v15442_v17 = vld [vmem:[#allocation78_spill] sm:$0xff] }
 0x5c3   :  { %v1726_v57 = vsel %vm28_vm0, %v1455_v8, 0.0  ;;  %v1730_v8 = vsel %vm28_vm0, %v1457_v13, 0.0  ;;  %v1460_v33 = vmul.f32 %v15442_v17, %v15442_v17 }
 0x5c4   :  { %v1725_v34 = vadd.f32 %v1724_v15, %v1723_v21  ;;  %v1144_v61 = vadd.f32 %v1143_v49, %v1142_v7  ;;  %v1732_v39 = vsel %vm28_vm0, %v1458_v59, 0.0  ;;  %v1149_v49 = vsel %vm28_vm0, %v15442_v17, 0.0  ;;  %v15445_v17 = vld [vmem:[#allocation81_spill] sm:$0xff] }
 0x5c5   :  { %v1736_v59 = vsel %vm28_vm0, %v1460_v33, 0.0  ;;  %v352_v33 = vld [vmem:[%s14987_s0 + $0x5b8] sm:$0xff] }
 0x5c6   :  { %v10320_v25 = vpop.f32.mrf.mxu0  ;;  %v1727_v9 = vadd.f32 %v1726_v57, %v1725_v34  ;;  %v1147_v57 = vsel %vm28_vm0, %v15441_v1, 0.0  ;;  %v1146_v34 = vadd.f32 %v1145_v5, %v1144_v61  ;;  %v1153_v61 = vsel %vm28_vm0, %v15444_v45, 0.0 }
 0x5c8   :  { %v1729_v15 = vadd.f32 %v1728_v43, %v1727_v9  ;;  %v15443_v43 = vld [vmem:[#allocation79_spill] sm:$0xff]  ;;  %v1148_v35 = vadd.f32 %v1147_v57, %v1146_v34 }
 0x5c9   :  { %940 = vmatmul.f32.gmra.mxu0 %v350_v16  ;;  %v1459_v16 = vmul.f32 %v15441_v1, %v15441_v1  ;;  %v1461_v9 = vmul.f32 %v15443_v43, %v15443_v43  ;;  %v1151_v1 = vsel %vm28_vm0, %v15443_v43, 0.0 }
 0x5ca   :  { %v1731_v13 = vadd.f32 %v1730_v8, %v1729_v15  ;;  %v1462_v8 = vmul.f32 %v15444_v45, %v15444_v45  ;;  %v1150_v15 = vadd.f32 %v1149_v49, %v1148_v35  ;;  %v15446_v35 = vld [vmem:[#allocation82_spill] sm:$0xff] }
 0x5cb   :  { %v1734_v53 = vsel %vm28_vm0, %v1459_v16, 0.0  ;;  %v1738_v16 = vsel %vm28_vm0, %v1461_v9, 0.0  ;;  %v1464_v49 = vmul.f32 %v15446_v35, %v15446_v35 }
 0x5cc   :  { %v1733_v7 = vadd.f32 %v1732_v39, %v1731_v13  ;;  %v1152_v57 = vadd.f32 %v1151_v1, %v1150_v15  ;;  %v1740_v34 = vsel %vm28_vm0, %v1462_v8, 0.0  ;;  %v1157_v1 = vsel %vm28_vm0, %v15446_v35, 0.0  ;;  %v15449_v35 = vld [vmem:[#allocation85_spill] sm:$0xff] }
 0x5cd   :  { %v1744_v8 = vsel %vm28_vm0, %v1464_v49, 0.0  ;;  %v353_v49 = vld [vmem:[%s14987_s0 + $0x5c0] sm:$0xff] }
 0x5ce   :  { %v10345_v21 = vpop.f32.mrf.mxu0  ;;  %v1735_v5 = vadd.f32 %v1734_v53, %v1733_v7  ;;  %v1155_v53 = vsel %vm28_vm0, %v15445_v17, 0.0  ;;  %v1154_v7 = vadd.f32 %v1153_v61, %v1152_v57  ;;  %v1161_v57 = vsel %vm28_vm0, %v15448_v41, 0.0 }
 0x5d0   :  { %v1737_v39 = vadd.f32 %v1736_v59, %v1735_v5  ;;  %v15447_v59 = vld [vmem:[#allocation83_spill] sm:$0xff]  ;;  %v1156_v43 = vadd.f32 %v1155_v53, %v1154_v7 }
 0x5d1   :  { %943 = vmatmul.f32.gmra.mxu0 %v351_v24  ;;  %v1463_v24 = vmul.f32 %v15445_v17, %v15445_v17  ;;  %v1465_v5 = vmul.f32 %v15447_v59, %v15447_v59  ;;  %v1159_v17 = vsel %vm28_vm0, %v15447_v59, 0.0 }
 0x5d2   :  { %v1739_v9 = vadd.f32 %v1738_v16, %v1737_v39  ;;  %v1466_v16 = vmul.f32 %v15448_v41, %v15448_v41  ;;  %v1158_v39 = vadd.f32 %v1157_v1, %v1156_v43  ;;  %v15451_v43 = vld [vmem:[#allocation86_spill] sm:$0xff] }
 0x5d3   :  { %v1742_v45 = vsel %vm28_vm0, %v1463_v24, 0.0  ;;  %v1746_v24 = vsel %vm28_vm0, %v1465_v5, 0.0  ;;  %v1468_v1 = vmul.f32 %v15451_v43, %v15451_v43 }
 0x5d4   :  { %v1741_v15 = vadd.f32 %v1740_v34, %v1739_v9  ;;  %v1160_v53 = vadd.f32 %v1159_v17, %v1158_v39  ;;  %v1748_v7 = vsel %vm28_vm0, %v1466_v16, 0.0  ;;  %v1165_v17 = vsel %vm28_vm0, %v15451_v43, 0.0  ;;  %v15454_v43 = vld [vmem:[#allocation89_spill] sm:$0xff] }
 0x5d5   :  { %v1752_v16 = vsel %vm28_vm0, %v1468_v1, 0.0  ;;  %v354_v1 = vld [vmem:[%s14987_s0 + $0x5c8] sm:$0xff] }
 0x5d6   :  { %v10370_v13 = vpop.f32.mrf.mxu0  ;;  %v1743_v61 = vadd.f32 %v1742_v45, %v1741_v15  ;;  %v1163_v45 = vsel %vm28_vm0, %v15449_v35, 0.0  ;;  %v1162_v15 = vadd.f32 %v1161_v57, %v1160_v53  ;;  %v1169_v53 = vsel %vm28_vm0, %v15453_v37, 0.0 }
 0x5d8   :  { %v1745_v34 = vadd.f32 %v1744_v8, %v1743_v61  ;;  %v15452_v8 = vld [vmem:[#allocation87_spill] sm:$0xff]  ;;  %v1164_v59 = vadd.f32 %v1163_v45, %v1162_v15 }
 0x5d9   :  { %946 = vmatmul.f32.gmra.mxu0 %v352_v33  ;;  %v1467_v33 = vmul.f32 %v15449_v35, %v15449_v35  ;;  %v1469_v61 = vmul.f32 %v15452_v8, %v15452_v8  ;;  %v1167_v35 = vsel %vm28_vm0, %v15452_v8, 0.0 }
 0x5da   :  { %v1747_v5 = vadd.f32 %v1746_v24, %v1745_v34  ;;  %v1470_v24 = vmul.f32 %v15453_v37, %v15453_v37  ;;  %v1166_v34 = vadd.f32 %v1165_v17, %v1164_v59  ;;  %v15455_v59 = vld [vmem:[#allocation90_spill] sm:$0xff] }
 0x5db   :  { %v1750_v41 = vsel %vm28_vm0, %v1467_v33, 0.0  ;;  %v1754_v33 = vsel %vm28_vm0, %v1469_v61, 0.0  ;;  %v1472_v17 = vmul.f32 %v15455_v59, %v15455_v59 }
 0x5dc   :  { %v1749_v39 = vadd.f32 %v1748_v7, %v1747_v5  ;;  %v1168_v45 = vadd.f32 %v1167_v35, %v1166_v34  ;;  %v1756_v15 = vsel %vm28_vm0, %v1470_v24, 0.0  ;;  %v1173_v35 = vsel %vm28_vm0, %v15455_v59, 0.0  ;;  %v15458_v59 = vld [vmem:[#allocation93_spill] sm:$0xff] }
 0x5dd   :  { %v1760_v24 = vsel %vm28_vm0, %v1472_v17, 0.0  ;;  %v355_v17 = vld [vmem:[%s14987_s0 + $0x5d0] sm:$0xff] }
 0x5de   :  { %v10395_v9 = vpop.f32.mrf.mxu0  ;;  %v1751_v57 = vadd.f32 %v1750_v41, %v1749_v39  ;;  %v1171_v41 = vsel %vm28_vm0, %v15454_v43, 0.0  ;;  %v1170_v39 = vadd.f32 %v1169_v53, %v1168_v45  ;;  %v1177_v45 = vsel %vm28_vm0, %v15457_v30, 0.0 }
 0x5df   :  { %15450 = vst [vmem:[#allocation149_spill] sm:$0xff] %v10395_v9 }
 0x5e0   :  { %v1753_v7 = vadd.f32 %v1752_v16, %v1751_v57  ;;  %v15456_v16 = vld [vmem:[#allocation91_spill] sm:$0xff]  ;;  %v1172_v8 = vadd.f32 %v1171_v41, %v1170_v39 }
 0x5e1   :  { %949 = vmatmul.f32.gmra.mxu0 %v353_v49  ;;  %v1471_v49 = vmul.f32 %v15454_v43, %v15454_v43  ;;  %v1473_v57 = vmul.f32 %v15456_v16, %v15456_v16  ;;  %v1175_v43 = vsel %vm28_vm0, %v15456_v16, 0.0 }
 0x5e2   :  { %v1755_v61 = vadd.f32 %v1754_v33, %v1753_v7  ;;  %v1474_v33 = vmul.f32 %v15457_v30, %v15457_v30  ;;  %v1174_v7 = vadd.f32 %v1173_v35, %v1172_v8  ;;  %v15459_v8 = vld [vmem:[#allocation94_spill] sm:$0xff] }
 0x5e3   :  { %v1758_v37 = vsel %vm28_vm0, %v1471_v49, 0.0  ;;  %v1762_v49 = vsel %vm28_vm0, %v1473_v57, 0.0  ;;  %v1476_v35 = vmul.f32 %v15459_v8, %v15459_v8 }
 0x5e4   :  { %v1757_v34 = vadd.f32 %v1756_v15, %v1755_v61  ;;  %v1176_v41 = vadd.f32 %v1175_v43, %v1174_v7  ;;  %v1764_v39 = vsel %vm28_vm0, %v1474_v33, 0.0  ;;  %v1181_v43 = vsel %vm28_vm0, %v15459_v8, 0.0  ;;  %v15462_v8 = vld [vmem:[#allocation97_spill] sm:$0xff] }
 0x5e5   :  { %v1768_v33 = vsel %vm28_vm0, %v1476_v35, 0.0  ;;  %v356_v35 = vld [vmem:[%s14987_s0 + $0x5d8] sm:$0xff] }
 0x5e6   :  { %v10420_v5 = vpop.f32.mrf.mxu0  ;;  %v1759_v53 = vadd.f32 %v1758_v37, %v1757_v34  ;;  %v1179_v37 = vsel %vm28_vm0, %v15458_v59, 0.0  ;;  %v1178_v34 = vadd.f32 %v1177_v45, %v1176_v41  ;;  %v1185_v41 = vsel %vm28_vm0, %v15461_v28, 0.0 }
 0x5e8   :  { %v1761_v15 = vadd.f32 %v1760_v24, %v1759_v53  ;;  %v15460_v24 = vld [vmem:[#allocation95_spill] sm:$0xff]  ;;  %v1180_v16 = vadd.f32 %v1179_v37, %v1178_v34 }
 0x5e9   :  { %952 = vmatmul.f32.gmra.mxu0 %v354_v1  ;;  %v1475_v1 = vmul.f32 %v15458_v59, %v15458_v59  ;;  %v1477_v53 = vmul.f32 %v15460_v24, %v15460_v24  ;;  %v1183_v59 = vsel %vm28_vm0, %v15460_v24, 0.0 }
 0x5ea   :  { %v1763_v57 = vadd.f32 %v1762_v49, %v1761_v15  ;;  %v1478_v49 = vmul.f32 %v15461_v28, %v15461_v28  ;;  %v1182_v15 = vadd.f32 %v1181_v43, %v1180_v16  ;;  %v15463_v16 = vld [vmem:[#allocation98_spill] sm:$0xff] }
 0x5eb   :  { %v1766_v30 = vsel %vm28_vm0, %v1475_v1, 0.0  ;;  %v1770_v1 = vsel %vm28_vm0, %v1477_v53, 0.0  ;;  %v1480_v43 = vmul.f32 %v15463_v16, %v15463_v16 }
 0x5ec   :  { %v1765_v7 = vadd.f32 %v1764_v39, %v1763_v57  ;;  %v1184_v37 = vadd.f32 %v1183_v59, %v1182_v15  ;;  %v1772_v34 = vsel %vm28_vm0, %v1478_v49, 0.0  ;;  %v1189_v59 = vsel %vm28_vm0, %v15463_v16, 0.0  ;;  %v15466_v16 = vld [vmem:[#allocation101_spill] sm:$0xff] }
 0x5ed   :  { %v1776_v49 = vsel %vm28_vm0, %v1480_v43, 0.0  ;;  %v357_v43 = vld [vmem:[%s14987_s0 + $0x5e0] sm:$0xff] }
 0x5ee   :  { %v10445_v61 = vpop.f32.mrf.mxu0  ;;  %v1767_v45 = vadd.f32 %v1766_v30, %v1765_v7  ;;  %v1187_v30 = vsel %vm28_vm0, %v15462_v8, 0.0  ;;  %v1186_v7 = vadd.f32 %v1185_v41, %v1184_v37  ;;  %v1193_v37 = vsel %vm28_vm0, %v15465_v26, 0.0 }
 0x5f0   :  { %v1769_v39 = vadd.f32 %v1768_v33, %v1767_v45  ;;  %v15464_v33 = vld [vmem:[#allocation99_spill] sm:$0xff]  ;;  %v1188_v24 = vadd.f32 %v1187_v30, %v1186_v7 }
 0x5f1   :  { %955 = vmatmul.f32.gmra.mxu0 %v355_v17  ;;  %v1479_v17 = vmul.f32 %v15462_v8, %v15462_v8  ;;  %v1481_v45 = vmul.f32 %v15464_v33, %v15464_v33  ;;  %v1191_v8 = vsel %vm28_vm0, %v15464_v33, 0.0 }
 0x5f2   :  { %v1771_v53 = vadd.f32 %v1770_v1, %v1769_v39  ;;  %v1482_v1 = vmul.f32 %v15465_v26, %v15465_v26  ;;  %v1190_v39 = vadd.f32 %v1189_v59, %v1188_v24  ;;  %v15467_v24 = vld [vmem:[#allocation102_spill] sm:$0xff] }
 0x5f3   :  { %v1774_v28 = vsel %vm28_vm0, %v1479_v17, 0.0  ;;  %v1778_v17 = vsel %vm28_vm0, %v1481_v45, 0.0  ;;  %v1484_v59 = vmul.f32 %v15467_v24, %v15467_v24 }
 0x5f4   :  { %v1773_v15 = vadd.f32 %v1772_v34, %v1771_v53  ;;  %v1192_v30 = vadd.f32 %v1191_v8, %v1190_v39  ;;  %v1780_v7 = vsel %vm28_vm0, %v1482_v1, 0.0  ;;  %v1197_v8 = vsel %vm28_vm0, %v15467_v24, 0.0  ;;  %v15470_v24 = vld [vmem:[#allocation105_spill] sm:$0xff] }
 0x5f5   :  { %v1784_v1 = vsel %vm28_vm0, %v1484_v59, 0.0  ;;  %v358_v59 = vld [vmem:[%s14987_s0 + $0x5e8] sm:$0xff] }
 0x5f6   :  { %v10470_v57 = vpop.f32.mrf.mxu0  ;;  %v1775_v41 = vadd.f32 %v1774_v28, %v1773_v15  ;;  %v1195_v28 = vsel %vm28_vm0, %v15466_v16, 0.0  ;;  %v1194_v15 = vadd.f32 %v1193_v37, %v1192_v30  ;;  %v1201_v30 = vsel %vm28_vm0, %v15469_v22, 0.0 }
 0x5f8   :  { %v1777_v34 = vadd.f32 %v1776_v49, %v1775_v41  ;;  %v15468_v49 = vld [vmem:[#allocation103_spill] sm:$0xff]  ;;  %v1196_v33 = vadd.f32 %v1195_v28, %v1194_v15 }
 0x5f9   :  { %958 = vmatmul.f32.gmra.mxu0 %v356_v35  ;;  %v1483_v35 = vmul.f32 %v15466_v16, %v15466_v16  ;;  %v1485_v41 = vmul.f32 %v15468_v49, %v15468_v49  ;;  %v1199_v16 = vsel %vm28_vm0, %v15468_v49, 0.0 }
 0x5fa   :  { %v1779_v45 = vadd.f32 %v1778_v17, %v1777_v34  ;;  %v1486_v17 = vmul.f32 %v15469_v22, %v15469_v22  ;;  %v1198_v34 = vadd.f32 %v1197_v8, %v1196_v33  ;;  %v15472_v33 = vld [vmem:[#allocation106_spill] sm:$0xff] }
 0x5fb   :  { %v1782_v26 = vsel %vm28_vm0, %v1483_v35, 0.0  ;;  %v1786_v35 = vsel %vm28_vm0, %v1485_v41, 0.0  ;;  %v1488_v8 = vmul.f32 %v15472_v33, %v15472_v33 }
 0x5fc   :  { %v1781_v39 = vadd.f32 %v1780_v7, %v1779_v45  ;;  %v1200_v28 = vadd.f32 %v1199_v16, %v1198_v34  ;;  %v1788_v15 = vsel %vm28_vm0, %v1486_v17, 0.0  ;;  %v1205_v16 = vsel %vm28_vm0, %v15472_v33, 0.0  ;;  %v15475_v33 = vld [vmem:[#allocation109_spill] sm:$0xff] }
 0x5fd   :  { %v1792_v17 = vsel %vm28_vm0, %v1488_v8, 0.0  ;;  %v359_v8 = vld [vmem:[%s14987_s0 + $0x5f0] sm:$0xff] }
 0x5fe   :  { %v10495_v53 = vpop.f32.mrf.mxu0  ;;  %v1783_v37 = vadd.f32 %v1782_v26, %v1781_v39  ;;  %v1203_v26 = vsel %vm28_vm0, %v15470_v24, 0.0  ;;  %v1202_v39 = vadd.f32 %v1201_v30, %v1200_v28  ;;  %v1209_v28 = vsel %vm28_vm0, %v15474_v20, 0.0 }
 0x600   :  { %v1785_v7 = vadd.f32 %v1784_v1, %v1783_v37  ;;  %v15473_v1 = vld [vmem:[#allocation107_spill] sm:$0xff]  ;;  %v1204_v49 = vadd.f32 %v1203_v26, %v1202_v39 }
 0x601   :  { %961 = vmatmul.f32.gmra.mxu0 %v357_v43  ;;  %v1487_v43 = vmul.f32 %v15470_v24, %v15470_v24  ;;  %v1489_v37 = vmul.f32 %v15473_v1, %v15473_v1  ;;  %v1207_v24 = vsel %vm28_vm0, %v15473_v1, 0.0 }
 0x602   :  { %v1787_v41 = vadd.f32 %v1786_v35, %v1785_v7  ;;  %v1490_v35 = vmul.f32 %v15474_v20, %v15474_v20  ;;  %v1206_v7 = vadd.f32 %v1205_v16, %v1204_v49  ;;  %v15476_v49 = vld [vmem:[#allocation110_spill] sm:$0xff] }
 0x603   :  { %v1790_v22 = vsel %vm28_vm0, %v1487_v43, 0.0  ;;  %v1794_v43 = vsel %vm28_vm0, %v1489_v37, 0.0  ;;  %v1492_v16 = vmul.f32 %v15476_v49, %v15476_v49 }
 0x604   :  { %v1789_v34 = vadd.f32 %v1788_v15, %v1787_v41  ;;  %v1208_v26 = vadd.f32 %v1207_v24, %v1206_v7  ;;  %v1796_v39 = vsel %vm28_vm0, %v1490_v35, 0.0  ;;  %v1213_v24 = vsel %vm28_vm0, %v15476_v49, 0.0  ;;  %v15479_v49 = vld [vmem:[#allocation113_spill] sm:$0xff] }
 0x605   :  { %v1800_v35 = vsel %vm28_vm0, %v1492_v16, 0.0  ;;  %v360_v16 = vld [vmem:[%s14987_s0 + $0x5f8] sm:$0xff] }
 0x606   :  { %v10520_v45 = vpop.f32.mrf.mxu0  ;;  %v1791_v30 = vadd.f32 %v1790_v22, %v1789_v34  ;;  %v1211_v22 = vsel %vm28_vm0, %v15475_v33, 0.0  ;;  %v1210_v34 = vadd.f32 %v1209_v28, %v1208_v26  ;;  %v1217_v26 = vsel %vm28_vm0, %v15478_v18, 0.0 }
 0x607   :  { %15471 = vst [vmem:[#allocation150_spill] sm:$0xff] %v10520_v45 }
 0x608   :  { %v1793_v15 = vadd.f32 %v1792_v17, %v1791_v30  ;;  %v15477_v17 = vld [vmem:[#allocation111_spill] sm:$0xff]  ;;  %v1212_v1 = vadd.f32 %v1211_v22, %v1210_v34 }
 0x609   :  { %964 = vmatmul.f32.gmra.mxu0 %v358_v59  ;;  %v1491_v59 = vmul.f32 %v15475_v33, %v15475_v33  ;;  %v1493_v30 = vmul.f32 %v15477_v17, %v15477_v17  ;;  %v1215_v33 = vsel %vm28_vm0, %v15477_v17, 0.0 }
 0x60a   :  { %v1795_v37 = vadd.f32 %v1794_v43, %v1793_v15  ;;  %v1494_v43 = vmul.f32 %v15478_v18, %v15478_v18  ;;  %v1214_v15 = vadd.f32 %v1213_v24, %v1212_v1  ;;  %v15481_v1 = vld [vmem:[#allocation114_spill] sm:$0xff] }
 0x60b   :  { %v1798_v20 = vsel %vm28_vm0, %v1491_v59, 0.0  ;;  %v1802_v59 = vsel %vm28_vm0, %v1493_v30, 0.0  ;;  %v1496_v24 = vmul.f32 %v15481_v1, %v15481_v1 }
 0x60c   :  { %v1797_v7 = vadd.f32 %v1796_v39, %v1795_v37  ;;  %v1216_v22 = vadd.f32 %v1215_v33, %v1214_v15  ;;  %v1804_v34 = vsel %vm28_vm0, %v1494_v43, 0.0  ;;  %v1221_v33 = vsel %vm28_vm0, %v15481_v1, 0.0  ;;  %v15484_v1 = vld [vmem:[#allocation117_spill] sm:$0xff] }
 0x60d   :  { %v1808_v43 = vsel %vm28_vm0, %v1496_v24, 0.0  ;;  %v361_v24 = vld [vmem:[%s14987_s0 + $0x600] sm:$0xff] }
 0x60e   :  { %v10545_v41 = vpop.f32.mrf.mxu0  ;;  %v1799_v28 = vadd.f32 %v1798_v20, %v1797_v7  ;;  %v1219_v20 = vsel %vm28_vm0, %v15479_v49, 0.0  ;;  %v1218_v7 = vadd.f32 %v1217_v26, %v1216_v22  ;;  %v1225_v22 = vsel %vm28_vm0, %v15483_v14, 0.0 }
 0x610   :  { %v1801_v39 = vadd.f32 %v1800_v35, %v1799_v28  ;;  %v15482_v35 = vld [vmem:[#allocation115_spill] sm:$0xff]  ;;  %v1220_v17 = vadd.f32 %v1219_v20, %v1218_v7 }
 0x611   :  { %967 = vmatmul.f32.gmra.mxu0 %v359_v8  ;;  %v1495_v8 = vmul.f32 %v15479_v49, %v15479_v49  ;;  %v1497_v28 = vmul.f32 %v15482_v35, %v15482_v35  ;;  %v1223_v49 = vsel %vm28_vm0, %v15482_v35, 0.0 }
 0x612   :  { %v1803_v30 = vadd.f32 %v1802_v59, %v1801_v39  ;;  %v1498_v59 = vmul.f32 %v15483_v14, %v15483_v14  ;;  %v1222_v39 = vadd.f32 %v1221_v33, %v1220_v17  ;;  %v15486_v17 = vld [vmem:[#allocation118_spill] sm:$0xff] }
 0x613   :  { %v1806_v18 = vsel %vm28_vm0, %v1495_v8, 0.0  ;;  %v1810_v8 = vsel %vm28_vm0, %v1497_v28, 0.0  ;;  %v1500_v33 = vmul.f32 %v15486_v17, %v15486_v17 }
 0x614   :  { %v1805_v15 = vadd.f32 %v1804_v34, %v1803_v30  ;;  %v1224_v20 = vadd.f32 %v1223_v49, %v1222_v39  ;;  %v1812_v7 = vsel %vm28_vm0, %v1498_v59, 0.0  ;;  %v1229_v49 = vsel %vm28_vm0, %v15486_v17, 0.0  ;;  %v15489_v17 = vld [vmem:[#allocation121_spill] sm:$0xff] }
 0x615   :  { %v1816_v59 = vsel %vm28_vm0, %v1500_v33, 0.0  ;;  %v362_v33 = vld [vmem:[%s14987_s0 + $0x608] sm:$0xff] }
 0x616   :  { %v10570_v37 = vpop.f32.mrf.mxu0  ;;  %v1807_v26 = vadd.f32 %v1806_v18, %v1805_v15  ;;  %v1227_v18 = vsel %vm28_vm0, %v15484_v1, 0.0  ;;  %v1226_v15 = vadd.f32 %v1225_v22, %v1224_v20  ;;  %v1233_v20 = vsel %vm28_vm0, %v15488_v12, 0.0 }
 0x617   :  { %15480 = vst [vmem:[#allocation151_spill] sm:$0xff] %v10570_v37 }
 0x618   :  { %v1809_v34 = vadd.f32 %v1808_v43, %v1807_v26  ;;  %v15487_v43 = vld [vmem:[#allocation119_spill] sm:$0xff]  ;;  %v1228_v35 = vadd.f32 %v1227_v18, %v1226_v15 }
 0x619   :  { %970 = vmatmul.f32.gmra.mxu0 %v360_v16  ;;  %v1499_v16 = vmul.f32 %v15484_v1, %v15484_v1  ;;  %v1501_v26 = vmul.f32 %v15487_v43, %v15487_v43  ;;  %v1231_v1 = vsel %vm28_vm0, %v15487_v43, 0.0 }
 0x61a   :  { %v1811_v28 = vadd.f32 %v1810_v8, %v1809_v34  ;;  %v1502_v8 = vmul.f32 %v15488_v12, %v15488_v12  ;;  %v1230_v34 = vadd.f32 %v1229_v49, %v1228_v35  ;;  %v15491_v35 = vld [vmem:[#allocation122_spill] sm:$0xff] }
 0x61b   :  { %v1814_v14 = vsel %vm28_vm0, %v1499_v16, 0.0  ;;  %v1818_v16 = vsel %vm28_vm0, %v1501_v26, 0.0  ;;  %v1504_v49 = vmul.f32 %v15491_v35, %v15491_v35 }
 0x61c   :  { %v1813_v39 = vadd.f32 %v1812_v7, %v1811_v28  ;;  %v1232_v18 = vadd.f32 %v1231_v1, %v1230_v34  ;;  %v1820_v15 = vsel %vm28_vm0, %v1502_v8, 0.0  ;;  %v1237_v1 = vsel %vm28_vm0, %v15491_v35, 0.0  ;;  %v15494_v35 = vld [vmem:[#allocation125_spill] sm:$0xff] }
 0x61d   :  { %v1824_v8 = vsel %vm28_vm0, %v1504_v49, 0.0  ;;  %v363_v49 = vld [vmem:[%s14987_s0 + $0x610] sm:$0xff] }
 0x61e   :  { %v10595_v30 = vpop.f32.mrf.mxu0  ;;  %v1815_v22 = vadd.f32 %v1814_v14, %v1813_v39  ;;  %v1235_v14 = vsel %vm28_vm0, %v15489_v17, 0.0  ;;  %v1234_v39 = vadd.f32 %v1233_v20, %v1232_v18  ;;  %v1241_v18 = vsel %vm28_vm0, %v15493_v10, 0.0 }
 0x61f   :  { %15485 = vst [vmem:[#allocation152_spill] sm:$0xff] %v10595_v30 }
 0x620   :  { %v1817_v7 = vadd.f32 %v1816_v59, %v1815_v22  ;;  %v15492_v59 = vld [vmem:[#allocation123_spill] sm:$0xff]  ;;  %v1236_v43 = vadd.f32 %v1235_v14, %v1234_v39 }
 0x621   :  { %973 = vmatmul.f32.gmra.mxu0 %v361_v24  ;;  %v1503_v24 = vmul.f32 %v15489_v17, %v15489_v17  ;;  %v1505_v22 = vmul.f32 %v15492_v59, %v15492_v59  ;;  %v1239_v17 = vsel %vm28_vm0, %v15492_v59, 0.0 }
 0x622   :  { %v1819_v26 = vadd.f32 %v1818_v16, %v1817_v7  ;;  %v1506_v16 = vmul.f32 %v15493_v10, %v15493_v10  ;;  %v1238_v7 = vadd.f32 %v1237_v1, %v1236_v43  ;;  %v15496_v43 = vld [vmem:[#allocation126_spill] sm:$0xff] }
 0x623   :  { %v1822_v12 = vsel %vm28_vm0, %v1503_v24, 0.0  ;;  %v1826_v24 = vsel %vm28_vm0, %v1505_v22, 0.0  ;;  %v1508_v1 = vmul.f32 %v15496_v43, %v15496_v43 }
 0x624   :  { %v1821_v34 = vadd.f32 %v1820_v15, %v1819_v26  ;;  %v1240_v14 = vadd.f32 %v1239_v17, %v1238_v7  ;;  %v1828_v39 = vsel %vm28_vm0, %v1506_v16, 0.0  ;;  %v1245_v17 = vsel %vm28_vm0, %v15496_v43, 0.0  ;;  %v15499_v43 = vld [vmem:[#allocation129_spill] sm:$0xff] }
 0x625   :  { %v1832_v16 = vsel %vm28_vm0, %v1508_v1, 0.0  ;;  %v364_v1 = vld [vmem:[%s14987_s0 + $0x618] sm:$0xff] }
 0x626   :  { %v10620_v28 = vpop.f32.mrf.mxu0  ;;  %v1823_v20 = vadd.f32 %v1822_v12, %v1821_v34  ;;  %v1243_v12 = vsel %vm28_vm0, %v15494_v35, 0.0  ;;  %v1242_v34 = vadd.f32 %v1241_v18, %v1240_v14  ;;  %v1249_v14 = vsel %vm28_vm0, %v15498_v6, 0.0 }
 0x627   :  { %15490 = vst [vmem:[#allocation153_spill] sm:$0xff] %v10620_v28 }
 0x628   :  { %v1825_v15 = vadd.f32 %v1824_v8, %v1823_v20  ;;  %v15497_v8 = vld [vmem:[#allocation127_spill] sm:$0xff]  ;;  %v1244_v59 = vadd.f32 %v1243_v12, %v1242_v34 }
 0x629   :  { %976 = vmatmul.f32.gmra.mxu0 %v362_v33  ;;  %v1507_v33 = vmul.f32 %v15494_v35, %v15494_v35  ;;  %v1509_v20 = vmul.f32 %v15497_v8, %v15497_v8  ;;  %v1247_v35 = vsel %vm28_vm0, %v15497_v8, 0.0 }
 0x62a   :  { %v1827_v22 = vadd.f32 %v1826_v24, %v1825_v15  ;;  %v1510_v24 = vmul.f32 %v15498_v6, %v15498_v6  ;;  %v1246_v15 = vadd.f32 %v1245_v17, %v1244_v59  ;;  %v15500_v59 = vld [vmem:[#allocation130_spill] sm:$0xff] }
 0x62b   :  { %v1830_v10 = vsel %vm28_vm0, %v1507_v33, 0.0  ;;  %v1834_v33 = vsel %vm28_vm0, %v1509_v20, 0.0  ;;  %v1512_v17 = vmul.f32 %v15500_v59, %v15500_v59 }
 0x62c   :  { %v1829_v7 = vadd.f32 %v1828_v39, %v1827_v22  ;;  %v1248_v12 = vadd.f32 %v1247_v35, %v1246_v15  ;;  %v1836_v34 = vsel %vm28_vm0, %v1510_v24, 0.0  ;;  %v1253_v35 = vsel %vm28_vm0, %v15500_v59, 0.0  ;;  %v15503_v59 = vld [vmem:[#allocation133_spill] sm:$0xff] }
 0x62d   :  { %v1840_v24 = vsel %vm28_vm0, %v1512_v17, 0.0 }
 0x62e   :  { %v10645_v26 = vpop.f32.mrf.mxu0  ;;  %v1831_v18 = vadd.f32 %v1830_v10, %v1829_v7  ;;  %v1251_v10 = vsel %vm28_vm0, %v15499_v43, 0.0  ;;  %v1250_v7 = vadd.f32 %v1249_v14, %v1248_v12  ;;  %v1257_v12 = vsel %vm28_vm0, %v15502_v4, 0.0 }
 0x62f   :  { %15495 = vst [vmem:[#allocation154_spill] sm:$0xff] %v10645_v26 }
 0x630   :  { %v1833_v39 = vadd.f32 %v1832_v16, %v1831_v18  ;;  %v15501_v16 = vld [vmem:[#allocation131_spill] sm:$0xff]  ;;  %v1252_v8 = vadd.f32 %v1251_v10, %v1250_v7  ;;  %v1259_v7 = vsel %vm28_vm0, %v15503_v59, 0.0 }
 0x631   :  { %979 = vmatmul.f32.gmra.mxu0 %v363_v49  ;;  %v1511_v49 = vmul.f32 %v15499_v43, %v15499_v43  ;;  %v1513_v18 = vmul.f32 %v15501_v16, %v15501_v16  ;;  %v1255_v43 = vsel %vm28_vm0, %v15501_v16, 0.0  ;;  %v15504_v16 = vld [vmem:[#allocation134_spill] sm:$0xff] }
 0x632   :  { %v1835_v20 = vadd.f32 %v1834_v33, %v1833_v39  ;;  %v1514_v33 = vmul.f32 %v15502_v4, %v15502_v4  ;;  %v1254_v39 = vadd.f32 %v1253_v35, %v1252_v8  ;;  %v15505_v4 = vld [vmem:[#allocation135_spill] sm:$0xff] }
 0x633   :  { %v1838_v6 = vsel %vm28_vm0, %v1511_v49, 0.0  ;;  %v1842_v49 = vsel %vm28_vm0, %v1513_v18, 0.0 }
 0x634   :  { %v1837_v15 = vadd.f32 %v1836_v34, %v1835_v20  ;;  %v1256_v10 = vadd.f32 %v1255_v43, %v1254_v39  ;;  %v1844_v17 = vsel %vm28_vm0, %v1514_v33, 0.0  ;;  %v1517_v43 = vmul.f32 %v15505_v4, %v15505_v4 }
 0x635   :  { %v1263_v39 = vsel %vm28_vm0, %v15505_v4, 0.0  ;;  %v15508_v4 = vld [vmem:[#allocation138_spill] sm:$0xff] }
 0x636   :  { %v10670_v22 = vpop.f32.mrf.mxu0  ;;  %v1839_v14 = vadd.f32 %v1838_v6, %v1837_v15  ;;  %v1516_v6 = vmul.f32 %v15504_v16, %v15504_v16  ;;  %v1258_v35 = vadd.f32 %v1257_v12, %v1256_v10  ;;  %v1261_v15 = vsel %vm28_vm0, %v15504_v16, 0.0  ;;  %v15507_v10 = vld [vmem:[#allocation137_spill] sm:$0xff] }
 0x637   :  { %v1519_v16 = vmul.f32 %v15507_v10, %v15507_v10 }
 0x638   :  { %v1841_v34 = vadd.f32 %v1840_v24, %v1839_v14  ;;  %v1260_v14 = vadd.f32 %v1259_v7, %v1258_v35  ;;  %v1848_v33 = vsel %vm28_vm0, %v1516_v6, 0.0  ;;  %v1267_v35 = vsel %vm28_vm0, %v15507_v10, 0.0  ;;  %v15510_v10 = vld [vmem:[#allocation140_spill] sm:$0xff] }
 0x639   :  { %982 = vmatmul.f32.gmra.mxu0 %v364_v1  ;;  %v1515_v1 = vmul.f32 %v15503_v59, %v15503_v59  ;;  %v15506_v59 = vld [vmem:[#allocation136_spill] sm:$0xff]  ;;  %v1522_v62 = vmul.f32 %v15510_v10, %v15510_v10 }
 0x63a   :  { %v1843_v8 = vadd.f32 %v1842_v49, %v1841_v34  ;;  %v1518_v2 = vmul.f32 %v15506_v59, %v15506_v59  ;;  %v1262_v12 = vadd.f32 %v1261_v15, %v1260_v14  ;;  %v1265_v34 = vsel %vm28_vm0, %v15506_v59, 0.0  ;;  %v15509_v59 = vld [vmem:[#allocation139_spill] sm:$0xff] }
 0x63b   :  { %v1846_v18 = vsel %vm28_vm0, %v1515_v1, 0.0  ;;  %v1850_v1 = vsel %vm28_vm0, %v1517_v43, 0.0  ;;  %v1269_v14 = vsel %vm28_vm0, %v15508_v4, 0.0 }
 0x63c   :  { %v1845_v24 = vadd.f32 %v1844_v17, %v1843_v8  ;;  %v1264_v7 = vadd.f32 %v1263_v39, %v1262_v12  ;;  %v1852_v6 = vsel %vm28_vm0, %v1518_v2, 0.0  ;;  %v1271_v12 = vsel %vm28_vm0, %v15509_v59, 0.0 }
 0x63e   :  { %v10695_v20 = vpop.f32.mrf.mxu0  ;;  %v1847_v49 = vadd.f32 %v1846_v18, %v1845_v24  ;;  %v1520_v18 = vmul.f32 %v15508_v4, %v15508_v4  ;;  %v1266_v43 = vadd.f32 %v1265_v34, %v1264_v7  ;;  %v1854_v24 = vsel %vm28_vm0, %v1519_v16, 0.0  ;;  %v15511_v7 = vld [vmem:[#allocation141_spill] sm:$0xff] }
 0x63f   :  { %v1523_v4 = vmul.f32 %v15511_v7, %v15511_v7 }
 0x640   :  { %v1849_v17 = vadd.f32 %v1848_v33, %v1847_v49  ;;  %v1521_v33 = vmul.f32 %v15509_v59, %v15509_v59  ;;  %v1268_v49 = vadd.f32 %v1267_v35, %v1266_v43  ;;  %v1856_v2 = vsel %vm28_vm0, %v1520_v18, 0.0  ;;  %v15512_v59 = vld [vmem:[#allocation142_spill] sm:$0xff] }
 0x641   :  { %v1860_v18 = vsel %vm28_vm0, %v1522_v62, 0.0  ;;  %v1275_v43 = vsel %vm28_vm0, %v15511_v7, 0.0  ;;  %v1526_v7 = vmul.f32 %v9870_v47, %v9870_v47 }
 0x642   :  { %v1851_v15 = vadd.f32 %v1850_v1, %v1849_v17  ;;  %v1270_v34 = vadd.f32 %v1269_v14, %v1268_v49  ;;  %v1858_v16 = vsel %vm28_vm0, %v1521_v33, 0.0  ;;  %v1273_v17 = vsel %vm28_vm0, %v15510_v10, 0.0  ;;  %v15513_v10 = vld [vmem:[#allocation143_spill] sm:$0xff] }
 0x643   :  { %v1277_v49 = vsel %vm28_vm0, %v15512_v59, 0.0 }
 0x644   :  { %v1853_v39 = vadd.f32 %v1852_v6, %v1851_v15  ;;  %v1272_v35 = vadd.f32 %v1271_v12, %v1270_v34  ;;  %v1279_v34 = vsel %vm28_vm0, %v15513_v10, 0.0 }
 0x646   :  { %v10717_v8 = vpop.f32.mrf.mxu0  ;;  %v1855_v1 = vadd.f32 %v1854_v24, %v1853_v39  ;;  %v1524_v24 = vmul.f32 %v15512_v59, %v15512_v59  ;;  %v1274_v33 = vadd.f32 %v1273_v17, %v1272_v35  ;;  %v1862_v39 = vsel %vm28_vm0, %v1523_v4, 0.0 }
 0x647   :  { %v1527_v35 = vmul.f32 %v9895_v63, %v9895_v63 }
 0x648   :  { %v1857_v6 = vadd.f32 %v1856_v2, %v1855_v1  ;;  %v1525_v2 = vmul.f32 %v15513_v10, %v15513_v10  ;;  %v1276_v1 = vadd.f32 %v1275_v43, %v1274_v33  ;;  %v1864_v62 = vsel %vm28_vm0, %v1524_v24, 0.0 }
 0x649   :  { %v1868_v24 = vsel %vm28_vm0, %v1526_v7, 0.0  ;;  %v1283_v33 = vsel %vm28_vm0, %v9895_v63, 0.0  ;;  %v1530_v63 = vmul.f32 %v9970_v32, %v9970_v32 }
 0x64a   :  { %v1859_v14 = vadd.f32 %v1858_v16, %v1857_v6  ;;  %v1278_v17 = vadd.f32 %v1277_v49, %v1276_v1  ;;  %v1866_v4 = vsel %vm28_vm0, %v1525_v2, 0.0  ;;  %v1281_v6 = vsel %vm28_vm0, %v9870_v47, 0.0 }
 0x64b   :  { %v1285_v1 = vsel %vm28_vm0, %v9920_v19, 0.0 }
 0x64c   :  { %v1861_v12 = vadd.f32 %v1860_v18, %v1859_v14  ;;  %v1280_v43 = vadd.f32 %v1279_v34, %v1278_v17  ;;  %v1287_v17 = vsel %vm28_vm0, %v9945_v27, 0.0 }
 0x64e   :  { %v10739_v15 = vpop.f32.mrf.mxu0  ;;  %v1863_v16 = vadd.f32 %v1862_v39, %v1861_v12  ;;  %v1528_v39 = vmul.f32 %v9920_v19, %v9920_v19  ;;  %v1282_v2 = vadd.f32 %v1281_v6, %v1280_v43  ;;  %v1870_v12 = vsel %vm28_vm0, %v1527_v35, 0.0 }
 0x64f   :  { %v1531_v43 = vmul.f32 %v9995_v3, %v9995_v3 }
 0x650   :  { %v1865_v18 = vadd.f32 %v1864_v62, %v1863_v16  ;;  %v1529_v62 = vmul.f32 %v9945_v27, %v9945_v27  ;;  %v1284_v16 = vadd.f32 %v1283_v33, %v1282_v2  ;;  %v1872_v7 = vsel %vm28_vm0, %v1528_v39, 0.0 }
 0x651   :  { %v1876_v39 = vsel %vm28_vm0, %v1530_v63, 0.0  ;;  %v1291_v2 = vsel %vm28_vm0, %v9995_v3, 0.0  ;;  %v1534_v3 = vmul.f32 %v10070_v11, %v10070_v11 }
 0x652   :  { %v1867_v49 = vadd.f32 %v1866_v4, %v1865_v18  ;;  %v1286_v6 = vadd.f32 %v1285_v1, %v1284_v16  ;;  %v1874_v35 = vsel %vm28_vm0, %v1529_v62, 0.0  ;;  %v1289_v18 = vsel %vm28_vm0, %v9970_v32, 0.0 }
 0x653   :  { %v1293_v16 = vsel %vm28_vm0, %v10020_v36, 0.0 }
 0x654   :  { %v1869_v34 = vadd.f32 %v1868_v24, %v1867_v49  ;;  %v1288_v33 = vadd.f32 %v1287_v17, %v1286_v6  ;;  %v1295_v6 = vsel %vm28_vm0, %v10045_v55, 0.0 }
 0x656   :  { %v10761_v14 = vpop.f32.mrf.mxu0  ;;  %v1871_v4 = vadd.f32 %v1870_v12, %v1869_v34  ;;  %v1532_v12 = vmul.f32 %v10020_v36, %v10020_v36  ;;  %v1290_v62 = vadd.f32 %v1289_v18, %v1288_v33  ;;  %v1878_v34 = vsel %vm28_vm0, %v1531_v43, 0.0 }
 0x657   :  { %v1535_v33 = vmul.f32 %v10095_v40, %v10095_v40 }
 0x658   :  { %v1873_v24 = vadd.f32 %v1872_v7, %v1871_v4  ;;  %v1533_v7 = vmul.f32 %v10045_v55, %v10045_v55  ;;  %v1292_v4 = vadd.f32 %v1291_v2, %v1290_v62  ;;  %v1880_v63 = vsel %vm28_vm0, %v1532_v12, 0.0 }
 0x659   :  { %v1884_v12 = vsel %vm28_vm0, %v1534_v3, 0.0  ;;  %v1299_v62 = vsel %vm28_vm0, %v10095_v40, 0.0  ;;  %v1538_v40 = vmul.f32 %v10170_v0, %v10170_v0 }
 0x65a   :  { %v1875_v1 = vadd.f32 %v1874_v35, %v1873_v24  ;;  %v1294_v18 = vadd.f32 %v1293_v16, %v1292_v4  ;;  %v1882_v43 = vsel %vm28_vm0, %v1533_v7, 0.0  ;;  %v1297_v24 = vsel %vm28_vm0, %v10070_v11, 0.0 }
 0x65b   :  { %v1301_v4 = vsel %vm28_vm0, %v10120_v48, 0.0 }
 0x65c   :  { %v1877_v17 = vadd.f32 %v1876_v39, %v1875_v1  ;;  %v1296_v2 = vadd.f32 %v1295_v6, %v1294_v18  ;;  %v1303_v18 = vsel %vm28_vm0, %v10145_v56, 0.0 }
 0x65e   :  { %v10783_v49 = vpop.f32.mrf.mxu0  ;;  %v1879_v35 = vadd.f32 %v1878_v34, %v1877_v17  ;;  %v1536_v34 = vmul.f32 %v10120_v48, %v10120_v48  ;;  %v1298_v7 = vadd.f32 %v1297_v24, %v1296_v2  ;;  %v1886_v17 = vsel %vm28_vm0, %v1535_v33, 0.0 }
 0x65f   :  { %v1539_v2 = vmul.f32 %v10195_v31, %v10195_v31 }
 0x660   :  { %v1881_v39 = vadd.f32 %v1880_v63, %v1879_v35  ;;  %v1537_v63 = vmul.f32 %v10145_v56, %v10145_v56  ;;  %v1300_v35 = vadd.f32 %v1299_v62, %v1298_v7  ;;  %v1888_v3 = vsel %vm28_vm0, %v1536_v34, 0.0 }
 0x661   :  { %v1892_v34 = vsel %vm28_vm0, %v1538_v40, 0.0  ;;  %v1307_v7 = vsel %vm28_vm0, %v10195_v31, 0.0  ;;  %v1542_v31 = vmul.f32 %v10270_v23, %v10270_v23 }
 0x662   :  { %v1883_v16 = vadd.f32 %v1882_v43, %v1881_v39  ;;  %v1302_v24 = vadd.f32 %v1301_v4, %v1300_v35  ;;  %v1890_v33 = vsel %vm28_vm0, %v1537_v63, 0.0  ;;  %v1305_v39 = vsel %vm28_vm0, %v10170_v0, 0.0 }
 0x663   :  { %v1309_v35 = vsel %vm28_vm0, %v10220_v38, 0.0 }
 0x664   :  { %v1885_v6 = vadd.f32 %v1884_v12, %v1883_v16  ;;  %v1304_v62 = vadd.f32 %v1303_v18, %v1302_v24  ;;  %v1311_v24 = vsel %vm28_vm0, %v10245_v51, 0.0 }
 0x666   :  { %v10805_v1 = vpop.f32.mrf.mxu0  ;;  %v1887_v43 = vadd.f32 %v1886_v17, %v1885_v6  ;;  %v1540_v17 = vmul.f32 %v10220_v38, %v10220_v38  ;;  %v1306_v63 = vadd.f32 %v1305_v39, %v1304_v62  ;;  %v1894_v6 = vsel %vm28_vm0, %v1539_v2, 0.0 }
 0x667   :  { %v1543_v62 = vmul.f32 %v10295_v29, %v10295_v29 }
 0x668   :  { %v1889_v12 = vadd.f32 %v1888_v3, %v1887_v43  ;;  %v1541_v3 = vmul.f32 %v10245_v51, %v10245_v51  ;;  %v1308_v43 = vadd.f32 %v1307_v7, %v1306_v63  ;;  %v1896_v40 = vsel %vm28_vm0, %v1540_v17, 0.0 }
 0x669   :  { %v1900_v17 = vsel %vm28_vm0, %v1542_v31, 0.0  ;;  %v1315_v63 = vsel %vm28_vm0, %v10295_v29, 0.0  ;;  %v1546_v29 = vmul.f32 %v10370_v13, %v10370_v13 }
 0x66a   :  { %v1891_v4 = vadd.f32 %v1890_v33, %v1889_v12  ;;  %v1310_v39 = vadd.f32 %v1309_v35, %v1308_v43  ;;  %v1898_v2 = vsel %vm28_vm0, %v1541_v3, 0.0  ;;  %v1313_v12 = vsel %vm28_vm0, %v10270_v23, 0.0 }
 0x66b   :  { %v1317_v43 = vsel %vm28_vm0, %v10320_v25, 0.0 }
 0x66c   :  { %v1893_v18 = vadd.f32 %v1892_v34, %v1891_v4  ;;  %v1312_v7 = vadd.f32 %v1311_v24, %v1310_v39  ;;  %v1319_v39 = vsel %vm28_vm0, %v10345_v21, 0.0 }
 0x66e   :  { %v10827_v16 = vpop.f32.mrf.mxu0  ;;  %v1895_v33 = vadd.f32 %v1894_v6, %v1893_v18  ;;  %v1544_v6 = vmul.f32 %v10320_v25, %v10320_v25  ;;  %v1314_v3 = vadd.f32 %v1313_v12, %v1312_v7  ;;  %v1902_v18 = vsel %vm28_vm0, %v1543_v62, 0.0 }
 0x66f   :  { %v1547_v7 = vmul.f32 %v10395_v9, %v10395_v9 }
 0x670   :  { %v1897_v34 = vadd.f32 %v1896_v40, %v1895_v33  ;;  %v1545_v40 = vmul.f32 %v10345_v21, %v10345_v21  ;;  %v1316_v33 = vadd.f32 %v1315_v63, %v1314_v3  ;;  %v1904_v31 = vsel %vm28_vm0, %v1544_v6, 0.0 }
 0x671   :  { %v1908_v6 = vsel %vm28_vm0, %v1546_v29, 0.0  ;;  %v1323_v3 = vsel %vm28_vm0, %v10395_v9, 0.0  ;;  %v1550_v9 = vmul.f32 %v10470_v57, %v10470_v57 }
 0x672   :  { %v1899_v35 = vadd.f32 %v1898_v2, %v1897_v34  ;;  %v1318_v12 = vadd.f32 %v1317_v43, %v1316_v33  ;;  %v1906_v62 = vsel %vm28_vm0, %v1545_v40, 0.0  ;;  %v1321_v34 = vsel %vm28_vm0, %v10370_v13, 0.0 }
 0x673   :  { %v1325_v33 = vsel %vm28_vm0, %v10420_v5, 0.0 }
 0x674   :  { %v1901_v24 = vadd.f32 %v1900_v17, %v1899_v35  ;;  %v1320_v63 = vadd.f32 %v1319_v39, %v1318_v12  ;;  %v1327_v12 = vsel %vm28_vm0, %v10445_v61, 0.0 }
 0x676   :  { %v10849_v4 = vpop.f32.mrf.mxu0  ;;  %v1903_v2 = vadd.f32 %v1902_v18, %v1901_v24  ;;  %v1548_v18 = vmul.f32 %v10420_v5, %v10420_v5  ;;  %v1322_v40 = vadd.f32 %v1321_v34, %v1320_v63  ;;  %v1910_v24 = vsel %vm28_vm0, %v1547_v7, 0.0 }
 0x677   :  { %v1551_v63 = vmul.f32 %v10495_v53, %v10495_v53 }
 0x678   :  { %v1905_v17 = vadd.f32 %v1904_v31, %v1903_v2  ;;  %v1549_v31 = vmul.f32 %v10445_v61, %v10445_v61  ;;  %v1324_v2 = vadd.f32 %v1323_v3, %v1322_v40  ;;  %v1912_v29 = vsel %vm28_vm0, %v1548_v18, 0.0 }
 0x679   :  { %v1916_v18 = vsel %vm28_vm0, %v1550_v9, 0.0  ;;  %v1331_v40 = vsel %vm28_vm0, %v10495_v53, 0.0  ;;  %v1553_v9 = vmul.f32 %v10545_v41, %v10545_v41 }
 0x67a   :  { %v1907_v43 = vadd.f32 %v1906_v62, %v1905_v17  ;;  %v1326_v34 = vadd.f32 %v1325_v33, %v1324_v2  ;;  %v1914_v7 = vsel %vm28_vm0, %v1549_v31, 0.0  ;;  %v1329_v17 = vsel %vm28_vm0, %v10470_v57, 0.0  ;;  %v3019_v33 = vld [vmem:[%s14988_s2 + $0x38] sm:$0xff] }
 0x67b   :  { %3495 = vmatpush.msra.mxu2 %v3019_v33  ;;  %v1918_v2 = vsel %vm28_vm0, %v1551_v63, 0.0  ;;  %v1335_v63 = vsel %vm28_vm0, %v10545_v41, 0.0 }
 0x67c   :  { %v1909_v39 = vadd.f32 %v1908_v6, %v1907_v43  ;;  %v1328_v3 = vadd.f32 %v1327_v12, %v1326_v34  ;;  %v3018_v12 = vld [vmem:[%s14988_s2 + $0x30] sm:$0xff] }
 0x67d   :  { %3496 = vmatpush.msra.mxu2 %v3018_v12  ;;  %v1339_v12 = vsel %vm28_vm0, %v10595_v30, 0.0 }
 0x67e   :  { %v10871_v35 = vpop.f32.mrf.mxu0  ;;  %v1911_v62 = vadd.f32 %v1910_v24, %v1909_v39  ;;  %v1552_v24 = vmul.f32 %v10520_v45, %v10520_v45  ;;  %v1330_v39 = vadd.f32 %v1329_v17, %v1328_v3 }
 0x680   :  { %v1913_v6 = vadd.f32 %v1912_v29, %v1911_v62  ;;  %v1333_v29 = vsel %vm28_vm0, %v10520_v45, 0.0  ;;  %v1332_v34 = vadd.f32 %v1331_v40, %v1330_v39  ;;  %v1920_v17 = vsel %vm28_vm0, %v1552_v24, 0.0  ;;  %v3016_v24 = vld [vmem:[%s14988_s2 + $0x20] sm:$0xff] }
 0x681   :  { %v1922_v45 = vsel %vm28_vm0, %v1553_v9, 0.0  ;;  %v1555_v40 = vmul.f32 %v10595_v30, %v10595_v30 }
 0x682   :  { %v1915_v31 = vadd.f32 %v1914_v7, %v1913_v6  ;;  %v3017_v7 = vld [vmem:[%s14988_s2 + $0x28] sm:$0xff]  ;;  %v1554_v6 = vmul.f32 %v10570_v37, %v10570_v37  ;;  %v1334_v33 = vadd.f32 %v1333_v29, %v1332_v34  ;;  %v8032_v34 = vld [vmem:[%s14988_s2 + $0x78] sm:$0xff] }
 0x683   :  { %3497 = vmatpush.msra.mxu2 %v3017_v7  ;;  %v3015_v7 = vld [vmem:[%s14988_s2 + $0x18] sm:$0xff]  ;;  %3184 = vmatpush.msra.mxu1 %v8032_v34  ;;  %v3013_v34 = vld [vmem:[%s14988_s2 + $0x8] sm:$0xff] }
 0x684   :  { %v1917_v62 = vadd.f32 %v1916_v18, %v1915_v31  ;;  %v1337_v18 = vsel %vm28_vm0, %v10570_v37, 0.0  ;;  %v8138_v31 = vld [vmem:[%s14988_s2 + $0xb8] sm:$0xff]  ;;  %v1924_v9 = vsel %vm28_vm0, %v1554_v6, 0.0 }
 0x685   :  { %3498 = vmatpush.msra.mxu2 %v3016_v24  ;;  %3689 = vmatpush.msra.mxu3 %v8138_v31  ;;  %v1557_v24 = vmul.f32 %v10645_v26, %v10645_v26  ;;  %v8031_v31 = vld [vmem:[%s14988_s2 + $0x70] sm:$0xff] }
 0x686   :  { %v10893_v43 = vpop.f32.mrf.mxu0  ;;  %v1919_v3 = vadd.f32 %v1918_v2, %v1917_v62  ;;  %v1336_v2 = vadd.f32 %v1335_v63, %v1334_v33  ;;  %v1556_v62 = vmul.f32 %v10620_v28, %v10620_v28  ;;  %v1341_v33 = vsel %vm28_vm0, %v10620_v28, 0.0  ;;  %3185 = vmatpush.msra.mxu1 %v8031_v31 }
 0x687   :  { %15514 = vst [vmem:[#allocation142_spill] sm:$0xff] %v10893_v43  ;;  %3499 = vmatpush.msra.mxu2 %v3015_v7  ;;  %v8135_v7 = vld [vmem:[%s14988_s2 + $0xa0] sm:$0xff]  ;;  %v1930_v31 = vsel %vm28_vm0, %v1557_v24, 0.0  ;;  %v1559_v28 = vmul.f32 %v10695_v20, %v10695_v20 }
 0x688   :  { %v1921_v39 = vadd.f32 %v1920_v17, %v1919_v3  ;;  %v8137_v17 = vld [vmem:[%s14988_s2 + $0xb0] sm:$0xff]  ;;  %v1338_v6 = vadd.f32 %v1337_v18, %v1336_v2  ;;  %v1926_v3 = vsel %vm28_vm0, %v1555_v40, 0.0  ;;  %v8136_v18 = vld [vmem:[%s14988_s2 + $0xa8] sm:$0xff] }
 0x689   :  { %3690 = vmatpush.msra.mxu3 %v8137_v17  ;;  %v8030_v2 = vld [vmem:[%s14988_s2 + $0x68] sm:$0xff]  ;;  %v1928_v17 = vsel %vm28_vm0, %v1556_v62, 0.0 }
 0x68a   :  { %v1923_v63 = vadd.f32 %v1922_v45, %v1921_v39  ;;  %v3014_v45 = vld [vmem:[%s14988_s2 + $0x10] sm:$0xff]  ;;  %v1340_v39 = vadd.f32 %v1339_v12, %v1338_v6  ;;  %v1558_v12 = vmul.f32 %v10670_v22, %v10670_v22  ;;  %3186 = vmatpush.msra.mxu1 %v8030_v2  ;;  %v1561_v2 = vmul.f32 %v10739_v15, %v10739_v15 }
 0x68b   :  { %3500 = vmatpush.msra.mxu2 %v3014_v45  ;;  %3691 = vmatpush.msra.mxu3 %v8136_v18  ;;  %v1345_v45 = vsel %vm28_vm0, %v10670_v22, 0.0 }
 0x68c   :  { %v1925_v40 = vadd.f32 %v1924_v9, %v1923_v63  ;;  %v1343_v9 = vsel %vm28_vm0, %v10645_v26, 0.0  ;;  %v1342_v6 = vadd.f32 %v1341_v33, %v1340_v39  ;;  %v1932_v37 = vsel %vm28_vm0, %v1558_v12, 0.0 }
 0x68d   :  { %3501 = vmatpush.msra.mxu2 %v3013_v34  ;;  %3692 = vmatpush.msra.mxu3 %v8135_v7  ;;  %v1560_v33 = vmul.f32 %v10717_v8, %v10717_v8  ;;  %v1349_v39 = vsel %vm28_vm0, %v10717_v8, 0.0  ;;  %v1562_v12 = vmul.f32 %v10761_v14, %v10761_v14 }
 0x68e   :  { %v10930_v29 = vpop.f32.mrf.mxu0  ;;  %v1927_v63 = vadd.f32 %v1926_v3, %v1925_v40  ;;  %v1344_v30 = vadd.f32 %v1343_v9, %v1342_v6  ;;  %v1347_v3 = vsel %vm28_vm0, %v10695_v20, 0.0  ;;  %v1934_v40 = vsel %vm28_vm0, %v1559_v28, 0.0 }
 0x68f   :  { %15515 = vst [vmem:[#allocation143_spill] sm:$0xff] %v10930_v29  ;;  %v1351_v9 = vsel %vm28_vm0, %v10739_v15, 0.0  ;;  %v1938_v28 = vsel %vm28_vm0, %v1561_v2, 0.0  ;;  %v1353_v6 = vsel %vm28_vm0, %v10761_v14, 0.0  ;;  %v1357_v2 = vsel %vm28_vm0, %v10805_v1, 0.0 }
 0x690   :  { %v1929_v62 = vadd.f32 %v1928_v17, %v1927_v63  ;;  %v1346_v18 = vadd.f32 %v1345_v45, %v1344_v30  ;;  %v1936_v17 = vsel %vm28_vm0, %v1560_v33, 0.0  ;;  %v1355_v33 = vsel %vm28_vm0, %v10783_v49, 0.0 }
 0x692   :  { %v1931_v24 = vadd.f32 %v1930_v31, %v1929_v62  ;;  %v1348_v34 = vadd.f32 %v1347_v3, %v1346_v18  ;;  %v1563_v31 = vmul.f32 %v10783_v49, %v10783_v49  ;;  %v1940_v3 = vsel %vm28_vm0, %v1562_v12, 0.0 }
 0x693   :  { %v1359_v12 = vsel %vm28_vm0, %v10827_v16, 0.0 }
 0x694   :  { %v1933_v7 = vadd.f32 %v1932_v37, %v1931_v24  ;;  %v1350_v30 = vadd.f32 %v1349_v39, %v1348_v34  ;;  %v1564_v24 = vmul.f32 %v10805_v1, %v10805_v1  ;;  %v1942_v39 = vsel %vm28_vm0, %v1563_v31, 0.0 }
 0x695   :  { %v1565_v34 = vmul.f32 %v10827_v16, %v10827_v16  ;;  %v1361_v31 = vsel %vm28_vm0, %v10849_v4, 0.0 }
 0x696   :  { %v10979_v26 = vpop.f32.mrf.mxu0  ;;  %v1935_v63 = vadd.f32 %v1934_v40, %v1933_v7  ;;  %v1352_v37 = vadd.f32 %v1351_v9, %v1350_v30  ;;  %v1944_v9 = vsel %vm28_vm0, %v1564_v24, 0.0 }
 0x697   :  { %15516 = vst [vmem:[#allocation155_spill] sm:$0xff] %v10979_v26 }
 0x698   :  { %v1937_v45 = vadd.f32 %v1936_v17, %v1935_v63  ;;  %v1354_v40 = vadd.f32 %v1353_v6, %v1352_v37  ;;  %v1566_v63 = vmul.f32 %v10849_v4, %v10849_v4  ;;  %v1946_v6 = vsel %vm28_vm0, %v1565_v34, 0.0 }
 0x69a   :  { %v1939_v18 = vadd.f32 %v1938_v28, %v1937_v45  ;;  %v1356_v17 = vadd.f32 %v1355_v33, %v1354_v40  ;;  %v1567_v45 = vmul.f32 %v10871_v35, %v10871_v35  ;;  %v1948_v24 = vsel %vm28_vm0, %v1566_v63, 0.0 }
 0x69b   :  { %v1568_v40 = vmul.f32 %v10893_v43, %v10893_v43 }
 0x69c   :  { %v1941_v7 = vadd.f32 %v1940_v3, %v1939_v18  ;;  %v1358_v28 = vadd.f32 %v1357_v2, %v1356_v17  ;;  %v1363_v18 = vsel %vm28_vm0, %v10871_v35, 0.0  ;;  %v1950_v34 = vsel %vm28_vm0, %v1567_v45, 0.0 }
 0x69d   :  { %v1569_v17 = vmul.f32 %v10930_v29, %v10930_v29  ;;  %v1952_v63 = vsel %vm28_vm0, %v1568_v40, 0.0 }
 0x69e   :  { %v11001_v62 = vpop.f32.mrf.mxu0  ;;  %v1943_v30 = vadd.f32 %v1942_v39, %v1941_v7  ;;  %v1360_v3 = vadd.f32 %v1359_v12, %v1358_v28  ;;  %v1365_v7 = vsel %vm28_vm0, %v10893_v43, 0.0  ;;  %v1570_v28 = vmul.f32 %v10979_v26, %v10979_v26 }
 0x69f   :  { %15517 = vst [vmem:[#allocation156_spill] sm:$0xff] %v11001_v62  ;;  %v1954_v45 = vsel %vm28_vm0, %v1569_v17, 0.0 }
 0x6a0   :  { %v1945_v37 = vadd.f32 %v1944_v9, %v1943_v30  ;;  %v1362_v2 = vadd.f32 %v1361_v31, %v1360_v3  ;;  %v1367_v30 = vsel %vm28_vm0, %v10930_v29, 0.0  ;;  %v1369_v3 = vsel %vm28_vm0, %v10979_v26, 0.0 }
 0x6a1   :  { %v1371_v29 = vsel %vm28_vm0, %v11001_v62, 0.0 }
 0x6a2   :  { %v1947_v39 = vadd.f32 %v1946_v6, %v1945_v37  ;;  %v1364_v12 = vadd.f32 %v1363_v18, %v1362_v2  ;;  %v23_v37 = vlaneseq  ;;  %v1956_v2 = vsel %vm28_vm0, %v1570_v28, 0.0 }
 0x6a4   :  { %v1949_v9 = vadd.f32 %v1948_v24, %v1947_v39  ;;  %v1366_v31 = vadd.f32 %v1365_v7, %v1364_v12  ;;  %v1571_v24 = vmul.f32 %v11001_v62, %v11001_v62 }
 0x6a6   :  { %v11023_v33 = vpop.f32.mrf.mxu0  ;;  %v1951_v6 = vadd.f32 %v1950_v34, %v1949_v9  ;;  %v1368_v39 = vadd.f32 %v1367_v30, %v1366_v31  ;;  %v24_v9 = vshrl.u32 %v23_v37, 7  ;;  %v1958_v12 = vsel %vm28_vm0, %v1571_v24, 0.0 }
 0x6a7   :  { %v1572_v34 = vmul.f32 %v11023_v33, %v11023_v33  ;;  %v1373_v26 = vsel %vm28_vm0, %v11023_v33, 0.0 }
 0x6a8   :  { %v1953_v18 = vadd.f32 %v1952_v63, %v1951_v6  ;;  %v1370_v17 = vadd.f32 %v1369_v3, %v1368_v39  ;;  %vm25_vm1 = vcmp.lt.s32.totalorder %v24_v9, 2 }
 0x6a9   :  { %v1960_v28 = vsel %vm28_vm0, %v1572_v34, 0.0 }
 0x6aa   :  { %v1955_v7 = vadd.f32 %v1954_v45, %v1953_v18  ;;  %v1372_v6 = vadd.f32 %v1371_v29, %v1370_v17  ;;  %v15242_v18 = vmov 0.0  }
 0x6ab   :  { %v11064_v39 = vsel %vm25_vm1, 1.0, %v15242_v18 }
 0x6ac   :  { %v1957_v30 = vadd.f32 %v1956_v2, %v1955_v7  ;;  %v1374_v43 = vadd.f32 %v1373_v26, %v1372_v6  ;;  %15519 = vst [vmem:[#allocation158_spill] sm:$0xff] %v11064_v39 }
 0x6ae   :  { %v11045_v40 = vpop.f32.mrf.mxu0  ;;  %v1959_v62 = vadd.f32 %v1958_v12, %v1957_v30 }
 0x6af   :  { %15518 = vst [vmem:[#allocation157_spill] sm:$0xff] %v11045_v40  ;;  %v1573_v63 = vmul.f32 %v11045_v40, %v11045_v40  ;;  %v1375_v31 = vsel %vm28_vm0, %v11045_v40, 0.0 }
 0x6b0   :  { %v1961_v45 = vadd.f32 %v1960_v28, %v1959_v62  ;;  %v1376_v3 = vadd.f32 %v1375_v31, %v1374_v43 }
 0x6b1   :  { %v1962_v37 = vsel %vm28_vm0, %v1573_v63, 0.0 }
 0x6b2   :  { %v1963_v34 = vadd.f32 %v1962_v37, %v1961_v45 }
 0x6b6   :  { %v11061_v24 = vpop.f32.mrf.mxu0 }
 0x6b7   :  { %v1377_v29 = vsel %vm28_vm0, %v11061_v24, 0.0  ;;  %v1574_v2 = vmul.f32 %v11061_v24, %v11061_v24 }
 0x6b8   :  { %v1378_v7 = vadd.f32 %v1377_v29, %v1376_v3 }
 0x6b9   :  { %v1964_v26 = vsel %vm28_vm0, %v1574_v2, 0.0 }
 0x6ba   :  { %v1965_v17 = vadd.f32 %v1964_v26, %v1963_v34  ;;  %v1966_v62 = vmul.f32 %v11064_v39, %v1378_v7 }
 0x6bc   :  { %v1967_v43 = vsel %vm28_vm0, %v1966_v62, 0.0  ;;  %v1975_v9 = vmul.f32 %v11064_v39, %v1965_v17  ;;  %v15520_v62 = vmov 0.0  }
 0x6bd   :  { %v1968_v12 = vrot.slane %v1967_v43, 4  ;;  %29 = vst.msk [vmem:[#allocation2] sm:$0xff] %vm28_vm0, %v15520_v62 }
 0x6be   :  { %v1976_v63 = vsel %vm28_vm0, %v1975_v9, 0.0  ;;  %30 = vst.msk [vmem:[#allocation2 + $0x8] sm:$0xff] %vm28_vm0, %v15520_v62 }
 0x6bf   :  { %v1969_v30 = vadd.f32 %v1968_v12, %v1967_v43  ;;  %v1977_v6 = vrot.slane %v1976_v63, 4  ;;  %31 = vst.msk [vmem:[#allocation2 + $0x10] sm:$0xff] %vm28_vm0, %v15520_v62 }
 0x6c0   :  { %32 = vst.msk [vmem:[#allocation2 + $0x18] sm:$0xff] %vm28_vm0, %v15520_v62 }
 0x6c1   :  { %v1970_v28 = vrot.slane %v1969_v30, 2  ;;  %v1978_v31 = vadd.f32 %v1977_v6, %v1976_v63  ;;  %33 = vst.msk [vmem:[#allocation2 + $0x20] sm:$0xff] %vm28_vm0, %v15520_v62 }
 0x6c2   :  { %34 = vst.msk [vmem:[#allocation2 + $0x28] sm:$0xff] %vm28_vm0, %v15520_v62 }
 0x6c3   :  { %v1971_v18 = vadd.f32 %v1970_v28, %v1969_v30  ;;  %v1979_v40 = vrot.slane %v1978_v31, 2  ;;  %35 = vst.msk [vmem:[#allocation2 + $0x30] sm:$0xff] %vm28_vm0, %v15520_v62  ;;  %v986_v30 = vld [vmem:[%s14989_s3] sm:$0x1] }
 0x6c4   :  { %36 = vst.msk [vmem:[#allocation2 + $0x38] sm:$0xff] %vm28_vm0, %v15520_v62 }
 0x6c5   :  { %v1972_v37 = vrot.slane %v1971_v18, 1  ;;  %v1980_v45 = vadd.f32 %v1979_v40, %v1978_v31  ;;  %37 = vst.msk [vmem:[#allocation2 + $0x40] sm:$0xff] %vm28_vm0, %v15520_v62 }
 0x6c6   :  { %38 = vst.msk [vmem:[#allocation2 + $0x48] sm:$0xff] %vm28_vm0, %v15520_v62 }
 0x6c7   :  { %v1973_v3 = vadd.f32 %v1972_v37, %v1971_v18  ;;  %v1981_v29 = vrot.slane %v1980_v45, 1  ;;  %39 = vst.msk [vmem:[#allocation2 + $0x50] sm:$0xff] %vm28_vm0, %v15520_v62  ;;  %v987_v37 = vld [vmem:[%s14989_s3 + $0x4] sm:$0x1] }
 0x6c8   :  { %40 = vst.msk [vmem:[#allocation2 + $0x58] sm:$0xff] %vm28_vm0, %v15520_v62 }
 0x6c9   :  { %v1974_v2 = vmul.f32 0.0025510204, %v1973_v3  ;;  %v1982_v34 = vadd.f32 %v1981_v29, %v1980_v45  ;;  %41 = vst.msk [vmem:[#allocation2 + $0x60] sm:$0xff] %vm28_vm0, %v15520_v62 }
 0x6ca   :  { %42 = vst.msk [vmem:[#allocation2 + $0x68] sm:$0xff] %vm28_vm0, %v15520_v62 }
 0x6cb   :  { %v1983_v7 = vmul.f32 0.0025510204, %v1982_v34  ;;  %v1984_v26 = vmul.f32 %v1974_v2, %v1974_v2  ;;  %43 = vst.msk [vmem:[#allocation2 + $0x70] sm:$0xff] %vm28_vm0, %v15520_v62 }
 0x6cc   :  { %63 = vst.msk [vmem:[#allocation2 + $0x80] sm:$0xff] %vm28_vm0, %v15520_v62 }
 0x6cd   :  { %v1985_v17 = vsub.f32 %v1983_v7, %v1984_v26  ;;  %64 = vst.msk [vmem:[#allocation2 + $0x100] sm:$0xff] %vm28_vm0, %v15520_v62 }
 0x6ce   :  { %65 = vst.msk [vmem:[#allocation2 + $0x180] sm:$0xff] %vm28_vm0, %v15520_v62 }
 0x6cf   :  { %v1986_v43 = vadd.f32 0.001, %v1985_v17  ;;  %66 = vst.msk [vmem:[#allocation2 + $0x200] sm:$0xff] %vm28_vm0, %v15520_v62 }
 0x6d0   :  { %67 = vst.msk [vmem:[#allocation2 + $0x280] sm:$0xff] %vm28_vm0, %v15520_v62 }
 0x6d1   :  { %8884 = vrsqrt.f32 %v1986_v43  ;;  %vm1993_vm3 = vweird.f32 %v1986_v43  ;;  %68 = vst.msk [vmem:[#allocation2 + $0x300] sm:$0xff] %vm28_vm0, %v15520_v62 }
 0x6d2   :  { %69 = vst.msk [vmem:[#allocation2 + $0x380] sm:$0xff] %vm28_vm0, %v15520_v62 }
 0x6d3   :  { %70 = vst.msk [vmem:[#allocation2 + $0x400] sm:$0xff] %vm28_vm0, %v15520_v62 }
 0x6d4   :  { %71 = vst.msk [vmem:[#allocation2 + $0x480] sm:$0xff] %vm28_vm0, %v15520_v62 }
 0x6d5   :  { %72 = vst.msk [vmem:[#allocation2 + $0x500] sm:$0xff] %vm28_vm0, %v15520_v62 }
 0x6d6   :  { %73 = vst.msk [vmem:[#allocation2 + $0x580] sm:$0xff] %vm28_vm0, %v15520_v62 }
 0x6d7   :  { %v8885_v40 = vpop.eup %8884  ;;  %74 = vst.msk [vmem:[#allocation2 + $0x600] sm:$0xff] %vm28_vm0, %v15520_v62 }
 0x6d8   :  { %v1988_v18 = vmul.f32 %v8885_v40, %v1986_v43  ;;  %vm1994_vm2 = vweird.f32 %v8885_v40  ;;  %75 = vst.msk [vmem:[#allocation2 + $0x680] sm:$0xff] %vm28_vm0, %v15520_v62  ;;  %v15522_v43 = vld [vmem:[#allocation6_spill] sm:$0xff] }
 0x6d9   :  { %vm1995_vm4 = vmor %vm1993_vm3, %vm1994_vm2  ;;  %76 = vst.msk [vmem:[#allocation2 + $0x700] sm:$0xff] %vm28_vm0, %v15520_v62 }
 0x6da   :  { %v1989_v9 = vmul.f32 %v8885_v40, %v1988_v18  ;;  %92 = vst.msk [vmem:[#allocation3] sm:$0xff] %vm28_vm0, %v15520_v62  ;;  %v15523_v18 = vld [vmem:[#allocation7_spill] sm:$0xff] }
 0x6db   :  { %93 = vst.msk [vmem:[#allocation3 + $0x8] sm:$0xff] %vm28_vm0, %v15520_v62 }
 0x6dc   :  { %v1990_v12 = vmul.f32 0.5, %v1989_v9  ;;  %94 = vst.msk [vmem:[#allocation3 + $0x10] sm:$0xff] %vm28_vm0, %v15520_v62 }
 0x6dd   :  { %95 = vst.msk [vmem:[#allocation3 + $0x18] sm:$0xff] %vm28_vm0, %v15520_v62 }
 0x6de   :  { %v1991_v63 = vsub.f32 1.5, %v1990_v12  ;;  %96 = vst.msk [vmem:[#allocation3 + $0x20] sm:$0xff] %vm28_vm0, %v15520_v62  ;;  %v15524_v12 = vld [vmem:[#allocation8_spill] sm:$0xff] }
 0x6df   :  { %97 = vst.msk [vmem:[#allocation3 + $0x28] sm:$0xff] %vm28_vm0, %v15520_v62 }
 0x6e0   :  { %v1992_v6 = vmul.f32 %v8885_v40, %v1991_v63  ;;  %98 = vst.msk [vmem:[#allocation3 + $0x30] sm:$0xff] %vm28_vm0, %v15520_v62 }
 0x6e1   :  { %99 = vst.msk [vmem:[#allocation3 + $0x38] sm:$0xff] %vm28_vm0, %v15520_v62 }
 0x6e2   :  { %v1996_v28 = vsel %vm1995_vm4, %v8885_v40, %v1992_v6  ;;  %100 = vst.msk [vmem:[#allocation3 + $0x40] sm:$0xff] %vm28_vm0, %v15520_v62 }
 0x6e3   :  { %v1997_v31 = vmul.f32 %v1996_v28, %v986_v30  ;;  %103 = vst.msk [vmem:[#allocation3 + $0x280] sm:$0xff] %vm28_vm0, %v15520_v62  ;;  %v15525_v30 = vld [vmem:[#allocation9_spill] sm:$0xff] }
 0x6e4   :  { %104 = vst.msk [vmem:[#allocation3 + $0x288] sm:$0xff] %vm28_vm0, %v15520_v62 }
 0x6e5   :  { %v1998_v45 = vmul.f32 %v1997_v31, %v1974_v2  ;;  %v11131_v3 = vperm.slane %v1997_v31, 0  ;;  %105 = vst.msk [vmem:[#allocation3 + $0x290] sm:$0xff] %vm28_vm0, %v15520_v62 }
 0x6e6   :  { %106 = vst.msk [vmem:[#allocation3 + $0x298] sm:$0xff] %vm28_vm0, %v15520_v62 }
 0x6e7   :  { %v1999_v29 = vsub.f32 %v987_v37, %v1998_v45  ;;  %v2196_v34 = vmul.f32 %v11131_v3, %v11061_v24  ;;  %107 = vst.msk [vmem:[#allocation3 + $0x2a0] sm:$0xff] %vm28_vm0, %v15520_v62  ;;  %v15521_v24 = vld [vmem:[#allocation5_spill] sm:$0xff]  ;;  %v2002_v40 = vmul.f32 %v11131_v3, %v15522_v43  ;;  %v2003_v9 = vmul.f32 %v11131_v3, %v15523_v18 }
 0x6e8   :  { %108 = vst.msk [vmem:[#allocation3 + $0x2a8] sm:$0xff] %vm28_vm0, %v15520_v62  ;;  %v2001_v17 = vmul.f32 %v11131_v3, %v15521_v24  ;;  %v2004_v63 = vmul.f32 %v11131_v3, %v15524_v12  ;;  %v2005_v6 = vmul.f32 %v11131_v3, %v15525_v30  ;;  %v15526_v24 = vld [vmem:[#allocation10_spill] sm:$0xff] }
 0x6e9   :  { %v11143_v7 = vperm.slane %v1999_v29, 0  ;;  %109 = vst.msk [vmem:[#allocation3 + $0x2b0] sm:$0xff] %vm28_vm0, %v15520_v62  ;;  %v2007_v29 = vmul.f32 %v11131_v3, %v9144_v44 }
 0x6ea   :  { %110 = vst.msk [vmem:[#allocation3 + $0x2b8] sm:$0xff] %vm28_vm0, %v15520_v62 }
 0x6eb   :  { %v2393_v2 = vadd.f32 %v11143_v7, %v2196_v34  ;;  %111 = vst.msk [vmem:[#allocation3 + $0x2c0] sm:$0xff] %vm28_vm0, %v15520_v62  ;;  %v2198_v28 = vadd.f32 %v11143_v7, %v2001_v17  ;;  %v2199_v31 = vadd.f32 %v11143_v7, %v2002_v40  ;;  %v2200_v37 = vadd.f32 %v11143_v7, %v2003_v9 }
 0x6ec   :  { %124 = vst.msk [vmem:[#allocation3 + $0x50] sm:$0xff] %vm28_vm0, %v15520_v62  ;;  %v2201_v45 = vadd.f32 %v11143_v7, %v2004_v63  ;;  %v2202_v34 = vadd.f32 %v11143_v7, %v2005_v6  ;;  %v2009_v17 = vmul.f32 %v11131_v3, %v15526_v24  ;;  %v2204_v43 = vadd.f32 %v11143_v7, %v2007_v29  ;;  %v15528_v24 = vld [vmem:[#allocation12_spill] sm:$0xff] }
 0x6ed   :  { %v2589_v26 = vmax.f32 %v2393_v2, 0.0  ;;  %125 = vst.msk [vmem:[#allocation3 + $0xa0] sm:$0xff] %vm28_vm0, %v15520_v62  ;;  %v2008_v2 = vmul.f32 %v11131_v3, %v9149_v46  ;;  %v2394_v40 = vmax.f32 %v2198_v28, 0.0  ;;  %v2395_v9 = vmax.f32 %v2199_v31, 0.0  ;;  %v15527_v28 = vld [vmem:[#allocation11_spill] sm:$0xff] }
 0x6ee   :  { %126 = vst.msk [vmem:[#allocation3 + $0xf0] sm:$0xff] %vm28_vm0, %v15520_v62  ;;  %v2396_v44 = vmax.f32 %v2200_v37, 0.0  ;;  %v2397_v12 = vmax.f32 %v2201_v45, 0.0  ;;  %v2011_v63 = vmul.f32 %v11131_v3, %v9164_v52  ;;  %v2206_v46 = vadd.f32 %v11143_v7, %v2009_v17 }
 0x6ef   :  { %2786 = vst.msk [vmem:[#allocation2 + $0x770] sm:$0xff] %vm28_vm0, %v2589_v26  ;;  %v2205_v18 = vadd.f32 %v11143_v7, %v2008_v2  ;;  %v2398_v30 = vmax.f32 %v2202_v34, 0.0  ;;  %v2012_v6 = vmul.f32 %v11131_v3, %v9169_v54  ;;  %v2013_v31 = vmul.f32 %v11131_v3, %v15527_v28 }
 0x6f0   :  { %127 = vst.msk [vmem:[#allocation3 + $0x140] sm:$0xff] %vm28_vm0, %v15520_v62  ;;  %v2208_v37 = vadd.f32 %v11143_v7, %v2011_v63  ;;  %v2400_v45 = vmax.f32 %v2204_v43, 0.0  ;;  %v2014_v52 = vmul.f32 %v11131_v3, %v9179_v58  ;;  %v2015_v54 = vmul.f32 %v11131_v3, %v9184_v60  ;;  %v15529_v58 = vld [vmem:[#allocation13_spill] sm:$0xff]  ;;  %v15530_v60 = vld [vmem:[#allocation14_spill] sm:$0xff] }
 0x6f1   :  { %128 = vst.msk [vmem:[#allocation3 + $0x190] sm:$0xff] %vm28_vm0, %v15520_v62  ;;  %v2209_v29 = vadd.f32 %v11143_v7, %v2012_v6  ;;  %v2401_v34 = vmax.f32 %v2205_v18, 0.0  ;;  %v2210_v2 = vadd.f32 %v11143_v7, %v2013_v31  ;;  %v2016_v17 = vmul.f32 %v11131_v3, %v15528_v24 }
 0x6f2   :  { %129 = vst.msk [vmem:[#allocation3 + $0x1e0] sm:$0xff] %vm28_vm0, %v15520_v62  ;;  %v2212_v18 = vadd.f32 %v11143_v7, %v2015_v54  ;;  %v15534_v54 = vld [vmem:[#allocation18_spill] sm:$0xff] }
 0x6f3   :  { %130 = vst.msk [vmem:[#allocation3 + $0x230] sm:$0xff] %vm28_vm0, %v15520_v62  ;;  %v2405_v63 = vmax.f32 %v2209_v29, 0.0 }
 0x6f4   :  { %132 = vst.msk [vmem:[#allocation3 + $0x90] sm:$0xff] %vm28_vm0, %v15520_v62 }
 0x6f5   :  { %134 = vst.msk [vmem:[#allocation3 + $0xe0] sm:$0xff] %vm28_vm0, %v15520_v62 }
 0x6f6   :  { %136 = vst.msk [vmem:[#allocation3 + $0x130] sm:$0xff] %vm28_vm0, %v15520_v62 }
 0x6f7   :  { %138 = vst.msk [vmem:[#allocation3 + $0x180] sm:$0xff] %vm28_vm0, %v15520_v62 }
 0x6f8   :  { %140 = vst.msk [vmem:[#allocation3 + $0x1d0] sm:$0xff] %vm28_vm0, %v15520_v62 }
 0x6f9   :  { %142 = vst.msk [vmem:[#allocation3 + $0x220] sm:$0xff] %vm28_vm0, %v15520_v62 }
 0x6fa   :  { %144 = vst.msk [vmem:[#allocation3 + $0x270] sm:$0xff] %vm28_vm0, %v15520_v62 }
 0x6fb   :  { %146 = vst.msk [vmem:[#allocation4] sm:$0xff] %vm28_vm0, %v15520_v62 }
 0x6fc   :  { %147 = vst.msk [vmem:[#allocation4 + $0x8] sm:$0xff] %vm28_vm0, %v15520_v62 }
 0x6fd   :  { %148 = vst.msk [vmem:[#allocation4 + $0x10] sm:$0xff] %vm28_vm0, %v15520_v62 }
 0x6fe   :  { %149 = vst.msk [vmem:[#allocation4 + $0x18] sm:$0xff] %vm28_vm0, %v15520_v62 }
 0x6ff   :  { %150 = vst.msk [vmem:[#allocation4 + $0x20] sm:$0xff] %vm28_vm0, %v15520_v62 }
 0x700   :  { %160 = vst.msk [vmem:[#allocation4 + $0x30] sm:$0xff] %vm28_vm0, %v15520_v62 }
 0x701   :  { %161 = vst.msk [vmem:[#allocation4 + $0x60] sm:$0xff] %vm28_vm0, %v15520_v62 }
 0x702   :  { %162 = vst.msk [vmem:[#allocation4 + $0x90] sm:$0xff] %vm28_vm0, %v15520_v62 }
 0x703   :  { %163 = vst.msk [vmem:[#allocation4 + $0xc0] sm:$0xff] %vm28_vm0, %v15520_v62  ;;  %v2006_v62 = vmul.f32 %v11131_v3, %v9139_v42  ;;  %v2010_v42 = vmul.f32 %v11131_v3, %v9159_v50 }
 0x704   :  { %2591 = vst.msk [vmem:[#allocation2 + $0x88] sm:$0xff] %vm28_vm0, %v2394_v40  ;;  %v2017_v40 = vmul.f32 %v11131_v3, %v15529_v58 }
 0x705   :  { %v2203_v26 = vadd.f32 %v11143_v7, %v2006_v62  ;;  %v2207_v50 = vadd.f32 %v11143_v7, %v2010_v42  ;;  %2592 = vst.msk [vmem:[#allocation2 + $0x90] sm:$0xff] %vm28_vm0, %v2395_v9  ;;  %v2211_v42 = vadd.f32 %v11143_v7, %v2014_v52  ;;  %v2404_v9 = vmax.f32 %v2208_v37, 0.0 }
 0x706   :  { %2593 = vst.msk [vmem:[#allocation2 + $0x98] sm:$0xff] %vm28_vm0, %v2396_v44  ;;  %v2018_v44 = vmul.f32 %v11131_v3, %v15530_v60  ;;  %v2214_v6 = vadd.f32 %v11143_v7, %v2017_v40  ;;  %v15536_v40 = vld [vmem:[#allocation20_spill] sm:$0xff] }
 0x707   :  { %v2399_v62 = vmax.f32 %v2203_v26, 0.0  ;;  %2594 = vst.msk [vmem:[#allocation2 + $0xa0] sm:$0xff] %vm28_vm0, %v2397_v12  ;;  %v2402_v26 = vmax.f32 %v2206_v46, 0.0  ;;  %v2403_v43 = vmax.f32 %v2207_v50, 0.0  ;;  %v2213_v12 = vadd.f32 %v11143_v7, %v2016_v17  ;;  %v15531_v46 = vld [vmem:[#allocation15_spill] sm:$0xff] }
 0x708   :  { %2595 = vst.msk [vmem:[#allocation2 + $0xa8] sm:$0xff] %vm28_vm0, %v2398_v30  ;;  %v2019_v30 = vmul.f32 %v11131_v3, %v15531_v46  ;;  %v2406_v50 = vmax.f32 %v2210_v2, 0.0  ;;  %v2215_v31 = vadd.f32 %v11143_v7, %v2018_v44  ;;  %v2407_v37 = vmax.f32 %v2211_v42, 0.0  ;;  %v15535_v17 = vld [vmem:[#allocation19_spill] sm:$0xff]  ;;  %v15537_v44 = vld [vmem:[#allocation21_spill] sm:$0xff] }
 0x709   :  { %2596 = vst.msk [vmem:[#allocation2 + $0xb0] sm:$0xff] %vm28_vm0, %v2399_v62  ;;  %v15532_v62 = vld [vmem:[#allocation16_spill] sm:$0xff]  ;;  %v2022_v2 = vmul.f32 %v11131_v3, %v15534_v54  ;;  %v2409_v24 = vmax.f32 %v2213_v12, 0.0  ;;  %v2023_v42 = vmul.f32 %v11131_v3, %v15535_v17  ;;  %v2410_v58 = vmax.f32 %v2214_v6, 0.0 }
 0x70a   :  { %2597 = vst.msk [vmem:[#allocation2 + $0xb8] sm:$0xff] %vm28_vm0, %v2400_v45  ;;  %v2020_v28 = vmul.f32 %v11131_v3, %v15532_v62  ;;  %v15533_v45 = vld [vmem:[#allocation17_spill] sm:$0xff]  ;;  %v2216_v29 = vadd.f32 %v11143_v7, %v2019_v30  ;;  %v2411_v60 = vmax.f32 %v2215_v31, 0.0  ;;  %v2025_v12 = vmul.f32 %v11131_v3, %v15537_v44  ;;  %v15538_v30 = vld [vmem:[#allocation22_spill] sm:$0xff] }
 0x70b   :  { %2598 = vst.msk [vmem:[#allocation2 + $0xc0] sm:$0xff] %vm28_vm0, %v2401_v34  ;;  %v2021_v52 = vmul.f32 %v11131_v3, %v15533_v45  ;;  %v2408_v34 = vmax.f32 %v2212_v18, 0.0  ;;  %v2024_v18 = vmul.f32 %v11131_v3, %v15536_v40  ;;  %v2026_v6 = vmul.f32 %v11131_v3, %v15538_v30 }
 0x70c   :  { %2599 = vst.msk [vmem:[#allocation2 + $0xc8] sm:$0xff] %vm28_vm0, %v2402_v26  ;;  %v2217_v26 = vadd.f32 %v11143_v7, %v2020_v28  ;;  %v2412_v46 = vmax.f32 %v2216_v29, 0.0  ;;  %v15539_v28 = vld [vmem:[#allocation23_spill] sm:$0xff] }
 0x70d   :  { %2600 = vst.msk [vmem:[#allocation2 + $0xd0] sm:$0xff] %vm28_vm0, %v2403_v43  ;;  %v2218_v43 = vadd.f32 %v11143_v7, %v2021_v52  ;;  %v2027_v31 = vmul.f32 %v11131_v3, %v15539_v28  ;;  %v15540_v52 = vld [vmem:[#allocation24_spill] sm:$0xff] }
 0x70e   :  { %2601 = vst.msk [vmem:[#allocation2 + $0xd8] sm:$0xff] %vm28_vm0, %v2404_v9  ;;  %v2219_v9 = vadd.f32 %v11143_v7, %v2022_v2  ;;  %v2413_v62 = vmax.f32 %v2217_v26, 0.0  ;;  %v2028_v29 = vmul.f32 %v11131_v3, %v15540_v52  ;;  %v15541_v2 = vld [vmem:[#allocation25_spill] sm:$0xff] }
 0x70f   :  { %2602 = vst.msk [vmem:[#allocation2 + $0xe0] sm:$0xff] %vm28_vm0, %v2405_v63  ;;  %v2220_v63 = vadd.f32 %v11143_v7, %v2023_v42  ;;  %v2414_v45 = vmax.f32 %v2218_v43, 0.0  ;;  %v2029_v26 = vmul.f32 %v11131_v3, %v15541_v2  ;;  %v15542_v42 = vld [vmem:[#allocation26_spill] sm:$0xff] }
 0x710   :  { %2603 = vst.msk [vmem:[#allocation2 + $0xe8] sm:$0xff] %vm28_vm0, %v2406_v50  ;;  %v2221_v50 = vadd.f32 %v11143_v7, %v2024_v18  ;;  %v2415_v54 = vmax.f32 %v2219_v9, 0.0  ;;  %v2030_v43 = vmul.f32 %v11131_v3, %v15542_v42  ;;  %v15543_v18 = vld [vmem:[#allocation27_spill] sm:$0xff] }
 0x711   :  { %2604 = vst.msk [vmem:[#allocation2 + $0xf0] sm:$0xff] %vm28_vm0, %v2407_v37  ;;  %v2222_v37 = vadd.f32 %v11143_v7, %v2025_v12  ;;  %v2416_v17 = vmax.f32 %v2220_v63, 0.0  ;;  %v2031_v9 = vmul.f32 %v11131_v3, %v15543_v18  ;;  %v15544_v12 = vld [vmem:[#allocation28_spill] sm:$0xff] }
 0x712   :  { %2605 = vst.msk [vmem:[#allocation2 + $0x108] sm:$0xff] %vm28_vm0, %v2408_v34  ;;  %v2223_v34 = vadd.f32 %v11143_v7, %v2026_v6  ;;  %v2417_v40 = vmax.f32 %v2221_v50, 0.0  ;;  %v2032_v63 = vmul.f32 %v11131_v3, %v15544_v12  ;;  %v15545_v6 = vld [vmem:[#allocation29_spill] sm:$0xff] }
 0x713   :  { %2606 = vst.msk [vmem:[#allocation2 + $0x110] sm:$0xff] %vm28_vm0, %v2409_v24  ;;  %v2224_v24 = vadd.f32 %v11143_v7, %v2027_v31  ;;  %v2418_v44 = vmax.f32 %v2222_v37, 0.0  ;;  %v2033_v50 = vmul.f32 %v11131_v3, %v15545_v6  ;;  %v15546_v31 = vld [vmem:[#allocation30_spill] sm:$0xff] }
 0x714   :  { %2607 = vst.msk [vmem:[#allocation2 + $0x118] sm:$0xff] %vm28_vm0, %v2410_v58  ;;  %v2225_v58 = vadd.f32 %v11143_v7, %v2028_v29  ;;  %v2419_v30 = vmax.f32 %v2223_v34, 0.0  ;;  %v2034_v37 = vmul.f32 %v11131_v3, %v15546_v31  ;;  %v15547_v29 = vld [vmem:[#allocation31_spill] sm:$0xff] }
 0x715   :  { %2608 = vst.msk [vmem:[#allocation2 + $0x120] sm:$0xff] %vm28_vm0, %v2411_v60  ;;  %v2226_v60 = vadd.f32 %v11143_v7, %v2029_v26  ;;  %v2420_v28 = vmax.f32 %v2224_v24, 0.0  ;;  %v2035_v34 = vmul.f32 %v11131_v3, %v15547_v29  ;;  %v15548_v26 = vld [vmem:[#allocation32_spill] sm:$0xff] }
 0x716   :  { %2609 = vst.msk [vmem:[#allocation2 + $0x128] sm:$0xff] %vm28_vm0, %v2412_v46  ;;  %v2227_v46 = vadd.f32 %v11143_v7, %v2030_v43  ;;  %v2421_v52 = vmax.f32 %v2225_v58, 0.0  ;;  %v2036_v24 = vmul.f32 %v11131_v3, %v15548_v26  ;;  %v15549_v43 = vld [vmem:[#allocation33_spill] sm:$0xff] }
 0x717   :  { %2610 = vst.msk [vmem:[#allocation2 + $0x130] sm:$0xff] %vm28_vm0, %v2413_v62  ;;  %v2228_v62 = vadd.f32 %v11143_v7, %v2031_v9  ;;  %v2422_v2 = vmax.f32 %v2226_v60, 0.0  ;;  %v2037_v58 = vmul.f32 %v11131_v3, %v15549_v43  ;;  %v15550_v9 = vld [vmem:[#allocation34_spill] sm:$0xff] }
 0x718   :  { %2611 = vst.msk [vmem:[#allocation2 + $0x138] sm:$0xff] %vm28_vm0, %v2414_v45  ;;  %v2229_v45 = vadd.f32 %v11143_v7, %v2032_v63  ;;  %v2423_v42 = vmax.f32 %v2227_v46, 0.0  ;;  %v2038_v60 = vmul.f32 %v11131_v3, %v15550_v9  ;;  %v15551_v63 = vld [vmem:[#allocation35_spill] sm:$0xff] }
 0x719   :  { %2612 = vst.msk [vmem:[#allocation2 + $0x140] sm:$0xff] %vm28_vm0, %v2415_v54  ;;  %v2230_v54 = vadd.f32 %v11143_v7, %v2033_v50  ;;  %v2424_v18 = vmax.f32 %v2228_v62, 0.0  ;;  %v2039_v46 = vmul.f32 %v11131_v3, %v15551_v63  ;;  %v15552_v50 = vld [vmem:[#allocation36_spill] sm:$0xff] }
 0x71a   :  { %2613 = vst.msk [vmem:[#allocation2 + $0x148] sm:$0xff] %vm28_vm0, %v2416_v17  ;;  %v2231_v17 = vadd.f32 %v11143_v7, %v2034_v37  ;;  %v2425_v12 = vmax.f32 %v2229_v45, 0.0  ;;  %v2040_v62 = vmul.f32 %v11131_v3, %v15552_v50  ;;  %v15553_v37 = vld [vmem:[#allocation37_spill] sm:$0xff] }
 0x71b   :  { %2614 = vst.msk [vmem:[#allocation2 + $0x150] sm:$0xff] %vm28_vm0, %v2417_v40  ;;  %v2232_v40 = vadd.f32 %v11143_v7, %v2035_v34  ;;  %v2426_v6 = vmax.f32 %v2230_v54, 0.0  ;;  %v2041_v45 = vmul.f32 %v11131_v3, %v15553_v37  ;;  %v15554_v34 = vld [vmem:[#allocation38_spill] sm:$0xff] }
 0x71c   :  { %2615 = vst.msk [vmem:[#allocation2 + $0x158] sm:$0xff] %vm28_vm0, %v2418_v44  ;;  %v2233_v44 = vadd.f32 %v11143_v7, %v2036_v24  ;;  %v2427_v31 = vmax.f32 %v2231_v17, 0.0  ;;  %v2042_v54 = vmul.f32 %v11131_v3, %v15554_v34  ;;  %v15555_v24 = vld [vmem:[#allocation39_spill] sm:$0xff] }
 0x71d   :  { %2616 = vst.msk [vmem:[#allocation2 + $0x160] sm:$0xff] %vm28_vm0, %v2419_v30  ;;  %v2234_v30 = vadd.f32 %v11143_v7, %v2037_v58  ;;  %v2428_v29 = vmax.f32 %v2232_v40, 0.0  ;;  %v2043_v17 = vmul.f32 %v11131_v3, %v15555_v24  ;;  %v15556_v58 = vld [vmem:[#allocation40_spill] sm:$0xff] }
 0x71e   :  { %2617 = vst.msk [vmem:[#allocation2 + $0x168] sm:$0xff] %vm28_vm0, %v2420_v28  ;;  %v2235_v28 = vadd.f32 %v11143_v7, %v2038_v60  ;;  %v2429_v26 = vmax.f32 %v2233_v44, 0.0  ;;  %v2044_v40 = vmul.f32 %v11131_v3, %v15556_v58  ;;  %v15557_v60 = vld [vmem:[#allocation41_spill] sm:$0xff] }
 0x71f   :  { %2618 = vst.msk [vmem:[#allocation2 + $0x170] sm:$0xff] %vm28_vm0, %v2421_v52  ;;  %v2236_v52 = vadd.f32 %v11143_v7, %v2039_v46  ;;  %v2430_v43 = vmax.f32 %v2234_v30, 0.0  ;;  %v2045_v44 = vmul.f32 %v11131_v3, %v15557_v60  ;;  %v15558_v46 = vld [vmem:[#allocation42_spill] sm:$0xff] }
 0x720   :  { %2619 = vst.msk [vmem:[#allocation2 + $0x188] sm:$0xff] %vm28_vm0, %v2422_v2  ;;  %v2237_v2 = vadd.f32 %v11143_v7, %v2040_v62  ;;  %v2431_v9 = vmax.f32 %v2235_v28, 0.0  ;;  %v2046_v30 = vmul.f32 %v11131_v3, %v15558_v46  ;;  %v15559_v62 = vld [vmem:[#allocation43_spill] sm:$0xff] }
 0x721   :  { %2620 = vst.msk [vmem:[#allocation2 + $0x190] sm:$0xff] %vm28_vm0, %v2423_v42  ;;  %v2238_v42 = vadd.f32 %v11143_v7, %v2041_v45  ;;  %v2432_v63 = vmax.f32 %v2236_v52, 0.0  ;;  %v2047_v28 = vmul.f32 %v11131_v3, %v15559_v62  ;;  %v15560_v45 = vld [vmem:[#allocation44_spill] sm:$0xff] }
 0x722   :  { %2621 = vst.msk [vmem:[#allocation2 + $0x198] sm:$0xff] %vm28_vm0, %v2424_v18  ;;  %v2239_v18 = vadd.f32 %v11143_v7, %v2042_v54  ;;  %v2433_v50 = vmax.f32 %v2237_v2, 0.0  ;;  %v2048_v52 = vmul.f32 %v11131_v3, %v15560_v45  ;;  %v15561_v54 = vld [vmem:[#allocation45_spill] sm:$0xff] }
 0x723   :  { %2622 = vst.msk [vmem:[#allocation2 + $0x1a0] sm:$0xff] %vm28_vm0, %v2425_v12  ;;  %v2240_v12 = vadd.f32 %v11143_v7, %v2043_v17  ;;  %v2434_v37 = vmax.f32 %v2238_v42, 0.0  ;;  %v2049_v2 = vmul.f32 %v11131_v3, %v15561_v54  ;;  %v15562_v17 = vld [vmem:[#allocation46_spill] sm:$0xff] }
 0x724   :  { %2623 = vst.msk [vmem:[#allocation2 + $0x1a8] sm:$0xff] %vm28_vm0, %v2426_v6  ;;  %v2241_v6 = vadd.f32 %v11143_v7, %v2044_v40  ;;  %v2435_v34 = vmax.f32 %v2239_v18, 0.0  ;;  %v2050_v42 = vmul.f32 %v11131_v3, %v15562_v17  ;;  %v15563_v40 = vld [vmem:[#allocation47_spill] sm:$0xff] }
 0x725   :  { %2624 = vst.msk [vmem:[#allocation2 + $0x1b0] sm:$0xff] %vm28_vm0, %v2427_v31  ;;  %v2242_v31 = vadd.f32 %v11143_v7, %v2045_v44  ;;  %v2436_v24 = vmax.f32 %v2240_v12, 0.0  ;;  %v2051_v18 = vmul.f32 %v11131_v3, %v15563_v40  ;;  %v15564_v44 = vld [vmem:[#allocation48_spill] sm:$0xff] }
 0x726   :  { %2625 = vst.msk [vmem:[#allocation2 + $0x1b8] sm:$0xff] %vm28_vm0, %v2428_v29  ;;  %v2243_v29 = vadd.f32 %v11143_v7, %v2046_v30  ;;  %v2437_v58 = vmax.f32 %v2241_v6, 0.0  ;;  %v2052_v12 = vmul.f32 %v11131_v3, %v15564_v44  ;;  %v15565_v30 = vld [vmem:[#allocation49_spill] sm:$0xff] }
 0x727   :  { %2626 = vst.msk [vmem:[#allocation2 + $0x1c0] sm:$0xff] %vm28_vm0, %v2429_v26  ;;  %v2244_v26 = vadd.f32 %v11143_v7, %v2047_v28  ;;  %v2438_v60 = vmax.f32 %v2242_v31, 0.0  ;;  %v2053_v6 = vmul.f32 %v11131_v3, %v15565_v30  ;;  %v15566_v28 = vld [vmem:[#allocation50_spill] sm:$0xff] }
 0x728   :  { %2627 = vst.msk [vmem:[#allocation2 + $0x1c8] sm:$0xff] %vm28_vm0, %v2430_v43  ;;  %v2245_v43 = vadd.f32 %v11143_v7, %v2048_v52  ;;  %v2439_v46 = vmax.f32 %v2243_v29, 0.0  ;;  %v2054_v31 = vmul.f32 %v11131_v3, %v15566_v28  ;;  %v15567_v52 = vld [vmem:[#allocation51_spill] sm:$0xff] }
 0x729   :  { %2628 = vst.msk [vmem:[#allocation2 + $0x1d0] sm:$0xff] %vm28_vm0, %v2431_v9  ;;  %v2246_v9 = vadd.f32 %v11143_v7, %v2049_v2  ;;  %v2440_v62 = vmax.f32 %v2244_v26, 0.0  ;;  %v2055_v29 = vmul.f32 %v11131_v3, %v15567_v52  ;;  %v15568_v2 = vld [vmem:[#allocation52_spill] sm:$0xff] }
 0x72a   :  { %2629 = vst.msk [vmem:[#allocation2 + $0x1d8] sm:$0xff] %vm28_vm0, %v2432_v63  ;;  %v2247_v63 = vadd.f32 %v11143_v7, %v2050_v42  ;;  %v2441_v45 = vmax.f32 %v2245_v43, 0.0  ;;  %v2056_v26 = vmul.f32 %v11131_v3, %v15568_v2  ;;  %v15569_v42 = vld [vmem:[#allocation53_spill] sm:$0xff] }
 0x72b   :  { %2630 = vst.msk [vmem:[#allocation2 + $0x1e0] sm:$0xff] %vm28_vm0, %v2433_v50  ;;  %v2248_v50 = vadd.f32 %v11143_v7, %v2051_v18  ;;  %v2442_v54 = vmax.f32 %v2246_v9, 0.0  ;;  %v2057_v43 = vmul.f32 %v11131_v3, %v15569_v42  ;;  %v15570_v18 = vld [vmem:[#allocation54_spill] sm:$0xff] }
 0x72c   :  { %2631 = vst.msk [vmem:[#allocation2 + $0x1e8] sm:$0xff] %vm28_vm0, %v2434_v37  ;;  %v2249_v37 = vadd.f32 %v11143_v7, %v2052_v12  ;;  %v2443_v17 = vmax.f32 %v2247_v63, 0.0  ;;  %v2058_v9 = vmul.f32 %v11131_v3, %v15570_v18  ;;  %v15571_v12 = vld [vmem:[#allocation55_spill] sm:$0xff] }
 0x72d   :  { %2632 = vst.msk [vmem:[#allocation2 + $0x1f0] sm:$0xff] %vm28_vm0, %v2435_v34  ;;  %v2250_v34 = vadd.f32 %v11143_v7, %v2053_v6  ;;  %v2444_v40 = vmax.f32 %v2248_v50, 0.0  ;;  %v2059_v63 = vmul.f32 %v11131_v3, %v15571_v12  ;;  %v15572_v6 = vld [vmem:[#allocation56_spill] sm:$0xff] }
 0x72e   :  { %2633 = vst.msk [vmem:[#allocation2 + $0x208] sm:$0xff] %vm28_vm0, %v2436_v24  ;;  %v2251_v24 = vadd.f32 %v11143_v7, %v2054_v31  ;;  %v2445_v44 = vmax.f32 %v2249_v37, 0.0  ;;  %v2060_v50 = vmul.f32 %v11131_v3, %v15572_v6  ;;  %v15573_v31 = vld [vmem:[#allocation57_spill] sm:$0xff] }
 0x72f   :  { %2634 = vst.msk [vmem:[#allocation2 + $0x210] sm:$0xff] %vm28_vm0, %v2437_v58  ;;  %v2252_v58 = vadd.f32 %v11143_v7, %v2055_v29  ;;  %v2446_v30 = vmax.f32 %v2250_v34, 0.0  ;;  %v2061_v37 = vmul.f32 %v11131_v3, %v15573_v31  ;;  %v15574_v29 = vld [vmem:[#allocation58_spill] sm:$0xff] }
 0x730   :  { %2635 = vst.msk [vmem:[#allocation2 + $0x218] sm:$0xff] %vm28_vm0, %v2438_v60  ;;  %v2253_v60 = vadd.f32 %v11143_v7, %v2056_v26  ;;  %v2447_v28 = vmax.f32 %v2251_v24, 0.0  ;;  %v2062_v34 = vmul.f32 %v11131_v3, %v15574_v29  ;;  %v15575_v26 = vld [vmem:[#allocation59_spill] sm:$0xff] }
 0x731   :  { %2636 = vst.msk [vmem:[#allocation2 + $0x220] sm:$0xff] %vm28_vm0, %v2439_v46  ;;  %v2254_v46 = vadd.f32 %v11143_v7, %v2057_v43  ;;  %v2448_v52 = vmax.f32 %v2252_v58, 0.0  ;;  %v2063_v24 = vmul.f32 %v11131_v3, %v15575_v26  ;;  %v15576_v43 = vld [vmem:[#allocation60_spill] sm:$0xff] }
 0x732   :  { %2637 = vst.msk [vmem:[#allocation2 + $0x228] sm:$0xff] %vm28_vm0, %v2440_v62  ;;  %v2255_v62 = vadd.f32 %v11143_v7, %v2058_v9  ;;  %v2449_v2 = vmax.f32 %v2253_v60, 0.0  ;;  %v2064_v58 = vmul.f32 %v11131_v3, %v15576_v43  ;;  %v15577_v9 = vld [vmem:[#allocation61_spill] sm:$0xff] }
 0x733   :  { %2638 = vst.msk [vmem:[#allocation2 + $0x230] sm:$0xff] %vm28_vm0, %v2441_v45  ;;  %v2256_v45 = vadd.f32 %v11143_v7, %v2059_v63  ;;  %v2450_v42 = vmax.f32 %v2254_v46, 0.0  ;;  %v2065_v60 = vmul.f32 %v11131_v3, %v15577_v9  ;;  %v15578_v63 = vld [vmem:[#allocation62_spill] sm:$0xff] }
 0x734   :  { %2639 = vst.msk [vmem:[#allocation2 + $0x238] sm:$0xff] %vm28_vm0, %v2442_v54  ;;  %v2257_v54 = vadd.f32 %v11143_v7, %v2060_v50  ;;  %v2451_v18 = vmax.f32 %v2255_v62, 0.0  ;;  %v2066_v46 = vmul.f32 %v11131_v3, %v15578_v63  ;;  %v15579_v50 = vld [vmem:[#allocation63_spill] sm:$0xff] }
 0x735   :  { %2640 = vst.msk [vmem:[#allocation2 + $0x240] sm:$0xff] %vm28_vm0, %v2443_v17  ;;  %v2258_v17 = vadd.f32 %v11143_v7, %v2061_v37  ;;  %v2452_v12 = vmax.f32 %v2256_v45, 0.0  ;;  %v2067_v62 = vmul.f32 %v11131_v3, %v15579_v50  ;;  %v15580_v37 = vld [vmem:[#allocation64_spill] sm:$0xff] }
 0x736   :  { %2641 = vst.msk [vmem:[#allocation2 + $0x248] sm:$0xff] %vm28_vm0, %v2444_v40  ;;  %v2259_v40 = vadd.f32 %v11143_v7, %v2062_v34  ;;  %v2453_v6 = vmax.f32 %v2257_v54, 0.0  ;;  %v2068_v45 = vmul.f32 %v11131_v3, %v15580_v37  ;;  %v15581_v34 = vld [vmem:[#allocation65_spill] sm:$0xff] }
 0x737   :  { %2642 = vst.msk [vmem:[#allocation2 + $0x250] sm:$0xff] %vm28_vm0, %v2445_v44  ;;  %v2260_v44 = vadd.f32 %v11143_v7, %v2063_v24  ;;  %v2454_v31 = vmax.f32 %v2258_v17, 0.0  ;;  %v2069_v54 = vmul.f32 %v11131_v3, %v15581_v34  ;;  %v15582_v24 = vld [vmem:[#allocation66_spill] sm:$0xff] }
 0x738   :  { %2643 = vst.msk [vmem:[#allocation2 + $0x258] sm:$0xff] %vm28_vm0, %v2446_v30  ;;  %v2261_v30 = vadd.f32 %v11143_v7, %v2064_v58  ;;  %v2455_v29 = vmax.f32 %v2259_v40, 0.0  ;;  %v2070_v17 = vmul.f32 %v11131_v3, %v15582_v24  ;;  %v15583_v58 = vld [vmem:[#allocation67_spill] sm:$0xff] }
 0x739   :  { %2644 = vst.msk [vmem:[#allocation2 + $0x260] sm:$0xff] %vm28_vm0, %v2447_v28  ;;  %v2262_v28 = vadd.f32 %v11143_v7, %v2065_v60  ;;  %v2456_v26 = vmax.f32 %v2260_v44, 0.0  ;;  %v2071_v40 = vmul.f32 %v11131_v3, %v15583_v58  ;;  %v15584_v60 = vld [vmem:[#allocation68_spill] sm:$0xff] }
 0x73a   :  { %2645 = vst.msk [vmem:[#allocation2 + $0x268] sm:$0xff] %vm28_vm0, %v2448_v52  ;;  %v2263_v52 = vadd.f32 %v11143_v7, %v2066_v46  ;;  %v2457_v43 = vmax.f32 %v2261_v30, 0.0  ;;  %v2072_v44 = vmul.f32 %v11131_v3, %v15584_v60  ;;  %v15585_v46 = vld [vmem:[#allocation69_spill] sm:$0xff] }
 0x73b   :  { %2646 = vst.msk [vmem:[#allocation2 + $0x270] sm:$0xff] %vm28_vm0, %v2449_v2  ;;  %v2264_v2 = vadd.f32 %v11143_v7, %v2067_v62  ;;  %v2458_v9 = vmax.f32 %v2262_v28, 0.0  ;;  %v2073_v30 = vmul.f32 %v11131_v3, %v15585_v46  ;;  %v15586_v62 = vld [vmem:[#allocation70_spill] sm:$0xff] }
 0x73c   :  { %2647 = vst.msk [vmem:[#allocation2 + $0x288] sm:$0xff] %vm28_vm0, %v2450_v42  ;;  %v2265_v42 = vadd.f32 %v11143_v7, %v2068_v45  ;;  %v2459_v63 = vmax.f32 %v2263_v52, 0.0  ;;  %v2074_v28 = vmul.f32 %v11131_v3, %v15586_v62  ;;  %v15587_v45 = vld [vmem:[#allocation71_spill] sm:$0xff] }
 0x73d   :  { %2648 = vst.msk [vmem:[#allocation2 + $0x290] sm:$0xff] %vm28_vm0, %v2451_v18  ;;  %v2266_v18 = vadd.f32 %v11143_v7, %v2069_v54  ;;  %v2460_v50 = vmax.f32 %v2264_v2, 0.0  ;;  %v2075_v52 = vmul.f32 %v11131_v3, %v15587_v45  ;;  %v15588_v54 = vld [vmem:[#allocation72_spill] sm:$0xff] }
 0x73e   :  { %2649 = vst.msk [vmem:[#allocation2 + $0x298] sm:$0xff] %vm28_vm0, %v2452_v12  ;;  %v2267_v12 = vadd.f32 %v11143_v7, %v2070_v17  ;;  %v2461_v37 = vmax.f32 %v2265_v42, 0.0  ;;  %v2076_v2 = vmul.f32 %v11131_v3, %v15588_v54  ;;  %v15589_v17 = vld [vmem:[#allocation73_spill] sm:$0xff] }
 0x73f   :  { %2650 = vst.msk [vmem:[#allocation2 + $0x2a0] sm:$0xff] %vm28_vm0, %v2453_v6  ;;  %v2268_v6 = vadd.f32 %v11143_v7, %v2071_v40  ;;  %v2462_v34 = vmax.f32 %v2266_v18, 0.0  ;;  %v2077_v42 = vmul.f32 %v11131_v3, %v15589_v17  ;;  %v15590_v40 = vld [vmem:[#allocation74_spill] sm:$0xff] }
 0x740   :  { %2651 = vst.msk [vmem:[#allocation2 + $0x2a8] sm:$0xff] %vm28_vm0, %v2454_v31  ;;  %v2269_v31 = vadd.f32 %v11143_v7, %v2072_v44  ;;  %v2463_v24 = vmax.f32 %v2267_v12, 0.0  ;;  %v2078_v18 = vmul.f32 %v11131_v3, %v15590_v40  ;;  %v15591_v44 = vld [vmem:[#allocation75_spill] sm:$0xff] }
 0x741   :  { %2652 = vst.msk [vmem:[#allocation2 + $0x2b0] sm:$0xff] %vm28_vm0, %v2455_v29  ;;  %v2270_v29 = vadd.f32 %v11143_v7, %v2073_v30  ;;  %v2464_v58 = vmax.f32 %v2268_v6, 0.0  ;;  %v2079_v12 = vmul.f32 %v11131_v3, %v15591_v44  ;;  %v15592_v30 = vld [vmem:[#allocation76_spill] sm:$0xff] }
 0x742   :  { %2653 = vst.msk [vmem:[#allocation2 + $0x2b8] sm:$0xff] %vm28_vm0, %v2456_v26  ;;  %v2271_v26 = vadd.f32 %v11143_v7, %v2074_v28  ;;  %v2465_v60 = vmax.f32 %v2269_v31, 0.0  ;;  %v2080_v6 = vmul.f32 %v11131_v3, %v15592_v30  ;;  %v15593_v28 = vld [vmem:[#allocation77_spill] sm:$0xff] }
 0x743   :  { %2654 = vst.msk [vmem:[#allocation2 + $0x2c0] sm:$0xff] %vm28_vm0, %v2457_v43  ;;  %v2272_v43 = vadd.f32 %v11143_v7, %v2075_v52  ;;  %v2466_v46 = vmax.f32 %v2270_v29, 0.0  ;;  %v2081_v31 = vmul.f32 %v11131_v3, %v15593_v28  ;;  %v15594_v52 = vld [vmem:[#allocation78_spill] sm:$0xff] }
 0x744   :  { %2655 = vst.msk [vmem:[#allocation2 + $0x2c8] sm:$0xff] %vm28_vm0, %v2458_v9  ;;  %v2273_v9 = vadd.f32 %v11143_v7, %v2076_v2  ;;  %v2467_v62 = vmax.f32 %v2271_v26, 0.0  ;;  %v2082_v29 = vmul.f32 %v11131_v3, %v15594_v52  ;;  %v15595_v2 = vld [vmem:[#allocation79_spill] sm:$0xff] }
 0x745   :  { %2656 = vst.msk [vmem:[#allocation2 + $0x2d0] sm:$0xff] %vm28_vm0, %v2459_v63  ;;  %v2274_v63 = vadd.f32 %v11143_v7, %v2077_v42  ;;  %v2468_v45 = vmax.f32 %v2272_v43, 0.0  ;;  %v2083_v26 = vmul.f32 %v11131_v3, %v15595_v2  ;;  %v15596_v42 = vld [vmem:[#allocation80_spill] sm:$0xff] }
 0x746   :  { %2657 = vst.msk [vmem:[#allocation2 + $0x2d8] sm:$0xff] %vm28_vm0, %v2460_v50  ;;  %v2275_v50 = vadd.f32 %v11143_v7, %v2078_v18  ;;  %v2469_v54 = vmax.f32 %v2273_v9, 0.0  ;;  %v2084_v43 = vmul.f32 %v11131_v3, %v15596_v42  ;;  %v15597_v18 = vld [vmem:[#allocation81_spill] sm:$0xff] }
 0x747   :  { %2658 = vst.msk [vmem:[#allocation2 + $0x2e0] sm:$0xff] %vm28_vm0, %v2461_v37  ;;  %v2276_v37 = vadd.f32 %v11143_v7, %v2079_v12  ;;  %v2470_v17 = vmax.f32 %v2274_v63, 0.0  ;;  %v2085_v9 = vmul.f32 %v11131_v3, %v15597_v18  ;;  %v15598_v12 = vld [vmem:[#allocation82_spill] sm:$0xff] }
 0x748   :  { %2659 = vst.msk [vmem:[#allocation2 + $0x2e8] sm:$0xff] %vm28_vm0, %v2462_v34  ;;  %v2277_v34 = vadd.f32 %v11143_v7, %v2080_v6  ;;  %v2471_v40 = vmax.f32 %v2275_v50, 0.0  ;;  %v2086_v63 = vmul.f32 %v11131_v3, %v15598_v12  ;;  %v15599_v6 = vld [vmem:[#allocation83_spill] sm:$0xff] }
 0x749   :  { %2660 = vst.msk [vmem:[#allocation2 + $0x2f0] sm:$0xff] %vm28_vm0, %v2463_v24  ;;  %v2278_v24 = vadd.f32 %v11143_v7, %v2081_v31  ;;  %v2472_v44 = vmax.f32 %v2276_v37, 0.0  ;;  %v2087_v50 = vmul.f32 %v11131_v3, %v15599_v6  ;;  %v15600_v31 = vld [vmem:[#allocation84_spill] sm:$0xff] }
 0x74a   :  { %2661 = vst.msk [vmem:[#allocation2 + $0x308] sm:$0xff] %vm28_vm0, %v2464_v58  ;;  %v2279_v58 = vadd.f32 %v11143_v7, %v2082_v29  ;;  %v2473_v30 = vmax.f32 %v2277_v34, 0.0  ;;  %v2088_v37 = vmul.f32 %v11131_v3, %v15600_v31  ;;  %v15601_v29 = vld [vmem:[#allocation85_spill] sm:$0xff] }
 0x74b   :  { %2662 = vst.msk [vmem:[#allocation2 + $0x310] sm:$0xff] %vm28_vm0, %v2465_v60  ;;  %v2280_v60 = vadd.f32 %v11143_v7, %v2083_v26  ;;  %v2474_v28 = vmax.f32 %v2278_v24, 0.0  ;;  %v2089_v34 = vmul.f32 %v11131_v3, %v15601_v29  ;;  %v15602_v26 = vld [vmem:[#allocation86_spill] sm:$0xff] }
 0x74c   :  { %2663 = vst.msk [vmem:[#allocation2 + $0x318] sm:$0xff] %vm28_vm0, %v2466_v46  ;;  %v2281_v46 = vadd.f32 %v11143_v7, %v2084_v43  ;;  %v2475_v52 = vmax.f32 %v2279_v58, 0.0  ;;  %v2090_v24 = vmul.f32 %v11131_v3, %v15602_v26  ;;  %v15603_v43 = vld [vmem:[#allocation87_spill] sm:$0xff] }
 0x74d   :  { %2664 = vst.msk [vmem:[#allocation2 + $0x320] sm:$0xff] %vm28_vm0, %v2467_v62  ;;  %v2282_v62 = vadd.f32 %v11143_v7, %v2085_v9  ;;  %v2476_v2 = vmax.f32 %v2280_v60, 0.0  ;;  %v2091_v58 = vmul.f32 %v11131_v3, %v15603_v43  ;;  %v15604_v9 = vld [vmem:[#allocation88_spill] sm:$0xff] }
 0x74e   :  { %2665 = vst.msk [vmem:[#allocation2 + $0x328] sm:$0xff] %vm28_vm0, %v2468_v45  ;;  %v2283_v45 = vadd.f32 %v11143_v7, %v2086_v63  ;;  %v2477_v42 = vmax.f32 %v2281_v46, 0.0  ;;  %v2092_v60 = vmul.f32 %v11131_v3, %v15604_v9  ;;  %v15605_v63 = vld [vmem:[#allocation89_spill] sm:$0xff] }
 0x74f   :  { %2666 = vst.msk [vmem:[#allocation2 + $0x330] sm:$0xff] %vm28_vm0, %v2469_v54  ;;  %v2284_v54 = vadd.f32 %v11143_v7, %v2087_v50  ;;  %v2478_v18 = vmax.f32 %v2282_v62, 0.0  ;;  %v2093_v46 = vmul.f32 %v11131_v3, %v15605_v63  ;;  %v15606_v50 = vld [vmem:[#allocation90_spill] sm:$0xff] }
 0x750   :  { %2667 = vst.msk [vmem:[#allocation2 + $0x338] sm:$0xff] %vm28_vm0, %v2470_v17  ;;  %v2285_v17 = vadd.f32 %v11143_v7, %v2088_v37  ;;  %v2479_v12 = vmax.f32 %v2283_v45, 0.0  ;;  %v2094_v62 = vmul.f32 %v11131_v3, %v15606_v50  ;;  %v15607_v37 = vld [vmem:[#allocation91_spill] sm:$0xff] }
 0x751   :  { %2668 = vst.msk [vmem:[#allocation2 + $0x340] sm:$0xff] %vm28_vm0, %v2471_v40  ;;  %v2286_v40 = vadd.f32 %v11143_v7, %v2089_v34  ;;  %v2480_v6 = vmax.f32 %v2284_v54, 0.0  ;;  %v2095_v45 = vmul.f32 %v11131_v3, %v15607_v37  ;;  %v15608_v34 = vld [vmem:[#allocation92_spill] sm:$0xff] }
 0x752   :  { %2669 = vst.msk [vmem:[#allocation2 + $0x348] sm:$0xff] %vm28_vm0, %v2472_v44  ;;  %v2287_v44 = vadd.f32 %v11143_v7, %v2090_v24  ;;  %v2481_v31 = vmax.f32 %v2285_v17, 0.0  ;;  %v2096_v54 = vmul.f32 %v11131_v3, %v15608_v34  ;;  %v15609_v24 = vld [vmem:[#allocation93_spill] sm:$0xff] }
 0x753   :  { %2670 = vst.msk [vmem:[#allocation2 + $0x350] sm:$0xff] %vm28_vm0, %v2473_v30  ;;  %v2288_v30 = vadd.f32 %v11143_v7, %v2091_v58  ;;  %v2482_v29 = vmax.f32 %v2286_v40, 0.0  ;;  %v2097_v17 = vmul.f32 %v11131_v3, %v15609_v24  ;;  %v15610_v58 = vld [vmem:[#allocation94_spill] sm:$0xff] }
 0x754   :  { %2671 = vst.msk [vmem:[#allocation2 + $0x358] sm:$0xff] %vm28_vm0, %v2474_v28  ;;  %v2289_v28 = vadd.f32 %v11143_v7, %v2092_v60  ;;  %v2483_v26 = vmax.f32 %v2287_v44, 0.0  ;;  %v2098_v40 = vmul.f32 %v11131_v3, %v15610_v58  ;;  %v15611_v60 = vld [vmem:[#allocation95_spill] sm:$0xff] }
 0x755   :  { %2672 = vst.msk [vmem:[#allocation2 + $0x360] sm:$0xff] %vm28_vm0, %v2475_v52  ;;  %v2290_v52 = vadd.f32 %v11143_v7, %v2093_v46  ;;  %v2484_v43 = vmax.f32 %v2288_v30, 0.0  ;;  %v2099_v44 = vmul.f32 %v11131_v3, %v15611_v60  ;;  %v15612_v46 = vld [vmem:[#allocation96_spill] sm:$0xff] }
 0x756   :  { %2673 = vst.msk [vmem:[#allocation2 + $0x368] sm:$0xff] %vm28_vm0, %v2476_v2  ;;  %v2291_v2 = vadd.f32 %v11143_v7, %v2094_v62  ;;  %v2485_v9 = vmax.f32 %v2289_v28, 0.0  ;;  %v2100_v30 = vmul.f32 %v11131_v3, %v15612_v46  ;;  %v15613_v62 = vld [vmem:[#allocation97_spill] sm:$0xff] }
 0x757   :  { %2674 = vst.msk [vmem:[#allocation2 + $0x370] sm:$0xff] %vm28_vm0, %v2477_v42  ;;  %v2292_v42 = vadd.f32 %v11143_v7, %v2095_v45  ;;  %v2486_v63 = vmax.f32 %v2290_v52, 0.0  ;;  %v2101_v28 = vmul.f32 %v11131_v3, %v15613_v62  ;;  %v15614_v45 = vld [vmem:[#allocation98_spill] sm:$0xff] }
 0x758   :  { %2675 = vst.msk [vmem:[#allocation2 + $0x388] sm:$0xff] %vm28_vm0, %v2478_v18  ;;  %v2293_v18 = vadd.f32 %v11143_v7, %v2096_v54  ;;  %v2487_v50 = vmax.f32 %v2291_v2, 0.0  ;;  %v2102_v52 = vmul.f32 %v11131_v3, %v15614_v45  ;;  %v15615_v54 = vld [vmem:[#allocation99_spill] sm:$0xff] }
 0x759   :  { %2676 = vst.msk [vmem:[#allocation2 + $0x390] sm:$0xff] %vm28_vm0, %v2479_v12  ;;  %v2294_v12 = vadd.f32 %v11143_v7, %v2097_v17  ;;  %v2488_v37 = vmax.f32 %v2292_v42, 0.0  ;;  %v2103_v2 = vmul.f32 %v11131_v3, %v15615_v54  ;;  %v15616_v17 = vld [vmem:[#allocation100_spill] sm:$0xff] }
 0x75a   :  { %2677 = vst.msk [vmem:[#allocation2 + $0x398] sm:$0xff] %vm28_vm0, %v2480_v6  ;;  %v2295_v6 = vadd.f32 %v11143_v7, %v2098_v40  ;;  %v2489_v34 = vmax.f32 %v2293_v18, 0.0  ;;  %v2104_v42 = vmul.f32 %v11131_v3, %v15616_v17  ;;  %v15617_v40 = vld [vmem:[#allocation101_spill] sm:$0xff] }
 0x75b   :  { %2678 = vst.msk [vmem:[#allocation2 + $0x3a0] sm:$0xff] %vm28_vm0, %v2481_v31  ;;  %v2296_v31 = vadd.f32 %v11143_v7, %v2099_v44  ;;  %v2490_v24 = vmax.f32 %v2294_v12, 0.0  ;;  %v2105_v18 = vmul.f32 %v11131_v3, %v15617_v40  ;;  %v15618_v44 = vld [vmem:[#allocation102_spill] sm:$0xff] }
 0x75c   :  { %2679 = vst.msk [vmem:[#allocation2 + $0x3a8] sm:$0xff] %vm28_vm0, %v2482_v29  ;;  %v2297_v29 = vadd.f32 %v11143_v7, %v2100_v30  ;;  %v2491_v58 = vmax.f32 %v2295_v6, 0.0  ;;  %v2106_v12 = vmul.f32 %v11131_v3, %v15618_v44  ;;  %v15619_v30 = vld [vmem:[#allocation103_spill] sm:$0xff] }
 0x75d   :  { %2680 = vst.msk [vmem:[#allocation2 + $0x3b0] sm:$0xff] %vm28_vm0, %v2483_v26  ;;  %v2298_v26 = vadd.f32 %v11143_v7, %v2101_v28  ;;  %v2492_v60 = vmax.f32 %v2296_v31, 0.0  ;;  %v2107_v6 = vmul.f32 %v11131_v3, %v15619_v30  ;;  %v15620_v28 = vld [vmem:[#allocation104_spill] sm:$0xff] }
 0x75e   :  { %2681 = vst.msk [vmem:[#allocation2 + $0x3b8] sm:$0xff] %vm28_vm0, %v2484_v43  ;;  %v2299_v43 = vadd.f32 %v11143_v7, %v2102_v52  ;;  %v2493_v46 = vmax.f32 %v2297_v29, 0.0  ;;  %v2108_v31 = vmul.f32 %v11131_v3, %v15620_v28  ;;  %v15621_v52 = vld [vmem:[#allocation105_spill] sm:$0xff] }
 0x75f   :  { %2682 = vst.msk [vmem:[#allocation2 + $0x3c0] sm:$0xff] %vm28_vm0, %v2485_v9  ;;  %v2300_v9 = vadd.f32 %v11143_v7, %v2103_v2  ;;  %v2494_v62 = vmax.f32 %v2298_v26, 0.0  ;;  %v2109_v29 = vmul.f32 %v11131_v3, %v15621_v52  ;;  %v15622_v2 = vld [vmem:[#allocation106_spill] sm:$0xff] }
 0x760   :  { %2683 = vst.msk [vmem:[#allocation2 + $0x3c8] sm:$0xff] %vm28_vm0, %v2486_v63  ;;  %v2301_v63 = vadd.f32 %v11143_v7, %v2104_v42  ;;  %v2495_v45 = vmax.f32 %v2299_v43, 0.0  ;;  %v2110_v26 = vmul.f32 %v11131_v3, %v15622_v2  ;;  %v15623_v42 = vld [vmem:[#allocation107_spill] sm:$0xff]  ;;  %v15628_v2 = vld [vmem:[#allocation112_spill] sm:$0xff] }
 0x761   :  { %2684 = vst.msk [vmem:[#allocation2 + $0x3d0] sm:$0xff] %vm28_vm0, %v2487_v50  ;;  %v2302_v50 = vadd.f32 %v11143_v7, %v2105_v18  ;;  %v2496_v54 = vmax.f32 %v2300_v9, 0.0  ;;  %v2111_v43 = vmul.f32 %v11131_v3, %v15623_v42  ;;  %v15624_v18 = vld [vmem:[#allocation108_spill] sm:$0xff]  ;;  %v2787_v42 = vld [vmem:[#allocation2] sm:$0xff] }
 0x762   :  { %2685 = vst.msk [vmem:[#allocation2 + $0x3d8] sm:$0xff] %vm28_vm0, %v2488_v37  ;;  %v2303_v37 = vadd.f32 %v11143_v7, %v2106_v12  ;;  %v2497_v17 = vmax.f32 %v2301_v63, 0.0  ;;  %v2112_v9 = vmul.f32 %v11131_v3, %v15624_v18  ;;  %v15625_v12 = vld [vmem:[#allocation109_spill] sm:$0xff] }
 0x763   :  { %2686 = vst.msk [vmem:[#allocation2 + $0x3e0] sm:$0xff] %vm28_vm0, %v2489_v34  ;;  %v2304_v34 = vadd.f32 %v11143_v7, %v2107_v6  ;;  %v2498_v40 = vmax.f32 %v2302_v50, 0.0  ;;  %v2113_v63 = vmul.f32 %v11131_v3, %v15625_v12  ;;  %v15626_v6 = vld [vmem:[#allocation110_spill] sm:$0xff] }
 0x764   :  { %2687 = vst.msk [vmem:[#allocation2 + $0x3e8] sm:$0xff] %vm28_vm0, %v2490_v24  ;;  %v2305_v24 = vadd.f32 %v11143_v7, %v2108_v31  ;;  %v2499_v44 = vmax.f32 %v2303_v37, 0.0  ;;  %v2114_v50 = vmul.f32 %v11131_v3, %v15626_v6  ;;  %v15627_v31 = vld [vmem:[#allocation111_spill] sm:$0xff] }
 0x765   :  { %2688 = vst.msk [vmem:[#allocation2 + $0x3f0] sm:$0xff] %vm28_vm0, %v2491_v58  ;;  %v2306_v58 = vadd.f32 %v11143_v7, %v2109_v29  ;;  %v2500_v30 = vmax.f32 %v2304_v34, 0.0  ;;  %v2115_v37 = vmul.f32 %v11131_v3, %v15627_v31  ;;  %v8029_v29 = vld [vmem:[%s14988_s2 + $0x60] sm:$0xff] }
 0x766   :  { %2689 = vst.msk [vmem:[#allocation2 + $0x408] sm:$0xff] %vm28_vm0, %v2492_v60  ;;  %v2307_v60 = vadd.f32 %v11143_v7, %v2110_v26  ;;  %v2501_v28 = vmax.f32 %v2305_v24, 0.0  ;;  %v3012_v34 = vld [vmem:[%s14988_s2] sm:$0xff]  ;;  %v2116_v26 = vmul.f32 %v11131_v3, %v15628_v2  ;;  %v2311_v24 = vadd.f32 %v11143_v7, %v2114_v50  ;;  %3187 = vmatpush.msra.mxu1 %v8029_v29  ;;  %v15632_v29 = vld [vmem:[#allocation116_spill] sm:$0xff] }
 0x767   :  { %2690 = vst.msk [vmem:[#allocation2 + $0x410] sm:$0xff] %vm28_vm0, %v2493_v46  ;;  %v2308_v46 = vadd.f32 %v11143_v7, %v2111_v43  ;;  %v2502_v52 = vmax.f32 %v2306_v58, 0.0  ;;  %3502 = vmatpush.msra.mxu2 %v3012_v34  ;;  %v15629_v43 = vld [vmem:[#allocation113_spill] sm:$0xff] }
 0x768   :  { %2691 = vst.msk [vmem:[#allocation2 + $0x418] sm:$0xff] %vm28_vm0, %v2494_v62  ;;  %v2309_v62 = vadd.f32 %v11143_v7, %v2112_v9  ;;  %v2117_v58 = vmul.f32 %v11131_v3, %v15629_v43  ;;  %8082 = vmatmul.msk.f32.vlgmr.msra.gmra.mxu2 %vm28_vm0, %v2787_v42  ;;  %v8028_v9 = vld [vmem:[%s14988_s2 + $0x58] sm:$0xff]  ;;  %v8026_v42 = vld [vmem:[%s14988_s2 + $0x48] sm:$0xff] }
 0x769   :  { %2692 = vst.msk [vmem:[#allocation2 + $0x420] sm:$0xff] %vm28_vm0, %v2495_v45  ;;  %v2310_v45 = vadd.f32 %v11143_v7, %v2113_v63  ;;  %v2504_v18 = vmax.f32 %v2308_v46, 0.0  ;;  %v2313_v63 = vadd.f32 %v11143_v7, %v2116_v26  ;;  %3188 = vmatpush.msra.mxu1 %v8028_v9  ;;  %v15631_v46 = vld [vmem:[#allocation115_spill] sm:$0xff]  ;;  %v15634_v43 = vld [vmem:[#allocation118_spill] sm:$0xff] }
 0x76a   :  { %2693 = vst.msk [vmem:[#allocation2 + $0x428] sm:$0xff] %vm28_vm0, %v2496_v54  ;;  %v8134_v54 = vld [vmem:[%s14988_s2 + $0x98] sm:$0xff]  ;;  %v2505_v6 = vmax.f32 %v2309_v62, 0.0  ;;  %v2314_v50 = vadd.f32 %v11143_v7, %v2117_v58  ;;  %v8132_v62 = vld [vmem:[%s14988_s2 + $0x88] sm:$0xff] }
 0x76b   :  { %2694 = vst.msk [vmem:[#allocation2 + $0x430] sm:$0xff] %vm28_vm0, %v2497_v17  ;;  %v2503_v17 = vmax.f32 %v2307_v60, 0.0  ;;  %3693 = vmatpush.msra.mxu3 %v8134_v54  ;;  %v8133_v60 = vld [vmem:[%s14988_s2 + $0x90] sm:$0xff]  ;;  %v2506_v31 = vmax.f32 %v2310_v45, 0.0  ;;  %v2507_v54 = vmax.f32 %v2311_v24, 0.0  ;;  %v15633_v45 = vld [vmem:[#allocation117_spill] sm:$0xff] }
 0x76c   :  { %2695 = vst.msk [vmem:[#allocation2 + $0x438] sm:$0xff] %vm28_vm0, %v2498_v40  ;;  %v2312_v40 = vadd.f32 %v11143_v7, %v2115_v37  ;;  %v8027_v37 = vld [vmem:[%s14988_s2 + $0x50] sm:$0xff]  ;;  %v8131_v24 = vld [vmem:[%s14988_s2 + $0x80] sm:$0xff]  ;;  %v2509_v9 = vmax.f32 %v2313_v63, 0.0 }
 0x76d   :  { %2696 = vst.msk [vmem:[#allocation2 + $0x440] sm:$0xff] %vm28_vm0, %v2499_v44  ;;  %v15630_v44 = vld [vmem:[#allocation114_spill] sm:$0xff]  ;;  %3694 = vmatpush.msra.mxu3 %v8133_v60  ;;  %3189 = vmatpush.msra.mxu1 %v8027_v37 }
 0x76e   :  { %2697 = vst.msk [vmem:[#allocation2 + $0x448] sm:$0xff] %vm28_vm0, %v2500_v30  ;;  %v2118_v12 = vmul.f32 %v11131_v3, %v15630_v44  ;;  %v2119_v30 = vmul.f32 %v11131_v3, %v15631_v46  ;;  %v2508_v26 = vmax.f32 %v2312_v40, 0.0  ;;  %v2789_v40 = vld [vmem:[#allocation2 + $0x10] sm:$0xff]  ;;  %v8025_v46 = vld [vmem:[%s14988_s2 + $0x40] sm:$0xff] }
 0x76f   :  { %2698 = vst.msk [vmem:[#allocation2 + $0x450] sm:$0xff] %vm28_vm0, %v2501_v28  ;;  %v2120_v28 = vmul.f32 %v11131_v3, %v15632_v29  ;;  %3695 = vmatpush.msra.mxu3 %v8132_v62  ;;  %3190 = vmatpush.msra.mxu1 %v8026_v42  ;;  %v2788_v62 = vld [vmem:[#allocation2 + $0x8] sm:$0xff]  ;;  %v15639_v42 = vld [vmem:[#allocation123_spill] sm:$0xff] }
 0x770   :  { %2699 = vst.msk [vmem:[#allocation2 + $0x458] sm:$0xff] %vm28_vm0, %v2502_v52  ;;  %v2315_v34 = vadd.f32 %v11143_v7, %v2118_v12  ;;  %v2121_v52 = vmul.f32 %v11131_v3, %v15633_v45  ;;  %v2316_v2 = vadd.f32 %v11143_v7, %v2119_v30  ;;  %v2510_v12 = vmax.f32 %v2314_v50, 0.0  ;;  %v15636_v30 = vld [vmem:[#allocation120_spill] sm:$0xff]  ;;  %v15637_v50 = vld [vmem:[#allocation121_spill] sm:$0xff]  ;;  %8083 = vmatmul.msk.f32.gmra.mxu2 %vm28_vm0, %v2789_v40  ;;  %v15638_v45 = vld [vmem:[#allocation122_spill] sm:$0xff] }
 0x771   :  { %2700 = vst.msk [vmem:[#allocation2 + $0x460] sm:$0xff] %vm28_vm0, %v2503_v17  ;;  %v2122_v17 = vmul.f32 %v11131_v3, %v15634_v43  ;;  %v2317_v58 = vadd.f32 %v11143_v7, %v2120_v28  ;;  %3696 = vmatpush.msra.mxu3 %v8131_v24  ;;  %v2124_v63 = vmul.f32 %v11131_v3, %v15636_v30  ;;  %v15642_v30 = vld [vmem:[#allocation126_spill] sm:$0xff] }
 0x772   :  { %2701 = vst.msk [vmem:[#allocation2 + $0x468] sm:$0xff] %vm28_vm0, %v2504_v18  ;;  %v15635_v18 = vld [vmem:[#allocation119_spill] sm:$0xff]  ;;  %v2318_v44 = vadd.f32 %v11143_v7, %v2121_v52  ;;  %v2511_v37 = vmax.f32 %v2315_v34, 0.0  ;;  %8139 = vmatmul.msk.f32.vlgmr.msra.gmra.mxu3 %vm28_vm0, %v2789_v40  ;;  %3191 = vmatpush.msra.mxu1 %v8025_v46  ;;  %v2512_v28 = vmax.f32 %v2316_v2, 0.0  ;;  %v2126_v34 = vmul.f32 %v11131_v3, %v15638_v45 }
 0x773   :  { %2702 = vst.msk [vmem:[#allocation2 + $0x470] sm:$0xff] %vm28_vm0, %v2505_v6  ;;  %v2123_v60 = vmul.f32 %v11131_v3, %v15635_v18  ;;  %v2319_v6 = vadd.f32 %v11143_v7, %v2122_v17  ;;  %8033 = vmatmul.msk.f32.vlgmr.msra.gmra.mxu1 %vm28_vm0, %v2788_v62  ;;  %v2513_v52 = vmax.f32 %v2317_v58, 0.0  ;;  %v2127_v24 = vmul.f32 %v11131_v3, %v15639_v42  ;;  %v2791_v62 = vld [vmem:[#allocation2 + $0x20] sm:$0xff] }
 0x774   :  { %2703 = vst.msk [vmem:[#allocation2 + $0x488] sm:$0xff] %vm28_vm0, %v2506_v31  ;;  %v2125_v31 = vmul.f32 %v11131_v3, %v15637_v50  ;;  %v2514_v2 = vmax.f32 %v2318_v44, 0.0  ;;  %v2323_v40 = vadd.f32 %v11143_v7, %v2126_v34  ;;  %v2130_v44 = vmul.f32 %v11131_v3, %v15642_v30 }
 0x775   :  { %2704 = vst.msk [vmem:[#allocation2 + $0x490] sm:$0xff] %vm28_vm0, %v2507_v54  ;;  %v2320_v29 = vadd.f32 %v11143_v7, %v2123_v60  ;;  %v2321_v54 = vadd.f32 %v11143_v7, %v2124_v63  ;;  %v2515_v18 = vmax.f32 %v2319_v6, 0.0  ;;  %v15641_v60 = vld [vmem:[#allocation125_spill] sm:$0xff]  ;;  %v15643_v6 = vld [vmem:[#allocation127_spill] sm:$0xff] }
 0x776   :  { %2705 = vst.msk [vmem:[#allocation2 + $0x498] sm:$0xff] %vm28_vm0, %v2508_v26  ;;  %v2322_v43 = vadd.f32 %v11143_v7, %v2125_v31  ;;  %v15640_v26 = vld [vmem:[#allocation124_spill] sm:$0xff]  ;;  %v2129_v58 = vmul.f32 %v11131_v3, %v15641_v60  ;;  %v2327_v45 = vadd.f32 %v11143_v7, %v2130_v44  ;;  %v2519_v34 = vmax.f32 %v2323_v40, 0.0 }
 0x777   :  { %2706 = vst.msk [vmem:[#allocation2 + $0x4a0] sm:$0xff] %vm28_vm0, %v2509_v9  ;;  %v2128_v17 = vmul.f32 %v11131_v3, %v15640_v26  ;;  %v2324_v9 = vadd.f32 %v11143_v7, %v2127_v24  ;;  %v2516_v46 = vmax.f32 %v2320_v29, 0.0  ;;  %v2517_v63 = vmax.f32 %v2321_v54, 0.0  ;;  %v15644_v29 = vld [vmem:[#allocation128_spill] sm:$0xff] }
 0x778   :  { %2707 = vst.msk [vmem:[#allocation2 + $0x4a8] sm:$0xff] %vm28_vm0, %v2510_v12  ;;  %v2326_v50 = vadd.f32 %v11143_v7, %v2129_v58  ;;  %v2518_v31 = vmax.f32 %v2322_v43, 0.0  ;;  %v2790_v54 = vld [vmem:[#allocation2 + $0x18] sm:$0xff]  ;;  %8084 = vmatmul.msk.f32.gmra.mxu2 %vm28_vm0, %v2791_v62  ;;  %v15646_v43 = vld [vmem:[#allocation130_spill] sm:$0xff] }
 0x779   :  { %2708 = vst.msk [vmem:[#allocation2 + $0x4b0] sm:$0xff] %vm28_vm0, %v2511_v37  ;;  %v2325_v12 = vadd.f32 %v11143_v7, %v2128_v17  ;;  %v2131_v37 = vmul.f32 %v11131_v3, %v15643_v6  ;;  %v2520_v26 = vmax.f32 %v2324_v9, 0.0  ;;  %v15649_v6 = vld [vmem:[#allocation133_spill] sm:$0xff] }
 0x77a   :  { %2709 = vst.msk [vmem:[#allocation2 + $0x4b8] sm:$0xff] %vm28_vm0, %v2512_v28  ;;  %v2132_v28 = vmul.f32 %v11131_v3, %v15644_v29  ;;  %8140 = vmatmul.msk.f32.gmra.mxu3 %vm28_vm0, %v2791_v62  ;;  %v2522_v9 = vmax.f32 %v2326_v50, 0.0  ;;  %v2523_v62 = vmax.f32 %v2327_v45, 0.0  ;;  %v15650_v29 = vld [vmem:[#allocation134_spill] sm:$0xff]  ;;  %v15651_v45 = vld [vmem:[#allocation135_spill] sm:$0xff] }
 0x77b   :  { %2710 = vst.msk [vmem:[#allocation2 + $0x4c0] sm:$0xff] %vm28_vm0, %v2513_v52  ;;  %v15645_v52 = vld [vmem:[#allocation129_spill] sm:$0xff]  ;;  %v2328_v24 = vadd.f32 %v11143_v7, %v2131_v37  ;;  %8034 = vmatmul.msk.f32.gmra.mxu1 %vm28_vm0, %v2790_v54  ;;  %v2521_v40 = vmax.f32 %v2325_v12, 0.0  ;;  %v2137_v12 = vmul.f32 %v11131_v3, %v15649_v6  ;;  %v2138_v50 = vmul.f32 %v11131_v3, %v15650_v29  ;;  %v2793_v54 = vld [vmem:[#allocation2 + $0x30] sm:$0xff] }
 0x77c   :  { %2711 = vst.msk [vmem:[#allocation2 + $0x4c8] sm:$0xff] %vm28_vm0, %v2514_v2  ;;  %v2133_v42 = vmul.f32 %v11131_v3, %v15645_v52  ;;  %v2134_v2 = vmul.f32 %v11131_v3, %v15646_v43  ;;  %v2329_v17 = vadd.f32 %v11143_v7, %v2132_v28 }
 0x77d   :  { %2712 = vst.msk [vmem:[#allocation2 + $0x4d0] sm:$0xff] %vm28_vm0, %v2515_v18  ;;  %v15647_v18 = vld [vmem:[#allocation131_spill] sm:$0xff]  ;;  %v2524_v37 = vmax.f32 %v2328_v24, 0.0  ;;  %v2334_v52 = vadd.f32 %v11143_v7, %v2137_v12  ;;  %v15652_v24 = vld [vmem:[#allocation136_spill] sm:$0xff]  ;;  %v2335_v43 = vadd.f32 %v11143_v7, %v2138_v50 }
 0x77e   :  { %2713 = vst.msk [vmem:[#allocation2 + $0x4d8] sm:$0xff] %vm28_vm0, %v2516_v46  ;;  %v2135_v60 = vmul.f32 %v11131_v3, %v15647_v18  ;;  %v2330_v58 = vadd.f32 %v11143_v7, %v2133_v42  ;;  %v15648_v46 = vld [vmem:[#allocation132_spill] sm:$0xff]  ;;  %v2331_v44 = vadd.f32 %v11143_v7, %v2134_v2  ;;  %v2525_v28 = vmax.f32 %v2329_v17, 0.0  ;;  %v2792_v17 = vld [vmem:[#allocation2 + $0x28] sm:$0xff] }
 0x77f   :  { %2714 = vst.msk [vmem:[#allocation2 + $0x4e0] sm:$0xff] %vm28_vm0, %v2517_v63  ;;  %v2136_v30 = vmul.f32 %v11131_v3, %v15648_v46  ;;  %v2925_v39 = vld [vmem:[#allocation2 + $0x498] sm:$0xff] }
 0x780   :  { %2715 = vst.msk [vmem:[#allocation2 + $0x4e8] sm:$0xff] %vm28_vm0, %v2518_v31  ;;  %v2332_v63 = vadd.f32 %v11143_v7, %v2135_v60  ;;  %v2526_v42 = vmax.f32 %v2330_v58, 0.0  ;;  %v2527_v2 = vmax.f32 %v2331_v44, 0.0  ;;  %8085 = vmatmul.msk.f32.gmra.mxu2 %vm28_vm0, %v2793_v54  ;;  %v15654_v58 = vld [vmem:[#allocation138_spill] sm:$0xff] }
 0x781   :  { %2716 = vst.msk [vmem:[#allocation2 + $0x4f0] sm:$0xff] %vm28_vm0, %v2519_v34  ;;  %v2333_v31 = vadd.f32 %v11143_v7, %v2136_v30  ;;  %v2139_v34 = vmul.f32 %v11131_v3, %v15651_v45  ;;  %v15657_v45 = vld [vmem:[#allocation141_spill] sm:$0xff] }
 0x782   :  { %2717 = vst.msk [vmem:[#allocation2 + $0x508] sm:$0xff] %vm28_vm0, %v2520_v26  ;;  %v2140_v26 = vmul.f32 %v11131_v3, %v15652_v24  ;;  %8141 = vmatmul.msk.f32.gmra.mxu3 %vm28_vm0, %v2793_v54  ;;  %v2528_v46 = vmax.f32 %v2332_v63, 0.0  ;;  %v2530_v63 = vmax.f32 %v2334_v52, 0.0  ;;  %v2531_v54 = vmax.f32 %v2335_v43, 0.0 }
 0x783   :  { %2718 = vst.msk [vmem:[#allocation2 + $0x510] sm:$0xff] %vm28_vm0, %v2521_v40  ;;  %v15653_v40 = vld [vmem:[#allocation137_spill] sm:$0xff]  ;;  %v2336_v60 = vadd.f32 %v11143_v7, %v2139_v34  ;;  %8035 = vmatmul.msk.f32.gmra.mxu1 %vm28_vm0, %v2792_v17  ;;  %v2529_v44 = vmax.f32 %v2333_v31, 0.0  ;;  %v2145_v31 = vmul.f32 %v11131_v3, %v15657_v45  ;;  %v2146_v52 = vmul.f32 %v11131_v3, %v15512_v59 }
 0x784   :  { %2719 = vst.msk [vmem:[#allocation2 + $0x518] sm:$0xff] %vm28_vm0, %v2522_v9  ;;  %v2141_v18 = vmul.f32 %v11131_v3, %v15653_v40  ;;  %v2142_v9 = vmul.f32 %v11131_v3, %v15654_v58  ;;  %v2337_v30 = vadd.f32 %v11143_v7, %v2140_v26  ;;  %v2795_v26 = vld [vmem:[#allocation2 + $0x40] sm:$0xff]  ;;  %v2147_v43 = vmul.f32 %v11131_v3, %v15513_v10 }
 0x785   :  { %2720 = vst.msk [vmem:[#allocation2 + $0x520] sm:$0xff] %vm28_vm0, %v2523_v62  ;;  %v15655_v62 = vld [vmem:[#allocation139_spill] sm:$0xff]  ;;  %v2532_v34 = vmax.f32 %v2336_v60, 0.0  ;;  %v2148_v40 = vmul.f32 %v11131_v3, %v9870_v47  ;;  %v2794_v60 = vld [vmem:[#allocation2 + $0x38] sm:$0xff]  ;;  %v2150_v47 = vmul.f32 %v11131_v3, %v9920_v19  ;;  %v15659_v19 = vld [vmem:[#allocation145_spill] sm:$0xff] }
 0x786   :  { %2721 = vst.msk [vmem:[#allocation2 + $0x528] sm:$0xff] %vm28_vm0, %v2524_v37  ;;  %v2143_v6 = vmul.f32 %v11131_v3, %v15655_v62  ;;  %v2338_v12 = vadd.f32 %v11143_v7, %v2141_v18  ;;  %v15656_v37 = vld [vmem:[#allocation140_spill] sm:$0xff]  ;;  %v2339_v50 = vadd.f32 %v11143_v7, %v2142_v9  ;;  %v2533_v24 = vmax.f32 %v2337_v30, 0.0 }
 0x787   :  { %2722 = vst.msk [vmem:[#allocation2 + $0x530] sm:$0xff] %vm28_vm0, %v2525_v28  ;;  %v2144_v29 = vmul.f32 %v11131_v3, %v15656_v37  ;;  %v2343_v18 = vadd.f32 %v11143_v7, %v2146_v52  ;;  %v2344_v10 = vadd.f32 %v11143_v7, %v2147_v43  ;;  %v2345_v30 = vadd.f32 %v11143_v7, %v2148_v40  ;;  %v2796_v43 = vld [vmem:[#allocation2 + $0x48] sm:$0xff] }
 0x788   :  { %2723 = vst.msk [vmem:[#allocation2 + $0x538] sm:$0xff] %vm28_vm0, %v2526_v42  ;;  %v2340_v28 = vadd.f32 %v11143_v7, %v2143_v6  ;;  %v2534_v17 = vmax.f32 %v2338_v12, 0.0  ;;  %v2535_v59 = vmax.f32 %v2339_v50, 0.0  ;;  %8086 = vmatmul.msk.f32.gmra.mxu2 %vm28_vm0, %v2795_v26  ;;  %v2151_v62 = vmul.f32 %v11131_v3, %v9945_v27 }
 0x789   :  { %2724 = vst.msk [vmem:[#allocation2 + $0x540] sm:$0xff] %vm28_vm0, %v2527_v2  ;;  %v2341_v42 = vadd.f32 %v11143_v7, %v2144_v29  ;;  %v2342_v2 = vadd.f32 %v11143_v7, %v2145_v31  ;;  %v2347_v37 = vadd.f32 %v11143_v7, %v2150_v47  ;;  %v2539_v29 = vmax.f32 %v2343_v18, 0.0 }
 0x78a   :  { %2725 = vst.msk [vmem:[#allocation2 + $0x548] sm:$0xff] %vm28_vm0, %v2528_v46  ;;  %8142 = vmatmul.msk.f32.gmra.mxu3 %vm28_vm0, %v2795_v26  ;;  %v15658_v46 = vld [vmem:[#allocation144_spill] sm:$0xff]  ;;  %v2536_v9 = vmax.f32 %v2340_v28, 0.0  ;;  %v2153_v50 = vmul.f32 %v11131_v3, %v15659_v19  ;;  %v2540_v45 = vmax.f32 %v2344_v10, 0.0  ;;  %v2154_v27 = vmul.f32 %v11131_v3, %v10020_v36 }
 0x78b   :  { %2726 = vst.msk [vmem:[#allocation2 + $0x550] sm:$0xff] %vm28_vm0, %v2529_v44  ;;  %v2149_v58 = vmul.f32 %v11131_v3, %v15658_v46  ;;  %8036 = vmatmul.msk.f32.gmra.mxu1 %vm28_vm0, %v2794_v60  ;;  %v2537_v44 = vmax.f32 %v2341_v42, 0.0  ;;  %v2538_v12 = vmax.f32 %v2342_v2, 0.0  ;;  %v2541_v28 = vmax.f32 %v2345_v30, 0.0  ;;  %v15660_v2 = vld [vmem:[#allocation146_spill] sm:$0xff] }
 0x78c   :  { %2727 = vst.msk [vmem:[#allocation2 + $0x558] sm:$0xff] %vm28_vm0, %v2530_v63  ;;  %v2152_v63 = vmul.f32 %v11131_v3, %v9970_v32  ;;  %v2797_v32 = vld [vmem:[#allocation2 + $0x50] sm:$0xff]  ;;  %v2350_v52 = vadd.f32 %v11143_v7, %v2153_v50  ;;  %v2351_v26 = vadd.f32 %v11143_v7, %v2154_v27  ;;  %v2543_v36 = vmax.f32 %v2347_v37, 0.0 }
 0x78d   :  { %2728 = vst.msk [vmem:[#allocation2 + $0x560] sm:$0xff] %vm28_vm0, %v2531_v54  ;;  %v2346_v6 = vadd.f32 %v11143_v7, %v2149_v58  ;;  %v2348_v54 = vadd.f32 %v11143_v7, %v2151_v62  ;;  %v2159_v60 = vmul.f32 %v11131_v3, %v10145_v56  ;;  %v2160_v10 = vmul.f32 %v11131_v3, %v10170_v0  ;;  %v2799_v0 = vld [vmem:[#allocation2 + $0x60] sm:$0xff] }
 0x78e   :  { %2729 = vst.msk [vmem:[#allocation2 + $0x568] sm:$0xff] %vm28_vm0, %v2532_v34  ;;  %v2349_v31 = vadd.f32 %v11143_v7, %v2152_v63  ;;  %v2155_v34 = vmul.f32 %v11131_v3, %v10045_v55  ;;  %v2546_v58 = vmax.f32 %v2350_v52, 0.0  ;;  %v2547_v47 = vmax.f32 %v2351_v26, 0.0 }
 0x78f   :  { %2730 = vst.msk [vmem:[#allocation2 + $0x570] sm:$0xff] %vm28_vm0, %v2533_v24  ;;  %v2542_v42 = vmax.f32 %v2346_v6, 0.0  ;;  %v2156_v24 = vmul.f32 %v11131_v3, %v10070_v11  ;;  %v2544_v40 = vmax.f32 %v2348_v54, 0.0  ;;  %v2158_v11 = vmul.f32 %v11131_v3, %v10120_v48  ;;  %v15661_v48 = vld [vmem:[#allocation147_spill] sm:$0xff]  ;;  %v2798_v54 = vld [vmem:[#allocation2 + $0x58] sm:$0xff] }
 0x790   :  { %2731 = vst.msk [vmem:[#allocation2 + $0x588] sm:$0xff] %vm28_vm0, %v2534_v17  ;;  %v2157_v17 = vmul.f32 %v11131_v3, %v15660_v2  ;;  %v2352_v55 = vadd.f32 %v11143_v7, %v2155_v34  ;;  %8087 = vmatmul.msk.f32.gmra.mxu2 %vm28_vm0, %v2797_v32  ;;  %v2161_v30 = vmul.f32 %v11131_v3, %v15661_v48  ;;  %v8309_v48 = vld [vmem:[%s14988_s2 + $0x178] sm:$0xff] }
 0x791   :  { %2732 = vst.msk [vmem:[#allocation2 + $0x590] sm:$0xff] %vm28_vm0, %v2535_v59  ;;  %v2353_v18 = vadd.f32 %v11143_v7, %v2156_v24  ;;  %v2545_v59 = vmax.f32 %v2349_v31, 0.0  ;;  %v2162_v56 = vmul.f32 %v11131_v3, %v10220_v38  ;;  %v2357_v6 = vadd.f32 %v11143_v7, %v2160_v10  ;;  %v2817_v10 = vld [vmem:[#allocation2 + $0x100] sm:$0xff]  ;;  %4670 = vmatpush.msrb.mxu3 %v8309_v48 }
 0x792   :  { %2733 = vst.msk [vmem:[#allocation2 + $0x598] sm:$0xff] %vm28_vm0, %v2536_v9  ;;  %8143 = vmatmul.msk.f32.gmra.mxu3 %vm28_vm0, %v2797_v32  ;;  %v2354_v46 = vadd.f32 %v11143_v7, %v2157_v17  ;;  %v2355_v9 = vadd.f32 %v11143_v7, %v2158_v11  ;;  %v2548_v62 = vmax.f32 %v2352_v55, 0.0  ;;  %v2163_v63 = vmul.f32 %v11131_v3, %v10245_v51 }
 0x793   :  { %2734 = vst.msk [vmem:[#allocation2 + $0x5a0] sm:$0xff] %vm28_vm0, %v2537_v44  ;;  %8037 = vmatmul.msk.f32.gmra.mxu1 %vm28_vm0, %v2796_v43  ;;  %v2356_v44 = vadd.f32 %v11143_v7, %v2159_v60  ;;  %v2358_v37 = vadd.f32 %v11143_v7, %v2161_v30  ;;  %v2164_v19 = vmul.f32 %v11131_v3, %v10270_v23  ;;  %v2553_v32 = vmax.f32 %v2357_v6, 0.0  ;;  %v8195_v30 = vld [vmem:[%s14988_s2 + $0xf8] sm:$0xff]  ;;  %v8251_v6 = vld [vmem:[%s14988_s2 + $0x130] sm:$0xff] }
 0x794   :  { %2735 = vst.msk [vmem:[#allocation2 + $0x5a8] sm:$0xff] %vm28_vm0, %v2538_v12  ;;  %v2549_v12 = vmax.f32 %v2353_v18, 0.0  ;;  %v2359_v50 = vadd.f32 %v11143_v7, %v2162_v56  ;;  %v2551_v38 = vmax.f32 %v2355_v9, 0.0  ;;  %v2360_v51 = vadd.f32 %v11143_v7, %v2163_v63  ;;  %4058 = vmatpush.msrb.mxu1 %v8195_v30  ;;  %v2820_v30 = vld [vmem:[#allocation2 + $0x118] sm:$0xff] }
 0x795   :  { %2736 = vst.msk [vmem:[#allocation2 + $0x5b0] sm:$0xff] %vm28_vm0, %v2539_v29  ;;  %v2550_v29 = vmax.f32 %v2354_v46, 0.0  ;;  %v2552_v31 = vmax.f32 %v2356_v44, 0.0  ;;  %v2166_v23 = vmul.f32 %v11131_v3, %v10320_v25  ;;  %v2167_v34 = vmul.f32 %v11131_v3, %v10345_v21  ;;  %v15663_v25 = vld [vmem:[#allocation149_spill] sm:$0xff] }
 0x796   :  { %2737 = vst.msk [vmem:[#allocation2 + $0x5b8] sm:$0xff] %vm28_vm0, %v2540_v45  ;;  %v15662_v45 = vld [vmem:[#allocation148_spill] sm:$0xff]  ;;  %v2168_v24 = vmul.f32 %v11131_v3, %v10370_v13  ;;  %v2169_v43 = vmul.f32 %v11131_v3, %v15663_v25  ;;  %v2556_v17 = vmax.f32 %v2360_v51, 0.0  ;;  %v2170_v21 = vmul.f32 %v11131_v3, %v10420_v5  ;;  %v2801_v13 = vld [vmem:[#allocation2 + $0x70] sm:$0xff] }
 0x797   :  { %2738 = vst.msk [vmem:[#allocation2 + $0x5c0] sm:$0xff] %vm28_vm0, %v2541_v28  ;;  %v2165_v27 = vmul.f32 %v11131_v3, %v15662_v45  ;;  %v2361_v28 = vadd.f32 %v11143_v7, %v2164_v19  ;;  %v2363_v26 = vadd.f32 %v11143_v7, %v2166_v23  ;;  %v2364_v2 = vadd.f32 %v11143_v7, %v2167_v34  ;;  %v15665_v19 = vld [vmem:[#allocation151_spill] sm:$0xff]  ;;  %v15666_v45 = vld [vmem:[#allocation152_spill] sm:$0xff]  ;;  %v15667_v23 = vld [vmem:[#allocation153_spill] sm:$0xff] }
 0x798   :  { %2739 = vst.msk [vmem:[#allocation2 + $0x5c8] sm:$0xff] %vm28_vm0, %v2542_v42  ;;  %8088 = vmatmul.msk.f32.gmra.mxu2 %vm28_vm0, %v2799_v0  ;;  %v2554_v42 = vmax.f32 %v2358_v37, 0.0  ;;  %v2365_v55 = vadd.f32 %v11143_v7, %v2168_v24  ;;  %v2171_v11 = vmul.f32 %v11131_v3, %v10445_v61  ;;  %v2366_v18 = vadd.f32 %v11143_v7, %v2169_v43 }
 0x799   :  { %2740 = vst.msk [vmem:[#allocation2 + $0x5d0] sm:$0xff] %vm28_vm0, %v2543_v36  ;;  %v2362_v52 = vadd.f32 %v11143_v7, %v2165_v27  ;;  %v2555_v36 = vmax.f32 %v2359_v50, 0.0  ;;  %v2172_v60 = vmul.f32 %v11131_v3, %v10470_v57  ;;  %v2367_v46 = vadd.f32 %v11143_v7, %v2170_v21  ;;  %v8252_v57 = vld [vmem:[%s14988_s2 + $0x138] sm:$0xff] }
 0x79a   :  { %2741 = vst.msk [vmem:[#allocation2 + $0x5d8] sm:$0xff] %vm28_vm0, %v2544_v40  ;;  %8144 = vmatmul.msk.f32.gmra.mxu3 %vm28_vm0, %v2799_v0  ;;  %v2557_v40 = vmax.f32 %v2361_v28, 0.0  ;;  %v2559_v5 = vmax.f32 %v2363_v26, 0.0  ;;  %v2173_v61 = vmul.f32 %v11131_v3, %v10495_v53  ;;  %v2368_v9 = vadd.f32 %v11143_v7, %v2171_v11  ;;  %v15664_v53 = vld [vmem:[#allocation150_spill] sm:$0xff]  ;;  %4427 = vmatpush.msrb.mxu2 %v8252_v57  ;;  %v8194_v0 = vld [vmem:[%s14988_s2 + $0xf0] sm:$0xff] }
 0x79b   :  { %2742 = vst.msk [vmem:[#allocation2 + $0x5e0] sm:$0xff] %vm28_vm0, %v2545_v59  ;;  %8038 = vmatmul.msk.f32.gmra.mxu1 %vm28_vm0, %v2798_v54  ;;  %v2558_v59 = vmax.f32 %v2362_v52, 0.0  ;;  %v2174_v44 = vmul.f32 %v11131_v3, %v15664_v53  ;;  %v2561_v56 = vmax.f32 %v2365_v55, 0.0  ;;  %v2175_v63 = vmul.f32 %v11131_v3, %v10545_v41  ;;  %v2818_v52 = vld [vmem:[#allocation2 + $0x108] sm:$0xff] }
 0x79c   :  { %2743 = vst.msk [vmem:[#allocation2 + $0x5e8] sm:$0xff] %vm28_vm0, %v2546_v58  ;;  %v2800_v58 = vld [vmem:[#allocation2 + $0x68] sm:$0xff]  ;;  %v2370_v37 = vadd.f32 %v11143_v7, %v2173_v61  ;;  %v2176_v50 = vmul.f32 %v11131_v3, %v15665_v19  ;;  %v2563_v54 = vmax.f32 %v2367_v46, 0.0  ;;  %4428 = vmatpush.msrb.mxu2 %v8251_v6  ;;  %v2177_v27 = vmul.f32 %v11131_v3, %v15666_v45 }
 0x79d   :  { %2744 = vst.msk [vmem:[#allocation2 + $0x5f0] sm:$0xff] %vm28_vm0, %v2547_v47  ;;  %v2560_v47 = vmax.f32 %v2364_v2, 0.0  ;;  %v2372_v41 = vadd.f32 %v11143_v7, %v2175_v63  ;;  %v2564_v51 = vmax.f32 %v2368_v9, 0.0  ;;  %4059 = vmatpush.msrb.mxu1 %v8194_v0  ;;  %v2178_v28 = vmul.f32 %v11131_v3, %v15667_v23  ;;  %v15670_v63 = vld [vmem:[#allocation143_spill] sm:$0xff] }
 0x79e   :  { %2745 = vst.msk [vmem:[#allocation2 + $0x608] sm:$0xff] %vm28_vm0, %v2548_v62  ;;  %v2369_v62 = vadd.f32 %v11143_v7, %v2172_v60  ;;  %v2374_v26 = vadd.f32 %v11143_v7, %v2177_v27  ;;  %v2180_v25 = vmul.f32 %v11131_v3, %v10670_v22  ;;  %v2182_v22 = vmul.f32 %v11131_v3, %v10717_v8  ;;  %v15672_v27 = vld [vmem:[#allocation156_spill] sm:$0xff] }
 0x79f   :  { %2746 = vst.msk [vmem:[#allocation2 + $0x610] sm:$0xff] %vm28_vm0, %v2549_v12  ;;  %v8308_v12 = vld [vmem:[%s14988_s2 + $0x170] sm:$0xff]  ;;  %v2375_v43 = vadd.f32 %v11143_v7, %v2178_v28  ;;  %v2568_v55 = vmax.f32 %v2372_v41, 0.0  ;;  %v2185_v8 = vmul.f32 %v11131_v3, %v10783_v49  ;;  %v2821_v49 = vld [vmem:[#allocation2 + $0x120] sm:$0xff]  ;;  %v2188_v57 = vmul.f32 %v11131_v3, %v10849_v4  ;;  %v8250_v4 = vld [vmem:[%s14988_s2 + $0x128] sm:$0xff] }
 0x7a0   :  { %2747 = vst.msk [vmem:[#allocation2 + $0x618] sm:$0xff] %vm28_vm0, %v2550_v29  ;;  %8089 = vmatmul.msk.f32.gmra.mxu2 %vm28_vm0, %v2817_v10  ;;  %v2562_v29 = vmax.f32 %v2366_v18, 0.0  ;;  %4671 = vmatpush.msrb.mxu3 %v8308_v12  ;;  %v2565_v34 = vmax.f32 %v2369_v62, 0.0  ;;  %v2570_v18 = vmax.f32 %v2374_v26, 0.0  ;;  %v2379_v60 = vadd.f32 %v11143_v7, %v2182_v22  ;;  %v8307_v62 = vld [vmem:[%s14988_s2 + $0x168] sm:$0xff]  ;;  %v2823_v26 = vld [vmem:[#allocation2 + $0x130] sm:$0xff] }
 0x7a1   :  { %2748 = vst.msk [vmem:[#allocation2 + $0x620] sm:$0xff] %vm28_vm0, %v2551_v38  ;;  %v2371_v38 = vadd.f32 %v11143_v7, %v2174_v44  ;;  %v2571_v46 = vmax.f32 %v2375_v43, 0.0  ;;  %v2382_v9 = vadd.f32 %v11143_v7, %v2185_v8  ;;  %v2385_v12 = vadd.f32 %v11143_v7, %v2188_v57  ;;  %4429 = vmatpush.msrb.mxu2 %v8250_v4  ;;  %v2824_v22 = vld [vmem:[#allocation2 + $0x138] sm:$0xff]  ;;  %v2848_v8 = vld [vmem:[#allocation2 + $0x208] sm:$0xff] }
 0x7a2   :  { %2749 = vst.msk [vmem:[#allocation2 + $0x628] sm:$0xff] %vm28_vm0, %v2552_v31  ;;  %8145 = vmatmul.msk.f32.gmra.mxu3 %vm28_vm0, %v2801_v13  ;;  %v2819_v31 = vld [vmem:[#allocation2 + $0x110] sm:$0xff]  ;;  %v2193_v41 = vmul.f32 %v11131_v3, %v15672_v27  ;;  %v2194_v23 = vmul.f32 %v11131_v3, %v11023_v33  ;;  %v2822_v33 = vld [vmem:[#allocation2 + $0x128] sm:$0xff]  ;;  %v2854_v4 = vld [vmem:[#allocation2 + $0x238] sm:$0xff] }
 0x7a3   :  { %2750 = vst.msk [vmem:[#allocation2 + $0x630] sm:$0xff] %vm28_vm0, %v2553_v32  ;;  %8039 = vmatmul.msk.f32.gmra.mxu1 %vm28_vm0, %v2800_v58  ;;  %v2373_v32 = vadd.f32 %v11143_v7, %v2176_v50  ;;  %v2567_v2 = vmax.f32 %v2371_v38, 0.0  ;;  %4672 = vmatpush.msrb.mxu3 %v8307_v62  ;;  %v2578_v19 = vmax.f32 %v2382_v9, 0.0  ;;  %v15671_v50 = vld [vmem:[#allocation155_spill] sm:$0xff]  ;;  %v2852_v57 = vld [vmem:[#allocation2 + $0x228] sm:$0xff] }
 0x7a4   :  { %2751 = vst.msk [vmem:[#allocation2 + $0x638] sm:$0xff] %vm28_vm0, %v2554_v42  ;;  %v15668_v42 = vld [vmem:[#allocation154_spill] sm:$0xff]  ;;  %v2192_v38 = vmul.f32 %v11131_v3, %v15671_v50 }
 0x7a5   :  { %2752 = vst.msk [vmem:[#allocation2 + $0x640] sm:$0xff] %vm28_vm0, %v2555_v36  ;;  %v2179_v24 = vmul.f32 %v11131_v3, %v15668_v42  ;;  %v2566_v36 = vmax.f32 %v2370_v37, 0.0  ;;  %v2569_v13 = vmax.f32 %v2373_v32, 0.0  ;;  %v2191_v37 = vmul.f32 %v11131_v3, %v15670_v63  ;;  %v2856_v63 = vld [vmem:[#allocation2 + $0x248] sm:$0xff] }
 0x7a6   :  { %2753 = vst.msk [vmem:[#allocation2 + $0x648] sm:$0xff] %vm28_vm0, %v2556_v17  ;;  %v2181_v17 = vmul.f32 %v11131_v3, %v10695_v20  ;;  %v2183_v20 = vmul.f32 %v11131_v3, %v10739_v15  ;;  %v2186_v15 = vmul.f32 %v11131_v3, %v10805_v1  ;;  %v2575_v1 = vmax.f32 %v2379_v60, 0.0  ;;  %v2830_v60 = vld [vmem:[#allocation2 + $0x168] sm:$0xff] }
 0x7a7   :  { %2754 = vst.msk [vmem:[#allocation2 + $0x650] sm:$0xff] %vm28_vm0, %v2557_v40  ;;  %v2376_v21 = vadd.f32 %v11143_v7, %v2179_v24  ;;  %v2377_v40 = vadd.f32 %v11143_v7, %v2180_v25  ;;  %v2389_v28 = vadd.f32 %v11143_v7, %v2192_v38  ;;  %v2581_v32 = vmax.f32 %v2385_v12, 0.0  ;;  %v2857_v12 = vld [vmem:[#allocation2 + $0x250] sm:$0xff]  ;;  %v2859_v38 = vld [vmem:[#allocation2 + $0x260] sm:$0xff] }
 0x7a8   :  { %2755 = vst.msk [vmem:[#allocation2 + $0x658] sm:$0xff] %vm28_vm0, %v2558_v59  ;;  %8090 = vmatmul.msk.f32.gmra.mxu2 %vm28_vm0, %v2819_v31  ;;  %v2378_v11 = vadd.f32 %v11143_v7, %v2181_v17  ;;  %v2184_v59 = vmul.f32 %v11131_v3, %v10761_v14  ;;  %v2187_v14 = vmul.f32 %v11131_v3, %v10827_v16 }
 0x7a9   :  { %2756 = vst.msk [vmem:[#allocation2 + $0x660] sm:$0xff] %vm28_vm0, %v2559_v5  ;;  %v2380_v5 = vadd.f32 %v11143_v7, %v2183_v20  ;;  %v2572_v58 = vmax.f32 %v2376_v21, 0.0  ;;  %v2573_v61 = vmax.f32 %v2377_v40, 0.0  ;;  %v2383_v48 = vadd.f32 %v11143_v7, %v2186_v15  ;;  %v2827_v40 = vld [vmem:[#allocation2 + $0x150] sm:$0xff]  ;;  %v2829_v20 = vld [vmem:[#allocation2 + $0x160] sm:$0xff] }
 0x7aa   :  { %2757 = vst.msk [vmem:[#allocation2 + $0x668] sm:$0xff] %vm28_vm0, %v2560_v47  ;;  %8146 = vmatmul.msk.f32.gmra.mxu3 %vm28_vm0, %v2819_v31  ;;  %v2381_v10 = vadd.f32 %v11143_v7, %v2184_v59  ;;  %v2574_v47 = vmax.f32 %v2378_v11, 0.0  ;;  %v2189_v16 = vmul.f32 %v11131_v3, %v10871_v35  ;;  %v2384_v53 = vadd.f32 %v11143_v7, %v2187_v14  ;;  %v8193_v35 = vld [vmem:[%s14988_s2 + $0xe8] sm:$0xff]  ;;  %v2828_v11 = vld [vmem:[#allocation2 + $0x158] sm:$0xff]  ;;  %v2831_v59 = vld [vmem:[#allocation2 + $0x170] sm:$0xff] }
 0x7ab   :  { %2758 = vst.msk [vmem:[#allocation2 + $0x670] sm:$0xff] %vm28_vm0, %v2561_v56  ;;  %8040 = vmatmul.msk.f32.gmra.mxu1 %vm28_vm0, %v2818_v52  ;;  %v2576_v44 = vmax.f32 %v2380_v5, 0.0  ;;  %v15669_v56 = vld [vmem:[#allocation142_spill] sm:$0xff]  ;;  %v2579_v45 = vmax.f32 %v2383_v48, 0.0  ;;  %v2390_v42 = vadd.f32 %v11143_v7, %v2193_v41  ;;  %v8249_v5 = vld [vmem:[%s14988_s2 + $0x120] sm:$0xff] }
 0x7ac   :  { %2759 = vst.msk [vmem:[#allocation2 + $0x688] sm:$0xff] %vm28_vm0, %v2562_v29  ;;  %v2190_v6 = vmul.f32 %v11131_v3, %v15669_v56  ;;  %v2577_v0 = vmax.f32 %v2381_v10, 0.0  ;;  %v2386_v29 = vadd.f32 %v11143_v7, %v2189_v16  ;;  %4060 = vmatpush.msrb.mxu1 %v8193_v35  ;;  %v2580_v31 = vmax.f32 %v2384_v53, 0.0  ;;  %4430 = vmatpush.msrb.mxu2 %v8249_v5  ;;  %v2851_v15 = vld [vmem:[#allocation2 + $0x220] sm:$0xff] }
 0x7ad   :  { %2760 = vst.msk [vmem:[#allocation2 + $0x690] sm:$0xff] %vm28_vm0, %v2563_v54  ;;  %v2586_v17 = vmax.f32 %v2390_v42, 0.0  ;;  %v8192_v10 = vld [vmem:[%s14988_s2 + $0xe0] sm:$0xff] }
 0x7ae   :  { %2761 = vst.msk [vmem:[#allocation2 + $0x698] sm:$0xff] %vm28_vm0, %v2564_v51  ;;  %v2387_v54 = vadd.f32 %v11143_v7, %v2190_v6  ;;  %v2388_v51 = vadd.f32 %v11143_v7, %v2191_v37  ;;  %v2582_v24 = vmax.f32 %v2386_v29, 0.0  ;;  %4061 = vmatpush.msrb.mxu1 %v8192_v10  ;;  %v2855_v53 = vld [vmem:[#allocation2 + $0x240] sm:$0xff] }
 0x7af   :  { %2762 = vst.msk [vmem:[#allocation2 + $0x6a0] sm:$0xff] %vm28_vm0, %v2565_v34  ;;  %v15673_v34 = vld [vmem:[#allocation157_spill] sm:$0xff] }
 0x7b0   :  { %2763 = vst.msk [vmem:[#allocation2 + $0x6a8] sm:$0xff] %vm28_vm0, %v2566_v36  ;;  %8091 = vmatmul.msk.f32.gmra.mxu2 %vm28_vm0, %v2821_v49  ;;  %v2195_v52 = vmul.f32 %v11131_v3, %v15673_v34  ;;  %v2391_v36 = vadd.f32 %v11143_v7, %v2194_v23  ;;  %v2583_v25 = vmax.f32 %v2387_v54, 0.0  ;;  %v2585_v3 = vmax.f32 %v2389_v28, 0.0  ;;  %v2877_v23 = vld [vmem:[#allocation2 + $0x300] sm:$0xff]  ;;  %v2861_v28 = vld [vmem:[#allocation2 + $0x270] sm:$0xff]  ;;  %v2860_v34 = vld [vmem:[#allocation2 + $0x268] sm:$0xff] }
 0x7b1   :  { %2764 = vst.msk [vmem:[#allocation2 + $0x6b0] sm:$0xff] %vm28_vm0, %v2567_v2  ;;  %v2584_v2 = vmax.f32 %v2388_v51, 0.0 }
 0x7b2   :  { %2765 = vst.msk [vmem:[#allocation2 + $0x6b8] sm:$0xff] %vm28_vm0, %v2568_v55  ;;  %8147 = vmatmul.msk.f32.gmra.mxu3 %vm28_vm0, %v2821_v49  ;;  %v2392_v43 = vadd.f32 %v11143_v7, %v2195_v52  ;;  %v2587_v21 = vmax.f32 %v2391_v36, 0.0  ;;  %v2825_v7 = vld [vmem:[#allocation2 + $0x140] sm:$0xff]  ;;  %v8248_v52 = vld [vmem:[%s14988_s2 + $0x118] sm:$0xff] }
 0x7b3   :  { %2766 = vst.msk [vmem:[#allocation2 + $0x6c0] sm:$0xff] %vm28_vm0, %v2569_v13  ;;  %8041 = vmatmul.msk.f32.gmra.mxu1 %vm28_vm0, %v2820_v30  ;;  %v2826_v13 = vld [vmem:[#allocation2 + $0x148] sm:$0xff]  ;;  %4431 = vmatpush.msrb.mxu2 %v8248_v52  ;;  %v8305_v36 = vld [vmem:[%s14988_s2 + $0x158] sm:$0xff] }
 0x7b4   :  { %2767 = vst.msk [vmem:[#allocation2 + $0x6c8] sm:$0xff] %vm28_vm0, %v2570_v18  ;;  %v2588_v55 = vmax.f32 %v2392_v43, 0.0  ;;  %v2847_v18 = vld [vmem:[#allocation2 + $0x200] sm:$0xff]  ;;  %v8191_v43 = vld [vmem:[%s14988_s2 + $0xd8] sm:$0xff] }
 0x7b5   :  { %2768 = vst.msk [vmem:[#allocation2 + $0x6d0] sm:$0xff] %vm28_vm0, %v2571_v46  ;;  %v2849_v46 = vld [vmem:[#allocation2 + $0x210] sm:$0xff]  ;;  %4062 = vmatpush.msrb.mxu1 %v8191_v43 }
 0x7b6   :  { %2769 = vst.msk [vmem:[#allocation2 + $0x6d8] sm:$0xff] %vm28_vm0, %v2572_v58  ;;  %v8306_v58 = vld [vmem:[%s14988_s2 + $0x160] sm:$0xff] }
 0x7b7   :  { %2770 = vst.msk [vmem:[#allocation2 + $0x6e0] sm:$0xff] %vm28_vm0, %v2573_v61  ;;  %4673 = vmatpush.msrb.mxu3 %v8306_v58  ;;  %v2850_v61 = vld [vmem:[#allocation2 + $0x218] sm:$0xff] }
 0x7b8   :  { %2771 = vst.msk [vmem:[#allocation2 + $0x6e8] sm:$0xff] %vm28_vm0, %v2574_v47  ;;  %8092 = vmatmul.msk.f32.gmra.mxu2 %vm28_vm0, %v2823_v26  ;;  %v2853_v47 = vld [vmem:[#allocation2 + $0x230] sm:$0xff] }
 0x7b9   :  { %2772 = vst.msk [vmem:[#allocation2 + $0x6f0] sm:$0xff] %vm28_vm0, %v2575_v1  ;;  %4674 = vmatpush.msrb.mxu3 %v8305_v36 }
 0x7ba   :  { %2773 = vst.msk [vmem:[#allocation2 + $0x708] sm:$0xff] %vm28_vm0, %v2576_v44  ;;  %8148 = vmatmul.msk.f32.gmra.mxu3 %vm28_vm0, %v2823_v26 }
 0x7bb   :  { %2774 = vst.msk [vmem:[#allocation2 + $0x710] sm:$0xff] %vm28_vm0, %v2577_v0  ;;  %8042 = vmatmul.msk.f32.gmra.mxu1 %vm28_vm0, %v2822_v33  ;;  %v2879_v33 = vld [vmem:[#allocation2 + $0x310] sm:$0xff] }
 0x7bc   :  { %2775 = vst.msk [vmem:[#allocation2 + $0x718] sm:$0xff] %vm28_vm0, %v2578_v19 }
 0x7bd   :  { %2776 = vst.msk [vmem:[#allocation2 + $0x720] sm:$0xff] %vm28_vm0, %v2579_v45  ;;  %v2858_v45 = vld [vmem:[#allocation2 + $0x258] sm:$0xff] }
 0x7be   :  { %2777 = vst.msk [vmem:[#allocation2 + $0x728] sm:$0xff] %vm28_vm0, %v2580_v31 }
 0x7bf   :  { %2778 = vst.msk [vmem:[#allocation2 + $0x730] sm:$0xff] %vm28_vm0, %v2581_v32 }
 0x7c0   :  { %2779 = vst.msk [vmem:[#allocation2 + $0x738] sm:$0xff] %vm28_vm0, %v2582_v24  ;;  %8093 = vmatmul.msk.f32.gmra.mxu2 %vm28_vm0, %v2825_v7 }
 0x7c1   :  { %2780 = vst.msk [vmem:[#allocation2 + $0x740] sm:$0xff] %vm28_vm0, %v2583_v25 }
 0x7c2   :  { %2781 = vst.msk [vmem:[#allocation2 + $0x748] sm:$0xff] %vm28_vm0, %v2584_v2  ;;  %8149 = vmatmul.msk.f32.gmra.mxu3 %vm28_vm0, %v2825_v7 }
 0x7c3   :  { %2782 = vst.msk [vmem:[#allocation2 + $0x750] sm:$0xff] %vm28_vm0, %v2585_v3  ;;  %8043 = vmatmul.msk.f32.gmra.mxu1 %vm28_vm0, %v2824_v22  ;;  %v2878_v3 = vld [vmem:[#allocation2 + $0x308] sm:$0xff]  ;;  %v2881_v22 = vld [vmem:[#allocation2 + $0x320] sm:$0xff] }
 0x7c4   :  { %2783 = vst.msk [vmem:[#allocation2 + $0x758] sm:$0xff] %vm28_vm0, %v2586_v17 }
 0x7c5   :  { %2784 = vst.msk [vmem:[#allocation2 + $0x760] sm:$0xff] %vm28_vm0, %v2587_v21 }
 0x7c6   :  { %2785 = vst.msk [vmem:[#allocation2 + $0x768] sm:$0xff] %vm28_vm0, %v2588_v55 }
 0x7c8   :  { %8094 = vmatmul.msk.f32.gmra.mxu2 %vm28_vm0, %v2827_v40 }
 0x7ca   :  { %8150 = vmatmul.msk.f32.gmra.mxu3 %vm28_vm0, %v2827_v40 }
 0x7cb   :  { %8044 = vmatmul.msk.f32.gmra.mxu1 %vm28_vm0, %v2826_v13  ;;  %v2880_v13 = vld [vmem:[#allocation2 + $0x318] sm:$0xff] }
 0x7d0   :  { %8095 = vmatmul.msk.f32.gmra.mxu2 %vm28_vm0, %v2829_v20 }
 0x7d2   :  { %8151 = vmatmul.msk.f32.gmra.mxu3 %vm28_vm0, %v2829_v20 }
 0x7d3   :  { %8045 = vmatmul.msk.f32.gmra.mxu1 %vm28_vm0, %v2828_v11 }
 0x7d8   :  { %8096 = vmatmul.msk.f32.gmra.mxu2 %vm28_vm0, %v2847_v18 }
 0x7da   :  { %8152 = vmatmul.msk.f32.gmra.mxu3 %vm28_vm0, %v2831_v59 }
 0x7db   :  { %8046 = vmatmul.msk.f32.gmra.mxu1 %vm28_vm0, %v2830_v60  ;;  %v2883_v60 = vld [vmem:[#allocation2 + $0x330] sm:$0xff] }
 0x7e0   :  { %8097 = vmatmul.msk.f32.gmra.mxu2 %vm28_vm0, %v2849_v46 }
 0x7e2   :  { %8153 = vmatmul.msk.f32.gmra.mxu3 %vm28_vm0, %v2849_v46  ;;  %v2882_v46 = vld [vmem:[#allocation2 + $0x328] sm:$0xff] }
 0x7e3   :  { %8047 = vmatmul.msk.f32.gmra.mxu1 %vm28_vm0, %v2848_v8 }
 0x7e8   :  { %8098 = vmatmul.msk.f32.gmra.mxu2 %vm28_vm0, %v2851_v15 }
 0x7ea   :  { %8154 = vmatmul.msk.f32.gmra.mxu3 %vm28_vm0, %v2851_v15 }
 0x7eb   :  { %8048 = vmatmul.msk.f32.gmra.mxu1 %vm28_vm0, %v2850_v61  ;;  %v3504_v14 = vpop.f32.mrf.mxu2  ;;  %v2885_v61 = vld [vmem:[#allocation2 + $0x340] sm:$0xff] }
 0x7f0   :  { %v3193_v9 = vpop.f32.mrf.mxu1  ;;  %8099 = vmatmul.msk.f32.gmra.mxu2 %vm28_vm0, %v2853_v47 }
 0x7f1   :  { %v3505_v49 = vadd.f32 %v3504_v14, %v3193_v9  ;;  %v2884_v14 = vld [vmem:[#allocation2 + $0x338] sm:$0xff] }
 0x7f2   :  { %8155 = vmatmul.msk.f32.gmra.mxu3 %vm28_vm0, %v2853_v47 }
 0x7f3   :  { %8049 = vmatmul.msk.f32.gmra.mxu1 %vm28_vm0, %v2852_v57  ;;  %v3507_v30 = vpop.f32.mrf.mxu2 }
 0x7f5   :  { %v3698_v48 = vpop.f32.mrf.mxu3 }
 0x7f6   :  { %v12127_v1 = vadd.f32 %v3698_v48, %v3505_v49 }
 0x7f8   :  { %v3196_v16 = vpop.f32.mrf.mxu1  ;;  %8100 = vmatmul.msk.f32.gmra.mxu2 %vm28_vm0, %v2855_v53 }
 0x7f9   :  { %v3508_v44 = vadd.f32 %v3507_v30, %v3196_v16  ;;  %v2887_v30 = vld [vmem:[#allocation2 + $0x350] sm:$0xff]  ;;  %v2886_v16 = vld [vmem:[#allocation2 + $0x348] sm:$0xff] }
 0x7fa   :  { %8156 = vmatmul.msk.f32.gmra.mxu3 %vm28_vm0, %v2855_v53 }
 0x7fb   :  { %8050 = vmatmul.msk.f32.gmra.mxu1 %vm28_vm0, %v2854_v4  ;;  %v3510_v56 = vpop.f32.mrf.mxu2 }
 0x7fd   :  { %v3701_v62 = vpop.f32.mrf.mxu3 }
 0x7fe   :  { %v12132_v35 = vadd.f32 %v3701_v62, %v3508_v44 }
 0x800   :  { %v3199_v6 = vpop.f32.mrf.mxu1  ;;  %8101 = vmatmul.msk.f32.gmra.mxu2 %vm28_vm0, %v2857_v12 }
 0x801   :  { %v3511_v0 = vadd.f32 %v3510_v56, %v3199_v6  ;;  %v2889_v6 = vld [vmem:[#allocation2 + $0x360] sm:$0xff] }
 0x802   :  { %8157 = vmatmul.msk.f32.gmra.mxu3 %vm28_vm0, %v2857_v12  ;;  %v2888_v12 = vld [vmem:[#allocation2 + $0x358] sm:$0xff] }
 0x803   :  { %8051 = vmatmul.msk.f32.gmra.mxu1 %vm28_vm0, %v2856_v63  ;;  %v3513_v19 = vpop.f32.mrf.mxu2 }
 0x805   :  { %v3704_v37 = vpop.f32.mrf.mxu3 }
 0x806   :  { %v12137_v29 = vadd.f32 %v3704_v37, %v3511_v0 }
 0x808   :  { %v3202_v50 = vpop.f32.mrf.mxu1  ;;  %8102 = vmatmul.msk.f32.gmra.mxu2 %vm28_vm0, %v2859_v38 }
 0x809   :  { %v3514_v54 = vadd.f32 %v3513_v19, %v3202_v50  ;;  %v8247_v50 = vld [vmem:[%s14988_s2 + $0x110] sm:$0xff] }
 0x80a   :  { %8158 = vmatmul.msk.f32.gmra.mxu3 %vm28_vm0, %v2859_v38  ;;  %4432 = vmatpush.msrb.mxu2 %v8247_v50 }
 0x80b   :  { %8052 = vmatmul.msk.f32.gmra.mxu1 %vm28_vm0, %v2858_v45  ;;  %v3516_v51 = vpop.f32.mrf.mxu2  ;;  %v2891_v45 = vld [vmem:[#allocation2 + $0x370] sm:$0xff] }
 0x80d   :  { %v3707_v27 = vpop.f32.mrf.mxu3 }
 0x80e   :  { %v12142_v41 = vadd.f32 %v3707_v27, %v3514_v54  ;;  %v2907_v54 = vld [vmem:[#allocation2 + $0x400] sm:$0xff]  ;;  %v8304_v27 = vld [vmem:[%s14988_s2 + $0x150] sm:$0xff] }
 0x80f   :  { %4675 = vmatpush.msrb.mxu3 %v8304_v27 }
 0x810   :  { %v3205_v31 = vpop.f32.mrf.mxu1  ;;  %8103 = vmatmul.msk.f32.gmra.mxu2 %vm28_vm0, %v2877_v23 }
 0x811   :  { %v3517_v32 = vadd.f32 %v3516_v51, %v3205_v31  ;;  %v8190_v51 = vld [vmem:[%s14988_s2 + $0xd0] sm:$0xff]  ;;  %v2890_v31 = vld [vmem:[#allocation2 + $0x368] sm:$0xff] }
 0x812   :  { %8159 = vmatmul.msk.f32.gmra.mxu3 %vm28_vm0, %v2861_v28  ;;  %4063 = vmatpush.msrb.mxu1 %v8190_v51  ;;  %v2937_v51 = vld [vmem:[#allocation2 + $0x500] sm:$0xff] }
 0x813   :  { %8053 = vmatmul.msk.f32.gmra.mxu1 %vm28_vm0, %v2860_v34  ;;  %v3519_v26 = vpop.f32.mrf.mxu2 }
 0x815   :  { %v3710_v42 = vpop.f32.mrf.mxu3 }
 0x816   :  { %v12150_v24 = vadd.f32 %v3710_v42, %v3517_v32  ;;  %v2909_v42 = vld [vmem:[#allocation2 + $0x410] sm:$0xff] }
 0x818   :  { %v3208_v25 = vpop.f32.mrf.mxu1  ;;  %8104 = vmatmul.msk.f32.gmra.mxu2 %vm28_vm0, %v2879_v33 }
 0x819   :  { %v3520_v2 = vadd.f32 %v3519_v26, %v3208_v25  ;;  %v2908_v26 = vld [vmem:[#allocation2 + $0x408] sm:$0xff] }
 0x81a   :  { %8160 = vmatmul.msk.f32.gmra.mxu3 %vm28_vm0, %v2879_v33 }
 0x81b   :  { %8054 = vmatmul.msk.f32.gmra.mxu1 %vm28_vm0, %v2878_v3  ;;  %v3522_v55 = vpop.f32.mrf.mxu2  ;;  %v2911_v3 = vld [vmem:[#allocation2 + $0x420] sm:$0xff] }
 0x81d   :  { %v3713_v17 = vpop.f32.mrf.mxu3 }
 0x81e   :  { %v12161_v21 = vadd.f32 %v3713_v17, %v3520_v2  ;;  %v2910_v17 = vld [vmem:[#allocation2 + $0x418] sm:$0xff] }
 0x820   :  { %v3211_v7 = vpop.f32.mrf.mxu1  ;;  %8105 = vmatmul.msk.f32.gmra.mxu2 %vm28_vm0, %v2881_v22 }
 0x821   :  { %v3523_v40 = vadd.f32 %v3522_v55, %v3211_v7 }
 0x822   :  { %8161 = vmatmul.msk.f32.gmra.mxu3 %vm28_vm0, %v2881_v22 }
 0x823   :  { %8055 = vmatmul.msk.f32.gmra.mxu1 %vm28_vm0, %v2880_v13  ;;  %v3525_v18 = vpop.f32.mrf.mxu2 }
 0x825   :  { %v3716_v20 = vpop.f32.mrf.mxu3 }
 0x826   :  { %v12166_v11 = vadd.f32 %v3716_v20, %v3523_v40  ;;  %v2913_v20 = vld [vmem:[#allocation2 + $0x430] sm:$0xff] }
 0x828   :  { %v3214_v59 = vpop.f32.mrf.mxu1  ;;  %8106 = vmatmul.msk.f32.gmra.mxu2 %vm28_vm0, %v2883_v60 }
 0x829   :  { %v3526_v8 = vadd.f32 %v3525_v18, %v3214_v59  ;;  %v2912_v18 = vld [vmem:[#allocation2 + $0x428] sm:$0xff] }
 0x82a   :  { %8162 = vmatmul.msk.f32.gmra.mxu3 %vm28_vm0, %v2883_v60 }
 0x82b   :  { %8056 = vmatmul.msk.f32.gmra.mxu1 %vm28_vm0, %v2882_v46  ;;  %v3528_v58 = vpop.f32.mrf.mxu2 }
 0x82d   :  { %v3719_v5 = vpop.f32.mrf.mxu3 }
 0x82e   :  { %v12171_v15 = vadd.f32 %v3719_v5, %v3526_v8 }
 0x830   :  { %v3217_v10 = vpop.f32.mrf.mxu1  ;;  %8107 = vmatmul.msk.f32.gmra.mxu2 %vm28_vm0, %v2885_v61 }
 0x831   :  { %v3529_v9 = vadd.f32 %v3528_v58, %v3217_v10  ;;  %v2915_v58 = vld [vmem:[#allocation2 + $0x440] sm:$0xff]  ;;  %v2914_v10 = vld [vmem:[#allocation2 + $0x438] sm:$0xff] }
 0x832   :  { %8163 = vmatmul.msk.f32.gmra.mxu3 %vm28_vm0, %v2885_v61 }
 0x833   :  { %8057 = vmatmul.msk.f32.gmra.mxu1 %vm28_vm0, %v2884_v14  ;;  %v3531_v49 = vpop.f32.mrf.mxu2 }
 0x835   :  { %v3722_v47 = vpop.f32.mrf.mxu3 }
 0x836   :  { %v12176_v57 = vadd.f32 %v3722_v47, %v3529_v9 }
 0x838   :  { %v3220_v48 = vpop.f32.mrf.mxu1  ;;  %8108 = vmatmul.msk.f32.gmra.mxu2 %vm28_vm0, %v2887_v30 }
 0x839   :  { %v3532_v53 = vadd.f32 %v3531_v49, %v3220_v48  ;;  %v2917_v48 = vld [vmem:[#allocation2 + $0x450] sm:$0xff] }
 0x83a   :  { %8164 = vmatmul.msk.f32.gmra.mxu3 %vm28_vm0, %v2887_v30  ;;  %v2916_v30 = vld [vmem:[#allocation2 + $0x448] sm:$0xff] }
 0x83b   :  { %8058 = vmatmul.msk.f32.gmra.mxu1 %vm28_vm0, %v2886_v16  ;;  %v3534_v4 = vpop.f32.mrf.mxu2 }
 0x83d   :  { %v3725_v44 = vpop.f32.mrf.mxu3 }
 0x83e   :  { %v12181_v62 = vadd.f32 %v3725_v44, %v3532_v53 }
 0x840   :  { %v3223_v56 = vpop.f32.mrf.mxu1  ;;  %8109 = vmatmul.msk.f32.gmra.mxu2 %vm28_vm0, %v2889_v6 }
 0x841   :  { %v3535_v0 = vadd.f32 %v3534_v4, %v3223_v56  ;;  %v8246_v56 = vld [vmem:[%s14988_s2 + $0x108] sm:$0xff] }
 0x842   :  { %8165 = vmatmul.msk.f32.gmra.mxu3 %vm28_vm0, %v2889_v6  ;;  %4433 = vmatpush.msrb.mxu2 %v8246_v56 }
 0x843   :  { %8059 = vmatmul.msk.f32.gmra.mxu1 %vm28_vm0, %v2888_v12  ;;  %v3537_v37 = vpop.f32.mrf.mxu2  ;;  %v2919_v12 = vld [vmem:[#allocation2 + $0x460] sm:$0xff] }
 0x845   :  { %v3728_v63 = vpop.f32.mrf.mxu3 }
 0x846   :  { %v12186_v19 = vadd.f32 %v3728_v63, %v3535_v0  ;;  %v8303_v0 = vld [vmem:[%s14988_s2 + $0x148] sm:$0xff]  ;;  %v2918_v63 = vld [vmem:[#allocation2 + $0x458] sm:$0xff] }
 0x847   :  { %4676 = vmatpush.msrb.mxu3 %v8303_v0  ;;  %v8302_v0 = vld [vmem:[%s14988_s2 + $0x140] sm:$0xff] }
 0x848   :  { %v3226_v38 = vpop.f32.mrf.mxu1  ;;  %8110 = vmatmul.msk.f32.gmra.mxu2 %vm28_vm0, %v2907_v54 }
 0x849   :  { %v3538_v23 = vadd.f32 %v3537_v37, %v3226_v38  ;;  %v8189_v37 = vld [vmem:[%s14988_s2 + $0xc8] sm:$0xff]  ;;  %4677 = vmatpush.msrb.mxu3 %v8302_v0 }
 0x84a   :  { %8166 = vmatmul.msk.f32.gmra.mxu3 %vm28_vm0, %v2891_v45  ;;  %4064 = vmatpush.msrb.mxu1 %v8189_v37  ;;  %v8188_v37 = vld [vmem:[%s14988_s2 + $0xc0] sm:$0xff] }
 0x84b   :  { %8060 = vmatmul.msk.f32.gmra.mxu1 %vm28_vm0, %v2890_v31  ;;  %v3540_v32 = vpop.f32.mrf.mxu2  ;;  %v2921_v31 = vld [vmem:[#allocation2 + $0x470] sm:$0xff] }
 0x84c   :  { %4065 = vmatpush.msrb.mxu1 %v8188_v37 }
 0x84d   :  { %v3731_v28 = vpop.f32.mrf.mxu3 }
 0x84e   :  { %v12200_v34 = vadd.f32 %v3731_v28, %v3538_v23  ;;  %v2920_v23 = vld [vmem:[#allocation2 + $0x468] sm:$0xff] }
 0x850   :  { %v3229_v52 = vpop.f32.mrf.mxu1  ;;  %8111 = vmatmul.msk.f32.gmra.mxu2 %vm28_vm0, %v2909_v42 }
 0x851   :  { %v3541_v36 = vadd.f32 %v3540_v32, %v3229_v52 }
 0x852   :  { %8167 = vmatmul.msk.f32.gmra.mxu3 %vm28_vm0, %v2909_v42 }
 0x853   :  { %8061 = vmatmul.msk.f32.gmra.mxu1 %vm28_vm0, %v2908_v26  ;;  %v3543_v33 = vpop.f32.mrf.mxu2 }
 0x855   :  { %v3734_v25 = vpop.f32.mrf.mxu3 }
 0x856   :  { %v12205_v43 = vadd.f32 %v3734_v25, %v3541_v36  ;;  %v2939_v36 = vld [vmem:[#allocation2 + $0x510] sm:$0xff]  ;;  %v2938_v25 = vld [vmem:[#allocation2 + $0x508] sm:$0xff] }
 0x858   :  { %v3232_v2 = vpop.f32.mrf.mxu1  ;;  %8112 = vmatmul.msk.f32.gmra.mxu2 %vm28_vm0, %v2911_v3 }
 0x859   :  { %v3544_v55 = vadd.f32 %v3543_v33, %v3232_v2 }
 0x85a   :  { %8168 = vmatmul.msk.f32.gmra.mxu3 %vm28_vm0, %v2911_v3 }
 0x85b   :  { %8062 = vmatmul.msk.f32.gmra.mxu1 %vm28_vm0, %v2910_v17  ;;  %v3546_v22 = vpop.f32.mrf.mxu2 }
 0x85d   :  { %v3737_v7 = vpop.f32.mrf.mxu3 }
 0x85e   :  { %v12210_v40 = vadd.f32 %v3737_v7, %v3544_v55  ;;  %v2941_v7 = vld [vmem:[#allocation2 + $0x520] sm:$0xff] }
 0x860   :  { %v3235_v13 = vpop.f32.mrf.mxu1  ;;  %8113 = vmatmul.msk.f32.gmra.mxu2 %vm28_vm0, %v2913_v20 }
 0x861   :  { %v3547_v59 = vadd.f32 %v3546_v22, %v3235_v13  ;;  %v2940_v22 = vld [vmem:[#allocation2 + $0x518] sm:$0xff] }
 0x862   :  { %8169 = vmatmul.msk.f32.gmra.mxu3 %vm28_vm0, %v2913_v20 }
 0x863   :  { %8063 = vmatmul.msk.f32.gmra.mxu1 %vm28_vm0, %v2912_v18  ;;  %v3549_v46 = vpop.f32.mrf.mxu2 }
 0x865   :  { %v3740_v60 = vpop.f32.mrf.mxu3 }
 0x866   :  { %v12215_v8 = vadd.f32 %v3740_v60, %v3547_v59 }
 0x868   :  { %v3238_v5 = vpop.f32.mrf.mxu1  ;;  %8114 = vmatmul.msk.f32.gmra.mxu2 %vm28_vm0, %v2915_v58 }
 0x869   :  { %v3550_v61 = vadd.f32 %v3549_v46, %v3238_v5  ;;  %v2943_v46 = vld [vmem:[#allocation2 + $0x530] sm:$0xff]  ;;  %v2942_v5 = vld [vmem:[#allocation2 + $0x528] sm:$0xff] }
 0x86a   :  { %8170 = vmatmul.msk.f32.gmra.mxu3 %vm28_vm0, %v2915_v58 }
 0x86b   :  { %8064 = vmatmul.msk.f32.gmra.mxu1 %vm28_vm0, %v2914_v10  ;;  %v3552_v9 = vpop.f32.mrf.mxu2 }
 0x86d   :  { %v3743_v14 = vpop.f32.mrf.mxu3 }
 0x86e   :  { %v12220_v47 = vadd.f32 %v3743_v14, %v3550_v61 }
 0x870   :  { %v3241_v49 = vpop.f32.mrf.mxu1  ;;  %8115 = vmatmul.msk.f32.gmra.mxu2 %vm28_vm0, %v2917_v48 }
 0x871   :  { %v3553_v16 = vadd.f32 %v3552_v9, %v3241_v49  ;;  %v2945_v49 = vld [vmem:[#allocation2 + $0x540] sm:$0xff] }
 0x872   :  { %8171 = vmatmul.msk.f32.gmra.mxu3 %vm28_vm0, %v2917_v48  ;;  %v2944_v48 = vld [vmem:[#allocation2 + $0x538] sm:$0xff] }
 0x873   :  { %8065 = vmatmul.msk.f32.gmra.mxu1 %vm28_vm0, %v2916_v30  ;;  %v3555_v44 = vpop.f32.mrf.mxu2 }
 0x875   :  { %v3746_v53 = vpop.f32.mrf.mxu3 }
 0x876   :  { %v12225_v4 = vadd.f32 %v3746_v53, %v3553_v16 }
 0x878   :  { %v3244_v6 = vpop.f32.mrf.mxu1  ;;  %8116 = vmatmul.msk.f32.gmra.mxu2 %vm28_vm0, %v2919_v12 }
 0x879   :  { %v3556_v50 = vadd.f32 %v3555_v44, %v3244_v6  ;;  %v2947_v6 = vld [vmem:[#allocation2 + $0x550] sm:$0xff] }
 0x87a   :  { %8172 = vmatmul.msk.f32.gmra.mxu3 %vm28_vm0, %v2919_v12  ;;  %v8245_v12 = vld [vmem:[%s14988_s2 + $0x100] sm:$0xff] }
 0x87b   :  { %8066 = vmatmul.msk.f32.gmra.mxu1 %vm28_vm0, %v2918_v63  ;;  %v3558_v54 = vpop.f32.mrf.mxu2  ;;  %v2946_v63 = vld [vmem:[#allocation2 + $0x548] sm:$0xff]  ;;  %4434 = vmatpush.msrb.mxu2 %v8245_v12 }
 0x87c   :  { %v2972_v12 = vld [vmem:[#allocation2 + $0x628] sm:$0xff] }
 0x87d   :  { %v3749_v38 = vpop.f32.mrf.mxu3 }
 0x87e   :  { %v12239_v45 = vadd.f32 %v3749_v38, %v3556_v50 }
 0x880   :  { %v3247_v27 = vpop.f32.mrf.mxu1  ;;  %8117 = vmatmul.msk.f32.gmra.mxu2 %vm28_vm0, %v2937_v51 }
 0x881   :  { %v3559_v28 = vadd.f32 %v3558_v54, %v3247_v27 }
 0x882   :  { %8173 = vmatmul.msk.f32.gmra.mxu3 %vm28_vm0, %v2921_v31  ;;  %v2949_v31 = vld [vmem:[#allocation2 + $0x560] sm:$0xff] }
 0x883   :  { %8067 = vmatmul.msk.f32.gmra.mxu1 %vm28_vm0, %v2920_v23  ;;  %v3561_v52 = vpop.f32.mrf.mxu2  ;;  %v2948_v23 = vld [vmem:[#allocation2 + $0x558] sm:$0xff] }
 0x885   :  { %v3752_v32 = vpop.f32.mrf.mxu3 }
 0x886   :  { %v12244_v42 = vadd.f32 %v3752_v32, %v3559_v28  ;;  %v8789_v28 = vld [vmem:[%s14988_s2 + $0x578] sm:$0xff] }
 0x887   :  { %7549 = vmatpush.msrb.mxu0 %v8789_v28  ;;  %v8366_v28 = vld [vmem:[%s14988_s2 + $0x1b8] sm:$0xff] }
 0x888   :  { %v3250_v26 = vpop.f32.mrf.mxu1  ;;  %8118 = vmatmul.msk.f32.gmra.mxu2 %vm28_vm0, %v2939_v36  ;;  %4913 = vmatpush.msra.mxu1 %v8366_v28 }
 0x889   :  { %v3562_v33 = vadd.f32 %v3561_v52, %v3250_v26 }
 0x88a   :  { %8174 = vmatmul.msk.f32.gmra.mxu3 %vm28_vm0, %v2939_v36 }
 0x88b   :  { %8068 = vmatmul.msk.f32.gmra.mxu1 %vm28_vm0, %v2938_v25  ;;  %v3564_v3 = vpop.f32.mrf.mxu2 }
 0x88d   :  { %v3755_v2 = vpop.f32.mrf.mxu3 }
 0x88e   :  { %v12249_v17 = vadd.f32 %v3755_v2, %v3562_v33  ;;  %v2967_v33 = vld [vmem:[#allocation2 + $0x600] sm:$0xff]  ;;  %v2951_v2 = vld [vmem:[#allocation2 + $0x570] sm:$0xff] }
 0x890   :  { %v3253_v55 = vpop.f32.mrf.mxu1  ;;  %8119 = vmatmul.msk.f32.gmra.mxu2 %vm28_vm0, %v2941_v7 }
 0x891   :  { %v3565_v13 = vadd.f32 %v3564_v3, %v3253_v55  ;;  %v2950_v3 = vld [vmem:[#allocation2 + $0x568] sm:$0xff] }
 0x892   :  { %8175 = vmatmul.msk.f32.gmra.mxu3 %vm28_vm0, %v2941_v7 }
 0x893   :  { %8069 = vmatmul.msk.f32.gmra.mxu1 %vm28_vm0, %v2940_v22  ;;  %v3567_v18 = vpop.f32.mrf.mxu2 }
 0x895   :  { %v3758_v20 = vpop.f32.mrf.mxu3 }
 0x896   :  { %v12254_v59 = vadd.f32 %v3758_v20, %v3565_v13 }
 0x898   :  { %v3256_v60 = vpop.f32.mrf.mxu1  ;;  %8120 = vmatmul.msk.f32.gmra.mxu2 %vm28_vm0, %v2943_v46 }
 0x899   :  { %v3568_v58 = vadd.f32 %v3567_v18, %v3256_v60  ;;  %v2969_v18 = vld [vmem:[#allocation2 + $0x610] sm:$0xff]  ;;  %v2968_v60 = vld [vmem:[#allocation2 + $0x608] sm:$0xff] }
 0x89a   :  { %8176 = vmatmul.msk.f32.gmra.mxu3 %vm28_vm0, %v2943_v46 }
 0x89b   :  { %8070 = vmatmul.msk.f32.gmra.mxu1 %vm28_vm0, %v2942_v5  ;;  %v3570_v61 = vpop.f32.mrf.mxu2 }
 0x89d   :  { %v3761_v10 = vpop.f32.mrf.mxu3 }
 0x89e   :  { %v12259_v14 = vadd.f32 %v3761_v10, %v3568_v58 }
 0x8a0   :  { %v3259_v9 = vpop.f32.mrf.mxu1  ;;  %8121 = vmatmul.msk.f32.gmra.mxu2 %vm28_vm0, %v2945_v49 }
 0x8a1   :  { %v3571_v30 = vadd.f32 %v3570_v61, %v3259_v9  ;;  %v2971_v9 = vld [vmem:[#allocation2 + $0x620] sm:$0xff] }
 0x8a2   :  { %8177 = vmatmul.msk.f32.gmra.mxu3 %vm28_vm0, %v2945_v49  ;;  %v2970_v49 = vld [vmem:[#allocation2 + $0x618] sm:$0xff] }
 0x8a3   :  { %8071 = vmatmul.msk.f32.gmra.mxu1 %vm28_vm0, %v2944_v48  ;;  %v3573_v53 = vpop.f32.mrf.mxu2 }
 0x8a5   :  { %v3764_v16 = vpop.f32.mrf.mxu3 }
 0x8a6   :  { %v12264_v44 = vadd.f32 %v3764_v16, %v3571_v30 }
 0x8a8   :  { %v3262_v56 = vpop.f32.mrf.mxu1  ;;  %8122 = vmatmul.msk.f32.gmra.mxu2 %vm28_vm0, %v2947_v6 }
 0x8a9   :  { %v3574_v50 = vadd.f32 %v3573_v53, %v3262_v56 }
 0x8aa   :  { %8178 = vmatmul.msk.f32.gmra.mxu3 %vm28_vm0, %v2947_v6  ;;  %v2973_v6 = vld [vmem:[#allocation2 + $0x630] sm:$0xff] }
 0x8ab   :  { %8072 = vmatmul.msk.f32.gmra.mxu1 %vm28_vm0, %v2946_v63  ;;  %v3576_v54 = vpop.f32.mrf.mxu2 }
 0x8ad   :  { %v3767_v38 = vpop.f32.mrf.mxu3 }
 0x8ae   :  { %v12278_v27 = vadd.f32 %v3767_v38, %v3574_v50 }
 0x8b0   :  { %v3265_v51 = vpop.f32.mrf.mxu1  ;;  %8123 = vmatmul.msk.f32.gmra.mxu2 %vm28_vm0, %v2949_v31 }
 0x8b1   :  { %v3577_v32 = vadd.f32 %v3576_v54, %v3265_v51  ;;  %v2975_v54 = vld [vmem:[#allocation2 + $0x640] sm:$0xff]  ;;  %v8423_v51 = vld [vmem:[%s14988_s2 + $0x1f8] sm:$0xff] }
 0x8b2   :  { %8179 = vmatmul.msk.f32.gmra.mxu3 %vm28_vm0, %v2949_v31  ;;  %v2974_v31 = vld [vmem:[#allocation2 + $0x638] sm:$0xff]  ;;  %5156 = vmatpush.msra.mxu2 %v8423_v51 }
 0x8b3   :  { %8073 = vmatmul.msk.f32.gmra.mxu1 %vm28_vm0, %v2948_v23  ;;  %v3579_v26 = vpop.f32.mrf.mxu2  ;;  %v8480_v23 = vld [vmem:[%s14988_s2 + $0x238] sm:$0xff] }
 0x8b4   :  { %5381 = vmatpush.msra.mxu3 %v8480_v23 }
 0x8b5   :  { %v3770_v52 = vpop.f32.mrf.mxu3 }
 0x8b6   :  { %v12286_v36 = vadd.f32 %v3770_v52, %v3577_v32 }
 0x8b8   :  { %v3268_v25 = vpop.f32.mrf.mxu1  ;;  %8124 = vmatmul.msk.f32.gmra.mxu2 %vm28_vm0, %v2967_v33 }
 0x8b9   :  { %v3580_v55 = vadd.f32 %v3579_v26, %v3268_v25 }
 0x8ba   :  { %8180 = vmatmul.msk.f32.gmra.mxu3 %vm28_vm0, %v2951_v2  ;;  %v2977_v2 = vld [vmem:[#allocation2 + $0x650] sm:$0xff] }
 0x8bb   :  { %8074 = vmatmul.msk.f32.gmra.mxu1 %vm28_vm0, %v2950_v3  ;;  %v3582_v22 = vpop.f32.mrf.mxu2  ;;  %v2976_v3 = vld [vmem:[#allocation2 + $0x648] sm:$0xff] }
 0x8bd   :  { %v3773_v7 = vpop.f32.mrf.mxu3 }
 0x8be   :  { %v12291_v13 = vadd.f32 %v3773_v7, %v3580_v55 }
 0x8c0   :  { %v3271_v20 = vpop.f32.mrf.mxu1  ;;  %8125 = vmatmul.msk.f32.gmra.mxu2 %vm28_vm0, %v2969_v18 }
 0x8c1   :  { %v3583_v46 = vadd.f32 %v3582_v22, %v3271_v20 }
 0x8c2   :  { %8181 = vmatmul.msk.f32.gmra.mxu3 %vm28_vm0, %v2969_v18 }
 0x8c3   :  { %8075 = vmatmul.msk.f32.gmra.mxu1 %vm28_vm0, %v2968_v60  ;;  %v3585_v58 = vpop.f32.mrf.mxu2  ;;  %v2979_v60 = vld [vmem:[#allocation2 + $0x660] sm:$0xff] }
 0x8c5   :  { %v3776_v5 = vpop.f32.mrf.mxu3 }
 0x8c6   :  { %v12296_v10 = vadd.f32 %v3776_v5, %v3583_v46  ;;  %v2978_v46 = vld [vmem:[#allocation2 + $0x658] sm:$0xff] }
 0x8c8   :  { %v3274_v61 = vpop.f32.mrf.mxu1  ;;  %8126 = vmatmul.msk.f32.gmra.mxu2 %vm28_vm0, %v2971_v9 }
 0x8c9   :  { %v3586_v48 = vadd.f32 %v3585_v58, %v3274_v61 }
 0x8ca   :  { %8182 = vmatmul.msk.f32.gmra.mxu3 %vm28_vm0, %v2971_v9 }
 0x8cb   :  { %8076 = vmatmul.msk.f32.gmra.mxu1 %vm28_vm0, %v2970_v49  ;;  %v3588_v16 = vpop.f32.mrf.mxu2 }
 0x8cd   :  { %v3779_v30 = vpop.f32.mrf.mxu3 }
 0x8ce   :  { %v12301_v53 = vadd.f32 %v3779_v30, %v3586_v48  ;;  %v2981_v48 = vld [vmem:[#allocation2 + $0x670] sm:$0xff]  ;;  %v2980_v30 = vld [vmem:[#allocation2 + $0x668] sm:$0xff] }
 0x8d0   :  { %v3277_v56 = vpop.f32.mrf.mxu1  ;;  %8127 = vmatmul.msk.f32.gmra.mxu2 %vm28_vm0, %v2973_v6 }
 0x8d1   :  { %v3589_v0 = vadd.f32 %v3588_v16, %v3277_v56  ;;  %v2803_v16 = vld [vmem:[#allocation2 + $0x88] sm:$0xff] }
 0x8d2   :  { %8183 = vmatmul.msk.f32.gmra.mxu3 %vm28_vm0, %v2973_v6 }
 0x8d3   :  { %8077 = vmatmul.msk.f32.gmra.mxu1 %vm28_vm0, %v2972_v12  ;;  %v3591_v37 = vpop.f32.mrf.mxu2 }
 0x8d5   :  { %v3782_v63 = vpop.f32.mrf.mxu3 }
 0x8d6   :  { %v12306_v50 = vadd.f32 %v3782_v63, %v3589_v0 }
 0x8d8   :  { %v3280_v38 = vpop.f32.mrf.mxu1  ;;  %8128 = vmatmul.msk.f32.gmra.mxu2 %vm28_vm0, %v2975_v54 }
 0x8d9   :  { %v3592_v32 = vadd.f32 %v3591_v37, %v3280_v38  ;;  %v2802_v37 = vld [vmem:[#allocation2 + $0x80] sm:$0xff]  ;;  %v2804_v38 = vld [vmem:[#allocation2 + $0x90] sm:$0xff] }
 0x8da   :  { %8184 = vmatmul.msk.f32.gmra.mxu3 %vm28_vm0, %v2975_v54  ;;  %v2805_v54 = vld [vmem:[#allocation2 + $0x98] sm:$0xff] }
 0x8db   :  { %8078 = vmatmul.msk.f32.gmra.mxu1 %vm28_vm0, %v2974_v31  ;;  %v3594_v26 = vpop.f32.mrf.mxu2 }
 0x8dd   :  { %v3785_v52 = vpop.f32.mrf.mxu3 }
 0x8de   :  { %v12320_v25 = vadd.f32 %v3785_v52, %v3592_v32  ;;  %v2806_v52 = vld [vmem:[#allocation2 + $0xa0] sm:$0xff] }
 0x8e0   :  { %v3283_v33 = vpop.f32.mrf.mxu1  ;;  %8129 = vmatmul.msk.f32.gmra.mxu2 %vm28_vm0, %v2977_v2 }
 0x8e1   :  { %v3595_v55 = vadd.f32 %v3594_v26, %v3283_v33  ;;  %v2807_v26 = vld [vmem:[#allocation2 + $0xa8] sm:$0xff] }
 0x8e2   :  { %8185 = vmatmul.msk.f32.gmra.mxu3 %vm28_vm0, %v2977_v2 }
 0x8e3   :  { %8079 = vmatmul.msk.f32.gmra.mxu1 %vm28_vm0, %v2976_v3  ;;  %v3597_v22 = vpop.f32.mrf.mxu2 }
 0x8e5   :  { %v3788_v7 = vpop.f32.mrf.mxu3 }
 0x8e6   :  { %v12325_v20 = vadd.f32 %v3788_v7, %v3595_v55 }
 0x8e8   :  { %v3286_v18 = vpop.f32.mrf.mxu1  ;;  %8130 = vmatmul.msk.f32.gmra.mxu2 %vm28_vm0, %v2979_v60 }
 0x8e9   :  { %v3598_v5 = vadd.f32 %v3597_v22, %v3286_v18  ;;  %v2808_v22 = vld [vmem:[#allocation2 + $0xb0] sm:$0xff] }
 0x8ea   :  { %8186 = vmatmul.msk.f32.gmra.mxu3 %vm28_vm0, %v2979_v60  ;;  %v8422_v18 = vld [vmem:[%s14988_s2 + $0x1f0] sm:$0xff]  ;;  %v2809_v60 = vld [vmem:[#allocation2 + $0xb8] sm:$0xff] }
 0x8eb   :  { %8080 = vmatmul.msk.f32.gmra.mxu1 %vm28_vm0, %v2978_v46  ;;  %v3600_v61 = vpop.f32.mrf.mxu2  ;;  %5157 = vmatpush.msra.mxu2 %v8422_v18  ;;  %v8479_v46 = vld [vmem:[%s14988_s2 + $0x230] sm:$0xff] }
 0x8ec   :  { %5382 = vmatpush.msra.mxu3 %v8479_v46  ;;  %v2816_v46 = vld [vmem:[#allocation2 + $0xf0] sm:$0xff] }
 0x8ed   :  { %v3791_v58 = vpop.f32.mrf.mxu3 }
 0x8ee   :  { %v12330_v9 = vadd.f32 %v3791_v58, %v3598_v5 }
 0x8f0   :  { %v3289_v49 = vpop.f32.mrf.mxu1  ;;  %8253 = vmatmul.msk.f32.vlgmr.msrb.gmra.mxu2 %vm28_vm0, %v2803_v16  ;;  %v2810_v16 = vld [vmem:[#allocation2 + $0xc0] sm:$0xff] }
 0x8f1   :  { %v3601_v56 = vadd.f32 %v3600_v61, %v3289_v49 }
 0x8f2   :  { %8187 = vmatmul.msk.f32.gmra.mxu3 %vm28_vm0, %v2981_v48  ;;  %v8365_v48 = vld [vmem:[%s14988_s2 + $0x1b0] sm:$0xff] }
 0x8f3   :  { %8081 = vmatmul.msk.f32.gmra.mxu1 %vm28_vm0, %v2980_v30  ;;  %v3603_v12 = vpop.f32.mrf.mxu2 }
 0x8f4   :  { %4914 = vmatpush.msra.mxu1 %v8365_v48 }
 0x8f5   :  { %v3794_v6 = vpop.f32.mrf.mxu3 }
 0x8f6   :  { %v12335_v0 = vadd.f32 %v3794_v6, %v3601_v56  ;;  %v2811_v56 = vld [vmem:[#allocation2 + $0xc8] sm:$0xff] }
 0x8f8   :  { %v3292_v63 = vpop.f32.mrf.mxu1  ;;  %8254 = vmatmul.msk.f32.gmra.mxu2 %vm28_vm0, %v2805_v54  ;;  %v2812_v54 = vld [vmem:[#allocation2 + $0xd0] sm:$0xff] }
 0x8f9   :  { %v3604_v51 = vadd.f32 %v3603_v12, %v3292_v63 }
 0x8fa   :  { %8310 = vmatmul.msk.f32.vlgmr.msrb.gmra.mxu3 %vm28_vm0, %v2804_v38 }
 0x8fb   :  { %8196 = vmatmul.msk.f32.vlgmr.msrb.gmra.mxu1 %vm28_vm0, %v2802_v37  ;;  %v3606_v23 = vpop.f32.mrf.mxu2 }
 0x8fd   :  { %v3797_v31 = vpop.f32.mrf.mxu3 }
 0x8fe   :  { %v12340_v28 = vadd.f32 %v3797_v31, %v3604_v51  ;;  %v2813_v51 = vld [vmem:[#allocation2 + $0xd8] sm:$0xff] }
 0x900   :  { %v3295_v32 = vpop.f32.mrf.mxu1  ;;  %8255 = vmatmul.msk.f32.gmra.mxu2 %vm28_vm0, %v2807_v26 }
 0x901   :  { %v3607_v33 = vadd.f32 %v3606_v23, %v3295_v32 }
 0x902   :  { %8311 = vmatmul.msk.f32.gmra.mxu3 %vm28_vm0, %v2806_v52 }
 0x903   :  { %8197 = vmatmul.msk.f32.gmra.mxu1 %vm28_vm0, %v2804_v38  ;;  %v3609_v3 = vpop.f32.mrf.mxu2 }
 0x905   :  { %v3800_v2 = vpop.f32.mrf.mxu3 }
 0x906   :  { %v12345_v55 = vadd.f32 %v3800_v2, %v3607_v33  ;;  %v2814_v33 = vld [vmem:[#allocation2 + $0xe0] sm:$0xff]  ;;  %v2815_v2 = vld [vmem:[#allocation2 + $0xe8] sm:$0xff] }
 0x908   :  { %v3298_v7 = vpop.f32.mrf.mxu1  ;;  %8256 = vmatmul.msk.f32.gmra.mxu2 %vm28_vm0, %v2809_v60 }
 0x909   :  { %v3610_v5 = vadd.f32 %v3609_v3, %v3298_v7 }
 0x90a   :  { %8312 = vmatmul.msk.f32.gmra.mxu3 %vm28_vm0, %v2808_v22 }
 0x90b   :  { %8198 = vmatmul.msk.f32.gmra.mxu1 %vm28_vm0, %v2806_v52  ;;  %v3612_v61 = vpop.f32.mrf.mxu2 }
 0x90d   :  { %v3803_v58 = vpop.f32.mrf.mxu3 }
 0x90e   :  { %v12356_v49 = vadd.f32 %v3803_v58, %v3610_v5  ;;  %v2833_v5 = vld [vmem:[#allocation2 + $0x188] sm:$0xff] }
 0x910   :  { %v3301_v30 = vpop.f32.mrf.mxu1  ;;  %8257 = vmatmul.msk.f32.gmra.mxu2 %vm28_vm0, %v2811_v56  ;;  %v2832_v56 = vld [vmem:[#allocation2 + $0x180] sm:$0xff] }
 0x911   :  { %v3613_v6 = vadd.f32 %v3612_v61, %v3301_v30 }
 0x912   :  { %8313 = vmatmul.msk.f32.gmra.mxu3 %vm28_vm0, %v2810_v16 }
 0x913   :  { %8199 = vmatmul.msk.f32.gmra.mxu1 %vm28_vm0, %v2808_v22  ;;  %v3615_v63 = vpop.f32.mrf.mxu2 }
 0x915   :  { %v3806_v12 = vpop.f32.mrf.mxu3 }
 0x916   :  { %v12364_v37 = vadd.f32 %v3806_v12, %v3613_v6  ;;  %v2834_v6 = vld [vmem:[#allocation2 + $0x190] sm:$0xff]  ;;  %v2835_v12 = vld [vmem:[#allocation2 + $0x198] sm:$0xff] }
 0x918   :  { %v3304_v38 = vpop.f32.mrf.mxu1  ;;  %8258 = vmatmul.msk.f32.gmra.mxu2 %vm28_vm0, %v2813_v51 }
 0x919   :  { %v3616_v31 = vadd.f32 %v3615_v63, %v3304_v38 }
 0x91a   :  { %8314 = vmatmul.msk.f32.gmra.mxu3 %vm28_vm0, %v2812_v54 }
 0x91b   :  { %8200 = vmatmul.msk.f32.gmra.mxu1 %vm28_vm0, %v2810_v16  ;;  %v3618_v32 = vpop.f32.mrf.mxu2 }
 0x91d   :  { %v3809_v23 = vpop.f32.mrf.mxu3 }
 0x91e   :  { %v12369_v52 = vadd.f32 %v3809_v23, %v3616_v31  ;;  %v2836_v23 = vld [vmem:[#allocation2 + $0x1a0] sm:$0xff] }
 0x920   :  { %v3307_v26 = vpop.f32.mrf.mxu1  ;;  %8259 = vmatmul.msk.f32.gmra.mxu2 %vm28_vm0, %v2815_v2 }
 0x921   :  { %v3619_v3 = vadd.f32 %v3618_v32, %v3307_v26  ;;  %v2837_v32 = vld [vmem:[#allocation2 + $0x1a8] sm:$0xff] }
 0x922   :  { %8315 = vmatmul.msk.f32.gmra.mxu3 %vm28_vm0, %v2814_v33  ;;  %v8421_v26 = vld [vmem:[%s14988_s2 + $0x1e8] sm:$0xff] }
 0x923   :  { %8201 = vmatmul.msk.f32.gmra.mxu1 %vm28_vm0, %v2812_v54  ;;  %v3621_v22 = vpop.f32.mrf.mxu2  ;;  %5158 = vmatpush.msra.mxu2 %v8421_v26  ;;  %v2842_v26 = vld [vmem:[#allocation2 + $0x1d0] sm:$0xff] }
 0x925   :  { %v3812_v7 = vpop.f32.mrf.mxu3 }
 0x926   :  { %v12374_v18 = vadd.f32 %v3812_v7, %v3619_v3 }
 0x928   :  { %v3310_v60 = vpop.f32.mrf.mxu1  ;;  %8260 = vmatmul.msk.f32.gmra.mxu2 %vm28_vm0, %v2833_v5  ;;  %v2838_v5 = vld [vmem:[#allocation2 + $0x1b0] sm:$0xff] }
 0x929   :  { %v3622_v58 = vadd.f32 %v3621_v22, %v3310_v60  ;;  %v8364_v60 = vld [vmem:[%s14988_s2 + $0x1a8] sm:$0xff] }
 0x92a   :  { %8316 = vmatmul.msk.f32.gmra.mxu3 %vm28_vm0, %v2816_v46  ;;  %4915 = vmatpush.msra.mxu1 %v8364_v60 }
 0x92b   :  { %8202 = vmatmul.msk.f32.gmra.mxu1 %vm28_vm0, %v2814_v33  ;;  %v3624_v48 = vpop.f32.mrf.mxu2  ;;  %v8478_v33 = vld [vmem:[%s14988_s2 + $0x228] sm:$0xff] }
 0x92c   :  { %5383 = vmatpush.msra.mxu3 %v8478_v33  ;;  %v2843_v33 = vld [vmem:[#allocation2 + $0x1d8] sm:$0xff] }
 0x92d   :  { %v3815_v61 = vpop.f32.mrf.mxu3 }
 0x92e   :  { %v12379_v30 = vadd.f32 %v3815_v61, %v3622_v58  ;;  %v2839_v58 = vld [vmem:[#allocation2 + $0x1b8] sm:$0xff] }
 0x930   :  { %v3313_v16 = vpop.f32.mrf.mxu1  ;;  %8261 = vmatmul.msk.f32.gmra.mxu2 %vm28_vm0, %v2835_v12  ;;  %v2840_v12 = vld [vmem:[#allocation2 + $0x1c0] sm:$0xff] }
 0x931   :  { %v3625_v63 = vadd.f32 %v3624_v48, %v3313_v16 }
 0x932   :  { %8317 = vmatmul.msk.f32.gmra.mxu3 %vm28_vm0, %v2834_v6 }
 0x933   :  { %8203 = vmatmul.msk.f32.gmra.mxu1 %vm28_vm0, %v2832_v56  ;;  %v3627_v54 = vpop.f32.mrf.mxu2 }
 0x935   :  { %v3818_v38 = vpop.f32.mrf.mxu3 }
 0x936   :  { %v12384_v51 = vadd.f32 %v3818_v38, %v3625_v63  ;;  %v2841_v63 = vld [vmem:[#allocation2 + $0x1c8] sm:$0xff] }
 0x938   :  { %v3316_v31 = vpop.f32.mrf.mxu1  ;;  %8262 = vmatmul.msk.f32.gmra.mxu2 %vm28_vm0, %v2837_v32 }
 0x939   :  { %v3628_v2 = vadd.f32 %v3627_v54, %v3316_v31 }
 0x93a   :  { %8318 = vmatmul.msk.f32.gmra.mxu3 %vm28_vm0, %v2836_v23 }
 0x93b   :  { %8204 = vmatmul.msk.f32.gmra.mxu1 %vm28_vm0, %v2834_v6  ;;  %v3630_v7 = vpop.f32.mrf.mxu2 }
 0x93d   :  { %v3821_v3 = vpop.f32.mrf.mxu3 }
 0x93e   :  { %v12395_v22 = vadd.f32 %v3821_v3, %v3628_v2 }
 0x940   :  { %v3319_v46 = vpop.f32.mrf.mxu1  ;;  %8263 = vmatmul.msk.f32.gmra.mxu2 %vm28_vm0, %v2839_v58  ;;  %v2845_v58 = vld [vmem:[#allocation2 + $0x1e8] sm:$0xff] }
 0x941   :  { %v3631_v61 = vadd.f32 %v3630_v7, %v3319_v46 }
 0x942   :  { %8319 = vmatmul.msk.f32.gmra.mxu3 %vm28_vm0, %v2838_v5 }
 0x943   :  { %8205 = vmatmul.msk.f32.gmra.mxu1 %vm28_vm0, %v2836_v23  ;;  %v3633_v16 = vpop.f32.mrf.mxu2 }
 0x945   :  { %v3824_v48 = vpop.f32.mrf.mxu3 }
 0x946   :  { %v12403_v56 = vadd.f32 %v3824_v48, %v3631_v61 }
 0x948   :  { %v3322_v6 = vpop.f32.mrf.mxu1  ;;  %8264 = vmatmul.msk.f32.gmra.mxu2 %vm28_vm0, %v2841_v63  ;;  %v2846_v63 = vld [vmem:[#allocation2 + $0x1f0] sm:$0xff] }
 0x949   :  { %v3634_v38 = vadd.f32 %v3633_v16, %v3322_v6 }
 0x94a   :  { %8320 = vmatmul.msk.f32.gmra.mxu3 %vm28_vm0, %v2840_v12 }
 0x94b   :  { %8206 = vmatmul.msk.f32.gmra.mxu1 %vm28_vm0, %v2838_v5  ;;  %v3636_v31 = vpop.f32.mrf.mxu2  ;;  %v2844_v5 = vld [vmem:[#allocation2 + $0x1e0] sm:$0xff] }
 0x94d   :  { %v3827_v54 = vpop.f32.mrf.mxu3 }
 0x94e   :  { %v12408_v23 = vadd.f32 %v3827_v54, %v3634_v38  ;;  %v2863_v38 = vld [vmem:[#allocation2 + $0x288] sm:$0xff] }
 0x950   :  { %v3325_v32 = vpop.f32.mrf.mxu1  ;;  %8265 = vmatmul.msk.f32.gmra.mxu2 %vm28_vm0, %v2843_v33 }
 0x951   :  { %v3637_v2 = vadd.f32 %v3636_v31, %v3325_v32 }
 0x952   :  { %8321 = vmatmul.msk.f32.gmra.mxu3 %vm28_vm0, %v2842_v26 }
 0x953   :  { %8207 = vmatmul.msk.f32.gmra.mxu1 %vm28_vm0, %v2840_v12  ;;  %v3639_v7 = vpop.f32.mrf.mxu2 }
 0x955   :  { %v3830_v3 = vpop.f32.mrf.mxu3 }
 0x956   :  { %v12413_v60 = vadd.f32 %v3830_v3, %v3637_v2  ;;  %v2862_v2 = vld [vmem:[#allocation2 + $0x280] sm:$0xff]  ;;  %v2864_v3 = vld [vmem:[#allocation2 + $0x290] sm:$0xff] }
 0x958   :  { %v3328_v46 = vpop.f32.mrf.mxu1  ;;  %8266 = vmatmul.msk.f32.gmra.mxu2 %vm28_vm0, %v2845_v58 }
 0x959   :  { %v3640_v61 = vadd.f32 %v3639_v7, %v3328_v46  ;;  %v2865_v7 = vld [vmem:[#allocation2 + $0x298] sm:$0xff]  ;;  %v8420_v46 = vld [vmem:[%s14988_s2 + $0x1e0] sm:$0xff] }
 0x95a   :  { %8322 = vmatmul.msk.f32.gmra.mxu3 %vm28_vm0, %v2844_v5  ;;  %5159 = vmatpush.msra.mxu2 %v8420_v46 }
 0x95b   :  { %8208 = vmatmul.msk.f32.gmra.mxu1 %vm28_vm0, %v2842_v26  ;;  %v3642_v16 = vpop.f32.mrf.mxu2 }
 0x95d   :  { %v3833_v48 = vpop.f32.mrf.mxu3 }
 0x95e   :  { %v12418_v6 = vadd.f32 %v3833_v48, %v3640_v61 }
 0x960   :  { %v3331_v12 = vpop.f32.mrf.mxu1  ;;  %8267 = vmatmul.msk.f32.gmra.mxu2 %vm28_vm0, %v2863_v38  ;;  %v8363_v38 = vld [vmem:[%s14988_s2 + $0x1a0] sm:$0xff] }
 0x961   :  { %v3643_v54 = vadd.f32 %v3642_v16, %v3331_v12  ;;  %v8477_v16 = vld [vmem:[%s14988_s2 + $0x220] sm:$0xff]  ;;  %4916 = vmatpush.msra.mxu1 %v8363_v38 }
 0x962   :  { %8323 = vmatmul.msk.f32.gmra.mxu3 %vm28_vm0, %v2846_v63  ;;  %v2866_v63 = vld [vmem:[#allocation2 + $0x2a0] sm:$0xff] }
 0x963   :  { %8209 = vmatmul.msk.f32.gmra.mxu1 %vm28_vm0, %v2844_v5  ;;  %v3645_v32 = vpop.f32.mrf.mxu2  ;;  %5384 = vmatpush.msra.mxu3 %v8477_v16  ;;  %v2869_v16 = vld [vmem:[#allocation2 + $0x2b8] sm:$0xff] }
 0x965   :  { %v3836_v31 = vpop.f32.mrf.mxu3 }
 0x966   :  { %v12423_v26 = vadd.f32 %v3836_v31, %v3643_v54  ;;  %v2867_v54 = vld [vmem:[#allocation2 + $0x2a8] sm:$0xff] }
 0x968   :  { %v3334_v33 = vpop.f32.mrf.mxu1  ;;  %8268 = vmatmul.msk.f32.gmra.mxu2 %vm28_vm0, %v2865_v7 }
 0x969   :  { %v3646_v5 = vadd.f32 %v3645_v32, %v3334_v33 }
 0x96a   :  { %8324 = vmatmul.msk.f32.gmra.mxu3 %vm28_vm0, %v2864_v3 }
 0x96b   :  { %8210 = vmatmul.msk.f32.gmra.mxu1 %vm28_vm0, %v2862_v2  ;;  %v3648_v61 = vpop.f32.mrf.mxu2 }
 0x96d   :  { %v3839_v58 = vpop.f32.mrf.mxu3 }
 0x96e   :  { %v12431_v48 = vadd.f32 %v3839_v58, %v3646_v5  ;;  %v2868_v5 = vld [vmem:[#allocation2 + $0x2b0] sm:$0xff] }
 0x96f   :  { %v8788_v58 = vld [vmem:[%s14988_s2 + $0x570] sm:$0xff] }
 0x970   :  { %v3337_v12 = vpop.f32.mrf.mxu1  ;;  %8269 = vmatmul.msk.f32.gmra.mxu2 %vm28_vm0, %v2867_v54  ;;  %7550 = vmatpush.msrb.mxu0 %v8788_v58 }
 0x971   :  { %v3649_v31 = vadd.f32 %v3648_v61, %v3337_v12 }
 0x972   :  { %8325 = vmatmul.msk.f32.gmra.mxu3 %vm28_vm0, %v2866_v63 }
 0x973   :  { %8211 = vmatmul.msk.f32.gmra.mxu1 %vm28_vm0, %v2864_v3  ;;  %v4436_v2 = vpop.f32.mrf.mxu2 }
 0x975   :  { %v3842_v32 = vpop.f32.mrf.mxu3 }
 0x976   :  { %v12442_v33 = vadd.f32 %v3842_v32, %v3649_v31  ;;  %v2870_v31 = vld [vmem:[#allocation2 + $0x2c0] sm:$0xff]  ;;  %v2871_v32 = vld [vmem:[#allocation2 + $0x2c8] sm:$0xff] }
 0x978   :  { %v4067_v7 = vpop.f32.mrf.mxu1  ;;  %8270 = vmatmul.msk.f32.gmra.mxu2 %vm28_vm0, %v2869_v16 }
 0x979   :  { %v4214_v46 = vadd.f32 %v4067_v7, %v12127_v1 }
 0x97a   :  { %8326 = vmatmul.msk.f32.gmra.mxu3 %vm28_vm0, %v2868_v5 }
 0x97b   :  { %8212 = vmatmul.msk.f32.gmra.mxu1 %vm28_vm0, %v2866_v63  ;;  %v4583_v3 = vadd.f32 %v4436_v2, %v4214_v46  ;;  %v4439_v12 = vpop.f32.mrf.mxu2 }
 0x97d   :  { %v4679_v61 = vpop.f32.mrf.mxu3 }
 0x97e   :  { %v12451_v38 = vadd.f32 %v4679_v61, %v4583_v3  ;;  %v2872_v3 = vld [vmem:[#allocation2 + $0x2d0] sm:$0xff]  ;;  %v2873_v61 = vld [vmem:[#allocation2 + $0x2d8] sm:$0xff] }
 0x980   :  { %v4070_v54 = vpop.f32.mrf.mxu1  ;;  %8271 = vmatmul.msk.f32.gmra.mxu2 %vm28_vm0, %v2871_v32 }
 0x981   :  { %v4215_v1 = vadd.f32 %v4070_v54, %v12132_v35 }
 0x982   :  { %8327 = vmatmul.msk.f32.gmra.mxu3 %vm28_vm0, %v2870_v31 }
 0x983   :  { %8213 = vmatmul.msk.f32.gmra.mxu1 %vm28_vm0, %v2868_v5  ;;  %v4584_v7 = vadd.f32 %v4439_v12, %v4215_v1  ;;  %v4442_v58 = vpop.f32.mrf.mxu2 }
 0x985   :  { %v4682_v63 = vpop.f32.mrf.mxu3 }
 0x986   :  { %v12457_v16 = vadd.f32 %v4682_v63, %v4584_v7  ;;  %v2874_v7 = vld [vmem:[#allocation2 + $0x2e0] sm:$0xff]  ;;  %v2875_v63 = vld [vmem:[#allocation2 + $0x2e8] sm:$0xff] }
 0x988   :  { %v4073_v2 = vpop.f32.mrf.mxu1  ;;  %8272 = vmatmul.msk.f32.gmra.mxu2 %vm28_vm0, %v2873_v61 }
 0x989   :  { %v4216_v46 = vadd.f32 %v4073_v2, %v12137_v29 }
 0x98a   :  { %8328 = vmatmul.msk.f32.gmra.mxu3 %vm28_vm0, %v2872_v3 }
 0x98b   :  { %8214 = vmatmul.msk.f32.gmra.mxu1 %vm28_vm0, %v2870_v31  ;;  %v4585_v35 = vadd.f32 %v4442_v58, %v4216_v46  ;;  %v4445_v54 = vpop.f32.mrf.mxu2 }
 0x98d   :  { %v4685_v5 = vpop.f32.mrf.mxu3 }
 0x98e   :  { %v12463_v32 = vadd.f32 %v4685_v5, %v4585_v35  ;;  %v2876_v35 = vld [vmem:[#allocation2 + $0x2f0] sm:$0xff]  ;;  %v2893_v5 = vld [vmem:[#allocation2 + $0x388] sm:$0xff] }
 0x990   :  { %v4076_v12 = vpop.f32.mrf.mxu1  ;;  %8273 = vmatmul.msk.f32.gmra.mxu2 %vm28_vm0, %v2875_v63 }
 0x991   :  { %v4217_v1 = vadd.f32 %v4076_v12, %v12142_v41 }
 0x992   :  { %8329 = vmatmul.msk.f32.gmra.mxu3 %vm28_vm0, %v2874_v7 }
 0x993   :  { %8215 = vmatmul.msk.f32.gmra.mxu1 %vm28_vm0, %v2872_v3  ;;  %v4586_v29 = vadd.f32 %v4445_v54, %v4217_v1  ;;  %v4448_v2 = vpop.f32.mrf.mxu2  ;;  %v8419_v3 = vld [vmem:[%s14988_s2 + $0x1d8] sm:$0xff] }
 0x994   :  { %5160 = vmatpush.msra.mxu2 %v8419_v3 }
 0x995   :  { %v4688_v31 = vpop.f32.mrf.mxu3 }
 0x996   :  { %v12469_v61 = vadd.f32 %v4688_v31, %v4586_v29  ;;  %v2892_v29 = vld [vmem:[#allocation2 + $0x380] sm:$0xff]  ;;  %v2894_v31 = vld [vmem:[#allocation2 + $0x390] sm:$0xff] }
 0x998   :  { %v4079_v58 = vpop.f32.mrf.mxu1  ;;  %8274 = vmatmul.msk.f32.gmra.mxu2 %vm28_vm0, %v2893_v5 }
 0x999   :  { %v4218_v46 = vadd.f32 %v4079_v58, %v12150_v24  ;;  %v8476_v24 = vld [vmem:[%s14988_s2 + $0x218] sm:$0xff] }
 0x99a   :  { %8330 = vmatmul.msk.f32.gmra.mxu3 %vm28_vm0, %v2876_v35  ;;  %v2895_v58 = vld [vmem:[#allocation2 + $0x398] sm:$0xff] }
 0x99b   :  { %8216 = vmatmul.msk.f32.gmra.mxu1 %vm28_vm0, %v2874_v7  ;;  %v4587_v41 = vadd.f32 %v4448_v2, %v4218_v46  ;;  %v4451_v12 = vpop.f32.mrf.mxu2  ;;  %5385 = vmatpush.msra.mxu3 %v8476_v24  ;;  %v8362_v2 = vld [vmem:[%s14988_s2 + $0x198] sm:$0xff]  ;;  %v2897_v24 = vld [vmem:[#allocation2 + $0x3a8] sm:$0xff] }
 0x99c   :  { %4917 = vmatpush.msra.mxu1 %v8362_v2 }
 0x99d   :  { %v4691_v54 = vpop.f32.mrf.mxu3 }
 0x99e   :  { %v12478_v1 = vadd.f32 %v4691_v54, %v4587_v41  ;;  %v2896_v54 = vld [vmem:[#allocation2 + $0x3a0] sm:$0xff] }
 0x9a0   :  { %v4082_v63 = vpop.f32.mrf.mxu1  ;;  %8275 = vmatmul.msk.f32.gmra.mxu2 %vm28_vm0, %v2895_v58 }
 0x9a1   :  { %v4219_v7 = vadd.f32 %v4082_v63, %v12161_v21 }
 0x9a2   :  { %8331 = vmatmul.msk.f32.gmra.mxu3 %vm28_vm0, %v2894_v31 }
 0x9a3   :  { %8217 = vmatmul.msk.f32.gmra.mxu1 %vm28_vm0, %v2892_v29  ;;  %v4588_v46 = vadd.f32 %v4451_v12, %v4219_v7  ;;  %v4454_v5 = vpop.f32.mrf.mxu2 }
 0x9a5   :  { %v4694_v35 = vpop.f32.mrf.mxu3 }
 0x9a6   :  { %v12490_v41 = vadd.f32 %v4694_v35, %v4588_v46  ;;  %v2898_v46 = vld [vmem:[#allocation2 + $0x3b0] sm:$0xff]  ;;  %v2899_v35 = vld [vmem:[#allocation2 + $0x3b8] sm:$0xff] }
 0x9a8   :  { %v4085_v3 = vpop.f32.mrf.mxu1  ;;  %8276 = vmatmul.msk.f32.gmra.mxu2 %vm28_vm0, %v2897_v24 }
 0x9a9   :  { %v4220_v21 = vadd.f32 %v4085_v3, %v12166_v11 }
 0x9aa   :  { %8332 = vmatmul.msk.f32.gmra.mxu3 %vm28_vm0, %v2896_v54 }
 0x9ab   :  { %8218 = vmatmul.msk.f32.gmra.mxu1 %vm28_vm0, %v2894_v31  ;;  %v4589_v63 = vadd.f32 %v4454_v5, %v4220_v21  ;;  %v4457_v2 = vpop.f32.mrf.mxu2 }
 0x9ad   :  { %v4697_v29 = vpop.f32.mrf.mxu3 }
 0x9ae   :  { %v12496_v58 = vadd.f32 %v4697_v29, %v4589_v63  ;;  %v2900_v63 = vld [vmem:[#allocation2 + $0x3c0] sm:$0xff]  ;;  %v2901_v29 = vld [vmem:[#allocation2 + $0x3c8] sm:$0xff] }
 0x9b0   :  { %v4088_v12 = vpop.f32.mrf.mxu1  ;;  %8277 = vmatmul.msk.f32.gmra.mxu2 %vm28_vm0, %v2899_v35 }
 0x9b1   :  { %v4221_v7 = vadd.f32 %v4088_v12, %v12171_v15 }
 0x9b2   :  { %8333 = vmatmul.msk.f32.gmra.mxu3 %vm28_vm0, %v2898_v46 }
 0x9b3   :  { %8219 = vmatmul.msk.f32.gmra.mxu1 %vm28_vm0, %v2896_v54  ;;  %v4590_v11 = vadd.f32 %v4457_v2, %v4221_v7  ;;  %v4460_v3 = vpop.f32.mrf.mxu2 }
 0x9b5   :  { %v4700_v31 = vpop.f32.mrf.mxu3 }
 0x9b6   :  { %v12502_v24 = vadd.f32 %v4700_v31, %v4590_v11  ;;  %v2902_v11 = vld [vmem:[#allocation2 + $0x3d0] sm:$0xff]  ;;  %v2903_v31 = vld [vmem:[#allocation2 + $0x3d8] sm:$0xff] }
 0x9b8   :  { %v4091_v5 = vpop.f32.mrf.mxu1  ;;  %8278 = vmatmul.msk.f32.gmra.mxu2 %vm28_vm0, %v2901_v29 }
 0x9b9   :  { %v4222_v21 = vadd.f32 %v4091_v5, %v12176_v57 }
 0x9ba   :  { %8334 = vmatmul.msk.f32.gmra.mxu3 %vm28_vm0, %v2900_v63 }
 0x9bb   :  { %8220 = vmatmul.msk.f32.gmra.mxu1 %vm28_vm0, %v2898_v46  ;;  %v4591_v15 = vadd.f32 %v4460_v3, %v4222_v21  ;;  %v4463_v12 = vpop.f32.mrf.mxu2 }
 0x9bd   :  { %v4703_v54 = vpop.f32.mrf.mxu3 }
 0x9be   :  { %v12508_v35 = vadd.f32 %v4703_v54, %v4591_v15  ;;  %v2904_v15 = vld [vmem:[#allocation2 + $0x3e0] sm:$0xff]  ;;  %v2905_v54 = vld [vmem:[#allocation2 + $0x3e8] sm:$0xff] }
 0x9c0   :  { %v4094_v2 = vpop.f32.mrf.mxu1  ;;  %8279 = vmatmul.msk.f32.gmra.mxu2 %vm28_vm0, %v2903_v31 }
 0x9c1   :  { %v4223_v7 = vadd.f32 %v4094_v2, %v12181_v62 }
 0x9c2   :  { %8335 = vmatmul.msk.f32.gmra.mxu3 %vm28_vm0, %v2902_v11 }
 0x9c3   :  { %8221 = vmatmul.msk.f32.gmra.mxu1 %vm28_vm0, %v2900_v63  ;;  %v4592_v57 = vadd.f32 %v4463_v12, %v4223_v7  ;;  %v4466_v5 = vpop.f32.mrf.mxu2  ;;  %v8418_v12 = vld [vmem:[%s14988_s2 + $0x1d0] sm:$0xff] }
 0x9c4   :  { %5161 = vmatpush.msra.mxu2 %v8418_v12 }
 0x9c5   :  { %v4706_v46 = vpop.f32.mrf.mxu3 }
 0x9c6   :  { %v12514_v29 = vadd.f32 %v4706_v46, %v4592_v57  ;;  %v2906_v57 = vld [vmem:[#allocation2 + $0x3f0] sm:$0xff] }
 0x9c7   :  { %v8361_v46 = vld [vmem:[%s14988_s2 + $0x190] sm:$0xff] }
 0x9c8   :  { %v4097_v3 = vpop.f32.mrf.mxu1  ;;  %8280 = vmatmul.msk.f32.gmra.mxu2 %vm28_vm0, %v2905_v54  ;;  %4918 = vmatpush.msra.mxu1 %v8361_v46 }
 0x9c9   :  { %v4224_v21 = vadd.f32 %v4097_v3, %v12186_v19 }
 0x9ca   :  { %8336 = vmatmul.msk.f32.gmra.mxu3 %vm28_vm0, %v2904_v15 }
 0x9cb   :  { %8222 = vmatmul.msk.f32.gmra.mxu1 %vm28_vm0, %v2902_v11  ;;  %v4593_v62 = vadd.f32 %v4466_v5, %v4224_v21  ;;  %v4469_v2 = vpop.f32.mrf.mxu2  ;;  %v8475_v11 = vld [vmem:[%s14988_s2 + $0x210] sm:$0xff]  ;;  %v2923_v5 = vld [vmem:[#allocation2 + $0x488] sm:$0xff] }
 0x9cc   :  { %5386 = vmatpush.msra.mxu3 %v8475_v11 }
 0x9cd   :  { %v4709_v63 = vpop.f32.mrf.mxu3 }
 0x9ce   :  { %v12520_v31 = vadd.f32 %v4709_v63, %v4593_v62  ;;  %v2922_v63 = vld [vmem:[#allocation2 + $0x480] sm:$0xff] }
 0x9d0   :  { %v4100_v7 = vpop.f32.mrf.mxu1  ;;  %8281 = vmatmul.msk.f32.gmra.mxu2 %vm28_vm0, %v2923_v5  ;;  %v2926_v5 = vld [vmem:[#allocation2 + $0x4a0] sm:$0xff] }
 0x9d1   :  { %v4225_v19 = vadd.f32 %v4100_v7, %v12200_v34  ;;  %v2924_v7 = vld [vmem:[#allocation2 + $0x490] sm:$0xff] }
 0x9d2   :  { %8337 = vmatmul.msk.f32.gmra.mxu3 %vm28_vm0, %v2906_v57 }
 0x9d3   :  { %8223 = vmatmul.msk.f32.gmra.mxu1 %vm28_vm0, %v2904_v15  ;;  %v4594_v3 = vadd.f32 %v4469_v2, %v4225_v19  ;;  %v4472_v21 = vpop.f32.mrf.mxu2 }
 0x9d5   :  { %v4712_v34 = vpop.f32.mrf.mxu3 }
 0x9d6   :  { %v12535_v54 = vadd.f32 %v4712_v34, %v4594_v3  ;;  %v2927_v3 = vld [vmem:[#allocation2 + $0x4a8] sm:$0xff] }
 0x9d8   :  { %v4103_v62 = vpop.f32.mrf.mxu1  ;;  %8282 = vmatmul.msk.f32.gmra.mxu2 %vm28_vm0, %v2925_v39 }
 0x9d9   :  { %v4226_v12 = vadd.f32 %v4103_v62, %v12205_v43 }
 0x9da   :  { %8338 = vmatmul.msk.f32.gmra.mxu3 %vm28_vm0, %v2924_v7 }
 0x9db   :  { %8224 = vmatmul.msk.f32.gmra.mxu1 %vm28_vm0, %v2922_v63  ;;  %v4595_v15 = vadd.f32 %v4472_v21, %v4226_v12  ;;  %v4475_v2 = vpop.f32.mrf.mxu2  ;;  %v2928_v12 = vld [vmem:[#allocation2 + $0x4b0] sm:$0xff] }
 0x9dd   :  { %v4715_v57 = vpop.f32.mrf.mxu3 }
 0x9de   :  { %v12541_v19 = vadd.f32 %v4715_v57, %v4595_v15  ;;  %v2929_v15 = vld [vmem:[#allocation2 + $0x4b8] sm:$0xff] }
 0x9e0   :  { %v4106_v11 = vpop.f32.mrf.mxu1  ;;  %8283 = vmatmul.msk.f32.gmra.mxu2 %vm28_vm0, %v2927_v3  ;;  %v2930_v3 = vld [vmem:[#allocation2 + $0x4c0] sm:$0xff] }
 0x9e1   :  { %v4227_v46 = vadd.f32 %v4106_v11, %v12210_v40 }
 0x9e2   :  { %8339 = vmatmul.msk.f32.gmra.mxu3 %vm28_vm0, %v2926_v5 }
 0x9e3   :  { %8225 = vmatmul.msk.f32.gmra.mxu1 %vm28_vm0, %v2924_v7  ;;  %v4596_v43 = vadd.f32 %v4475_v2, %v4227_v46  ;;  %v4478_v62 = vpop.f32.mrf.mxu2 }
 0x9e5   :  { %v4718_v34 = vpop.f32.mrf.mxu3 }
 0x9e6   :  { %v12547_v39 = vadd.f32 %v4718_v34, %v4596_v43  ;;  %v2931_v43 = vld [vmem:[#allocation2 + $0x4c8] sm:$0xff] }
 0x9e8   :  { %v4109_v21 = vpop.f32.mrf.mxu1  ;;  %8284 = vmatmul.msk.f32.gmra.mxu2 %vm28_vm0, %v2929_v15  ;;  %v2932_v15 = vld [vmem:[#allocation2 + $0x4d0] sm:$0xff] }
 0x9e9   :  { %v4228_v63 = vadd.f32 %v4109_v21, %v12215_v8 }
 0x9ea   :  { %8340 = vmatmul.msk.f32.gmra.mxu3 %vm28_vm0, %v2928_v12 }
 0x9eb   :  { %8226 = vmatmul.msk.f32.gmra.mxu1 %vm28_vm0, %v2926_v5  ;;  %v4597_v40 = vadd.f32 %v4478_v62, %v4228_v63  ;;  %v4481_v57 = vpop.f32.mrf.mxu2 }
 0x9ed   :  { %v4721_v7 = vpop.f32.mrf.mxu3 }
 0x9ee   :  { %v12553_v11 = vadd.f32 %v4721_v7, %v4597_v40  ;;  %v2933_v40 = vld [vmem:[#allocation2 + $0x4d8] sm:$0xff] }
 0x9f0   :  { %v4112_v2 = vpop.f32.mrf.mxu1  ;;  %8285 = vmatmul.msk.f32.gmra.mxu2 %vm28_vm0, %v2931_v43  ;;  %v2934_v43 = vld [vmem:[#allocation2 + $0x4e0] sm:$0xff] }
 0x9f1   :  { %v4229_v46 = vadd.f32 %v4112_v2, %v12220_v47 }
 0x9f2   :  { %8341 = vmatmul.msk.f32.gmra.mxu3 %vm28_vm0, %v2930_v3 }
 0x9f3   :  { %8227 = vmatmul.msk.f32.gmra.mxu1 %vm28_vm0, %v2928_v12  ;;  %v4598_v8 = vadd.f32 %v4481_v57, %v4229_v46  ;;  %v4484_v34 = vpop.f32.mrf.mxu2  ;;  %v8417_v57 = vld [vmem:[%s14988_s2 + $0x1c8] sm:$0xff] }
 0x9f4   :  { %5162 = vmatpush.msra.mxu2 %v8417_v57  ;;  %v2953_v57 = vld [vmem:[#allocation2 + $0x588] sm:$0xff] }
 0x9f5   :  { %v4724_v5 = vpop.f32.mrf.mxu3 }
 0x9f6   :  { %v12559_v21 = vadd.f32 %v4724_v5, %v4598_v8  ;;  %v2935_v8 = vld [vmem:[#allocation2 + $0x4e8] sm:$0xff] }
 0x9f8   :  { %v4115_v62 = vpop.f32.mrf.mxu1  ;;  %8286 = vmatmul.msk.f32.gmra.mxu2 %vm28_vm0, %v2933_v40 }
 0x9f9   :  { %v4230_v63 = vadd.f32 %v4115_v62, %v12225_v4 }
 0x9fa   :  { %8342 = vmatmul.msk.f32.gmra.mxu3 %vm28_vm0, %v2932_v15 }
 0x9fb   :  { %8228 = vmatmul.msk.f32.gmra.mxu1 %vm28_vm0, %v2930_v3  ;;  %v4599_v47 = vadd.f32 %v4484_v34, %v4230_v63  ;;  %v4487_v7 = vpop.f32.mrf.mxu2  ;;  %v8474_v3 = vld [vmem:[%s14988_s2 + $0x208] sm:$0xff] }
 0x9fc   :  { %v8360_v34 = vld [vmem:[%s14988_s2 + $0x188] sm:$0xff]  ;;  %5387 = vmatpush.msra.mxu3 %v8474_v3 }
 0x9fd   :  { %v4727_v12 = vpop.f32.mrf.mxu3  ;;  %4919 = vmatpush.msra.mxu1 %v8360_v34  ;;  %v2954_v34 = vld [vmem:[#allocation2 + $0x590] sm:$0xff] }
 0x9fe   :  { %v12565_v2 = vadd.f32 %v4727_v12, %v4599_v47  ;;  %v2936_v12 = vld [vmem:[#allocation2 + $0x4f0] sm:$0xff] }
 0xa00   :  { %v4118_v46 = vpop.f32.mrf.mxu1  ;;  %8287 = vmatmul.msk.f32.gmra.mxu2 %vm28_vm0, %v2935_v8  ;;  %v2952_v8 = vld [vmem:[#allocation2 + $0x580] sm:$0xff] }
 0xa01   :  { %v4231_v4 = vadd.f32 %v4118_v46, %v12239_v45 }
 0xa02   :  { %8343 = vmatmul.msk.f32.gmra.mxu3 %vm28_vm0, %v2934_v43 }
 0xa03   :  { %8229 = vmatmul.msk.f32.gmra.mxu1 %vm28_vm0, %v2932_v15  ;;  %v4600_v5 = vadd.f32 %v4487_v7, %v4231_v4  ;;  %v4490_v62 = vpop.f32.mrf.mxu2 }
 0xa05   :  { %v4730_v45 = vpop.f32.mrf.mxu3 }
 0xa06   :  { %v12580_v63 = vadd.f32 %v4730_v45, %v4600_v5  ;;  %v2955_v45 = vld [vmem:[#allocation2 + $0x598] sm:$0xff] }
 0xa08   :  { %v4121_v40 = vpop.f32.mrf.mxu1  ;;  %8288 = vmatmul.msk.f32.gmra.mxu2 %vm28_vm0, %v2953_v57  ;;  %v2956_v57 = vld [vmem:[#allocation2 + $0x5a0] sm:$0xff] }
 0xa09   :  { %v4232_v47 = vadd.f32 %v4121_v40, %v12244_v42 }
 0xa0a   :  { %8344 = vmatmul.msk.f32.gmra.mxu3 %vm28_vm0, %v2936_v12 }
 0xa0b   :  { %8230 = vmatmul.msk.f32.gmra.mxu1 %vm28_vm0, %v2934_v43  ;;  %v4601_v15 = vadd.f32 %v4490_v62, %v4232_v47  ;;  %v4493_v46 = vpop.f32.mrf.mxu2 }
 0xa0d   :  { %v4733_v7 = vpop.f32.mrf.mxu3 }
 0xa0e   :  { %v12586_v4 = vadd.f32 %v4733_v7, %v4601_v15  ;;  %v2957_v15 = vld [vmem:[#allocation2 + $0x5a8] sm:$0xff] }
 0xa10   :  { %v4124_v3 = vpop.f32.mrf.mxu1  ;;  %8289 = vmatmul.msk.f32.gmra.mxu2 %vm28_vm0, %v2955_v45  ;;  %v2958_v45 = vld [vmem:[#allocation2 + $0x5b0] sm:$0xff] }
 0xa11   :  { %v4233_v5 = vadd.f32 %v4124_v3, %v12249_v17 }
 0xa12   :  { %8345 = vmatmul.msk.f32.gmra.mxu3 %vm28_vm0, %v2954_v34 }
 0xa13   :  { %8231 = vmatmul.msk.f32.gmra.mxu1 %vm28_vm0, %v2952_v8  ;;  %v4602_v42 = vadd.f32 %v4493_v46, %v4233_v5  ;;  %v4496_v40 = vpop.f32.mrf.mxu2 }
 0xa15   :  { %v4736_v43 = vpop.f32.mrf.mxu3 }
 0xa16   :  { %v12592_v62 = vadd.f32 %v4736_v43, %v4602_v42  ;;  %v2959_v42 = vld [vmem:[#allocation2 + $0x5b8] sm:$0xff] }
 0xa18   :  { %v4127_v47 = vpop.f32.mrf.mxu1  ;;  %8290 = vmatmul.msk.f32.gmra.mxu2 %vm28_vm0, %v2957_v15  ;;  %v2960_v15 = vld [vmem:[#allocation2 + $0x5c0] sm:$0xff] }
 0xa19   :  { %v4234_v12 = vadd.f32 %v4127_v47, %v12254_v59 }
 0xa1a   :  { %8346 = vmatmul.msk.f32.gmra.mxu3 %vm28_vm0, %v2956_v57 }
 0xa1b   :  { %8232 = vmatmul.msk.f32.gmra.mxu1 %vm28_vm0, %v2954_v34  ;;  %v4603_v17 = vadd.f32 %v4496_v40, %v4234_v12  ;;  %v4499_v3 = vpop.f32.mrf.mxu2 }
 0xa1d   :  { %v4739_v7 = vpop.f32.mrf.mxu3 }
 0xa1e   :  { %v12598_v8 = vadd.f32 %v4739_v7, %v4603_v17  ;;  %v2961_v17 = vld [vmem:[#allocation2 + $0x5c8] sm:$0xff] }
 0xa20   :  { %v4130_v46 = vpop.f32.mrf.mxu1  ;;  %8291 = vmatmul.msk.f32.gmra.mxu2 %vm28_vm0, %v2959_v42  ;;  %v2962_v42 = vld [vmem:[#allocation2 + $0x5d0] sm:$0xff] }
 0xa21   :  { %v4235_v5 = vadd.f32 %v4130_v46, %v12259_v14 }
 0xa22   :  { %8347 = vmatmul.msk.f32.gmra.mxu3 %vm28_vm0, %v2958_v45 }
 0xa23   :  { %8233 = vmatmul.msk.f32.gmra.mxu1 %vm28_vm0, %v2956_v57  ;;  %v4604_v59 = vadd.f32 %v4499_v3, %v4235_v5  ;;  %v4502_v43 = vpop.f32.mrf.mxu2 }
 0xa25   :  { %v4742_v34 = vpop.f32.mrf.mxu3 }
 0xa26   :  { %v12604_v47 = vadd.f32 %v4742_v34, %v4604_v59  ;;  %v8473_v59 = vld [vmem:[%s14988_s2 + $0x200] sm:$0xff] }
 0xa27   :  { %5388 = vmatpush.msra.mxu3 %v8473_v59 }
 0xa28   :  { %v4133_v40 = vpop.f32.mrf.mxu1  ;;  %8292 = vmatmul.msk.f32.gmra.mxu2 %vm28_vm0, %v2961_v17 }
 0xa29   :  { %v4236_v12 = vadd.f32 %v4133_v40, %v12264_v44  ;;  %v8416_v44 = vld [vmem:[%s14988_s2 + $0x1c0] sm:$0xff] }
 0xa2a   :  { %8348 = vmatmul.msk.f32.gmra.mxu3 %vm28_vm0, %v2960_v15  ;;  %5163 = vmatpush.msra.mxu2 %v8416_v44 }
 0xa2b   :  { %8234 = vmatmul.msk.f32.gmra.mxu1 %vm28_vm0, %v2958_v45  ;;  %v4605_v14 = vadd.f32 %v4502_v43, %v4236_v12  ;;  %v4505_v7 = vpop.f32.mrf.mxu2  ;;  %v2963_v45 = vld [vmem:[#allocation2 + $0x5d8] sm:$0xff] }
 0xa2d   :  { %v4745_v57 = vpop.f32.mrf.mxu3 }
 0xa2e   :  { %v12610_v46 = vadd.f32 %v4745_v57, %v4605_v14  ;;  %v2964_v57 = vld [vmem:[#allocation2 + $0x5e0] sm:$0xff] }
 0xa30   :  { %v4136_v3 = vpop.f32.mrf.mxu1  ;;  %8293 = vmatmul.msk.f32.gmra.mxu2 %vm28_vm0, %v2963_v45 }
 0xa31   :  { %v4237_v5 = vadd.f32 %v4136_v3, %v12278_v27  ;;  %v8359_v27 = vld [vmem:[%s14988_s2 + $0x180] sm:$0xff]  ;;  %v2965_v3 = vld [vmem:[#allocation2 + $0x5e8] sm:$0xff] }
 0xa32   :  { %8349 = vmatmul.msk.f32.gmra.mxu3 %vm28_vm0, %v2962_v42  ;;  %4920 = vmatpush.msra.mxu1 %v8359_v27  ;;  %v2983_v27 = vld [vmem:[#allocation2 + $0x688] sm:$0xff] }
 0xa33   :  { %8235 = vmatmul.msk.f32.gmra.mxu1 %vm28_vm0, %v2960_v15  ;;  %v4606_v34 = vadd.f32 %v4505_v7, %v4237_v5  ;;  %v4508_v40 = vpop.f32.mrf.mxu2  ;;  %v8787_v7 = vld [vmem:[%s14988_s2 + $0x568] sm:$0xff] }
 0xa34   :  { %7551 = vmatpush.msrb.mxu0 %v8787_v7  ;;  %v2984_v7 = vld [vmem:[#allocation2 + $0x690] sm:$0xff] }
 0xa35   :  { %v4748_v43 = vpop.f32.mrf.mxu3 }
 0xa36   :  { %v12625_v12 = vadd.f32 %v4748_v43, %v4606_v34  ;;  %v2966_v34 = vld [vmem:[#allocation2 + $0x5f0] sm:$0xff] }
 0xa38   :  { %v4139_v17 = vpop.f32.mrf.mxu1  ;;  %8294 = vmatmul.msk.f32.gmra.mxu2 %vm28_vm0, %v2965_v3  ;;  %v2982_v3 = vld [vmem:[#allocation2 + $0x680] sm:$0xff] }
 0xa39   :  { %v4238_v14 = vadd.f32 %v4139_v17, %v12286_v36 }
 0xa3a   :  { %8350 = vmatmul.msk.f32.gmra.mxu3 %vm28_vm0, %v2964_v57 }
 0xa3b   :  { %8236 = vmatmul.msk.f32.gmra.mxu1 %vm28_vm0, %v2962_v42  ;;  %v4607_v15 = vadd.f32 %v4508_v40, %v4238_v14  ;;  %v4511_v44 = vpop.f32.mrf.mxu2 }
 0xa3d   :  { %v4751_v5 = vpop.f32.mrf.mxu3 }
 0xa3e   :  { %v12634_v59 = vadd.f32 %v4751_v5, %v4607_v15  ;;  %v2985_v5 = vld [vmem:[#allocation2 + $0x698] sm:$0xff] }
 0xa40   :  { %v4142_v45 = vpop.f32.mrf.mxu1  ;;  %8295 = vmatmul.msk.f32.gmra.mxu2 %vm28_vm0, %v2983_v27  ;;  %v2986_v27 = vld [vmem:[#allocation2 + $0x6a0] sm:$0xff] }
 0xa41   :  { %v4239_v36 = vadd.f32 %v4142_v45, %v12291_v13 }
 0xa42   :  { %8351 = vmatmul.msk.f32.gmra.mxu3 %vm28_vm0, %v2966_v34 }
 0xa43   :  { %8237 = vmatmul.msk.f32.gmra.mxu1 %vm28_vm0, %v2964_v57  ;;  %v4608_v42 = vadd.f32 %v4511_v44, %v4239_v36  ;;  %v4514_v40 = vpop.f32.mrf.mxu2 }
 0xa45   :  { %v4754_v43 = vpop.f32.mrf.mxu3 }
 0xa46   :  { %v12640_v17 = vadd.f32 %v4754_v43, %v4608_v42  ;;  %v2987_v42 = vld [vmem:[#allocation2 + $0x6a8] sm:$0xff] }
 0xa48   :  { %v4145_v14 = vpop.f32.mrf.mxu1  ;;  %8296 = vmatmul.msk.f32.gmra.mxu2 %vm28_vm0, %v2985_v5  ;;  %v2988_v5 = vld [vmem:[#allocation2 + $0x6b0] sm:$0xff] }
 0xa49   :  { %v4240_v15 = vadd.f32 %v4145_v14, %v12296_v10 }
 0xa4a   :  { %8352 = vmatmul.msk.f32.gmra.mxu3 %vm28_vm0, %v2984_v7 }
 0xa4b   :  { %8238 = vmatmul.msk.f32.gmra.mxu1 %vm28_vm0, %v2982_v3  ;;  %v4609_v13 = vadd.f32 %v4514_v40, %v4240_v15  ;;  %v4517_v45 = vpop.f32.mrf.mxu2 }
 0xa4d   :  { %v4757_v57 = vpop.f32.mrf.mxu3 }
 0xa4e   :  { %v12646_v44 = vadd.f32 %v4757_v57, %v4609_v13  ;;  %v2989_v13 = vld [vmem:[#allocation2 + $0x6b8] sm:$0xff] }
 0xa50   :  { %v4148_v36 = vpop.f32.mrf.mxu1  ;;  %8297 = vmatmul.msk.f32.gmra.mxu2 %vm28_vm0, %v2987_v42  ;;  %v2990_v42 = vld [vmem:[#allocation2 + $0x6c0] sm:$0xff] }
 0xa51   :  { %v4241_v34 = vadd.f32 %v4148_v36, %v12301_v53 }
 0xa52   :  { %8353 = vmatmul.msk.f32.gmra.mxu3 %vm28_vm0, %v2986_v27 }
 0xa53   :  { %8239 = vmatmul.msk.f32.gmra.mxu1 %vm28_vm0, %v2984_v7  ;;  %v4610_v10 = vadd.f32 %v4517_v45, %v4241_v34  ;;  %v4520_v14 = vpop.f32.mrf.mxu2 }
 0xa55   :  { %v4760_v43 = vpop.f32.mrf.mxu3 }
 0xa56   :  { %v12652_v3 = vadd.f32 %v4760_v43, %v4610_v10  ;;  %v2991_v10 = vld [vmem:[#allocation2 + $0x6c8] sm:$0xff] }
 0xa58   :  { %v4151_v40 = vpop.f32.mrf.mxu1  ;;  %8298 = vmatmul.msk.f32.gmra.mxu2 %vm28_vm0, %v2989_v13  ;;  %v2992_v13 = vld [vmem:[#allocation2 + $0x6d0] sm:$0xff] }
 0xa59   :  { %v4242_v15 = vadd.f32 %v4151_v40, %v12306_v50 }
 0xa5a   :  { %8354 = vmatmul.msk.f32.gmra.mxu3 %vm28_vm0, %v2988_v5 }
 0xa5b   :  { %8240 = vmatmul.msk.f32.gmra.mxu1 %vm28_vm0, %v2986_v27  ;;  %v4611_v53 = vadd.f32 %v4520_v14, %v4242_v15  ;;  %v4523_v57 = vpop.f32.mrf.mxu2 }
 0xa5d   :  { %v4763_v7 = vpop.f32.mrf.mxu3 }
 0xa5e   :  { %v12658_v36 = vadd.f32 %v4763_v7, %v4611_v53  ;;  %v2993_v53 = vld [vmem:[#allocation2 + $0x6d8] sm:$0xff] }
 0xa60   :  { %v4154_v45 = vpop.f32.mrf.mxu1  ;;  %8299 = vmatmul.msk.f32.gmra.mxu2 %vm28_vm0, %v2991_v10  ;;  %v2994_v10 = vld [vmem:[#allocation2 + $0x6e0] sm:$0xff] }
 0xa61   :  { %v4243_v34 = vadd.f32 %v4154_v45, %v12320_v25 }
 0xa62   :  { %8355 = vmatmul.msk.f32.gmra.mxu3 %vm28_vm0, %v2990_v42 }
 0xa63   :  { %8241 = vmatmul.msk.f32.gmra.mxu1 %vm28_vm0, %v2988_v5  ;;  %v4612_v50 = vadd.f32 %v4523_v57, %v4243_v34  ;;  %v4526_v43 = vpop.f32.mrf.mxu2 }
 0xa65   :  { %v4766_v27 = vpop.f32.mrf.mxu3 }
 0xa66   :  { %v12664_v40 = vadd.f32 %v4766_v27, %v4612_v50  ;;  %v2995_v50 = vld [vmem:[#allocation2 + $0x6e8] sm:$0xff] }
 0xa68   :  { %v4157_v14 = vpop.f32.mrf.mxu1  ;;  %8300 = vmatmul.msk.f32.gmra.mxu2 %vm28_vm0, %v2993_v53  ;;  %v2996_v53 = vld [vmem:[#allocation2 + $0x6f0] sm:$0xff] }
 0xa69   :  { %v4244_v15 = vadd.f32 %v4157_v14, %v12325_v20 }
 0xa6a   :  { %8356 = vmatmul.msk.f32.gmra.mxu3 %vm28_vm0, %v2992_v13 }
 0xa6b   :  { %8242 = vmatmul.msk.f32.gmra.mxu1 %vm28_vm0, %v2990_v42  ;;  %v4613_v25 = vadd.f32 %v4526_v43, %v4244_v15  ;;  %v4529_v7 = vpop.f32.mrf.mxu2 }
 0xa6d   :  { %v4769_v5 = vpop.f32.mrf.mxu3 }
 0xa6e   :  { %v12670_v45 = vadd.f32 %v4769_v5, %v4613_v25 }
 0xa70   :  { %v4160_v57 = vpop.f32.mrf.mxu1  ;;  %8301 = vmatmul.msk.f32.gmra.mxu2 %vm28_vm0, %v2995_v50  ;;  %v8893_v50 = vld [vmem:[#allocation2 + $0x110] sm:$0xff] }
 0xa71   :  { %v4245_v34 = vadd.f32 %v4160_v57, %v12330_v9  ;;  %v8892_v9 = vld [vmem:[#allocation2 + $0x108] sm:$0xff] }
 0xa72   :  { %8357 = vmatmul.msk.f32.gmra.mxu3 %vm28_vm0, %v2994_v10 }
 0xa73   :  { %8243 = vmatmul.msk.f32.gmra.mxu1 %vm28_vm0, %v2992_v13  ;;  %v4614_v20 = vadd.f32 %v4529_v7, %v4245_v34  ;;  %v4532_v27 = vpop.f32.mrf.mxu2 }
 0xa75   :  { %v4772_v42 = vpop.f32.mrf.mxu3 }
 0xa76   :  { %v12676_v14 = vadd.f32 %v4772_v42, %v4614_v20  ;;  %v8895_v20 = vld [vmem:[#allocation2 + $0x118] sm:$0xff] }
 0xa78   :  { %v4163_v43 = vpop.f32.mrf.mxu1  ;;  %8424 = vmatmul.msk.f32.vlgmr.msra.gmra.mxu2 %vm28_vm0, %v8892_v9  ;;  %v8896_v9 = vld [vmem:[#allocation2 + $0x120] sm:$0xff] }
 0xa79   :  { %v4246_v15 = vadd.f32 %v4163_v43, %v12335_v0  ;;  %v8894_v0 = vld [vmem:[#allocation2 + $0x100] sm:$0xff] }
 0xa7a   :  { %8358 = vmatmul.msk.f32.gmra.mxu3 %vm28_vm0, %v2996_v53 }
 0xa7b   :  { %8244 = vmatmul.msk.f32.gmra.mxu1 %vm28_vm0, %v2994_v10  ;;  %v4615_v25 = vadd.f32 %v4532_v27, %v4246_v15  ;;  %v4535_v5 = vpop.f32.mrf.mxu2 }
 0xa7d   :  { %v4775_v13 = vpop.f32.mrf.mxu3 }
 0xa7e   :  { %v12682_v57 = vadd.f32 %v4775_v13, %v4615_v25 }
 0xa80   :  { %15674 = vst [vmem:[#allocation5_spill] sm:$0xff] %v12682_v57  ;;  %v4166_v7 = vpop.f32.mrf.mxu1  ;;  %8425 = vmatmul.msk.f32.gmra.mxu2 %vm28_vm0, %v8895_v20  ;;  %v8898_v20 = vld [vmem:[#allocation2 + $0x130] sm:$0xff] }
 0xa81   :  { %v4247_v34 = vadd.f32 %v4166_v7, %v12340_v28  ;;  %v8897_v28 = vld [vmem:[#allocation2 + $0x128] sm:$0xff] }
 0xa82   :  { %8481 = vmatmul.msk.f32.vlgmr.msra.gmra.mxu3 %vm28_vm0, %v8893_v50 }
 0xa83   :  { %8367 = vmatmul.msk.f32.vlgmr.msra.gmra.mxu1 %vm28_vm0, %v8894_v0  ;;  %v4616_v10 = vadd.f32 %v4535_v5, %v4247_v34  ;;  %v4538_v43 = vpop.f32.mrf.mxu2 }
 0xa85   :  { %v4778_v42 = vpop.f32.mrf.mxu3 }
 0xa86   :  { %v12688_v27 = vadd.f32 %v4778_v42, %v4616_v10 }
 0xa88   :  { %15675 = vst [vmem:[#allocation6_spill] sm:$0xff] %v12688_v27  ;;  %v4169_v15 = vpop.f32.mrf.mxu1  ;;  %8426 = vmatmul.msk.f32.gmra.mxu2 %vm28_vm0, %v8897_v28  ;;  %v8900_v28 = vld [vmem:[#allocation2 + $0x140] sm:$0xff] }
 0xa89   :  { %v4248_v53 = vadd.f32 %v4169_v15, %v12345_v55  ;;  %v8899_v55 = vld [vmem:[#allocation2 + $0x138] sm:$0xff] }
 0xa8a   :  { %8482 = vmatmul.msk.f32.gmra.mxu3 %vm28_vm0, %v8896_v9 }
 0xa8b   :  { %8368 = vmatmul.msk.f32.gmra.mxu1 %vm28_vm0, %v8893_v50  ;;  %v4617_v25 = vadd.f32 %v4538_v43, %v4248_v53  ;;  %v4541_v7 = vpop.f32.mrf.mxu2 }
 0xa8d   :  { %v4781_v13 = vpop.f32.mrf.mxu3 }
 0xa8e   :  { %v12694_v0 = vadd.f32 %v4781_v13, %v4617_v25 }
 0xa90   :  { %15676 = vst [vmem:[#allocation7_spill] sm:$0xff] %v12694_v0  ;;  %v4172_v5 = vpop.f32.mrf.mxu1  ;;  %8427 = vmatmul.msk.f32.gmra.mxu2 %vm28_vm0, %v8899_v55  ;;  %v8902_v55 = vld [vmem:[#allocation2 + $0x150] sm:$0xff] }
 0xa91   :  { %v4249_v34 = vadd.f32 %v4172_v5, %v12356_v49  ;;  %v8901_v49 = vld [vmem:[#allocation2 + $0x148] sm:$0xff] }
 0xa92   :  { %8483 = vmatmul.msk.f32.gmra.mxu3 %vm28_vm0, %v8898_v20 }
 0xa93   :  { %8369 = vmatmul.msk.f32.gmra.mxu1 %vm28_vm0, %v8896_v9  ;;  %v4618_v50 = vadd.f32 %v4541_v7, %v4249_v34  ;;  %v4544_v42 = vpop.f32.mrf.mxu2 }
 0xa95   :  { %v4784_v10 = vpop.f32.mrf.mxu3 }
 0xa96   :  { %v12700_v15 = vadd.f32 %v4784_v10, %v4618_v50 }
 0xa98   :  { %15677 = vst [vmem:[#allocation8_spill] sm:$0xff] %v12700_v15  ;;  %v4175_v43 = vpop.f32.mrf.mxu1  ;;  %8428 = vmatmul.msk.f32.gmra.mxu2 %vm28_vm0, %v8901_v49  ;;  %v8904_v49 = vld [vmem:[#allocation2 + $0x160] sm:$0xff]  ;;  %v3011_v15 = vld [vmem:[#allocation2 + $0x770] sm:$0xff] }
 0xa99   :  { %v4250_v53 = vadd.f32 %v4175_v43, %v12364_v37  ;;  %v8903_v37 = vld [vmem:[#allocation2 + $0x158] sm:$0xff] }
 0xa9a   :  { %8484 = vmatmul.msk.f32.gmra.mxu3 %vm28_vm0, %v8900_v28 }
 0xa9b   :  { %8370 = vmatmul.msk.f32.gmra.mxu1 %vm28_vm0, %v8898_v20  ;;  %v4619_v9 = vadd.f32 %v4544_v42, %v4250_v53  ;;  %v4547_v13 = vpop.f32.mrf.mxu2 }
 0xa9d   :  { %v4787_v25 = vpop.f32.mrf.mxu3 }
 0xa9e   :  { %v12706_v5 = vadd.f32 %v4787_v25, %v4619_v9 }
 0xaa0   :  { %15678 = vst [vmem:[#allocation9_spill] sm:$0xff] %v12706_v5  ;;  %v4178_v7 = vpop.f32.mrf.mxu1  ;;  %8429 = vmatmul.msk.f32.gmra.mxu2 %vm28_vm0, %v8903_v37  ;;  %v8906_v37 = vld [vmem:[#allocation2 + $0x170] sm:$0xff] }
 0xaa1   :  { %v4251_v34 = vadd.f32 %v4178_v7, %v12369_v52  ;;  %v8905_v52 = vld [vmem:[#allocation2 + $0x168] sm:$0xff] }
 0xaa2   :  { %8485 = vmatmul.msk.f32.gmra.mxu3 %vm28_vm0, %v8902_v55 }
 0xaa3   :  { %8371 = vmatmul.msk.f32.gmra.mxu1 %vm28_vm0, %v8900_v28  ;;  %v4620_v20 = vadd.f32 %v4547_v13, %v4251_v34  ;;  %v4550_v10 = vpop.f32.mrf.mxu2 }
 0xaa5   :  { %v4790_v50 = vpop.f32.mrf.mxu3 }
 0xaa6   :  { %v12712_v43 = vadd.f32 %v4790_v50, %v4620_v20 }
 0xaa8   :  { %15679 = vst [vmem:[#allocation10_spill] sm:$0xff] %v12712_v43  ;;  %v4181_v42 = vpop.f32.mrf.mxu1  ;;  %8430 = vmatmul.msk.f32.gmra.mxu2 %vm28_vm0, %v8905_v52  ;;  %v8908_v52 = vld [vmem:[#allocation2 + $0x210] sm:$0xff] }
 0xaa9   :  { %v4252_v53 = vadd.f32 %v4181_v42, %v12374_v18  ;;  %v8907_v18 = vld [vmem:[#allocation2 + $0x208] sm:$0xff] }
 0xaaa   :  { %8486 = vmatmul.msk.f32.gmra.mxu3 %vm28_vm0, %v8904_v49 }
 0xaab   :  { %8372 = vmatmul.msk.f32.gmra.mxu1 %vm28_vm0, %v8902_v55  ;;  %v4621_v28 = vadd.f32 %v4550_v10, %v4252_v53  ;;  %v4553_v25 = vpop.f32.mrf.mxu2 }
 0xaad   :  { %v4793_v9 = vpop.f32.mrf.mxu3 }
 0xaae   :  { %v12718_v7 = vadd.f32 %v4793_v9, %v4621_v28  ;;  %v8910_v28 = vld [vmem:[#allocation2 + $0x218] sm:$0xff] }
 0xab0   :  { %15680 = vst [vmem:[#allocation11_spill] sm:$0xff] %v12718_v7  ;;  %v4184_v13 = vpop.f32.mrf.mxu1  ;;  %8431 = vmatmul.msk.f32.gmra.mxu2 %vm28_vm0, %v8907_v18  ;;  %v8911_v18 = vld [vmem:[#allocation2 + $0x220] sm:$0xff]  ;;  %v3010_v7 = vld [vmem:[#allocation2 + $0x768] sm:$0xff] }
 0xab1   :  { %v4253_v34 = vadd.f32 %v4184_v13, %v12379_v30  ;;  %v8909_v30 = vld [vmem:[#allocation2 + $0x200] sm:$0xff] }
 0xab2   :  { %8487 = vmatmul.msk.f32.gmra.mxu3 %vm28_vm0, %v8906_v37 }
 0xab3   :  { %8373 = vmatmul.msk.f32.gmra.mxu1 %vm28_vm0, %v8904_v49  ;;  %v4622_v55 = vadd.f32 %v4553_v25, %v4253_v34  ;;  %v4556_v50 = vpop.f32.mrf.mxu2 }
 0xab5   :  { %v4796_v20 = vpop.f32.mrf.mxu3 }
 0xab6   :  { %v12724_v42 = vadd.f32 %v4796_v20, %v4622_v55 }
 0xab8   :  { %15681 = vst [vmem:[#allocation12_spill] sm:$0xff] %v12724_v42  ;;  %v4187_v10 = vpop.f32.mrf.mxu1  ;;  %8432 = vmatmul.msk.f32.gmra.mxu2 %vm28_vm0, %v8910_v28  ;;  %v8913_v28 = vld [vmem:[#allocation2 + $0x230] sm:$0xff]  ;;  %v3009_v42 = vld [vmem:[#allocation2 + $0x760] sm:$0xff] }
 0xab9   :  { %v4254_v53 = vadd.f32 %v4187_v10, %v12384_v51  ;;  %v8912_v51 = vld [vmem:[#allocation2 + $0x228] sm:$0xff] }
 0xaba   :  { %8488 = vmatmul.msk.f32.gmra.mxu3 %vm28_vm0, %v8908_v52 }
 0xabb   :  { %8374 = vmatmul.msk.f32.gmra.mxu1 %vm28_vm0, %v8909_v30  ;;  %v4623_v49 = vadd.f32 %v4556_v50, %v4254_v53  ;;  %v4559_v13 = vpop.f32.mrf.mxu2 }
 0xabd   :  { %v4799_v9 = vpop.f32.mrf.mxu3 }
 0xabe   :  { %v12730_v25 = vadd.f32 %v4799_v9, %v4623_v49 }
 0xac0   :  { %15682 = vst [vmem:[#allocation13_spill] sm:$0xff] %v12730_v25  ;;  %v4190_v34 = vpop.f32.mrf.mxu1  ;;  %8433 = vmatmul.msk.f32.gmra.mxu2 %vm28_vm0, %v8912_v51  ;;  %v8915_v51 = vld [vmem:[#allocation2 + $0x240] sm:$0xff] }
 0xac1   :  { %v4255_v37 = vadd.f32 %v4190_v34, %v12395_v22  ;;  %v8914_v22 = vld [vmem:[#allocation2 + $0x238] sm:$0xff] }
 0xac2   :  { %8489 = vmatmul.msk.f32.gmra.mxu3 %vm28_vm0, %v8911_v18 }
 0xac3   :  { %8375 = vmatmul.msk.f32.gmra.mxu1 %vm28_vm0, %v8908_v52  ;;  %v4624_v55 = vadd.f32 %v4559_v13, %v4255_v37  ;;  %v4562_v10 = vpop.f32.mrf.mxu2 }
 0xac5   :  { %v4802_v20 = vpop.f32.mrf.mxu3 }
 0xac6   :  { %v12736_v30 = vadd.f32 %v4802_v20, %v4624_v55 }
 0xac8   :  { %15683 = vst [vmem:[#allocation14_spill] sm:$0xff] %v12736_v30  ;;  %v4193_v50 = vpop.f32.mrf.mxu1  ;;  %8434 = vmatmul.msk.f32.gmra.mxu2 %vm28_vm0, %v8914_v22  ;;  %v8917_v22 = vld [vmem:[#allocation2 + $0x250] sm:$0xff] }
 0xac9   :  { %v4256_v53 = vadd.f32 %v4193_v50, %v12403_v56  ;;  %v8916_v56 = vld [vmem:[#allocation2 + $0x248] sm:$0xff] }
 0xaca   :  { %8490 = vmatmul.msk.f32.gmra.mxu3 %vm28_vm0, %v8913_v28 }
 0xacb   :  { %8376 = vmatmul.msk.f32.gmra.mxu1 %vm28_vm0, %v8911_v18  ;;  %v4625_v52 = vadd.f32 %v4562_v10, %v4256_v53  ;;  %v4565_v9 = vpop.f32.mrf.mxu2 }
 0xacd   :  { %v4805_v49 = vpop.f32.mrf.mxu3 }
 0xace   :  { %v12742_v34 = vadd.f32 %v4805_v49, %v4625_v52 }
 0xad0   :  { %15684 = vst [vmem:[#allocation15_spill] sm:$0xff] %v12742_v34  ;;  %v4196_v13 = vpop.f32.mrf.mxu1  ;;  %8435 = vmatmul.msk.f32.gmra.mxu2 %vm28_vm0, %v8916_v56  ;;  %v8919_v56 = vld [vmem:[#allocation2 + $0x260] sm:$0xff]  ;;  %v3008_v34 = vld [vmem:[#allocation2 + $0x758] sm:$0xff] }
 0xad1   :  { %v4257_v37 = vadd.f32 %v4196_v13, %v12408_v23  ;;  %v8918_v23 = vld [vmem:[#allocation2 + $0x258] sm:$0xff] }
 0xad2   :  { %8491 = vmatmul.msk.f32.gmra.mxu3 %vm28_vm0, %v8915_v51 }
 0xad3   :  { %8377 = vmatmul.msk.f32.gmra.mxu1 %vm28_vm0, %v8913_v28  ;;  %v4626_v18 = vadd.f32 %v4565_v9, %v4257_v37  ;;  %v4568_v20 = vpop.f32.mrf.mxu2 }
 0xad5   :  { %v4808_v55 = vpop.f32.mrf.mxu3 }
 0xad6   :  { %v12748_v50 = vadd.f32 %v4808_v55, %v4626_v18 }
 0xad8   :  { %15685 = vst [vmem:[#allocation16_spill] sm:$0xff] %v12748_v50  ;;  %v4199_v10 = vpop.f32.mrf.mxu1  ;;  %8436 = vmatmul.msk.f32.gmra.mxu2 %vm28_vm0, %v8918_v23  ;;  %v8921_v23 = vld [vmem:[#allocation2 + $0x270] sm:$0xff] }
 0xad9   :  { %v4258_v53 = vadd.f32 %v4199_v10, %v12413_v60  ;;  %v8920_v60 = vld [vmem:[#allocation2 + $0x268] sm:$0xff] }
 0xada   :  { %8492 = vmatmul.msk.f32.gmra.mxu3 %vm28_vm0, %v8917_v22 }
 0xadb   :  { %8378 = vmatmul.msk.f32.gmra.mxu1 %vm28_vm0, %v8915_v51  ;;  %v4627_v28 = vadd.f32 %v4568_v20, %v4258_v53  ;;  %v4571_v49 = vpop.f32.mrf.mxu2 }
 0xadd   :  { %v4811_v52 = vpop.f32.mrf.mxu3 }
 0xade   :  { %v12754_v13 = vadd.f32 %v4811_v52, %v4627_v28 }
 0xae0   :  { %15686 = vst [vmem:[#allocation17_spill] sm:$0xff] %v12754_v13  ;;  %v4202_v9 = vpop.f32.mrf.mxu1  ;;  %8437 = vmatmul.msk.f32.gmra.mxu2 %vm28_vm0, %v8920_v60  ;;  %v8923_v60 = vld [vmem:[#allocation2 + $0x310] sm:$0xff] }
 0xae1   :  { %v4259_v37 = vadd.f32 %v4202_v9, %v12418_v6  ;;  %v8922_v6 = vld [vmem:[#allocation2 + $0x308] sm:$0xff] }
 0xae2   :  { %8493 = vmatmul.msk.f32.gmra.mxu3 %vm28_vm0, %v8919_v56 }
 0xae3   :  { %8379 = vmatmul.msk.f32.gmra.mxu1 %vm28_vm0, %v8917_v22  ;;  %v4628_v51 = vadd.f32 %v4571_v49, %v4259_v37  ;;  %v4574_v55 = vpop.f32.mrf.mxu2 }
 0xae5   :  { %v4814_v18 = vpop.f32.mrf.mxu3 }
 0xae6   :  { %v12760_v10 = vadd.f32 %v4814_v18, %v4628_v51  ;;  %v8925_v51 = vld [vmem:[#allocation2 + $0x318] sm:$0xff] }
 0xae8   :  { %15687 = vst [vmem:[#allocation18_spill] sm:$0xff] %v12760_v10  ;;  %v4205_v20 = vpop.f32.mrf.mxu1  ;;  %8438 = vmatmul.msk.f32.gmra.mxu2 %vm28_vm0, %v8922_v6  ;;  %v8926_v6 = vld [vmem:[#allocation2 + $0x320] sm:$0xff]  ;;  %v3006_v10 = vld [vmem:[#allocation2 + $0x748] sm:$0xff] }
 0xae9   :  { %v4260_v53 = vadd.f32 %v4205_v20, %v12423_v26  ;;  %v8924_v26 = vld [vmem:[#allocation2 + $0x300] sm:$0xff] }
 0xaea   :  { %8494 = vmatmul.msk.f32.gmra.mxu3 %vm28_vm0, %v8921_v23 }
 0xaeb   :  { %8380 = vmatmul.msk.f32.gmra.mxu1 %vm28_vm0, %v8919_v56  ;;  %v4629_v22 = vadd.f32 %v4574_v55, %v4260_v53  ;;  %v4577_v52 = vpop.f32.mrf.mxu2 }
 0xaed   :  { %v4817_v28 = vpop.f32.mrf.mxu3 }
 0xaee   :  { %v12766_v9 = vadd.f32 %v4817_v28, %v4629_v22 }
 0xaf0   :  { %15688 = vst [vmem:[#allocation19_spill] sm:$0xff] %v12766_v9  ;;  %v4208_v49 = vpop.f32.mrf.mxu1  ;;  %8439 = vmatmul.msk.f32.gmra.mxu2 %vm28_vm0, %v8925_v51  ;;  %v8928_v51 = vld [vmem:[#allocation2 + $0x330] sm:$0xff] }
 0xaf1   :  { %v4261_v37 = vadd.f32 %v4208_v49, %v12431_v48  ;;  %v8927_v48 = vld [vmem:[#allocation2 + $0x328] sm:$0xff] }
 0xaf2   :  { %8495 = vmatmul.msk.f32.gmra.mxu3 %vm28_vm0, %v8923_v60 }
 0xaf3   :  { %8381 = vmatmul.msk.f32.gmra.mxu1 %vm28_vm0, %v8924_v26  ;;  %v4630_v56 = vadd.f32 %v4577_v52, %v4261_v37  ;;  %v4580_v20 = vpop.f32.mrf.mxu2 }
 0xaf5   :  { %v4820_v18 = vpop.f32.mrf.mxu3 }
 0xaf6   :  { %v12772_v55 = vadd.f32 %v4820_v18, %v4630_v56  ;;  %v8537_v56 = vld [vmem:[%s14988_s2 + $0x278] sm:$0xff] }
 0xaf7   :  { %v8585_v18 = vld [vmem:[%s14988_s2 + $0x2f8] sm:$0xff]  ;;  %6332 = vmatpush.msrb.mxu2 %v8537_v56 }
 0xaf8   :  { %15689 = vst [vmem:[#allocation20_spill] sm:$0xff] %v12772_v55  ;;  %v4211_v53 = vpop.f32.mrf.mxu1  ;;  %8440 = vmatmul.msk.f32.gmra.mxu2 %vm28_vm0, %v8927_v48  ;;  %6418 = vmatpush.msrb.mxu3 %v8585_v18 }
 0xaf9   :  { %v4262_v23 = vadd.f32 %v4211_v53, %v12442_v33  ;;  %v8929_v33 = vld [vmem:[#allocation2 + $0x338] sm:$0xff] }
 0xafa   :  { %8496 = vmatmul.msk.f32.gmra.mxu3 %vm28_vm0, %v8926_v6 }
 0xafb   :  { %8382 = vmatmul.msk.f32.gmra.mxu1 %vm28_vm0, %v8923_v60  ;;  %v4631_v22 = vadd.f32 %v4580_v20, %v4262_v23  ;;  %v5165_v52 = vpop.f32.mrf.mxu2  ;;  %v8545_v20 = vld [vmem:[%s14988_s2 + $0x2b8] sm:$0xff] }
 0xafc   :  { %6219 = vmatpush.msrb.mxu1 %v8545_v20 }
 0xafd   :  { %v4823_v28 = vpop.f32.mrf.mxu3 }
 0xafe   :  { %v12778_v49 = vadd.f32 %v4823_v28, %v4631_v22  ;;  %v8930_v28 = vld [vmem:[#allocation2 + $0x340] sm:$0xff] }
 0xb00   :  { %15690 = vst [vmem:[#allocation21_spill] sm:$0xff] %v12778_v49  ;;  %v4922_v37 = vpop.f32.mrf.mxu1  ;;  %8441 = vmatmul.msk.f32.gmra.mxu2 %vm28_vm0, %v8929_v33  ;;  %v3004_v49 = vld [vmem:[#allocation2 + $0x738] sm:$0xff] }
 0xb01   :  { %v5069_v26 = vadd.f32 %v4922_v37, %v12451_v38  ;;  %v8786_v38 = vld [vmem:[%s14988_s2 + $0x560] sm:$0xff] }
 0xb02   :  { %8497 = vmatmul.msk.f32.gmra.mxu3 %vm28_vm0, %v8928_v51  ;;  %7552 = vmatpush.msrb.mxu0 %v8786_v38  ;;  %v8932_v38 = vld [vmem:[#allocation2 + $0x350] sm:$0xff] }
 0xb03   :  { %8383 = vmatmul.msk.f32.gmra.mxu1 %vm28_vm0, %v8926_v6  ;;  %v5312_v60 = vadd.f32 %v5165_v52, %v5069_v26  ;;  %v5168_v23 = vpop.f32.mrf.mxu2  ;;  %v8931_v52 = vld [vmem:[#allocation2 + $0x348] sm:$0xff] }
 0xb05   :  { %v5390_v53 = vpop.f32.mrf.mxu3 }
 0xb06   :  { %v12796_v6 = vadd.f32 %v5390_v53, %v5312_v60 }
 0xb08   :  { %15691 = vst [vmem:[#allocation22_spill] sm:$0xff] %v12796_v6  ;;  %v4925_v48 = vpop.f32.mrf.mxu1  ;;  %8442 = vmatmul.msk.f32.gmra.mxu2 %vm28_vm0, %v8931_v52  ;;  %v8934_v52 = vld [vmem:[#allocation2 + $0x360] sm:$0xff] }
 0xb09   :  { %v5070_v22 = vadd.f32 %v4925_v48, %v12457_v16  ;;  %v8933_v16 = vld [vmem:[#allocation2 + $0x358] sm:$0xff] }
 0xb0a   :  { %8498 = vmatmul.msk.f32.gmra.mxu3 %vm28_vm0, %v8930_v28 }
 0xb0b   :  { %8384 = vmatmul.msk.f32.gmra.mxu1 %vm28_vm0, %v8928_v51  ;;  %v5313_v37 = vadd.f32 %v5168_v23, %v5070_v22  ;;  %v5171_v33 = vpop.f32.mrf.mxu2 }
 0xb0d   :  { %v5393_v26 = vpop.f32.mrf.mxu3 }
 0xb0e   :  { %v12802_v56 = vadd.f32 %v5393_v26, %v5313_v37 }
 0xb10   :  { %15692 = vst [vmem:[#allocation23_spill] sm:$0xff] %v12802_v56  ;;  %v4928_v18 = vpop.f32.mrf.mxu1  ;;  %8443 = vmatmul.msk.f32.gmra.mxu2 %vm28_vm0, %v8933_v16  ;;  %v8936_v16 = vld [vmem:[#allocation2 + $0x370] sm:$0xff] }
 0xb11   :  { %v5071_v60 = vadd.f32 %v4928_v18, %v12463_v32  ;;  %v8935_v32 = vld [vmem:[#allocation2 + $0x368] sm:$0xff] }
 0xb12   :  { %8499 = vmatmul.msk.f32.gmra.mxu3 %vm28_vm0, %v8932_v38 }
 0xb13   :  { %8385 = vmatmul.msk.f32.gmra.mxu1 %vm28_vm0, %v8930_v28  ;;  %v5314_v51 = vadd.f32 %v5171_v33, %v5071_v60  ;;  %v5174_v53 = vpop.f32.mrf.mxu2 }
 0xb15   :  { %v5396_v20 = vpop.f32.mrf.mxu3 }
 0xb16   :  { %v12808_v48 = vadd.f32 %v5396_v20, %v5314_v51 }
 0xb18   :  { %15693 = vst [vmem:[#allocation24_spill] sm:$0xff] %v12808_v48  ;;  %v4931_v23 = vpop.f32.mrf.mxu1  ;;  %8444 = vmatmul.msk.f32.gmra.mxu2 %vm28_vm0, %v8935_v32  ;;  %v8938_v32 = vld [vmem:[#allocation2 + $0x410] sm:$0xff] }
 0xb19   :  { %v5072_v22 = vadd.f32 %v4931_v23, %v12469_v61  ;;  %v8937_v61 = vld [vmem:[#allocation2 + $0x408] sm:$0xff] }
 0xb1a   :  { %8500 = vmatmul.msk.f32.gmra.mxu3 %vm28_vm0, %v8934_v52 }
 0xb1b   :  { %8386 = vmatmul.msk.f32.gmra.mxu1 %vm28_vm0, %v8932_v38  ;;  %v5315_v28 = vadd.f32 %v5174_v53, %v5072_v22  ;;  %v5177_v26 = vpop.f32.mrf.mxu2 }
 0xb1d   :  { %v5399_v37 = vpop.f32.mrf.mxu3 }
 0xb1e   :  { %v12814_v18 = vadd.f32 %v5399_v37, %v5315_v28  ;;  %v8940_v28 = vld [vmem:[#allocation2 + $0x418] sm:$0xff] }
 0xb20   :  { %15694 = vst [vmem:[#allocation25_spill] sm:$0xff] %v12814_v18  ;;  %v4934_v33 = vpop.f32.mrf.mxu1  ;;  %8445 = vmatmul.msk.f32.gmra.mxu2 %vm28_vm0, %v8937_v61  ;;  %v8941_v61 = vld [vmem:[#allocation2 + $0x420] sm:$0xff] }
 0xb21   :  { %v5073_v60 = vadd.f32 %v4934_v33, %v12478_v1  ;;  %v8939_v1 = vld [vmem:[#allocation2 + $0x400] sm:$0xff] }
 0xb22   :  { %8501 = vmatmul.msk.f32.gmra.mxu3 %vm28_vm0, %v8936_v16 }
 0xb23   :  { %8387 = vmatmul.msk.f32.gmra.mxu1 %vm28_vm0, %v8934_v52  ;;  %v5316_v38 = vadd.f32 %v5177_v26, %v5073_v60  ;;  %v5180_v20 = vpop.f32.mrf.mxu2 }
 0xb25   :  { %v5402_v51 = vpop.f32.mrf.mxu3 }
 0xb26   :  { %v12820_v23 = vadd.f32 %v5402_v51, %v5316_v38  ;;  %v8536_v51 = vld [vmem:[%s14988_s2 + $0x270] sm:$0xff] }
 0xb27   :  { %6333 = vmatpush.msrb.mxu2 %v8536_v51 }
 0xb28   :  { %15695 = vst [vmem:[#allocation26_spill] sm:$0xff] %v12820_v23  ;;  %v4937_v53 = vpop.f32.mrf.mxu1  ;;  %8446 = vmatmul.msk.f32.gmra.mxu2 %vm28_vm0, %v8940_v28 }
 0xb29   :  { %v5074_v22 = vadd.f32 %v4937_v53, %v12490_v41  ;;  %v8942_v41 = vld [vmem:[#allocation2 + $0x428] sm:$0xff] }
 0xb2a   :  { %8502 = vmatmul.msk.f32.gmra.mxu3 %vm28_vm0, %v8938_v32 }
 0xb2b   :  { %8388 = vmatmul.msk.f32.gmra.mxu1 %vm28_vm0, %v8939_v1  ;;  %v5317_v52 = vadd.f32 %v5180_v20, %v5074_v22  ;;  %v5183_v33 = vpop.f32.mrf.mxu2  ;;  %v8584_v20 = vld [vmem:[%s14988_s2 + $0x2f0] sm:$0xff] }
 0xb2c   :  { %6419 = vmatpush.msrb.mxu3 %v8584_v20  ;;  %v8945_v20 = vld [vmem:[#allocation2 + $0x440] sm:$0xff] }
 0xb2d   :  { %v5405_v37 = vpop.f32.mrf.mxu3 }
 0xb2e   :  { %v12826_v26 = vadd.f32 %v5405_v37, %v5317_v52  ;;  %v8943_v52 = vld [vmem:[#allocation2 + $0x430] sm:$0xff]  ;;  %v8944_v37 = vld [vmem:[#allocation2 + $0x438] sm:$0xff] }
 0xb30   :  { %15696 = vst [vmem:[#allocation27_spill] sm:$0xff] %v12826_v26  ;;  %v4940_v60 = vpop.f32.mrf.mxu1  ;;  %8447 = vmatmul.msk.f32.gmra.mxu2 %vm28_vm0, %v8942_v41 }
 0xb31   :  { %v5075_v16 = vadd.f32 %v4940_v60, %v12496_v58  ;;  %v8544_v58 = vld [vmem:[%s14988_s2 + $0x2b0] sm:$0xff] }
 0xb32   :  { %8503 = vmatmul.msk.f32.gmra.mxu3 %vm28_vm0, %v8941_v61  ;;  %6220 = vmatpush.msrb.mxu1 %v8544_v58 }
 0xb33   :  { %8389 = vmatmul.msk.f32.gmra.mxu1 %vm28_vm0, %v8938_v32  ;;  %v5318_v38 = vadd.f32 %v5183_v33, %v5075_v16  ;;  %v5186_v22 = vpop.f32.mrf.mxu2 }
 0xb35   :  { %v5408_v53 = vpop.f32.mrf.mxu3 }
 0xb36   :  { %v12841_v32 = vadd.f32 %v5408_v53, %v5318_v38 }
 0xb38   :  { %v4943_v1 = vpop.f32.mrf.mxu1  ;;  %8448 = vmatmul.msk.f32.gmra.mxu2 %vm28_vm0, %v8944_v37  ;;  %v8947_v37 = vld [vmem:[#allocation2 + $0x450] sm:$0xff] }
 0xb39   :  { %v5076_v28 = vadd.f32 %v4943_v1, %v12502_v24  ;;  %v8946_v24 = vld [vmem:[#allocation2 + $0x448] sm:$0xff] }
 0xb3a   :  { %8504 = vmatmul.msk.f32.gmra.mxu3 %vm28_vm0, %v8943_v52 }
 0xb3b   :  { %8390 = vmatmul.msk.f32.gmra.mxu1 %vm28_vm0, %v8941_v61  ;;  %v5319_v33 = vadd.f32 %v5186_v22, %v5076_v28  ;;  %v5189_v16 = vpop.f32.mrf.mxu2 }
 0xb3d   :  { %v5411_v60 = vpop.f32.mrf.mxu3 }
 0xb3e   :  { %v12847_v41 = vadd.f32 %v5411_v60, %v5319_v33 }
 0xb40   :  { %15697 = vst [vmem:[#allocation28_spill] sm:$0xff] %v12847_v41  ;;  %v4946_v51 = vpop.f32.mrf.mxu1  ;;  %8449 = vmatmul.msk.f32.gmra.mxu2 %vm28_vm0, %v8946_v24  ;;  %v8949_v24 = vld [vmem:[#allocation2 + $0x460] sm:$0xff] }
 0xb41   :  { %v5077_v38 = vadd.f32 %v4946_v51, %v12508_v35  ;;  %v8948_v35 = vld [vmem:[#allocation2 + $0x458] sm:$0xff] }
 0xb42   :  { %8505 = vmatmul.msk.f32.gmra.mxu3 %vm28_vm0, %v8945_v20 }
 0xb43   :  { %8391 = vmatmul.msk.f32.gmra.mxu1 %vm28_vm0, %v8943_v52  ;;  %v5320_v61 = vadd.f32 %v5189_v16, %v5077_v38  ;;  %v5192_v53 = vpop.f32.mrf.mxu2 }
 0xb45   :  { %v5414_v58 = vpop.f32.mrf.mxu3 }
 0xb46   :  { %v12853_v1 = vadd.f32 %v5414_v58, %v5320_v61 }
 0xb48   :  { %v4949_v22 = vpop.f32.mrf.mxu1  ;;  %8450 = vmatmul.msk.f32.gmra.mxu2 %vm28_vm0, %v8948_v35  ;;  %v8951_v35 = vld [vmem:[#allocation2 + $0x470] sm:$0xff] }
 0xb49   :  { %v5078_v28 = vadd.f32 %v4949_v22, %v12514_v29  ;;  %v8950_v29 = vld [vmem:[#allocation2 + $0x468] sm:$0xff] }
 0xb4a   :  { %8506 = vmatmul.msk.f32.gmra.mxu3 %vm28_vm0, %v8947_v37 }
 0xb4b   :  { %8392 = vmatmul.msk.f32.gmra.mxu1 %vm28_vm0, %v8945_v20  ;;  %v5321_v52 = vadd.f32 %v5192_v53, %v5078_v28  ;;  %v5195_v60 = vpop.f32.mrf.mxu2 }
 0xb4d   :  { %v5417_v33 = vpop.f32.mrf.mxu3 }
 0xb4e   :  { %v12859_v51 = vadd.f32 %v5417_v33, %v5321_v52 }
 0xb50   :  { %15698 = vst [vmem:[#allocation29_spill] sm:$0xff] %v12859_v51  ;;  %v4952_v16 = vpop.f32.mrf.mxu1  ;;  %8451 = vmatmul.msk.f32.gmra.mxu2 %vm28_vm0, %v8950_v29  ;;  %v8953_v29 = vld [vmem:[#allocation2 + $0x510] sm:$0xff] }
 0xb51   :  { %v5079_v38 = vadd.f32 %v4952_v16, %v12520_v31  ;;  %v8952_v31 = vld [vmem:[#allocation2 + $0x508] sm:$0xff] }
 0xb52   :  { %8507 = vmatmul.msk.f32.gmra.mxu3 %vm28_vm0, %v8949_v24 }
 0xb53   :  { %8393 = vmatmul.msk.f32.gmra.mxu1 %vm28_vm0, %v8947_v37  ;;  %v5322_v20 = vadd.f32 %v5195_v60, %v5079_v38  ;;  %v5198_v58 = vpop.f32.mrf.mxu2 }
 0xb55   :  { %v5420_v61 = vpop.f32.mrf.mxu3 }
 0xb56   :  { %v12865_v22 = vadd.f32 %v5420_v61, %v5322_v20  ;;  %v8955_v20 = vld [vmem:[#allocation2 + $0x518] sm:$0xff]  ;;  %v8535_v61 = vld [vmem:[%s14988_s2 + $0x268] sm:$0xff] }
 0xb57   :  { %6334 = vmatpush.msrb.mxu2 %v8535_v61 }
 0xb58   :  { %15699 = vst [vmem:[#allocation30_spill] sm:$0xff] %v12865_v22  ;;  %v4955_v53 = vpop.f32.mrf.mxu1  ;;  %8452 = vmatmul.msk.f32.gmra.mxu2 %vm28_vm0, %v8952_v31 }
 0xb59   :  { %v5080_v28 = vadd.f32 %v4955_v53, %v12535_v54  ;;  %v8954_v54 = vld [vmem:[#allocation2 + $0x500] sm:$0xff] }
 0xb5a   :  { %8508 = vmatmul.msk.f32.gmra.mxu3 %vm28_vm0, %v8951_v35 }
 0xb5b   :  { %8394 = vmatmul.msk.f32.gmra.mxu1 %vm28_vm0, %v8949_v24  ;;  %v5323_v37 = vadd.f32 %v5198_v58, %v5080_v28  ;;  %v5201_v33 = vpop.f32.mrf.mxu2  ;;  %v8583_v58 = vld [vmem:[%s14988_s2 + $0x2e8] sm:$0xff] }
 0xb5c   :  { %6420 = vmatpush.msrb.mxu3 %v8583_v58  ;;  %v8958_v58 = vld [vmem:[#allocation2 + $0x530] sm:$0xff] }
 0xb5d   :  { %v5423_v52 = vpop.f32.mrf.mxu3 }
 0xb5e   :  { %v12871_v16 = vadd.f32 %v5423_v52, %v5323_v37  ;;  %v8956_v52 = vld [vmem:[#allocation2 + $0x520] sm:$0xff] }
 0xb60   :  { %15700 = vst [vmem:[#allocation31_spill] sm:$0xff] %v12871_v16  ;;  %v4958_v60 = vpop.f32.mrf.mxu1  ;;  %8453 = vmatmul.msk.f32.gmra.mxu2 %vm28_vm0, %v8955_v20 }
 0xb61   :  { %v5081_v38 = vadd.f32 %v4958_v60, %v12541_v19  ;;  %v8543_v19 = vld [vmem:[%s14988_s2 + $0x2a8] sm:$0xff] }
 0xb62   :  { %8509 = vmatmul.msk.f32.gmra.mxu3 %vm28_vm0, %v8953_v29  ;;  %6221 = vmatpush.msrb.mxu1 %v8543_v19 }
 0xb63   :  { %8395 = vmatmul.msk.f32.gmra.mxu1 %vm28_vm0, %v8954_v54  ;;  %v5324_v24 = vadd.f32 %v5201_v33, %v5081_v38  ;;  %v5204_v28 = vpop.f32.mrf.mxu2  ;;  %v8957_v33 = vld [vmem:[#allocation2 + $0x528] sm:$0xff] }
 0xb65   :  { %v5426_v53 = vpop.f32.mrf.mxu3 }
 0xb66   :  { %v12886_v35 = vadd.f32 %v5426_v53, %v5324_v24 }
 0xb68   :  { %v4961_v31 = vpop.f32.mrf.mxu1  ;;  %8454 = vmatmul.msk.f32.gmra.mxu2 %vm28_vm0, %v8957_v33  ;;  %v8960_v33 = vld [vmem:[#allocation2 + $0x540] sm:$0xff] }
 0xb69   :  { %v5082_v37 = vadd.f32 %v4961_v31, %v12547_v39  ;;  %v8959_v39 = vld [vmem:[#allocation2 + $0x538] sm:$0xff] }
 0xb6a   :  { %8510 = vmatmul.msk.f32.gmra.mxu3 %vm28_vm0, %v8956_v52 }
 0xb6b   :  { %8396 = vmatmul.msk.f32.gmra.mxu1 %vm28_vm0, %v8953_v29  ;;  %v5325_v60 = vadd.f32 %v5204_v28, %v5082_v37  ;;  %v5207_v54 = vpop.f32.mrf.mxu2 }
 0xb6d   :  { %v5429_v38 = vpop.f32.mrf.mxu3 }
 0xb6e   :  { %v12892_v20 = vadd.f32 %v5429_v38, %v5325_v60 }
 0xb70   :  { %15701 = vst [vmem:[#allocation32_spill] sm:$0xff] %v12892_v20  ;;  %v4964_v61 = vpop.f32.mrf.mxu1  ;;  %8455 = vmatmul.msk.f32.gmra.mxu2 %vm28_vm0, %v8959_v39  ;;  %v8962_v39 = vld [vmem:[#allocation2 + $0x550] sm:$0xff] }
 0xb71   :  { %v5083_v24 = vadd.f32 %v4964_v61, %v12553_v11  ;;  %v8961_v11 = vld [vmem:[#allocation2 + $0x548] sm:$0xff] }
 0xb72   :  { %8511 = vmatmul.msk.f32.gmra.mxu3 %vm28_vm0, %v8958_v58 }
 0xb73   :  { %8397 = vmatmul.msk.f32.gmra.mxu1 %vm28_vm0, %v8956_v52  ;;  %v5326_v29 = vadd.f32 %v5207_v54, %v5083_v24  ;;  %v5210_v53 = vpop.f32.mrf.mxu2 }
 0xb75   :  { %v5432_v19 = vpop.f32.mrf.mxu3 }
 0xb76   :  { %v12898_v31 = vadd.f32 %v5432_v19, %v5326_v29 }
 0xb78   :  { %15702 = vst [vmem:[#allocation33_spill] sm:$0xff] %v12898_v31  ;;  %v4967_v28 = vpop.f32.mrf.mxu1  ;;  %8456 = vmatmul.msk.f32.gmra.mxu2 %vm28_vm0, %v8961_v11  ;;  %v8964_v11 = vld [vmem:[#allocation2 + $0x560] sm:$0xff] }
 0xb79   :  { %v5084_v37 = vadd.f32 %v4967_v28, %v12559_v21  ;;  %v8963_v21 = vld [vmem:[#allocation2 + $0x558] sm:$0xff] }
 0xb7a   :  { %8512 = vmatmul.msk.f32.gmra.mxu3 %vm28_vm0, %v8960_v33 }
 0xb7b   :  { %8398 = vmatmul.msk.f32.gmra.mxu1 %vm28_vm0, %v8958_v58  ;;  %v5327_v52 = vadd.f32 %v5210_v53, %v5084_v37  ;;  %v5213_v38 = vpop.f32.mrf.mxu2 }
 0xb7d   :  { %v5435_v60 = vpop.f32.mrf.mxu3 }
 0xb7e   :  { %v12904_v61 = vadd.f32 %v5435_v60, %v5327_v52 }
 0xb80   :  { %15703 = vst [vmem:[#allocation34_spill] sm:$0xff] %v12904_v61  ;;  %v4970_v54 = vpop.f32.mrf.mxu1  ;;  %8457 = vmatmul.msk.f32.gmra.mxu2 %vm28_vm0, %v8963_v21  ;;  %v8966_v21 = vld [vmem:[#allocation2 + $0x570] sm:$0xff] }
 0xb81   :  { %v5085_v24 = vadd.f32 %v4970_v54, %v12565_v2  ;;  %v8965_v2 = vld [vmem:[#allocation2 + $0x568] sm:$0xff] }
 0xb82   :  { %8513 = vmatmul.msk.f32.gmra.mxu3 %vm28_vm0, %v8962_v39 }
 0xb83   :  { %8399 = vmatmul.msk.f32.gmra.mxu1 %vm28_vm0, %v8960_v33  ;;  %v5328_v58 = vadd.f32 %v5213_v38, %v5085_v24  ;;  %v5216_v19 = vpop.f32.mrf.mxu2 }
 0xb85   :  { %v5438_v29 = vpop.f32.mrf.mxu3 }
 0xb86   :  { %v12910_v28 = vadd.f32 %v5438_v29, %v5328_v58  ;;  %v8534_v58 = vld [vmem:[%s14988_s2 + $0x260] sm:$0xff] }
 0xb87   :  { %v8582_v29 = vld [vmem:[%s14988_s2 + $0x2e0] sm:$0xff]  ;;  %6335 = vmatpush.msrb.mxu2 %v8534_v58 }
 0xb88   :  { %v4973_v53 = vpop.f32.mrf.mxu1  ;;  %8458 = vmatmul.msk.f32.gmra.mxu2 %vm28_vm0, %v8965_v2  ;;  %6421 = vmatpush.msrb.mxu3 %v8582_v29  ;;  %v8968_v2 = vld [vmem:[#allocation2 + $0x610] sm:$0xff]  ;;  %v8971_v58 = vld [vmem:[#allocation2 + $0x620] sm:$0xff]  ;;  %v8972_v29 = vld [vmem:[#allocation2 + $0x628] sm:$0xff] }
 0xb89   :  { %v5086_v37 = vadd.f32 %v4973_v53, %v12580_v63  ;;  %v8967_v63 = vld [vmem:[#allocation2 + $0x608] sm:$0xff] }
 0xb8a   :  { %8514 = vmatmul.msk.f32.gmra.mxu3 %vm28_vm0, %v8964_v11 }
 0xb8b   :  { %8400 = vmatmul.msk.f32.gmra.mxu1 %vm28_vm0, %v8962_v39  ;;  %v5329_v33 = vadd.f32 %v5216_v19, %v5086_v37  ;;  %v5219_v60 = vpop.f32.mrf.mxu2 }
 0xb8d   :  { %v5441_v52 = vpop.f32.mrf.mxu3 }
 0xb8e   :  { %v12916_v54 = vadd.f32 %v5441_v52, %v5329_v33  ;;  %v8969_v33 = vld [vmem:[#allocation2 + $0x600] sm:$0xff]  ;;  %v8970_v52 = vld [vmem:[#allocation2 + $0x618] sm:$0xff] }
 0xb90   :  { %15704 = vst [vmem:[#allocation35_spill] sm:$0xff] %v12916_v54  ;;  %v4976_v38 = vpop.f32.mrf.mxu1  ;;  %8459 = vmatmul.msk.f32.gmra.mxu2 %vm28_vm0, %v8967_v63 }
 0xb91   :  { %v5087_v24 = vadd.f32 %v4976_v38, %v12586_v4  ;;  %v8542_v38 = vld [vmem:[%s14988_s2 + $0x2a0] sm:$0xff] }
 0xb92   :  { %8515 = vmatmul.msk.f32.gmra.mxu3 %vm28_vm0, %v8966_v21  ;;  %6222 = vmatpush.msrb.mxu1 %v8542_v38 }
 0xb93   :  { %8401 = vmatmul.msk.f32.gmra.mxu1 %vm28_vm0, %v8964_v11  ;;  %v5330_v39 = vadd.f32 %v5219_v60, %v5087_v24  ;;  %v5222_v19 = vpop.f32.mrf.mxu2 }
 0xb95   :  { %v5444_v4 = vpop.f32.mrf.mxu3 }
 0xb96   :  { %v12928_v53 = vadd.f32 %v5444_v4, %v5330_v39 }
 0xb98   :  { %15705 = vst [vmem:[#allocation36_spill] sm:$0xff] %v12928_v53  ;;  %v4979_v37 = vpop.f32.mrf.mxu1  ;;  %8460 = vmatmul.msk.f32.gmra.mxu2 %vm28_vm0, %v8970_v52 }
 0xb99   :  { %v5088_v11 = vadd.f32 %v4979_v37, %v12592_v62 }
 0xb9a   :  { %8516 = vmatmul.msk.f32.gmra.mxu3 %vm28_vm0, %v8968_v2 }
 0xb9b   :  { %8402 = vmatmul.msk.f32.gmra.mxu1 %vm28_vm0, %v8969_v33  ;;  %v5331_v60 = vadd.f32 %v5222_v19, %v5088_v11  ;;  %v5225_v21 = vpop.f32.mrf.mxu2 }
 0xb9d   :  { %v5447_v24 = vpop.f32.mrf.mxu3 }
 0xb9e   :  { %v12937_v63 = vadd.f32 %v5447_v24, %v5331_v60  ;;  %v8973_v60 = vld [vmem:[#allocation2 + $0x630] sm:$0xff] }
 0xba0   :  { %15706 = vst [vmem:[#allocation37_spill] sm:$0xff] %v12937_v63  ;;  %v4982_v62 = vpop.f32.mrf.mxu1  ;;  %8461 = vmatmul.msk.f32.gmra.mxu2 %vm28_vm0, %v8972_v29  ;;  %v8975_v29 = vld [vmem:[#allocation2 + $0x640] sm:$0xff] }
 0xba1   :  { %v5089_v39 = vadd.f32 %v4982_v62, %v12598_v8  ;;  %v8974_v8 = vld [vmem:[#allocation2 + $0x638] sm:$0xff] }
 0xba2   :  { %8517 = vmatmul.msk.f32.gmra.mxu3 %vm28_vm0, %v8971_v58 }
 0xba3   :  { %8403 = vmatmul.msk.f32.gmra.mxu1 %vm28_vm0, %v8968_v2  ;;  %v5332_v4 = vadd.f32 %v5225_v21, %v5089_v39  ;;  %v5228_v37 = vpop.f32.mrf.mxu2 }
 0xba5   :  { %v5450_v19 = vpop.f32.mrf.mxu3 }
 0xba6   :  { %v12943_v11 = vadd.f32 %v5450_v19, %v5332_v4 }
 0xba8   :  { %15707 = vst [vmem:[#allocation38_spill] sm:$0xff] %v12943_v11  ;;  %v4985_v33 = vpop.f32.mrf.mxu1  ;;  %8462 = vmatmul.msk.f32.gmra.mxu2 %vm28_vm0, %v8974_v8  ;;  %v8977_v8 = vld [vmem:[#allocation2 + $0x650] sm:$0xff] }
 0xba9   :  { %v5090_v52 = vadd.f32 %v4985_v33, %v12604_v47  ;;  %v8976_v47 = vld [vmem:[#allocation2 + $0x648] sm:$0xff] }
 0xbaa   :  { %8518 = vmatmul.msk.f32.gmra.mxu3 %vm28_vm0, %v8973_v60 }
 0xbab   :  { %8404 = vmatmul.msk.f32.gmra.mxu1 %vm28_vm0, %v8971_v58  ;;  %v5333_v2 = vadd.f32 %v5228_v37, %v5090_v52  ;;  %v5231_v24 = vpop.f32.mrf.mxu2 }
 0xbad   :  { %v5453_v38 = vpop.f32.mrf.mxu3 }
 0xbae   :  { %v12949_v62 = vadd.f32 %v5453_v38, %v5333_v2 }
 0xbb0   :  { %v4988_v21 = vpop.f32.mrf.mxu1  ;;  %8463 = vmatmul.msk.f32.gmra.mxu2 %vm28_vm0, %v8976_v47  ;;  %v8979_v47 = vld [vmem:[#allocation2 + $0x660] sm:$0xff] }
 0xbb1   :  { %v5091_v39 = vadd.f32 %v4988_v21, %v12610_v46  ;;  %v8978_v46 = vld [vmem:[#allocation2 + $0x658] sm:$0xff] }
 0xbb2   :  { %8519 = vmatmul.msk.f32.gmra.mxu3 %vm28_vm0, %v8975_v29 }
 0xbb3   :  { %8405 = vmatmul.msk.f32.gmra.mxu1 %vm28_vm0, %v8973_v60  ;;  %v5334_v58 = vadd.f32 %v5231_v24, %v5091_v39  ;;  %v5234_v19 = vpop.f32.mrf.mxu2 }
 0xbb5   :  { %v5456_v4 = vpop.f32.mrf.mxu3 }
 0xbb6   :  { %v12955_v33 = vadd.f32 %v5456_v4, %v5334_v58  ;;  %v8533_v58 = vld [vmem:[%s14988_s2 + $0x258] sm:$0xff] }
 0xbb7   :  { %v8581_v4 = vld [vmem:[%s14988_s2 + $0x2d8] sm:$0xff]  ;;  %6336 = vmatpush.msrb.mxu2 %v8533_v58 }
 0xbb8   :  { %v4991_v37 = vpop.f32.mrf.mxu1  ;;  %8464 = vmatmul.msk.f32.gmra.mxu2 %vm28_vm0, %v8978_v46  ;;  %6422 = vmatpush.msrb.mxu3 %v8581_v4  ;;  %v2998_v46 = vld [vmem:[#allocation2 + $0x708] sm:$0xff]  ;;  %v3000_v58 = vld [vmem:[#allocation2 + $0x718] sm:$0xff] }
 0xbb9   :  { %v5092_v52 = vadd.f32 %v4991_v37, %v12625_v12  ;;  %v8980_v12 = vld [vmem:[#allocation2 + $0x668] sm:$0xff] }
 0xbba   :  { %8520 = vmatmul.msk.f32.gmra.mxu3 %vm28_vm0, %v8977_v8 }
 0xbbb   :  { %8406 = vmatmul.msk.f32.gmra.mxu1 %vm28_vm0, %v8975_v29  ;;  %v5335_v60 = vadd.f32 %v5234_v19, %v5092_v52  ;;  %v5237_v38 = vpop.f32.mrf.mxu2 }
 0xbbd   :  { %v5459_v2 = vpop.f32.mrf.mxu3 }
 0xbbe   :  { %v12961_v21 = vadd.f32 %v5459_v2, %v5335_v60  ;;  %v8981_v60 = vld [vmem:[#allocation2 + $0x670] sm:$0xff]  ;;  %v8541_v2 = vld [vmem:[%s14988_s2 + $0x298] sm:$0xff] }
 0xbbf   :  { %6223 = vmatpush.msrb.mxu1 %v8541_v2 }
 0xbc0   :  { %v4994_v24 = vpop.f32.mrf.mxu1  ;;  %8465 = vmatmul.msk.f32.gmra.mxu2 %vm28_vm0, %v8980_v12  ;;  %v2997_v12 = vld [vmem:[#allocation2 + $0x700] sm:$0xff] }
 0xbc1   :  { %v5093_v39 = vadd.f32 %v4994_v24, %v12634_v59  ;;  %v8785_v59 = vld [vmem:[%s14988_s2 + $0x558] sm:$0xff] }
 0xbc2   :  { %8521 = vmatmul.msk.f32.gmra.mxu3 %vm28_vm0, %v8979_v47  ;;  %7553 = vmatpush.msrb.mxu0 %v8785_v59 }
 0xbc3   :  { %8407 = vmatmul.msk.f32.gmra.mxu1 %vm28_vm0, %v8977_v8  ;;  %v5336_v29 = vadd.f32 %v5237_v38, %v5093_v39  ;;  %v12976_v37 = vpop.f32.mrf.mxu2 }
 0xbc5   :  { %v5462_v19 = vpop.f32.mrf.mxu3 }
 0xbc6   :  { %v12978_v52 = vadd.f32 %v5462_v19, %v5336_v29  ;;  %v2999_v29 = vld [vmem:[#allocation2 + $0x710] sm:$0xff]  ;;  %v3001_v19 = vld [vmem:[#allocation2 + $0x720] sm:$0xff] }
 0xbc8   :  { %v12980_v8 = vpop.f32.mrf.mxu1  ;;  %8466 = vmatmul.msk.f32.gmra.mxu2 %vm28_vm0, %v2998_v46  ;;  %v3002_v46 = vld [vmem:[#allocation2 + $0x728] sm:$0xff] }
 0xbca   :  { %8522 = vmatmul.msk.f32.gmra.mxu3 %vm28_vm0, %v8981_v60 }
 0xbcb   :  { %8408 = vmatmul.msk.f32.gmra.mxu1 %vm28_vm0, %v8979_v47  ;;  %v12990_v24 = vpop.f32.mrf.mxu2 }
 0xbcd   :  { %v12988_v38 = vpop.f32.mrf.mxu3 }
 0xbd0   :  { %v12992_v39 = vpop.f32.mrf.mxu1  ;;  %8467 = vmatmul.msk.f32.gmra.mxu2 %vm28_vm0, %v3000_v58  ;;  %v3003_v58 = vld [vmem:[#allocation2 + $0x730] sm:$0xff] }
 0xbd2   :  { %8523 = vmatmul.msk.f32.gmra.mxu3 %vm28_vm0, %v2999_v29 }
 0xbd3   :  { %8409 = vmatmul.msk.f32.gmra.mxu1 %vm28_vm0, %v2997_v12  ;;  %v12999_v4 = vpop.f32.mrf.mxu2 }
 0xbd5   :  { %v12997_v47 = vpop.f32.mrf.mxu3 }
 0xbd8   :  { %v13001_v59 = vpop.f32.mrf.mxu1  ;;  %8468 = vmatmul.msk.f32.gmra.mxu2 %vm28_vm0, %v3002_v46  ;;  %v3005_v46 = vld [vmem:[#allocation2 + $0x740] sm:$0xff] }
 0xbda   :  { %8524 = vmatmul.msk.f32.gmra.mxu3 %vm28_vm0, %v3001_v19 }
 0xbdb   :  { %8410 = vmatmul.msk.f32.gmra.mxu1 %vm28_vm0, %v2999_v29  ;;  %v13008_v2 = vpop.f32.mrf.mxu2 }
 0xbdd   :  { %v13006_v60 = vpop.f32.mrf.mxu3 }
 0xbe0   :  { %v13010_v12 = vpop.f32.mrf.mxu1  ;;  %8469 = vmatmul.msk.f32.gmra.mxu2 %vm28_vm0, %v3004_v49  ;;  %v3007_v49 = vld [vmem:[#allocation2 + $0x750] sm:$0xff] }
 0xbe2   :  { %8525 = vmatmul.msk.f32.gmra.mxu3 %vm28_vm0, %v3003_v58 }
 0xbe3   :  { %8411 = vmatmul.msk.f32.gmra.mxu1 %vm28_vm0, %v3001_v19  ;;  %v13017_v9 = vpop.f32.mrf.mxu2 }
 0xbe5   :  { %v13015_v55 = vpop.f32.mrf.mxu3 }
 0xbe8   :  { %v13019_v29 = vpop.f32.mrf.mxu1  ;;  %8470 = vmatmul.msk.f32.gmra.mxu2 %vm28_vm0, %v3006_v10 }
 0xbea   :  { %8526 = vmatmul.msk.f32.gmra.mxu3 %vm28_vm0, %v3005_v46 }
 0xbeb   :  { %8412 = vmatmul.msk.f32.gmra.mxu1 %vm28_vm0, %v3003_v58  ;;  %v13026_v50 = vpop.f32.mrf.mxu2  ;;  %v8532_v58 = vld [vmem:[%s14988_s2 + $0x250] sm:$0xff] }
 0xbec   :  { %6337 = vmatpush.msrb.mxu2 %v8532_v58 }
 0xbed   :  { %v13024_v13 = vpop.f32.mrf.mxu3 }
 0xbf0   :  { %v13028_v19 = vpop.f32.mrf.mxu1  ;;  %8471 = vmatmul.msk.f32.gmra.mxu2 %vm28_vm0, %v3008_v34  ;;  %v8580_v34 = vld [vmem:[%s14988_s2 + $0x2d0] sm:$0xff] }
 0xbf1   :  { %6423 = vmatpush.msrb.mxu3 %v8580_v34 }
 0xbf2   :  { %8527 = vmatmul.msk.f32.gmra.mxu3 %vm28_vm0, %v3007_v49 }
 0xbf3   :  { %8413 = vmatmul.msk.f32.gmra.mxu1 %vm28_vm0, %v3005_v46  ;;  %v13038_v30 = vpop.f32.mrf.mxu2  ;;  %v8540_v46 = vld [vmem:[%s14988_s2 + $0x290] sm:$0xff] }
 0xbf4   :  { %15709 = vst [vmem:[#allocation40_spill] sm:$0xff] %v13038_v30  ;;  %6224 = vmatpush.msrb.mxu1 %v8540_v46 }
 0xbf5   :  { %v13036_v10 = vpop.f32.mrf.mxu3 }
 0xbf6   :  { %15708 = vst [vmem:[#allocation39_spill] sm:$0xff] %v13036_v10 }
 0xbf8   :  { %v13040_v25 = vpop.f32.mrf.mxu1  ;;  %8472 = vmatmul.msk.f32.gmra.mxu2 %vm28_vm0, %v3010_v7 }
 0xbfa   :  { %8528 = vmatmul.msk.f32.gmra.mxu3 %vm28_vm0, %v3009_v42 }
 0xbfb   :  { %8414 = vmatmul.msk.f32.gmra.mxu1 %vm28_vm0, %v3007_v49  ;;  %v13053_v43 = vpop.f32.mrf.mxu2 }
 0xbfc   :  { %15711 = vst [vmem:[#allocation42_spill] sm:$0xff] %v13053_v43 }
 0xbfd   :  { %v13051_v58 = vpop.f32.mrf.mxu3 }
 0xbfe   :  { %15710 = vst [vmem:[#allocation41_spill] sm:$0xff] %v13051_v58 }
 0xc00   :  { %v13055_v5 = vpop.f32.mrf.mxu1 }
 0xc01   :  { %15712 = vst [vmem:[#allocation43_spill] sm:$0xff] %v13055_v5 }
 0xc02   :  { %8529 = vmatmul.msk.f32.gmra.mxu3 %vm28_vm0, %v3011_v15 }
 0xc03   :  { %8415 = vmatmul.msk.f32.gmra.mxu1 %vm28_vm0, %v3009_v42  ;;  %v13061_v49 = vpop.f32.mrf.mxu2 }
 0xc04   :  { %15714 = vst [vmem:[#allocation45_spill] sm:$0xff] %v13061_v49  ;;  %v5686_v49 = vmul.f32 %v12802_v56, %v12802_v56 }
 0xc05   :  { %v13059_v7 = vpop.f32.mrf.mxu3 }
 0xc06   :  { %15713 = vst [vmem:[#allocation44_spill] sm:$0xff] %v13059_v7 }
 0xc08   :  { %v13063_v0 = vpop.f32.mrf.mxu1 }
 0xc09   :  { %15715 = vst [vmem:[#allocation46_spill] sm:$0xff] %v13063_v0 }
 0xc0b   :  { %v13067_v34 = vpop.f32.mrf.mxu2 }
 0xc0c   :  { %15717 = vst [vmem:[#allocation48_spill] sm:$0xff] %v13067_v34  ;;  %v8531_v34 = vld [vmem:[%s14988_s2 + $0x248] sm:$0xff] }
 0xc0d   :  { %v13065_v27 = vpop.f32.mrf.mxu3  ;;  %6338 = vmatpush.msrb.mxu2 %v8531_v34 }
 0xc0e   :  { %15716 = vst [vmem:[#allocation47_spill] sm:$0xff] %v13065_v27  ;;  %v5735_v27 = vsel %vm28_vm0, %v5686_v49, 0.0 }
 0xc10   :  { %v13069_v46 = vpop.f32.mrf.mxu1 }
 0xc11   :  { %15718 = vst [vmem:[#allocation49_spill] sm:$0xff] %v13069_v46  ;;  %v5688_v46 = vmul.f32 %v12814_v18, %v12814_v18 }
 0xc13   :  { %v13073_v58 = vpop.f32.mrf.mxu2  ;;  %v5739_v57 = vsel %vm28_vm0, %v5688_v46, 0.0 }
 0xc14   :  { %15720 = vst [vmem:[#allocation51_spill] sm:$0xff] %v13073_v58  ;;  %v5589_v58 = vsel %vm28_vm0, %v12802_v56, 0.0 }
 0xc15   :  { %v13071_v43 = vpop.f32.mrf.mxu3 }
 0xc16   :  { %15719 = vst [vmem:[#allocation50_spill] sm:$0xff] %v13071_v43  ;;  %v5685_v43 = vmul.f32 %v12796_v6, %v12796_v6 }
 0xc18   :  { %v13075_v30 = vpop.f32.mrf.mxu1  ;;  %v5734_v10 = vsel %vm28_vm0, %v5685_v43, 0.0  ;;  %v5690_v43 = vmul.f32 %v12826_v26, %v12826_v26 }
 0xc19   :  { %15721 = vst [vmem:[#allocation52_spill] sm:$0xff] %v13075_v30  ;;  %v5591_v30 = vsel %vm28_vm0, %v12808_v48, 0.0  ;;  %v5736_v5 = vadd.f32 %v5735_v27, %v5734_v10 }
 0xc1a   :  { %v5743_v46 = vsel %vm28_vm0, %v5690_v43, 0.0 }
 0xc1b   :  { %v13079_v42 = vpop.f32.mrf.mxu2 }
 0xc1c   :  { %15723 = vst [vmem:[#allocation54_spill] sm:$0xff] %v13079_v42 }
 0xc1d   :  { %v13077_v15 = vpop.f32.mrf.mxu3 }
 0xc1e   :  { %15722 = vst [vmem:[#allocation53_spill] sm:$0xff] %v13077_v15  ;;  %v5687_v15 = vmul.f32 %v12808_v48, %v12808_v48 }
 0xc20   :  { %v13081_v7 = vpop.f32.mrf.mxu1  ;;  %v5737_v34 = vsel %vm28_vm0, %v5687_v15, 0.0  ;;  %v8579_v15 = vld [vmem:[%s14988_s2 + $0x2c8] sm:$0xff] }
 0xc21   :  { %15724 = vst [vmem:[#allocation55_spill] sm:$0xff] %v13081_v7  ;;  %v5588_v7 = vsel %vm28_vm0, %v12796_v6, 0.0  ;;  %v5689_v6 = vmul.f32 %v12820_v23, %v12820_v23  ;;  %6424 = vmatpush.msrb.mxu3 %v8579_v15  ;;  %v5603_v15 = vsel %vm28_vm0, %v12853_v1, 0.0 }
 0xc22   :  { %v5590_v56 = vadd.f32 %v5589_v58, %v5588_v7  ;;  %v5738_v58 = vadd.f32 %v5737_v34, %v5736_v5 }
 0xc23   :  { %v13103_v0 = vpop.f32.mrf.mxu2  ;;  %v5741_v27 = vsel %vm28_vm0, %v5689_v6, 0.0  ;;  %v5692_v6 = vmul.f32 %v12847_v41, %v12847_v41 }
 0xc24   :  { %15726 = vst [vmem:[#allocation57_spill] sm:$0xff] %v13103_v0  ;;  %v5592_v48 = vadd.f32 %v5591_v30, %v5590_v56  ;;  %v5595_v0 = vsel %vm28_vm0, %v12820_v23, 0.0  ;;  %v5597_v30 = vsel %vm28_vm0, %v12826_v26, 0.0  ;;  %v5691_v56 = vmul.f32 %v12841_v32, %v12841_v32 }
 0xc25   :  { %v13094_v42 = vpop.f32.mrf.mxu3  ;;  %v5740_v5 = vadd.f32 %v5739_v57, %v5738_v58  ;;  %v5601_v57 = vsel %vm28_vm0, %v12847_v41, 0.0  ;;  %v5695_v41 = vmul.f32 %v12865_v22, %v12865_v22 }
 0xc26   :  { %15725 = vst [vmem:[#allocation56_spill] sm:$0xff] %v13094_v42  ;;  %v5593_v42 = vsel %vm28_vm0, %v12814_v18, 0.0  ;;  %v8539_v18 = vld [vmem:[%s14988_s2 + $0x288] sm:$0xff] }
 0xc27   :  { %v5594_v7 = vadd.f32 %v5593_v42, %v5592_v48  ;;  %6225 = vmatpush.msrb.mxu1 %v8539_v18  ;;  %v5599_v42 = vsel %vm28_vm0, %v12841_v32, 0.0  ;;  %v5742_v26 = vadd.f32 %v5741_v27, %v5740_v5  ;;  %v5694_v27 = vmul.f32 %v12859_v51, %v12859_v51 }
 0xc28   :  { %v13111_v49 = vpop.f32.mrf.mxu1 }
 0xc29   :  { %15727 = vst [vmem:[#allocation58_spill] sm:$0xff] %v13111_v49  ;;  %v5596_v48 = vadd.f32 %v5595_v0, %v5594_v7  ;;  %v5745_v49 = vsel %vm28_vm0, %v5691_v56, 0.0  ;;  %v5693_v0 = vmul.f32 %v12853_v1, %v12853_v1  ;;  %v5744_v43 = vadd.f32 %v5743_v46, %v5742_v26 }
 0xc2a   :  { %v5747_v7 = vsel %vm28_vm0, %v5692_v6, 0.0  ;;  %v5607_v6 = vsel %vm28_vm0, %v12865_v22, 0.0 }
 0xc2b   :  { %v13136_v34 = vpop.f32.mrf.mxu2  ;;  %v5598_v23 = vadd.f32 %v5597_v30, %v5596_v48  ;;  %v5746_v30 = vadd.f32 %v5745_v49, %v5744_v43  ;;  %v5749_v5 = vsel %vm28_vm0, %v5693_v0, 0.0  ;;  %v5605_v48 = vsel %vm28_vm0, %v12859_v51, 0.0 }
 0xc2c   :  { %v5696_v49 = vmul.f32 %v12871_v16, %v12871_v16  ;;  %v5611_v51 = vsel %vm28_vm0, %v12886_v35, 0.0 }
 0xc2d   :  { %v13129_v10 = vpop.f32.mrf.mxu3  ;;  %v5600_v58 = vadd.f32 %v5599_v42, %v5598_v23  ;;  %v5748_v26 = vadd.f32 %v5747_v7, %v5746_v30  ;;  %v5751_v42 = vsel %vm28_vm0, %v5694_v27, 0.0  ;;  %v5609_v7 = vsel %vm28_vm0, %v12871_v16, 0.0 }
 0xc2e   :  { %v5755_v22 = vsel %vm28_vm0, %v5696_v49, 0.0  ;;  %v5699_v16 = vmul.f32 %v12898_v31, %v12898_v31 }
 0xc2f   :  { %v5602_v56 = vadd.f32 %v5601_v57, %v5600_v58  ;;  %v5750_v0 = vadd.f32 %v5749_v5, %v5748_v26  ;;  %v5753_v58 = vsel %vm28_vm0, %v5695_v41, 0.0  ;;  %v5698_v5 = vmul.f32 %v12892_v20, %v12892_v20 }
 0xc30   :  { %v13143_v18 = vpop.f32.mrf.mxu1 }
 0xc31   :  { %v5604_v23 = vadd.f32 %v5603_v15, %v5602_v56  ;;  %v5697_v15 = vmul.f32 %v12886_v35, %v12886_v35  ;;  %v5752_v27 = vadd.f32 %v5751_v42, %v5750_v0  ;;  %v5759_v49 = vsel %vm28_vm0, %v5698_v5, 0.0 }
 0xc33   :  { %v13162_v57 = vpop.f32.mrf.mxu2  ;;  %v5606_v43 = vadd.f32 %v5605_v48, %v5604_v23  ;;  %v5754_v48 = vadd.f32 %v5753_v58, %v5752_v27  ;;  %v5757_v26 = vsel %vm28_vm0, %v5697_v15, 0.0  ;;  %v5613_v23 = vsel %vm28_vm0, %v12892_v20, 0.0 }
 0xc34   :  { %v5700_v58 = vmul.f32 %v12904_v61, %v12904_v61  ;;  %v5619_v20 = vsel %vm28_vm0, %v12910_v28, 0.0 }
 0xc35   :  { %v13155_v46 = vpop.f32.mrf.mxu3  ;;  %v5608_v56 = vadd.f32 %v5607_v6, %v5606_v43  ;;  %v5756_v42 = vadd.f32 %v5755_v22, %v5754_v48  ;;  %v5615_v43 = vsel %vm28_vm0, %v12898_v31, 0.0  ;;  %v5617_v22 = vsel %vm28_vm0, %v12904_v61, 0.0 }
 0xc36   :  { %v5763_v31 = vsel %vm28_vm0, %v5700_v58, 0.0  ;;  %v5703_v61 = vmul.f32 %v12928_v53, %v12928_v53 }
 0xc37   :  { %v5610_v41 = vadd.f32 %v5609_v7, %v5608_v56  ;;  %v5758_v15 = vadd.f32 %v5757_v26, %v5756_v42  ;;  %v5761_v56 = vsel %vm28_vm0, %v5699_v16, 0.0  ;;  %v5702_v26 = vmul.f32 %v12916_v54, %v12916_v54 }
 0xc38   :  { %v13169_v30 = vpop.f32.mrf.mxu1 }
 0xc39   :  { %v5612_v6 = vadd.f32 %v5611_v51, %v5610_v41  ;;  %v5701_v51 = vmul.f32 %v12910_v28, %v12910_v28  ;;  %v5760_v5 = vadd.f32 %v5759_v49, %v5758_v15  ;;  %v5767_v58 = vsel %vm28_vm0, %v5702_v26, 0.0 }
 0xc3b   :  { %v13188_v7 = vpop.f32.mrf.mxu2  ;;  %v5614_v27 = vadd.f32 %v5613_v23, %v5612_v6  ;;  %v5762_v23 = vadd.f32 %v5761_v56, %v5760_v5  ;;  %v5765_v42 = vsel %vm28_vm0, %v5701_v51, 0.0  ;;  %v5621_v6 = vsel %vm28_vm0, %v12916_v54, 0.0 }
 0xc3c   :  { %v5704_v56 = vmul.f32 %v12937_v63, %v12937_v63  ;;  %v5627_v54 = vsel %vm28_vm0, %v12943_v11, 0.0 }
 0xc3d   :  { %v13181_v0 = vpop.f32.mrf.mxu3  ;;  %v5616_v41 = vadd.f32 %v5615_v43, %v5614_v27  ;;  %v5764_v49 = vadd.f32 %v5763_v31, %v5762_v23  ;;  %v5623_v27 = vsel %vm28_vm0, %v12928_v53, 0.0  ;;  %v5625_v31 = vsel %vm28_vm0, %v12937_v63, 0.0 }
 0xc3e   :  { %v5771_v53 = vsel %vm28_vm0, %v5704_v56, 0.0  ;;  %v5629_v63 = vsel %vm28_vm0, %v12949_v62, 0.0 }
 0xc3f   :  { %v5618_v16 = vadd.f32 %v5617_v22, %v5616_v41  ;;  %v5766_v51 = vadd.f32 %v5765_v42, %v5764_v49  ;;  %v5769_v41 = vsel %vm28_vm0, %v5703_v61, 0.0  ;;  %v5706_v42 = vmul.f32 %v12949_v62, %v12949_v62 }
 0xc40   :  { %v13195_v48 = vpop.f32.mrf.mxu1  ;;  %v5094_v61 = vadd.f32 %v12980_v8, %v12640_v17  ;;  %v5631_v8 = vsel %vm28_vm0, %v12955_v33, 0.0 }
 0xc41   :  { %v5620_v43 = vadd.f32 %v5619_v20, %v5618_v16  ;;  %v5705_v20 = vmul.f32 %v12943_v11, %v12943_v11  ;;  %v5768_v26 = vadd.f32 %v5767_v58, %v5766_v51  ;;  %v5707_v58 = vmul.f32 %v12955_v33, %v12955_v33 }
 0xc42   :  { %v5775_v17 = vsel %vm28_vm0, %v5706_v42, 0.0 }
 0xc43   :  { %v13214_v22 = vpop.f32.mrf.mxu2  ;;  %v5622_v5 = vadd.f32 %v5621_v6, %v5620_v43  ;;  %v5770_v6 = vadd.f32 %v5769_v41, %v5768_v26  ;;  %v5773_v43 = vsel %vm28_vm0, %v5705_v20, 0.0  ;;  %v5708_v41 = vmul.f32 %v12961_v21, %v12961_v21 }
 0xc45   :  { %v13207_v15 = vpop.f32.mrf.mxu3  ;;  %v5624_v16 = vadd.f32 %v5623_v27, %v5622_v5  ;;  %v5095_v27 = vadd.f32 %v12992_v39, %v12646_v44  ;;  %v5772_v56 = vadd.f32 %v5771_v53, %v5770_v6  ;;  %v5096_v5 = vadd.f32 %v13001_v59, %v12652_v3 }
 0xc46   :  { %v5777_v3 = vsel %vm28_vm0, %v5707_v58, 0.0  ;;  %v5709_v39 = vmul.f32 %v12978_v52, %v12978_v52 }
 0xc47   :  { %v5626_v49 = vadd.f32 %v5625_v31, %v5624_v16  ;;  %v5337_v31 = vadd.f32 %v12976_v37, %v5094_v61  ;;  %v5774_v44 = vadd.f32 %v5773_v43, %v5772_v56  ;;  %v5338_v26 = vadd.f32 %v12990_v24, %v5095_v27 }
 0xc48   :  { %v13221_v23 = vpop.f32.mrf.mxu1  ;;  %v5339_v61 = vadd.f32 %v12999_v4, %v5096_v5  ;;  %v5099_v4 = vadd.f32 %v13028_v19, %v12670_v45  ;;  %v5635_v43 = vsel %vm28_vm0, %v12978_v52, 0.0  ;;  %v5781_v58 = vsel %vm28_vm0, %v5709_v39, 0.0  ;;  %v15730_v39 = vld [vmem:[#allocation39_spill] sm:$0xff] }
 0xc49   :  { %v5628_v51 = vadd.f32 %v5627_v54, %v5626_v49  ;;  %v5097_v54 = vadd.f32 %v13010_v12, %v12658_v36  ;;  %v13255_v59 = vadd.f32 %v12988_v38, %v5337_v31  ;;  %v5776_v37 = vadd.f32 %v5775_v17, %v5774_v44  ;;  %v15728_v31 = vld [vmem:[#allocation5_spill] sm:$0xff]  ;;  %v15729_v44 = vld [vmem:[#allocation43_spill] sm:$0xff] }
 0xc4a   :  { %v5779_v36 = vsel %vm28_vm0, %v5708_v41, 0.0  ;;  %v13265_v12 = vadd.f32 %v12997_v47, %v5338_v26  ;;  %v5098_v38 = vadd.f32 %v13019_v29, %v12664_v40  ;;  %v13270_v24 = vadd.f32 %v13006_v60, %v5339_v61  ;;  %v15732_v61 = vld [vmem:[#allocation6_spill] sm:$0xff] }
 0xc4b   :  { %v13247_v20 = vpop.f32.mrf.mxu2  ;;  %v5630_v53 = vadd.f32 %v5629_v63, %v5628_v51  ;;  %v5633_v63 = vsel %vm28_vm0, %v12961_v21, 0.0  ;;  %v5778_v6 = vadd.f32 %v5777_v3, %v5776_v37  ;;  %v5340_v49 = vadd.f32 %v13008_v2, %v5097_v54 }
 0xc4c   :  { %v5710_v47 = vmul.f32 %v13255_v59, %v13255_v59  ;;  %v5100_v60 = vadd.f32 %v13040_v25, %v12676_v14  ;;  %v5637_v45 = vsel %vm28_vm0, %v13255_v59, 0.0  ;;  %v5711_v29 = vmul.f32 %v13265_v12, %v13265_v12 }
 0xc4d   :  { %v13239_v11 = vpop.f32.mrf.mxu3  ;;  %v5632_v42 = vadd.f32 %v5631_v8, %v5630_v53  ;;  %v5780_v56 = vadd.f32 %v5779_v36, %v5778_v6  ;;  %v13281_v40 = vadd.f32 %v13015_v55, %v5340_v49  ;;  %v5341_v19 = vadd.f32 %v13017_v9, %v5098_v38 }
 0xc4e   :  { %v5712_v55 = vmul.f32 %v13270_v24, %v13270_v24  ;;  %v5342_v8 = vadd.f32 %v13026_v50, %v5099_v4  ;;  %v5783_v14 = vsel %vm28_vm0, %v5710_v47, 0.0  ;;  %v5639_v25 = vsel %vm28_vm0, %v13265_v12, 0.0  ;;  %v15731_v50 = vld [vmem:[#allocation40_spill] sm:$0xff]  ;;  %v15734_v4 = vld [vmem:[#allocation41_spill] sm:$0xff] }
 0xc4f   :  { %v5634_v27 = vadd.f32 %v5633_v63, %v5632_v42  ;;  %v5782_v17 = vadd.f32 %v5781_v58, %v5780_v56  ;;  %v13301_v41 = vadd.f32 %v13024_v13, %v5341_v19  ;;  %v5101_v9 = vadd.f32 %v15729_v44, %v15728_v31  ;;  %v15733_v63 = vld [vmem:[#allocation46_spill] sm:$0xff]  ;;  %v8530_v58 = vld [vmem:[%s14988_s2 + $0x240] sm:$0xff]  ;;  %v15736_v19 = vld [vmem:[#allocation7_spill] sm:$0xff] }
 0xc50   :  { %v13258_v16 = vpop.f32.mrf.mxu1  ;;  %v5713_v3 = vmul.f32 %v13281_v40, %v13281_v40  ;;  %v13310_v26 = vadd.f32 %v15730_v39, %v5342_v8  ;;  %v5343_v37 = vadd.f32 %v15731_v50, %v5100_v60  ;;  %v5785_v42 = vsel %vm28_vm0, %v5711_v29, 0.0  ;;  %v8578_v47 = vld [vmem:[%s14988_s2 + $0x2c0] sm:$0xff]  ;;  %6339 = vmatpush.msrb.mxu2 %v8530_v58  ;;  %v15743_v58 = vld [vmem:[#allocation47_spill] sm:$0xff] }
 0xc51   :  { %v5636_v5 = vadd.f32 %v5635_v43, %v5634_v27  ;;  %v5641_v13 = vsel %vm28_vm0, %v13270_v24, 0.0  ;;  %v5102_v36 = vadd.f32 %v15733_v63, %v15732_v61  ;;  %v5784_v38 = vadd.f32 %v5783_v14, %v5782_v17  ;;  %v8538_v27 = vld [vmem:[%s14988_s2 + $0x280] sm:$0xff]  ;;  %6425 = vmatpush.msrb.mxu3 %v8578_v47  ;;  %v15742_v61 = vld [vmem:[#allocation52_spill] sm:$0xff] }
 0xc52   :  { %v5787_v49 = vsel %vm28_vm0, %v5712_v55, 0.0  ;;  %v13320_v43 = vadd.f32 %v15734_v4, %v5343_v37  ;;  %v5643_v56 = vsel %vm28_vm0, %v13281_v40, 0.0  ;;  %v5714_v60 = vmul.f32 %v13301_v41, %v13301_v41  ;;  %6226 = vmatpush.msrb.mxu1 %v8538_v27  ;;  %v15740_v39 = vld [vmem:[#allocation45_spill] sm:$0xff]  ;;  %v15741_v37 = vld [vmem:[#allocation8_spill] sm:$0xff] }
 0xc53   :  { %v13292_v51 = vpop.f32.mrf.mxu2  ;;  %v5638_v54 = vadd.f32 %v5637_v45, %v5636_v5  ;;  %v15735_v45 = vld [vmem:[#allocation42_spill] sm:$0xff]  ;;  %v15737_v5 = vld [vmem:[#allocation49_spill] sm:$0xff]  ;;  %v5786_v55 = vadd.f32 %v5785_v42, %v5784_v38  ;;  %v5789_v14 = vsel %vm28_vm0, %v5713_v3, 0.0  ;;  %v5645_v44 = vsel %vm28_vm0, %v13301_v41, 0.0  ;;  %v15745_v27 = vld [vmem:[#allocation48_spill] sm:$0xff] }
 0xc54   :  { %v5344_v29 = vadd.f32 %v15735_v45, %v5101_v9  ;;  %v5103_v17 = vadd.f32 %v15737_v5, %v15736_v19  ;;  %v5345_v50 = vadd.f32 %v15740_v39, %v5102_v36  ;;  %v5104_v42 = vadd.f32 %v15742_v61, %v15741_v37  ;;  %v15746_v5 = vld [vmem:[#allocation50_spill] sm:$0xff]  ;;  %v15748_v39 = vld [vmem:[#allocation9_spill] sm:$0xff] }
 0xc55   :  { %v13285_v2 = vpop.f32.mrf.mxu3  ;;  %v5640_v6 = vadd.f32 %v5639_v25, %v5638_v54  ;;  %v5715_v25 = vmul.f32 %v13310_v26, %v13310_v26  ;;  %v15738_v54 = vld [vmem:[#allocation44_spill] sm:$0xff]  ;;  %v5788_v3 = vadd.f32 %v5787_v49, %v5786_v55  ;;  %v5716_v38 = vmul.f32 %v13320_v43, %v13320_v43 }
 0xc56   :  { %v13346_v9 = vadd.f32 %v15738_v54, %v5344_v29  ;;  %v5647_v4 = vsel %vm28_vm0, %v13310_v26, 0.0  ;;  %v13359_v47 = vadd.f32 %v15743_v58, %v5345_v50  ;;  %v5346_v36 = vadd.f32 %v15745_v27, %v5103_v17  ;;  %v15749_v50 = vld [vmem:[#allocation55_spill] sm:$0xff]  ;;  %v15751_v58 = vld [vmem:[#allocation10_spill] sm:$0xff] }
 0xc57   :  { %v5642_v8 = vadd.f32 %v5641_v13, %v5640_v6  ;;  %v5791_v6 = vsel %vm28_vm0, %v5714_v60, 0.0  ;;  %v5790_v29 = vadd.f32 %v5789_v14, %v5788_v3  ;;  %v5793_v49 = vsel %vm28_vm0, %v5715_v25, 0.0  ;;  %v15750_v3 = vld [vmem:[#allocation53_spill] sm:$0xff]  ;;  %v15752_v27 = vld [vmem:[#allocation58_spill] sm:$0xff] }
 0xc58   :  { %v13305_v53 = vpop.f32.mrf.mxu1  ;;  %15739 = vst [vmem:[#allocation59_spill] sm:$0xff] %v13346_v9  ;;  %v5717_v60 = vmul.f32 %v13346_v9, %v13346_v9  ;;  %v13370_v55 = vadd.f32 %v15746_v5, %v5346_v36  ;;  %v5105_v17 = vadd.f32 %v15749_v50, %v15748_v39  ;;  %v5795_v14 = vsel %vm28_vm0, %v5716_v38, 0.0 }
 0xc59   :  { %v5644_v63 = vadd.f32 %v5643_v56, %v5642_v8  ;;  %15744 = vst [vmem:[#allocation60_spill] sm:$0xff] %v13359_v47  ;;  %v5649_v56 = vsel %vm28_vm0, %v13320_v43, 0.0  ;;  %v15747_v8 = vld [vmem:[#allocation51_spill] sm:$0xff]  ;;  %v5792_v37 = vadd.f32 %v5791_v6, %v5790_v29  ;;  %v5651_v25 = vsel %vm28_vm0, %v13346_v9, 0.0 }
 0xc5a   :  { %v5347_v54 = vadd.f32 %v15747_v8, %v5104_v42  ;;  %v5106_v36 = vadd.f32 %v15752_v27, %v15751_v58  ;;  %v15753_v8 = vld [vmem:[#allocation11_spill] sm:$0xff]  ;;  %v5797_v38 = vsel %vm28_vm0, %v5717_v60, 0.0  ;;  %v5653_v29 = vsel %vm28_vm0, %v13359_v47, 0.0  ;;  %v15757_v27 = vld [vmem:[#allocation57_spill] sm:$0xff] }
 0xc5b   :  { %v13351_v13 = vpop.f32.mrf.mxu2  ;;  %v5646_v19 = vadd.f32 %v5645_v44, %v5644_v63  ;;  %v5718_v44 = vmul.f32 %v13359_v47, %v13359_v47  ;;  %v5794_v42 = vadd.f32 %v5793_v49, %v5792_v37  ;;  %v5107_v6 = vadd.f32 %v13143_v18, %v15753_v8 }
 0xc5c   :  { %v13381_v63 = vadd.f32 %v15750_v3, %v5347_v54  ;;  %v15754_v54 = vld [vmem:[#allocation54_spill] sm:$0xff]  ;;  %v5349_v8 = vadd.f32 %v15757_v27, %v5106_v36 }
 0xc5d   :  { %v13341_v31 = vpop.f32.mrf.mxu3  ;;  %v5648_v61 = vadd.f32 %v5647_v4, %v5646_v19  ;;  %v5719_v19 = vmul.f32 %v13370_v55, %v13370_v55  ;;  %v5348_v39 = vadd.f32 %v15754_v54, %v5105_v17  ;;  %v5796_v3 = vadd.f32 %v5795_v14, %v5794_v42 }
 0xc5e   :  { %v5799_v18 = vsel %vm28_vm0, %v5718_v44, 0.0  ;;  %v5720_v60 = vmul.f32 %v13381_v63, %v13381_v63  ;;  %v5350_v54 = vadd.f32 %v13136_v34, %v5107_v6  ;;  %v5655_v14 = vsel %vm28_vm0, %v13370_v55, 0.0  ;;  %v15758_v44 = vld [vmem:[#allocation13_spill] sm:$0xff] }
 0xc5f   :  { %v5650_v5 = vadd.f32 %v5649_v56, %v5648_v61  ;;  %v15755_v56 = vld [vmem:[#allocation12_spill] sm:$0xff]  ;;  %v5798_v9 = vadd.f32 %v5797_v38, %v5796_v3  ;;  %v5109_v42 = vadd.f32 %v13195_v48, %v15758_v44  ;;  %v15759_v38 = vld [vmem:[#allocation14_spill] sm:$0xff]  ;;  %v5657_v6 = vsel %vm28_vm0, %v13381_v63, 0.0 }
 0xc60   :  { %v13362_v45 = vpop.f32.mrf.mxu1  ;;  %v5108_v37 = vadd.f32 %v13169_v30, %v15755_v56  ;;  %v15756_v61 = vld [vmem:[#allocation56_spill] sm:$0xff]  ;;  %v5801_v30 = vsel %vm28_vm0, %v5719_v19, 0.0  ;;  %v5110_v34 = vadd.f32 %v13221_v23, %v15759_v38 }
 0xc61   :  { %v5652_v49 = vadd.f32 %v5651_v25, %v5650_v5  ;;  %v13403_v58 = vadd.f32 %v15756_v61, %v5348_v39  ;;  %v13411_v25 = vadd.f32 %v13129_v10, %v5349_v8  ;;  %v5800_v5 = vadd.f32 %v5799_v18, %v5798_v9 }
 0xc62   :  { %v13416_v39 = vadd.f32 %v13155_v46, %v5350_v54  ;;  %v5351_v36 = vadd.f32 %v13162_v57, %v5108_v37  ;;  %v15760_v46 = vld [vmem:[#allocation15_spill] sm:$0xff]  ;;  %v5352_v56 = vadd.f32 %v13188_v7, %v5109_v42 }
 0xc63   :  { %v13395_v50 = vpop.f32.mrf.mxu2  ;;  %v5654_v17 = vadd.f32 %v5653_v29, %v5652_v49  ;;  %v5803_v29 = vsel %vm28_vm0, %v5720_v60, 0.0  ;;  %v5721_v10 = vmul.f32 %v13403_v58, %v13403_v58  ;;  %v5802_v3 = vadd.f32 %v5801_v30, %v5800_v5 }
 0xc64   :  { %v13427_v48 = vadd.f32 %v13181_v0, %v5351_v36  ;;  %v5111_v9 = vadd.f32 %v13258_v16, %v15760_v46  ;;  %v5659_v23 = vsel %vm28_vm0, %v13403_v58, 0.0  ;;  %v5722_v49 = vmul.f32 %v13411_v25, %v13411_v25 }
 0xc65   :  { %v13387_v4 = vpop.f32.mrf.mxu3  ;;  %v5656_v19 = vadd.f32 %v5655_v14, %v5654_v17  ;;  %v5804_v18 = vadd.f32 %v5803_v29, %v5802_v3  ;;  %v5723_v60 = vmul.f32 %v13416_v39, %v13416_v39  ;;  %v5353_v0 = vadd.f32 %v13214_v22, %v5110_v34  ;;  %v15761_v17 = vld [vmem:[#allocation16_spill] sm:$0xff] }
 0xc66   :  { %v5805_v27 = vsel %vm28_vm0, %v5721_v10, 0.0  ;;  %v5661_v16 = vsel %vm28_vm0, %v13411_v25, 0.0  ;;  %v13443_v8 = vadd.f32 %v13207_v15, %v5352_v56  ;;  %v5112_v54 = vadd.f32 %v13305_v53, %v15761_v17  ;;  %v15762_v15 = vld [vmem:[#allocation17_spill] sm:$0xff]  ;;  %v15763_v10 = vld [vmem:[#allocation18_spill] sm:$0xff] }
 0xc67   :  { %v5658_v37 = vadd.f32 %v5657_v6, %v5656_v19  ;;  %v5724_v30 = vmul.f32 %v13427_v48, %v13427_v48  ;;  %v13450_v44 = vadd.f32 %v13239_v11, %v5353_v0  ;;  %v5354_v22 = vadd.f32 %v13247_v20, %v5111_v9 }
 0xc68   :  { %v5057_v47 = vpop.f32.mrf.mxu1  ;;  %v5807_v42 = vsel %vm28_vm0, %v5722_v49, 0.0  ;;  %v5663_v5 = vsel %vm28_vm0, %v13416_v39, 0.0  ;;  %v5113_v36 = vadd.f32 %v13362_v45, %v15762_v15  ;;  %v5806_v38 = vadd.f32 %v5805_v27, %v5804_v18 }
 0xc69   :  { %v5660_v14 = vadd.f32 %v5659_v23, %v5658_v37  ;;  %v5809_v34 = vsel %vm28_vm0, %v5723_v60, 0.0  ;;  %v13460_v6 = vadd.f32 %v13285_v2, %v5354_v22  ;;  %v5665_v11 = vsel %vm28_vm0, %v13427_v48, 0.0  ;;  %v15764_v37 = vld [vmem:[#allocation19_spill] sm:$0xff] }
 0xc6a   :  { %v5725_v20 = vmul.f32 %v13443_v8, %v13443_v8  ;;  %v5355_v29 = vadd.f32 %v13292_v51, %v5112_v54  ;;  %v5114_v19 = vadd.f32 %v5057_v47, %v15763_v10  ;;  %v5808_v3 = vadd.f32 %v5807_v42, %v5806_v38 }
 0xc6b   :  { %v5303_v61 = vpop.f32.mrf.mxu2  ;;  %v5662_v53 = vadd.f32 %v5661_v16, %v5660_v14  ;;  %v5811_v45 = vsel %vm28_vm0, %v5724_v30, 0.0  ;;  %v5726_v9 = vmul.f32 %v13450_v44, %v13450_v44  ;;  %v5667_v2 = vsel %vm28_vm0, %v13443_v8, 0.0  ;;  %v15765_v30 = vld [vmem:[#allocation20_spill] sm:$0xff] }
 0xc6c   :  { %v13474_v49 = vadd.f32 %v13341_v31, %v5355_v29  ;;  %v5356_v56 = vadd.f32 %v13351_v13, %v5113_v36  ;;  %v5810_v18 = vadd.f32 %v5809_v34, %v5808_v3  ;;  %v5727_v60 = vmul.f32 %v13460_v6, %v13460_v6 }
 0xc6d   :  { %v5525_v57 = vpop.f32.mrf.mxu3  ;;  %v5664_v46 = vadd.f32 %v5663_v5, %v5662_v53  ;;  %v5813_v0 = vsel %vm28_vm0, %v5725_v20, 0.0  ;;  %v5669_v27 = vsel %vm28_vm0, %v13450_v44, 0.0  ;;  %v5357_v31 = vadd.f32 %v13395_v50, %v5114_v19 }
 0xc6e   :  { %v13484_v16 = vadd.f32 %v13387_v4, %v5356_v56  ;;  %v5812_v54 = vadd.f32 %v5811_v45, %v5810_v18  ;;  %v5671_v42 = vsel %vm28_vm0, %v13460_v6, 0.0  ;;  %v5728_v5 = vmul.f32 %v13474_v49, %v13474_v49 }
 0xc6f   :  { %v5666_v47 = vadd.f32 %v5665_v11, %v5664_v46  ;;  %v13493_v15 = vadd.f32 %v5525_v57, %v5357_v31  ;;  %v5817_v50 = vsel %vm28_vm0, %v5727_v60, 0.0  ;;  %v5673_v53 = vsel %vm28_vm0, %v13474_v49, 0.0 }
 0xc70   :  { %v5060_v7 = vpop.f32.mrf.mxu1  ;;  %v5814_v36 = vadd.f32 %v5813_v0, %v5812_v54  ;;  %v5729_v34 = vmul.f32 %v13484_v16, %v13484_v16  ;;  %v5819_v57 = vsel %vm28_vm0, %v5728_v5, 0.0 }
 0xc71   :  { %v5115_v51 = vadd.f32 %v5060_v7, %v15764_v37  ;;  %v5668_v13 = vadd.f32 %v5667_v2, %v5666_v47  ;;  %v5815_v7 = vsel %vm28_vm0, %v5726_v9, 0.0  ;;  %v5730_v3 = vmul.f32 %v13493_v15, %v13493_v15  ;;  %v15766_v47 = vld [vmem:[#allocation21_spill] sm:$0xff] }
 0xc72   :  { %v5816_v29 = vadd.f32 %v5815_v7, %v5814_v36  ;;  %v5821_v2 = vsel %vm28_vm0, %v5729_v34, 0.0 }
 0xc73   :  { %v5306_v14 = vpop.f32.mrf.mxu2  ;;  %v5358_v4 = vadd.f32 %v5303_v61, %v5115_v51  ;;  %v5670_v38 = vadd.f32 %v5669_v27, %v5668_v13  ;;  %v5675_v61 = vsel %vm28_vm0, %v13484_v16, 0.0  ;;  %v5823_v0 = vsel %vm28_vm0, %v5730_v3, 0.0 }
 0xc74   :  { %v5818_v45 = vadd.f32 %v5817_v50, %v5816_v29 }
 0xc75   :  { %v5528_v23 = vpop.f32.mrf.mxu3  ;;  %v5672_v10 = vadd.f32 %v5671_v42, %v5670_v38 }
 0xc76   :  { %v13500_v11 = vadd.f32 %v5528_v23, %v5358_v4  ;;  %v5677_v23 = vsel %vm28_vm0, %v13493_v15, 0.0  ;;  %v5820_v51 = vadd.f32 %v5819_v57, %v5818_v45  ;;  %v15767_v57 = vld [vmem:[#allocation158_spill] sm:$0xff] }
 0xc77   :  { %v5674_v9 = vadd.f32 %v5673_v53, %v5672_v10 }
 0xc78   :  { %v5063_v17 = vpop.f32.mrf.mxu1  ;;  %v5731_v56 = vmul.f32 %v13500_v11, %v13500_v11  ;;  %v5679_v27 = vsel %vm28_vm0, %v13500_v11, 0.0 }
 0xc79   :  { %v5116_v22 = vadd.f32 %v5063_v17, %v15765_v30  ;;  %v5676_v18 = vadd.f32 %v5675_v61, %v5674_v9  ;;  %v5822_v17 = vadd.f32 %v5821_v2, %v5820_v51 }
 0xc7a   :  { %v5825_v7 = vsel %vm28_vm0, %v5731_v56, 0.0 }
 0xc7b   :  { %v5359_v20 = vadd.f32 %v5306_v14, %v5116_v22  ;;  %v5678_v54 = vadd.f32 %v5677_v23, %v5676_v18  ;;  %v5309_v13 = vpop.f32.mrf.mxu2  ;;  %v5824_v22 = vadd.f32 %v5823_v0, %v5822_v17 }
 0xc7d   :  { %v5531_v19 = vpop.f32.mrf.mxu3  ;;  %v5680_v42 = vadd.f32 %v5679_v27, %v5678_v54  ;;  %v5826_v38 = vadd.f32 %v5825_v7, %v5824_v22  ;;  %v6064_v22 = vld [vmem:[#allocation3] sm:$0xff] }
 0xc7e   :  { %v13507_v46 = vadd.f32 %v5531_v19, %v5359_v20  ;;  %8562 = vmatmul.msk.f32.vlgmr.msrb.gmra.mxu2 %vm28_vm0, %v6064_v22  ;;  %v15774_v22 = vld [vmem:[#allocation28_spill] sm:$0xff] }
 0xc80   :  { %v5066_v37 = vpop.f32.mrf.mxu1  ;;  %v5732_v31 = vmul.f32 %v13507_v46, %v13507_v46  ;;  %v5681_v14 = vsel %vm28_vm0, %v13507_v46, 0.0 }
 0xc81   :  { %v5117_v60 = vadd.f32 %v5066_v37, %v15766_v47  ;;  %v5682_v50 = vadd.f32 %v5681_v14, %v5680_v42 }
 0xc82   :  { %v5827_v4 = vsel %vm28_vm0, %v5732_v31, 0.0 }
 0xc83   :  { %v5360_v30 = vadd.f32 %v5309_v13, %v5117_v60  ;;  %v5828_v20 = vadd.f32 %v5827_v4, %v5826_v38 }
 0xc85   :  { %v5534_v5 = vpop.f32.mrf.mxu3 }
 0xc86   :  { %v5585_v36 = vadd.f32 %v5534_v5, %v5360_v30 }
 0xc88   :  { %v5683_v53 = vsel %vm28_vm0, %v5585_v36, 0.0  ;;  %v5733_v34 = vmul.f32 %v5585_v36, %v5585_v36 }
 0xc89   :  { %v5684_v29 = vadd.f32 %v5683_v53, %v5682_v50  ;;  %v5586_v53 = vld [vmem:[%s14989_s3 + $0x1] sm:$0x1] }
 0xc8a   :  { %v5829_v10 = vsel %vm28_vm0, %v5733_v34, 0.0 }
 0xc8b   :  { %v5830_v19 = vadd.f32 %v5829_v10, %v5828_v20  ;;  %v5831_v61 = vmul.f32 %v15767_v57, %v5684_v29  ;;  %v6066_v20 = vld [vmem:[#allocation3 + $0x10] sm:$0xff] }
 0xc8c   :  { %8586 = vmatmul.msk.f32.vlgmr.msrb.gmra.mxu3 %vm28_vm0, %v6066_v20  ;;  %8563 = vmatmul.msk.f32.gmra.mxu2 %vm28_vm0, %v6066_v20 }
 0xc8d   :  { %v5832_v3 = vsel %vm28_vm0, %v5831_v61, 0.0  ;;  %v5840_v45 = vmul.f32 %v15767_v57, %v5830_v19  ;;  %v5587_v19 = vld [vmem:[%s14989_s3 + $0x5] sm:$0x1] }
 0xc8e   :  { %v5833_v9 = vrot.slane %v5832_v3, 4 }
 0xc8f   :  { %v5841_v2 = vsel %vm28_vm0, %v5840_v45, 0.0 }
 0xc90   :  { %v5834_v23 = vadd.f32 %v5833_v9, %v5832_v3  ;;  %v5842_v56 = vrot.slane %v5841_v2, 4 }
 0xc92   :  { %v5835_v37 = vrot.slane %v5834_v23, 2  ;;  %v5843_v51 = vadd.f32 %v5842_v56, %v5841_v2  ;;  %v8633_v56 = vld [vmem:[%s14988_s2 + $0x378] sm:$0xff] }
 0xc93   :  { %6694 = vmatpush.msra.mxu2 %v8633_v56  ;;  %v6067_v56 = vld [vmem:[#allocation3 + $0x18] sm:$0xff] }
 0xc94   :  { %v5836_v18 = vadd.f32 %v5835_v37, %v5834_v23  ;;  %v5844_v47 = vrot.slane %v5843_v51, 2 }
 0xc96   :  { %v5837_v60 = vrot.slane %v5836_v18, 1  ;;  %v5845_v0 = vadd.f32 %v5844_v47, %v5843_v51  ;;  %v6065_v51 = vld [vmem:[#allocation3 + $0x8] sm:$0xff] }
 0xc97   :  { %8546 = vmatmul.msk.f32.vlgmr.msrb.gmra.mxu1 %vm28_vm0, %v6065_v51 }
 0xc98   :  { %v5838_v27 = vadd.f32 %v5837_v60, %v5836_v18  ;;  %v5846_v31 = vrot.slane %v5845_v0, 1  ;;  %v15768_v18 = vld [vmem:[#allocation22_spill] sm:$0xff]  ;;  %v15769_v60 = vld [vmem:[#allocation23_spill] sm:$0xff] }
 0xc9a   :  { %v5839_v17 = vmul.f32 0.010204081, %v5838_v27  ;;  %v5847_v54 = vadd.f32 %v5846_v31, %v5845_v0  ;;  %v15770_v0 = vld [vmem:[#allocation24_spill] sm:$0xff]  ;;  %v15771_v31 = vld [vmem:[#allocation25_spill] sm:$0xff] }
 0xc9c   :  { %v5848_v13 = vmul.f32 0.010204081, %v5847_v54  ;;  %v5849_v7 = vmul.f32 %v5839_v17, %v5839_v17  ;;  %v15772_v54 = vld [vmem:[#allocation26_spill] sm:$0xff] }
 0xc9e   :  { %v5850_v14 = vsub.f32 %v5848_v13, %v5849_v7  ;;  %v15773_v7 = vld [vmem:[#allocation27_spill] sm:$0xff] }
 0xc9f   :  { %8547 = vmatmul.msk.f32.gmra.mxu1 %vm28_vm0, %v6067_v56 }
 0xca0   :  { %v5851_v30 = vadd.f32 0.001, %v5850_v14 }
 0xca2   :  { %8886 = vrsqrt.f32 %v5851_v30  ;;  %vm5858_vm6 = vweird.f32 %v5851_v30 }
 0xca8   :  { %v8887_v42 = vpop.eup %8886 }
 0xca9   :  { %v5853_v5 = vmul.f32 %v8887_v42, %v5851_v30  ;;  %vm5859_vm5 = vweird.f32 %v8887_v42 }
 0xcaa   :  { %vm5860_vm7 = vmor %vm5858_vm6, %vm5859_vm5 }
 0xcab   :  { %v5854_v4 = vmul.f32 %v8887_v42, %v5853_v5 }
 0xcad   :  { %v5855_v38 = vmul.f32 0.5, %v5854_v4 }
 0xcaf   :  { %v5856_v50 = vsub.f32 1.5, %v5855_v38 }
 0xcb1   :  { %v5857_v34 = vmul.f32 %v8887_v42, %v5856_v50 }
 0xcb3   :  { %v5861_v29 = vsel %vm5860_vm7, %v8887_v42, %v5857_v34 }
 0xcb4   :  { %v5862_v10 = vmul.f32 %v5861_v29, %v5586_v53 }
 0xcb6   :  { %v5863_v61 = vmul.f32 %v5862_v10, %v5839_v17  ;;  %v13539_v3 = vperm.slane %v5862_v10, 0 }
 0xcb8   :  { %v5864_v45 = vsub.f32 %v5587_v19, %v5863_v61  ;;  %v5914_v9 = vmul.f32 %v13539_v3, %v5585_v36  ;;  %v5866_v47 = vmul.f32 %v13539_v3, %v15768_v18  ;;  %v5867_v36 = vmul.f32 %v13539_v3, %v15769_v60  ;;  %v6068_v61 = vld [vmem:[#allocation3 + $0x20] sm:$0xff]  ;;  %v15776_v60 = vld [vmem:[#allocation30_spill] sm:$0xff] }
 0xcb9   :  { %v5868_v27 = vmul.f32 %v13539_v3, %v15770_v0  ;;  %v5869_v17 = vmul.f32 %v13539_v3, %v15771_v31  ;;  %v5870_v13 = vmul.f32 %v13539_v3, %v15772_v54  ;;  %v5871_v14 = vmul.f32 %v13539_v3, %v15773_v7  ;;  %8587 = vmatmul.msk.f32.gmra.mxu3 %vm28_vm0, %v6068_v61  ;;  %v15777_v31 = vld [vmem:[#allocation31_spill] sm:$0xff] }
 0xcba   :  { %v13542_v2 = vperm.slane %v5864_v45, 0  ;;  %v5872_v30 = vmul.f32 %v13539_v3, %v12841_v32  ;;  %v5873_v42 = vmul.f32 %v13539_v3, %v15774_v22  ;;  %v5910_v50 = vmul.f32 %v13539_v3, %v13484_v16  ;;  %8564 = vmatmul.msk.f32.gmra.mxu2 %vm28_vm0, %v6068_v61  ;;  %v15778_v22 = vld [vmem:[#allocation32_spill] sm:$0xff] }
 0xcbb   :  { %v5911_v53 = vmul.f32 %v13539_v3, %v13493_v15  ;;  %v5912_v34 = vmul.f32 %v13539_v3, %v13500_v11  ;;  %v5874_v20 = vmul.f32 %v13539_v3, %v12853_v1  ;;  %v5913_v29 = vmul.f32 %v13539_v3, %v13507_v46 }
 0xcbc   :  { %v5964_v23 = vadd.f32 %v13542_v2, %v5914_v9  ;;  %v5916_v5 = vadd.f32 %v13542_v2, %v5866_v47  ;;  %v5917_v4 = vadd.f32 %v13542_v2, %v5867_v36  ;;  %v5918_v38 = vadd.f32 %v13542_v2, %v5868_v27 }
 0xcbd   :  { %v5919_v32 = vadd.f32 %v13542_v2, %v5869_v17  ;;  %v5920_v10 = vadd.f32 %v13542_v2, %v5870_v13  ;;  %v5921_v19 = vadd.f32 %v13542_v2, %v5871_v14  ;;  %v5922_v16 = vadd.f32 %v13542_v2, %v5872_v30 }
 0xcbe   :  { %v6013_v37 = vmax.f32 %v5964_v23, 0.0  ;;  %v13584_v15 = vadd.f32 %v13542_v2, %v5910_v50  ;;  %v13587_v11 = vadd.f32 %v13542_v2, %v5911_v53  ;;  %v13590_v45 = vadd.f32 %v13542_v2, %v5912_v34 }
 0xcbf   :  { %v13594_v1 = vadd.f32 %v13542_v2, %v5913_v29  ;;  %v5965_v46 = vmax.f32 %v5916_v5, 0.0  ;;  %v5966_v9 = vmax.f32 %v5917_v4, 0.0  ;;  %v5967_v23 = vmax.f32 %v5918_v38, 0.0  ;;  %v15779_v38 = vld [vmem:[#allocation33_spill] sm:$0xff] }
 0xcc0   :  { %6063 = vst.msk [vmem:[#allocation3 + $0x268] sm:$0xff] %vm28_vm0, %v6013_v37  ;;  %v15775_v37 = vld [vmem:[#allocation29_spill] sm:$0xff]  ;;  %v5923_v18 = vadd.f32 %v13542_v2, %v5873_v42  ;;  %v5968_v47 = vmax.f32 %v5919_v32, 0.0  ;;  %v5876_v36 = vmul.f32 %v13539_v3, %v15776_v60  ;;  %v5924_v0 = vadd.f32 %v13542_v2, %v5874_v20  ;;  %v15780_v32 = vld [vmem:[#allocation34_spill] sm:$0xff] }
 0xcc1   :  { %v5875_v51 = vmul.f32 %v13539_v3, %v15775_v37  ;;  %v5969_v27 = vmax.f32 %v5920_v10, 0.0  ;;  %6015 = vst.msk [vmem:[#allocation3 + $0x58] sm:$0xff] %vm28_vm0, %v5965_v46  ;;  %v5877_v17 = vmul.f32 %v13539_v3, %v15777_v31  ;;  %v5970_v13 = vmax.f32 %v5921_v19, 0.0  ;;  %v6069_v46 = vld [vmem:[#allocation3 + $0x28] sm:$0xff]  ;;  %v15783_v60 = vld [vmem:[#allocation37_spill] sm:$0xff] }
 0xcc2   :  { %6016 = vst.msk [vmem:[#allocation3 + $0x60] sm:$0xff] %vm28_vm0, %v5966_v9  ;;  %v5878_v7 = vmul.f32 %v13539_v3, %v12886_v35  ;;  %v5926_v14 = vadd.f32 %v13542_v2, %v5876_v36  ;;  %v5971_v30 = vmax.f32 %v5922_v16, 0.0  ;;  %v5879_v42 = vmul.f32 %v13539_v3, %v15778_v22  ;;  %v6070_v35 = vld [vmem:[#allocation3 + $0x30] sm:$0xff]  ;;  %8548 = vmatmul.msk.f32.gmra.mxu1 %vm28_vm0, %v6069_v46  ;;  %v15784_v31 = vld [vmem:[#allocation38_spill] sm:$0xff] }
 0xcc3   :  { %v5925_v54 = vadd.f32 %v13542_v2, %v5875_v51  ;;  %6017 = vst.msk [vmem:[#allocation3 + $0x68] sm:$0xff] %vm28_vm0, %v5967_v23  ;;  %v5927_v5 = vadd.f32 %v13542_v2, %v5877_v17  ;;  %v5972_v4 = vmax.f32 %v5923_v18, 0.0  ;;  %v5880_v50 = vmul.f32 %v13539_v3, %v15779_v38  ;;  %8588 = vmatmul.msk.f32.gmra.mxu3 %vm28_vm0, %v6070_v35  ;;  %v15781_v9 = vld [vmem:[#allocation35_spill] sm:$0xff]  ;;  %v15782_v51 = vld [vmem:[#allocation36_spill] sm:$0xff] }
 0xcc4   :  { %6018 = vst.msk [vmem:[#allocation3 + $0x70] sm:$0xff] %vm28_vm0, %v5968_v47  ;;  %v5928_v53 = vadd.f32 %v13542_v2, %v5878_v7  ;;  %v5973_v34 = vmax.f32 %v5924_v0, 0.0  ;;  %v5881_v20 = vmul.f32 %v13539_v3, %v15780_v32  ;;  %v5929_v29 = vadd.f32 %v13542_v2, %v5879_v42  ;;  %8565 = vmatmul.msk.f32.gmra.mxu2 %vm28_vm0, %v6070_v35  ;;  %v6071_v35 = vld [vmem:[#allocation3 + $0x38] sm:$0xff]  ;;  %v13667_v32 = vld [vmem:[#allocation3 + $0xa0] sm:$0xff]  ;;  %v8632_v46 = vld [vmem:[%s14988_s2 + $0x370] sm:$0xff] }
 0xcc5   :  { %6019 = vst.msk [vmem:[#allocation3 + $0x78] sm:$0xff] %vm28_vm0, %v5969_v27  ;;  %v5974_v10 = vmax.f32 %v5925_v54, 0.0  ;;  %v5882_v19 = vmul.f32 %v13539_v3, %v12910_v28  ;;  %v5930_v61 = vadd.f32 %v13542_v2, %v5880_v50  ;;  %v5975_v16 = vmax.f32 %v5926_v14, 0.0  ;;  %6695 = vmatpush.msra.mxu2 %v8632_v46 }
 0xcc6   :  { %6020 = vst.msk [vmem:[#allocation3 + $0x80] sm:$0xff] %vm28_vm0, %v5970_v13  ;;  %v5883_v23 = vmul.f32 %v13539_v3, %v15781_v9  ;;  %v5931_v56 = vadd.f32 %v13542_v2, %v5881_v20  ;;  %v5976_v37 = vmax.f32 %v5927_v5, 0.0  ;;  %v5884_v28 = vmul.f32 %v13539_v3, %v15782_v51  ;;  %v8656_v9 = vld [vmem:[%s14988_s2 + $0x3b0] sm:$0xff]  ;;  %v8631_v51 = vld [vmem:[%s14988_s2 + $0x368] sm:$0xff] }
 0xcc7   :  { %6021 = vst.msk [vmem:[#allocation3 + $0x88] sm:$0xff] %vm28_vm0, %v5971_v30  ;;  %v5932_v18 = vadd.f32 %v13542_v2, %v5882_v19  ;;  %v5977_v47 = vmax.f32 %v5928_v53, 0.0  ;;  %v5885_v36 = vmul.f32 %v13539_v3, %v15783_v60  ;;  %v5978_v27 = vmax.f32 %v5929_v29, 0.0  ;;  %v8609_v19 = vld [vmem:[%s14988_s2 + $0x338] sm:$0xff]  ;;  %v8655_v60 = vld [vmem:[%s14988_s2 + $0x3a8] sm:$0xff]  ;;  %6696 = vmatpush.msra.mxu2 %v8631_v51 }
 0xcc8   :  { %6022 = vst.msk [vmem:[#allocation3 + $0xa8] sm:$0xff] %vm28_vm0, %v5972_v4  ;;  %v5933_v0 = vadd.f32 %v13542_v2, %v5883_v23  ;;  %v5886_v17 = vmul.f32 %v13539_v3, %v15784_v31  ;;  %v5934_v54 = vadd.f32 %v13542_v2, %v5884_v28  ;;  %v5979_v13 = vmax.f32 %v5930_v61, 0.0  ;;  %v6072_v4 = vld [vmem:[#allocation3 + $0x40] sm:$0xff]  ;;  %6556 = vmatpush.msra.mxu1 %v8609_v19 }
 0xcc9   :  { %6023 = vst.msk [vmem:[#allocation3 + $0xb0] sm:$0xff] %vm28_vm0, %v5973_v34  ;;  %v5887_v7 = vmul.f32 %v13539_v3, %v12949_v62  ;;  %v5935_v14 = vadd.f32 %v13542_v2, %v5885_v36  ;;  %v5980_v30 = vmax.f32 %v5931_v56, 0.0  ;;  %v5888_v22 = vmul.f32 %v13539_v3, %v12955_v33  ;;  %v8607_v36 = vld [vmem:[%s14988_s2 + $0x328] sm:$0xff]  ;;  %v8630_v31 = vld [vmem:[%s14988_s2 + $0x360] sm:$0xff] }
 0xcca   :  { %6024 = vst.msk [vmem:[#allocation3 + $0xb8] sm:$0xff] %vm28_vm0, %v5974_v10  ;;  %v5936_v42 = vadd.f32 %v13542_v2, %v5886_v17  ;;  %v5981_v5 = vmax.f32 %v5932_v18, 0.0  ;;  %v5889_v38 = vmul.f32 %v13539_v3, %v12961_v21  ;;  %v5982_v62 = vmax.f32 %v5933_v0, 0.0  ;;  %v8784_v10 = vld [vmem:[%s14988_s2 + $0x550] sm:$0xff]  ;;  %8549 = vmatmul.msk.f32.gmra.mxu1 %vm28_vm0, %v6071_v35  ;;  %6697 = vmatpush.msra.mxu2 %v8630_v31  ;;  %v8605_v35 = vld [vmem:[%s14988_s2 + $0x318] sm:$0xff] }
 0xccb   :  { %6025 = vst.msk [vmem:[#allocation3 + $0xc0] sm:$0xff] %vm28_vm0, %v5975_v16  ;;  %v5937_v50 = vadd.f32 %v13542_v2, %v5887_v7  ;;  %8589 = vmatmul.msk.f32.gmra.mxu3 %vm28_vm0, %v6072_v4  ;;  %v5890_v53 = vmul.f32 %v13539_v3, %v12978_v52  ;;  %v13664_v33 = vadd.f32 %v13542_v2, %v5888_v22  ;;  %v5983_v34 = vmax.f32 %v5934_v54, 0.0  ;;  %v8657_v52 = vld [vmem:[%s14988_s2 + $0x3b8] sm:$0xff]  ;;  %v8654_v7 = vld [vmem:[%s14988_s2 + $0x3a0] sm:$0xff] }
 0xccc   :  { %6026 = vst.msk [vmem:[#allocation3 + $0xc8] sm:$0xff] %vm28_vm0, %v5976_v37  ;;  %v5891_v21 = vmul.f32 %v13539_v3, %v13255_v59  ;;  %v13672_v20 = vadd.f32 %v13542_v2, %v5889_v38  ;;  %v5984_v29 = vmax.f32 %v5935_v14, 0.0  ;;  %8566 = vmatmul.msk.f32.gmra.mxu2 %vm28_vm0, %v13667_v32  ;;  %v5892_v59 = vmul.f32 %v13539_v3, %v13265_v12  ;;  %v8608_v12 = vld [vmem:[%s14988_s2 + $0x330] sm:$0xff] }
 0xccd   :  { %6027 = vst.msk [vmem:[#allocation3 + $0xd0] sm:$0xff] %vm28_vm0, %v5977_v47  ;;  %v13690_v61 = vadd.f32 %v13542_v2, %v5890_v53  ;;  %v5985_v16 = vmax.f32 %v5936_v42, 0.0  ;;  %6796 = vmatpush.msra.mxu3 %v8657_v52  ;;  %7554 = vmatpush.msrb.mxu0 %v8784_v10  ;;  %v5893_v23 = vmul.f32 %v13539_v3, %v13270_v24  ;;  %v5986_v37 = vmax.f32 %v5937_v50, 0.0  ;;  %v15785_v42 = vld [vmem:[#allocation59_spill] sm:$0xff]  ;;  %v15786_v50 = vld [vmem:[#allocation60_spill] sm:$0xff] }
 0xcce   :  { %6028 = vst.msk [vmem:[#allocation3 + $0xd8] sm:$0xff] %vm28_vm0, %v5978_v27  ;;  %v5941_v56 = vadd.f32 %v13542_v2, %v5891_v21  ;;  %v5894_v28 = vmul.f32 %v13539_v3, %v13281_v40  ;;  %v5942_v18 = vadd.f32 %v13542_v2, %v5892_v59  ;;  %v5987_v47 = vmax.f32 %v13664_v33, 0.0  ;;  %6557 = vmatpush.msra.mxu1 %v8608_v12 }
 0xccf   :  { %6029 = vst.msk [vmem:[#allocation3 + $0xf8] sm:$0xff] %vm28_vm0, %v5979_v13  ;;  %6797 = vmatpush.msra.mxu3 %v8656_v9  ;;  %v5895_v40 = vmul.f32 %v13539_v3, %v13301_v41  ;;  %v5943_v0 = vadd.f32 %v13542_v2, %v5893_v23  ;;  %v5988_v27 = vmax.f32 %v13672_v20, 0.0  ;;  %v5896_v17 = vmul.f32 %v13539_v3, %v13310_v26  ;;  %v13735_v41 = vld [vmem:[#allocation3 + $0xa8] sm:$0xff]  ;;  %v8606_v26 = vld [vmem:[%s14988_s2 + $0x320] sm:$0xff] }
 0xcd0   :  { %6030 = vst.msk [vmem:[#allocation3 + $0x100] sm:$0xff] %vm28_vm0, %v5980_v30  ;;  %v13714_v24 = vld [vmem:[#allocation3 + $0xb0] sm:$0xff]  ;;  %v5944_v54 = vadd.f32 %v13542_v2, %v5894_v28  ;;  %v5989_v13 = vmax.f32 %v13690_v61, 0.0  ;;  %v5897_v14 = vmul.f32 %v13539_v3, %v13320_v43  ;;  %v5990_v22 = vmax.f32 %v5941_v56, 0.0  ;;  %6558 = vmatpush.msra.mxu1 %v8607_v36  ;;  %v8629_v43 = vld [vmem:[%s14988_s2 + $0x358] sm:$0xff] }
 0xcd1   :  { %6031 = vst.msk [vmem:[#allocation3 + $0x108] sm:$0xff] %vm28_vm0, %v5981_v5  ;;  %6798 = vmatpush.msra.mxu3 %v8655_v60  ;;  %v5945_v30 = vadd.f32 %v13542_v2, %v5895_v40  ;;  %v5898_v5 = vmul.f32 %v13539_v3, %v15785_v42  ;;  %v5946_v4 = vadd.f32 %v13542_v2, %v5896_v17  ;;  %v5991_v38 = vmax.f32 %v5942_v18, 0.0  ;;  %v13802_v18 = vld [vmem:[#allocation3 + $0xb8] sm:$0xff] }
 0xcd2   :  { %6032 = vst.msk [vmem:[#allocation3 + $0x110] sm:$0xff] %vm28_vm0, %v5982_v62  ;;  %v5899_v62 = vmul.f32 %v13539_v3, %v15786_v50  ;;  %v5947_v53 = vadd.f32 %v13542_v2, %v5897_v14  ;;  %v5992_v33 = vmax.f32 %v5943_v0, 0.0  ;;  %8550 = vmatmul.msk.f32.gmra.mxu1 %vm28_vm0, %v13735_v41  ;;  %v5900_v21 = vmul.f32 %v13539_v3, %v13370_v55  ;;  %v13790_v23 = vld [vmem:[#allocation3 + $0xc0] sm:$0xff] }
 0xcd3   :  { %6033 = vst.msk [vmem:[#allocation3 + $0x118] sm:$0xff] %vm28_vm0, %v5983_v34  ;;  %8590 = vmatmul.msk.f32.gmra.mxu3 %vm28_vm0, %v13714_v24  ;;  %v8653_v34 = vld [vmem:[%s14988_s2 + $0x398] sm:$0xff]  ;;  %v5948_v20 = vadd.f32 %v13542_v2, %v5898_v5  ;;  %6559 = vmatpush.msra.mxu1 %v8606_v26  ;;  %v5901_v52 = vmul.f32 %v13539_v3, %v13381_v63  ;;  %v5994_v19 = vmax.f32 %v5945_v30, 0.0  ;;  %v5995_v61 = vmax.f32 %v5946_v4, 0.0  ;;  %v13834_v30 = vld [vmem:[#allocation3 + $0xc8] sm:$0xff]  ;;  %v8604_v26 = vld [vmem:[%s14988_s2 + $0x310] sm:$0xff] }
 0xcd4   :  { %6034 = vst.msk [vmem:[#allocation3 + $0x120] sm:$0xff] %vm28_vm0, %v5984_v29  ;;  %6799 = vmatpush.msra.mxu3 %v8654_v7  ;;  %8567 = vmatmul.msk.f32.gmra.mxu2 %vm28_vm0, %v13714_v24  ;;  %v5993_v29 = vmax.f32 %v5944_v54, 0.0  ;;  %v5949_v10 = vadd.f32 %v13542_v2, %v5899_v62  ;;  %v5902_v59 = vmul.f32 %v13539_v3, %v13403_v58  ;;  %v5996_v46 = vmax.f32 %v5947_v53, 0.0  ;;  %v13828_v14 = vld [vmem:[#allocation3 + $0xd0] sm:$0xff]  ;;  %v8651_v62 = vld [vmem:[%s14988_s2 + $0x388] sm:$0xff] }
 0xcd5   :  { %6035 = vst.msk [vmem:[#allocation3 + $0x128] sm:$0xff] %vm28_vm0, %v5985_v16  ;;  %6698 = vmatpush.msra.mxu2 %v8629_v43  ;;  %v5950_v55 = vadd.f32 %v13542_v2, %v5900_v21  ;;  %6560 = vmatpush.msra.mxu1 %v8605_v35  ;;  %v5903_v16 = vmul.f32 %v13539_v3, %v13411_v25  ;;  %v5997_v58 = vmax.f32 %v5948_v20, 0.0  ;;  %v6009_v42 = vmax.f32 %v13584_v15, 0.0  ;;  %v13858_v15 = vld [vmem:[#allocation3 + $0x140] sm:$0xff]  ;;  %v8603_v53 = vld [vmem:[%s14988_s2 + $0x308] sm:$0xff] }
 0xcd6   :  { %6036 = vst.msk [vmem:[#allocation3 + $0x148] sm:$0xff] %vm28_vm0, %v5986_v37  ;;  %6800 = vmatpush.msra.mxu3 %v8653_v34  ;;  %v5951_v63 = vadd.f32 %v13542_v2, %v5901_v52  ;;  %v5904_v9 = vmul.f32 %v13539_v3, %v13416_v39  ;;  %v5952_v12 = vadd.f32 %v13542_v2, %v5902_v59  ;;  %v5998_v37 = vmax.f32 %v5949_v10, 0.0  ;;  %v8626_v35 = vld [vmem:[%s14988_s2 + $0x340] sm:$0xff] }
 0xcd7   :  { %6037 = vst.msk [vmem:[#allocation3 + $0x150] sm:$0xff] %vm28_vm0, %v5987_v47  ;;  %v5905_v56 = vmul.f32 %v13539_v3, %v13427_v48  ;;  %v5953_v25 = vadd.f32 %v13542_v2, %v5903_v16  ;;  %v5906_v39 = vmul.f32 %v13539_v3, %v13443_v8  ;;  %v5999_v28 = vmax.f32 %v5950_v55, 0.0  ;;  %v8628_v8 = vld [vmem:[%s14988_s2 + $0x350] sm:$0xff]  ;;  %6561 = vmatpush.msra.mxu1 %v8604_v26  ;;  %v8602_v52 = vld [vmem:[%s14988_s2 + $0x300] sm:$0xff] }
 0xcd8   :  { %6038 = vst.msk [vmem:[#allocation3 + $0x158] sm:$0xff] %vm28_vm0, %v5988_v27  ;;  %v5954_v51 = vadd.f32 %v13542_v2, %v5904_v9  ;;  %v5907_v48 = vmul.f32 %v13539_v3, %v13450_v44  ;;  %v6000_v60 = vmax.f32 %v5951_v63, 0.0  ;;  %v5908_v36 = vmul.f32 %v13539_v3, %v13460_v6  ;;  %6699 = vmatpush.msra.mxu2 %v8628_v8  ;;  %v13919_v10 = vld [vmem:[#allocation3 + $0x180] sm:$0xff]  ;;  %v8729_v63 = vld [vmem:[%s14988_s2 + $0x478] sm:$0xff]  ;;  %v6073_v8 = vld [vmem:[#allocation3 + $0x50] sm:$0xff] }
 0xcd9   :  { %6039 = vst.msk [vmem:[#allocation3 + $0x160] sm:$0xff] %vm28_vm0, %v5989_v13  ;;  %v5955_v47 = vadd.f32 %v13542_v2, %v5905_v56  ;;  %v5956_v44 = vadd.f32 %v13542_v2, %v5906_v39  ;;  %v6001_v40 = vmax.f32 %v5952_v12, 0.0  ;;  %v5909_v0 = vmul.f32 %v13539_v3, %v13474_v49  ;;  %6562 = vmatpush.msra.mxu1 %v8603_v53  ;;  %v8704_v56 = vld [vmem:[%s14988_s2 + $0x430] sm:$0xff]  ;;  %v6079_v26 = vld [vmem:[#allocation3 + $0x80] sm:$0xff] }
 0xcda   :  { %6040 = vst.msk [vmem:[#allocation3 + $0x168] sm:$0xff] %vm28_vm0, %v5990_v22  ;;  %8551 = vmatmul.msk.f32.gmra.mxu1 %vm28_vm0, %v13802_v18  ;;  %v5957_v27 = vadd.f32 %v13542_v2, %v5907_v48  ;;  %v6002_v31 = vmax.f32 %v5953_v25, 0.0  ;;  %v5958_v17 = vadd.f32 %v13542_v2, %v5908_v36  ;;  %v6003_v54 = vmax.f32 %v5954_v51, 0.0  ;;  %v8652_v22 = vld [vmem:[%s14988_s2 + $0x390] sm:$0xff]  ;;  %v13979_v51 = vld [vmem:[#allocation3 + $0x220] sm:$0xff] }
 0xcdb   :  { %6041 = vst.msk [vmem:[#allocation3 + $0x170] sm:$0xff] %vm28_vm0, %v5991_v38  ;;  %8591 = vmatmul.msk.f32.gmra.mxu3 %vm28_vm0, %v13790_v23  ;;  %v5959_v6 = vadd.f32 %v13542_v2, %v5909_v0  ;;  %v6004_v13 = vmax.f32 %v5955_v47, 0.0  ;;  %v6005_v7 = vmax.f32 %v5956_v44, 0.0  ;;  %v6010_v5 = vmax.f32 %v13587_v11, 0.0  ;;  %v13853_v38 = vld [vmem:[#allocation3 + $0xe0] sm:$0xff]  ;;  %v13864_v11 = vld [vmem:[#allocation3 + $0xd8] sm:$0xff]  ;;  %6563 = vmatpush.msra.mxu1 %v8602_v52 }
 0xcdc   :  { %6042 = vst.msk [vmem:[#allocation3 + $0x178] sm:$0xff] %vm28_vm0, %v5992_v33  ;;  %8568 = vmatmul.msk.f32.gmra.mxu2 %vm28_vm0, %v13790_v23  ;;  %v6006_v49 = vmax.f32 %v5957_v27, 0.0  ;;  %v6007_v3 = vmax.f32 %v5958_v17, 0.0  ;;  %6801 = vmatpush.msra.mxu3 %v8652_v22  ;;  %v6011_v4 = vmax.f32 %v13590_v45, 0.0  ;;  %v6012_v43 = vmax.f32 %v13594_v1, 0.0  ;;  %v8627_v45 = vld [vmem:[%s14988_s2 + $0x348] sm:$0xff] }
 0xcdd   :  { %6043 = vst.msk [vmem:[#allocation3 + $0x198] sm:$0xff] %vm28_vm0, %v5993_v29  ;;  %v6008_v2 = vmax.f32 %v5959_v6, 0.0  ;;  %6700 = vmatpush.msra.mxu2 %v8627_v45  ;;  %v13878_v50 = vld [vmem:[#allocation3 + $0x148] sm:$0xff]  ;;  %v8650_v29 = vld [vmem:[%s14988_s2 + $0x380] sm:$0xff]  ;;  %v8680_v39 = vld [vmem:[%s14988_s2 + $0x3f0] sm:$0xff] }
 0xcde   :  { %6044 = vst.msk [vmem:[#allocation3 + $0x1a0] sm:$0xff] %vm28_vm0, %v5994_v19  ;;  %v13874_v1 = vld [vmem:[#allocation3 + $0x150] sm:$0xff]  ;;  %6802 = vmatpush.msra.mxu3 %v8651_v62  ;;  %v13921_v19 = vld [vmem:[#allocation3 + $0x1e0] sm:$0xff]  ;;  %v6074_v47 = vld [vmem:[#allocation3 + $0x58] sm:$0xff] }
 0xcdf   :  { %6045 = vst.msk [vmem:[#allocation3 + $0x1a8] sm:$0xff] %vm28_vm0, %v5995_v61  ;;  %v13894_v34 = vld [vmem:[#allocation3 + $0x158] sm:$0xff]  ;;  %6701 = vmatpush.msra.mxu2 %v8626_v35  ;;  %v6075_v36 = vld [vmem:[#allocation3 + $0x60] sm:$0xff]  ;;  %v8703_v44 = vld [vmem:[%s14988_s2 + $0x428] sm:$0xff] }
 0xce0   :  { %6046 = vst.msk [vmem:[#allocation3 + $0x1b0] sm:$0xff] %vm28_vm0, %v5996_v46  ;;  %v13890_v33 = vld [vmem:[#allocation3 + $0x160] sm:$0xff]  ;;  %6803 = vmatpush.msra.mxu3 %v8650_v29  ;;  %v8705_v61 = vld [vmem:[%s14988_s2 + $0x438] sm:$0xff]  ;;  %v8679_v17 = vld [vmem:[%s14988_s2 + $0x3e8] sm:$0xff] }
 0xce1   :  { %6047 = vst.msk [vmem:[#allocation3 + $0x1b8] sm:$0xff] %vm28_vm0, %v5997_v58  ;;  %v13907_v20 = vld [vmem:[#allocation3 + $0x168] sm:$0xff]  ;;  %7000 = vmatpush.msrb.mxu2 %v8705_v61  ;;  %v8681_v46 = vld [vmem:[%s14988_s2 + $0x3f8] sm:$0xff]  ;;  %v6077_v6 = vld [vmem:[#allocation3 + $0x70] sm:$0xff] }
 0xce2   :  { %6048 = vst.msk [vmem:[#allocation3 + $0x1c0] sm:$0xff] %vm28_vm0, %v5998_v37  ;;  %8552 = vmatmul.msk.f32.gmra.mxu1 %vm28_vm0, %v13834_v30  ;;  %v13903_v21 = vld [vmem:[#allocation3 + $0x170] sm:$0xff]  ;;  %7093 = vmatpush.msrb.mxu3 %v8729_v63  ;;  %v8678_v45 = vld [vmem:[%s14988_s2 + $0x3e0] sm:$0xff]  ;;  %v6092_v63 = vld [vmem:[#allocation3 + $0xf8] sm:$0xff] }
 0xce3   :  { %6049 = vst.msk [vmem:[#allocation3 + $0x1c8] sm:$0xff] %vm28_vm0, %v5999_v28  ;;  %8592 = vmatmul.msk.f32.gmra.mxu3 %vm28_vm0, %v13828_v14  ;;  %v13925_v59 = vld [vmem:[#allocation3 + $0x178] sm:$0xff]  ;;  %6898 = vmatpush.msrb.mxu1 %v8681_v46  ;;  %v8728_v37 = vld [vmem:[%s14988_s2 + $0x470] sm:$0xff] }
 0xce4   :  { %6050 = vst.msk [vmem:[#allocation3 + $0x1e8] sm:$0xff] %vm28_vm0, %v6000_v60  ;;  %8569 = vmatmul.msk.f32.gmra.mxu2 %vm28_vm0, %v13828_v14  ;;  %7094 = vmatpush.msrb.mxu3 %v8728_v37  ;;  %v6081_v29 = vld [vmem:[#allocation3 + $0x90] sm:$0xff] }
 0xce5   :  { %6051 = vst.msk [vmem:[#allocation3 + $0x1f0] sm:$0xff] %vm28_vm0, %v6001_v40  ;;  %7001 = vmatpush.msrb.mxu2 %v8704_v56  ;;  %6899 = vmatpush.msrb.mxu1 %v8680_v39  ;;  %v6076_v40 = vld [vmem:[#allocation3 + $0x68] sm:$0xff] }
 0xce6   :  { %6052 = vst.msk [vmem:[#allocation3 + $0x1f8] sm:$0xff] %vm28_vm0, %v6002_v31  ;;  %v8727_v31 = vld [vmem:[%s14988_s2 + $0x468] sm:$0xff] }
 0xce7   :  { %6053 = vst.msk [vmem:[#allocation3 + $0x200] sm:$0xff] %vm28_vm0, %v6003_v54  ;;  %7002 = vmatpush.msrb.mxu2 %v8703_v44  ;;  %7095 = vmatpush.msrb.mxu3 %v8727_v31  ;;  %v6094_v44 = vld [vmem:[#allocation3 + $0x108] sm:$0xff]  ;;  %v8677_v31 = vld [vmem:[%s14988_s2 + $0x3d8] sm:$0xff] }
 0xce8   :  { %6054 = vst.msk [vmem:[#allocation3 + $0x208] sm:$0xff] %vm28_vm0, %v6004_v13  ;;  %6900 = vmatpush.msrb.mxu1 %v8679_v17 }
 0xce9   :  { %6055 = vst.msk [vmem:[#allocation3 + $0x210] sm:$0xff] %vm28_vm0, %v6005_v7  ;;  %v6078_v7 = vld [vmem:[#allocation3 + $0x78] sm:$0xff] }
 0xcea   :  { %6056 = vst.msk [vmem:[#allocation3 + $0x218] sm:$0xff] %vm28_vm0, %v6006_v49  ;;  %8553 = vmatmul.msk.f32.gmra.mxu1 %vm28_vm0, %v13864_v11 }
 0xceb   :  { %6057 = vst.msk [vmem:[#allocation3 + $0x238] sm:$0xff] %vm28_vm0, %v6007_v3  ;;  %8593 = vmatmul.msk.f32.gmra.mxu3 %vm28_vm0, %v13853_v38  ;;  %v13938_v16 = vld [vmem:[#allocation3 + $0x1e8] sm:$0xff]  ;;  %6901 = vmatpush.msrb.mxu1 %v8678_v45  ;;  %v8700_v45 = vld [vmem:[%s14988_s2 + $0x410] sm:$0xff] }
 0xcec   :  { %6058 = vst.msk [vmem:[#allocation3 + $0x240] sm:$0xff] %vm28_vm0, %v6008_v2  ;;  %8570 = vmatmul.msk.f32.gmra.mxu2 %vm28_vm0, %v13858_v15  ;;  %v13931_v55 = vld [vmem:[#allocation3 + $0x1f0] sm:$0xff] }
 0xced   :  { %6059 = vst.msk [vmem:[#allocation3 + $0x248] sm:$0xff] %vm28_vm0, %v6009_v42  ;;  %v13954_v12 = vld [vmem:[#allocation3 + $0x1f8] sm:$0xff]  ;;  %6902 = vmatpush.msrb.mxu1 %v8677_v31  ;;  %v6109_v31 = vld [vmem:[#allocation3 + $0x190] sm:$0xff] }
 0xcee   :  { %6060 = vst.msk [vmem:[#allocation3 + $0x250] sm:$0xff] %vm28_vm0, %v6010_v5  ;;  %v13950_v9 = vld [vmem:[#allocation3 + $0x200] sm:$0xff] }
 0xcef   :  { %6061 = vst.msk [vmem:[#allocation3 + $0x258] sm:$0xff] %vm28_vm0, %v6011_v4  ;;  %v13967_v25 = vld [vmem:[#allocation3 + $0x208] sm:$0xff]  ;;  %v8702_v5 = vld [vmem:[%s14988_s2 + $0x420] sm:$0xff] }
 0xcf0   :  { %6062 = vst.msk [vmem:[#allocation3 + $0x260] sm:$0xff] %vm28_vm0, %v6012_v43  ;;  %v13960_v58 = vld [vmem:[#allocation3 + $0x210] sm:$0xff]  ;;  %v6080_v4 = vld [vmem:[#allocation3 + $0x88] sm:$0xff]  ;;  %7003 = vmatpush.msrb.mxu2 %v8702_v5  ;;  %v8726_v43 = vld [vmem:[%s14988_s2 + $0x460] sm:$0xff] }
 0xcf1   :  { %v13985_v48 = vld [vmem:[#allocation3 + $0x218] sm:$0xff]  ;;  %7096 = vmatpush.msrb.mxu3 %v8726_v43  ;;  %v6097_v43 = vld [vmem:[#allocation3 + $0x120] sm:$0xff] }
 0xcf2   :  { %8554 = vmatmul.msk.f32.gmra.mxu1 %vm28_vm0, %v13878_v50 }
 0xcf3   :  { %8594 = vmatmul.msk.f32.gmra.mxu3 %vm28_vm0, %v13874_v1 }
 0xcf4   :  { %8571 = vmatmul.msk.f32.gmra.mxu2 %vm28_vm0, %v13874_v1 }
 0xcfa   :  { %8555 = vmatmul.msk.f32.gmra.mxu1 %vm28_vm0, %v13894_v34 }
 0xcfb   :  { %8595 = vmatmul.msk.f32.gmra.mxu3 %vm28_vm0, %v13890_v33 }
 0xcfc   :  { %8572 = vmatmul.msk.f32.gmra.mxu2 %vm28_vm0, %v13890_v33 }
 0xd01   :  { %v13983_v28 = vpop.f32.mrf.mxu2 }
 0xd02   :  { %8556 = vmatmul.msk.f32.gmra.mxu1 %vm28_vm0, %v13907_v20 }
 0xd03   :  { %8596 = vmatmul.msk.f32.gmra.mxu3 %vm28_vm0, %v13903_v21 }
 0xd04   :  { %8573 = vmatmul.msk.f32.gmra.mxu2 %vm28_vm0, %v13903_v21 }
 0xd0a   :  { %8557 = vmatmul.msk.f32.gmra.mxu1 %vm28_vm0, %v13925_v59 }
 0xd0b   :  { %8597 = vmatmul.msk.f32.gmra.mxu3 %vm28_vm0, %v13919_v10 }
 0xd0c   :  { %8574 = vmatmul.msk.f32.gmra.mxu2 %vm28_vm0, %v13921_v19 }
 0xd0f   :  { %v13996_v0 = vpop.f32.mrf.mxu3  ;;  %v6344_v27 = vpop.f32.mrf.mxu2 }
 0xd12   :  { %8558 = vmatmul.msk.f32.gmra.mxu1 %vm28_vm0, %v13938_v16 }
 0xd13   :  { %8598 = vmatmul.msk.f32.gmra.mxu3 %vm28_vm0, %v13931_v55 }
 0xd14   :  { %8575 = vmatmul.msk.f32.gmra.mxu2 %vm28_vm0, %v13931_v55  ;;  %v13990_v60 = vpop.f32.mrf.mxu1 }
 0xd1a   :  { %8559 = vmatmul.msk.f32.gmra.mxu1 %vm28_vm0, %v13954_v12 }
 0xd1b   :  { %8599 = vmatmul.msk.f32.gmra.mxu3 %vm28_vm0, %v13950_v9 }
 0xd1c   :  { %8576 = vmatmul.msk.f32.gmra.mxu2 %vm28_vm0, %v13950_v9  ;;  %v6231_v54 = vpop.f32.mrf.mxu1 }
 0xd1d   :  { %v6345_v13 = vadd.f32 %v6344_v27, %v6231_v54  ;;  %v8725_v27 = vld [vmem:[%s14988_s2 + $0x458] sm:$0xff] }
 0xd1e   :  { %7097 = vmatpush.msrb.mxu3 %v8725_v27 }
 0xd22   :  { %8560 = vmatmul.msk.f32.gmra.mxu1 %vm28_vm0, %v13967_v25 }
 0xd23   :  { %8600 = vmatmul.msk.f32.gmra.mxu3 %vm28_vm0, %v13960_v58 }
 0xd24   :  { %8577 = vmatmul.msk.f32.gmra.mxu2 %vm28_vm0, %v13960_v58 }
 0xd2a   :  { %8561 = vmatmul.msk.f32.gmra.mxu1 %vm28_vm0, %v13985_v48 }
 0xd2b   :  { %8601 = vmatmul.msk.f32.gmra.mxu3 %vm28_vm0, %v13979_v51 }
 0xd2c   :  { %8634 = vmatmul.msk.f32.vlgmr.msra.gmra.mxu2 %vm28_vm0, %v6074_v47  ;;  %v6091_v47 = vld [vmem:[#allocation3 + $0xf0] sm:$0xff] }
 0xd32   :  { %8610 = vmatmul.msk.f32.vlgmr.msra.gmra.mxu1 %vm28_vm0, %v6073_v8  ;;  %v6093_v8 = vld [vmem:[#allocation3 + $0x100] sm:$0xff] }
 0xd33   :  { %8658 = vmatmul.msk.f32.vlgmr.msra.gmra.mxu3 %vm28_vm0, %v6075_v36 }
 0xd34   :  { %8635 = vmatmul.msk.f32.gmra.mxu2 %vm28_vm0, %v6076_v40 }
 0xd3a   :  { %8611 = vmatmul.msk.f32.gmra.mxu1 %vm28_vm0, %v6075_v36  ;;  %v8701_v36 = vld [vmem:[%s14988_s2 + $0x418] sm:$0xff] }
 0xd3b   :  { %8659 = vmatmul.msk.f32.gmra.mxu3 %vm28_vm0, %v6077_v6  ;;  %7004 = vmatpush.msrb.mxu2 %v8701_v36 }
 0xd3c   :  { %8636 = vmatmul.msk.f32.gmra.mxu2 %vm28_vm0, %v6078_v7  ;;  %v6430_v49 = vpop.f32.mrf.mxu3 }
 0xd3d   :  { %v14009_v3 = vadd.f32 %v6430_v49, %v6345_v13  ;;  %v6347_v2 = vpop.f32.mrf.mxu2  ;;  %v8783_v13 = vld [vmem:[%s14988_s2 + $0x548] sm:$0xff]  ;;  %v6095_v49 = vld [vmem:[#allocation3 + $0x110] sm:$0xff]  ;;  %7005 = vmatpush.msrb.mxu2 %v8700_v45  ;;  %v6114_v45 = vld [vmem:[#allocation3 + $0x1b8] sm:$0xff] }
 0xd3e   :  { %7555 = vmatpush.msrb.mxu0 %v8783_v13  ;;  %v6112_v13 = vld [vmem:[#allocation3 + $0x1a8] sm:$0xff] }
 0xd3f   :  { %v6234_v22 = vpop.f32.mrf.mxu1 }
 0xd40   :  { %v6348_v42 = vadd.f32 %v6347_v2, %v6234_v22  ;;  %v6096_v2 = vld [vmem:[#allocation3 + $0x118] sm:$0xff] }
 0xd42   :  { %8612 = vmatmul.msk.f32.gmra.mxu1 %vm28_vm0, %v6077_v6 }
 0xd43   :  { %8660 = vmatmul.msk.f32.gmra.mxu3 %vm28_vm0, %v6079_v26 }
 0xd44   :  { %8637 = vmatmul.msk.f32.gmra.mxu2 %vm28_vm0, %v6080_v4 }
 0xd46   :  { %v6433_v62 = vpop.f32.mrf.mxu3 }
 0xd47   :  { %v14023_v53 = vadd.f32 %v6433_v62, %v6348_v42  ;;  %v6350_v35 = vpop.f32.mrf.mxu2  ;;  %v6237_v52 = vpop.f32.mrf.mxu1  ;;  %v6098_v62 = vld [vmem:[#allocation3 + $0x128] sm:$0xff] }
 0xd48   :  { %v6351_v61 = vadd.f32 %v6350_v35, %v6237_v52  ;;  %v8676_v52 = vld [vmem:[%s14988_s2 + $0x3d0] sm:$0xff] }
 0xd49   :  { %6903 = vmatpush.msrb.mxu1 %v8676_v52 }
 0xd4a   :  { %8613 = vmatmul.msk.f32.gmra.mxu1 %vm28_vm0, %v6079_v26 }
 0xd4b   :  { %8661 = vmatmul.msk.f32.gmra.mxu3 %vm28_vm0, %v6081_v29  ;;  %v8724_v29 = vld [vmem:[%s14988_s2 + $0x450] sm:$0xff] }
 0xd4c   :  { %8638 = vmatmul.msk.f32.gmra.mxu2 %vm28_vm0, %v6092_v63  ;;  %7098 = vmatpush.msrb.mxu3 %v8724_v29 }
 0xd4e   :  { %v6436_v46 = vpop.f32.mrf.mxu3 }
 0xd4f   :  { %v14028_v56 = vadd.f32 %v6436_v46, %v6351_v61  ;;  %v6353_v37 = vpop.f32.mrf.mxu2  ;;  %v6240_v39 = vpop.f32.mrf.mxu1 }
 0xd50   :  { %v6354_v40 = vadd.f32 %v6353_v37, %v6240_v39  ;;  %v6099_v37 = vld [vmem:[#allocation3 + $0x130] sm:$0xff] }
 0xd52   :  { %8614 = vmatmul.msk.f32.gmra.mxu1 %vm28_vm0, %v6091_v47  ;;  %v6110_v47 = vld [vmem:[#allocation3 + $0x198] sm:$0xff] }
 0xd53   :  { %8662 = vmatmul.msk.f32.gmra.mxu3 %vm28_vm0, %v6093_v8 }
 0xd54   :  { %8639 = vmatmul.msk.f32.gmra.mxu2 %vm28_vm0, %v6094_v44 }
 0xd56   :  { %v6439_v17 = vpop.f32.mrf.mxu3 }
 0xd57   :  { %v14042_v54 = vadd.f32 %v6439_v17, %v6354_v40  ;;  %v6356_v6 = vpop.f32.mrf.mxu2  ;;  %v6243_v7 = vpop.f32.mrf.mxu1  ;;  %v6111_v17 = vld [vmem:[#allocation3 + $0x1a0] sm:$0xff] }
 0xd58   :  { %v6357_v22 = vadd.f32 %v6356_v6, %v6243_v7  ;;  %v8699_v6 = vld [vmem:[%s14988_s2 + $0x408] sm:$0xff] }
 0xd59   :  { %7006 = vmatpush.msrb.mxu2 %v8699_v6 }
 0xd5a   :  { %8615 = vmatmul.msk.f32.gmra.mxu1 %vm28_vm0, %v6093_v8 }
 0xd5b   :  { %8663 = vmatmul.msk.f32.gmra.mxu3 %vm28_vm0, %v6095_v49 }
 0xd5c   :  { %8640 = vmatmul.msk.f32.gmra.mxu2 %vm28_vm0, %v6096_v2  ;;  %v8675_v2 = vld [vmem:[%s14988_s2 + $0x3c8] sm:$0xff] }
 0xd5d   :  { %6904 = vmatpush.msrb.mxu1 %v8675_v2 }
 0xd5e   :  { %v6442_v26 = vpop.f32.mrf.mxu3 }
 0xd5f   :  { %v14050_v42 = vadd.f32 %v6442_v26, %v6357_v22  ;;  %v6359_v5 = vpop.f32.mrf.mxu2  ;;  %v6246_v4 = vpop.f32.mrf.mxu1 }
 0xd60   :  { %v6360_v35 = vadd.f32 %v6359_v5, %v6246_v4 }
 0xd62   :  { %8616 = vmatmul.msk.f32.gmra.mxu1 %vm28_vm0, %v6095_v49  ;;  %v8723_v49 = vld [vmem:[%s14988_s2 + $0x448] sm:$0xff] }
 0xd63   :  { %8664 = vmatmul.msk.f32.gmra.mxu3 %vm28_vm0, %v6097_v43 }
 0xd64   :  { %8641 = vmatmul.msk.f32.gmra.mxu2 %vm28_vm0, %v6098_v62  ;;  %7099 = vmatpush.msrb.mxu3 %v8723_v49 }
 0xd66   :  { %v6445_v61 = vpop.f32.mrf.mxu3 }
 0xd67   :  { %v14064_v63 = vadd.f32 %v6445_v61, %v6360_v35  ;;  %v6362_v46 = vpop.f32.mrf.mxu2  ;;  %v6249_v39 = vpop.f32.mrf.mxu1 }
 0xd68   :  { %v6363_v8 = vadd.f32 %v6362_v46, %v6249_v39  ;;  %v6115_v46 = vld [vmem:[#allocation3 + $0x1c0] sm:$0xff]  ;;  %v6116_v39 = vld [vmem:[#allocation3 + $0x1c8] sm:$0xff] }
 0xd6a   :  { %8617 = vmatmul.msk.f32.gmra.mxu1 %vm28_vm0, %v6097_v43  ;;  %v6113_v43 = vld [vmem:[#allocation3 + $0x1b0] sm:$0xff] }
 0xd6b   :  { %8665 = vmatmul.msk.f32.gmra.mxu3 %vm28_vm0, %v6099_v37  ;;  %v8698_v37 = vld [vmem:[%s14988_s2 + $0x400] sm:$0xff] }
 0xd6c   :  { %8642 = vmatmul.msk.f32.gmra.mxu2 %vm28_vm0, %v6110_v47 }
 0xd6d   :  { %7007 = vmatpush.msrb.mxu2 %v8698_v37  ;;  %v6131_v37 = vld [vmem:[#allocation3 + $0x250] sm:$0xff] }
 0xd6e   :  { %v6448_v36 = vpop.f32.mrf.mxu3 }
 0xd6f   :  { %v14069_v44 = vadd.f32 %v6448_v36, %v6363_v8  ;;  %v6365_v40 = vpop.f32.mrf.mxu2  ;;  %v6252_v27 = vpop.f32.mrf.mxu1  ;;  %v8722_v8 = vld [vmem:[%s14988_s2 + $0x440] sm:$0xff] }
 0xd70   :  { %v6366_v7 = vadd.f32 %v6365_v40, %v6252_v27  ;;  %v8674_v36 = vld [vmem:[%s14988_s2 + $0x3c0] sm:$0xff]  ;;  %7100 = vmatpush.msrb.mxu3 %v8722_v8 }
 0xd71   :  { %6905 = vmatpush.msrb.mxu1 %v8674_v36 }
 0xd72   :  { %8618 = vmatmul.msk.f32.gmra.mxu1 %vm28_vm0, %v6109_v31 }
 0xd73   :  { %8666 = vmatmul.msk.f32.gmra.mxu3 %vm28_vm0, %v6111_v17 }
 0xd74   :  { %8643 = vmatmul.msk.f32.gmra.mxu2 %vm28_vm0, %v6112_v13  ;;  %v6128_v13 = vld [vmem:[#allocation3 + $0x238] sm:$0xff] }
 0xd76   :  { %v6451_v22 = vpop.f32.mrf.mxu3 }
 0xd77   :  { %v14083_v26 = vadd.f32 %v6451_v22, %v6366_v7  ;;  %v6368_v5 = vpop.f32.mrf.mxu2  ;;  %v6255_v4 = vpop.f32.mrf.mxu1 }
 0xd78   :  { %v6369_v62 = vadd.f32 %v6368_v5, %v6255_v4  ;;  %v6127_v4 = vld [vmem:[#allocation3 + $0x230] sm:$0xff] }
 0xd7a   :  { %8619 = vmatmul.msk.f32.gmra.mxu1 %vm28_vm0, %v6111_v17  ;;  %v6117_v17 = vld [vmem:[#allocation3 + $0x1d0] sm:$0xff] }
 0xd7b   :  { %8667 = vmatmul.msk.f32.gmra.mxu3 %vm28_vm0, %v6113_v43 }
 0xd7c   :  { %8644 = vmatmul.msk.f32.gmra.mxu2 %vm28_vm0, %v6114_v45  ;;  %v6130_v45 = vld [vmem:[#allocation3 + $0x248] sm:$0xff] }
 0xd7e   :  { %v6454_v35 = vpop.f32.mrf.mxu3 }
 0xd7f   :  { %v14088_v29 = vadd.f32 %v6454_v35, %v6369_v62  ;;  %v6371_v52 = vpop.f32.mrf.mxu2  ;;  %v6258_v61 = vpop.f32.mrf.mxu1 }
 0xd80   :  { %v6372_v47 = vadd.f32 %v6371_v52, %v6258_v61 }
 0xd82   :  { %8620 = vmatmul.msk.f32.gmra.mxu1 %vm28_vm0, %v6113_v43  ;;  %v6129_v43 = vld [vmem:[#allocation3 + $0x240] sm:$0xff] }
 0xd83   :  { %8668 = vmatmul.msk.f32.gmra.mxu3 %vm28_vm0, %v6115_v46 }
 0xd84   :  { %8645 = vmatmul.msk.f32.gmra.mxu2 %vm28_vm0, %v6116_v39  ;;  %v6132_v39 = vld [vmem:[#allocation3 + $0x258] sm:$0xff] }
 0xd86   :  { %v6457_v40 = vpop.f32.mrf.mxu3 }
 0xd87   :  { %v14102_v27 = vadd.f32 %v6457_v40, %v6372_v47  ;;  %v6374_v31 = vpop.f32.mrf.mxu2  ;;  %v6261_v6 = vpop.f32.mrf.mxu1 }
 0xd88   :  { %v6375_v7 = vadd.f32 %v6374_v31, %v6261_v6  ;;  %v6134_v6 = vld [vmem:[#allocation3 + $0x268] sm:$0xff] }
 0xd8a   :  { %8621 = vmatmul.msk.f32.gmra.mxu1 %vm28_vm0, %v6115_v46 }
 0xd8b   :  { %8669 = vmatmul.msk.f32.gmra.mxu3 %vm28_vm0, %v6117_v17  ;;  %v6133_v17 = vld [vmem:[#allocation3 + $0x260] sm:$0xff] }
 0xd8c   :  { %8646 = vmatmul.msk.f32.gmra.mxu2 %vm28_vm0, %v6128_v13 }
 0xd8e   :  { %v6460_v49 = vpop.f32.mrf.mxu3 }
 0xd8f   :  { %v14107_v2 = vadd.f32 %v6460_v49, %v6375_v7  ;;  %v6377_v22 = vpop.f32.mrf.mxu2  ;;  %v6264_v5 = vpop.f32.mrf.mxu1 }
 0xd90   :  { %v6378_v62 = vadd.f32 %v6377_v22, %v6264_v5  ;;  %v6135_v5 = vld [vmem:[#allocation3 + $0x270] sm:$0xff] }
 0xd92   :  { %8622 = vmatmul.msk.f32.gmra.mxu1 %vm28_vm0, %v6127_v4 }
 0xd93   :  { %8670 = vmatmul.msk.f32.gmra.mxu3 %vm28_vm0, %v6129_v43 }
 0xd94   :  { %8647 = vmatmul.msk.f32.gmra.mxu2 %vm28_vm0, %v6130_v45 }
 0xd96   :  { %v6463_v35 = vpop.f32.mrf.mxu3 }
 0xd97   :  { %v14112_v52 = vadd.f32 %v6463_v35, %v6378_v62  ;;  %v6380_v61 = vpop.f32.mrf.mxu2  ;;  %v6267_v46 = vpop.f32.mrf.mxu1 }
 0xd98   :  { %v6381_v47 = vadd.f32 %v6380_v61, %v6267_v46 }
 0xd9a   :  { %8623 = vmatmul.msk.f32.gmra.mxu1 %vm28_vm0, %v6129_v43  ;;  %v6342_v43 = vadd.f32 %v13983_v28, %v13990_v60 }
 0xd9b   :  { %8671 = vmatmul.msk.f32.gmra.mxu3 %vm28_vm0, %v6131_v37 }
 0xd9c   :  { %8648 = vmatmul.msk.f32.gmra.mxu2 %vm28_vm0, %v6132_v39  ;;  %v6475_v46 = vadd.f32 %v13996_v0, %v6342_v43 }
 0xd9e   :  { %v6466_v8 = vpop.f32.mrf.mxu3 }
 0xd9f   :  { %v14117_v36 = vadd.f32 %v6466_v8, %v6381_v47  ;;  %v6383_v40 = vpop.f32.mrf.mxu2  ;;  %v6270_v31 = vpop.f32.mrf.mxu1 }
 0xda0   :  { %v6384_v13 = vadd.f32 %v6383_v40, %v6270_v31 }
 0xda2   :  { %8624 = vmatmul.msk.f32.gmra.mxu1 %vm28_vm0, %v6131_v37 }
 0xda3   :  { %8672 = vmatmul.msk.f32.gmra.mxu3 %vm28_vm0, %v6133_v17 }
 0xda4   :  { %8649 = vmatmul.msk.f32.gmra.mxu2 %vm28_vm0, %v6134_v6 }
 0xda6   :  { %v6469_v7 = vpop.f32.mrf.mxu3 }
 0xda7   :  { %v14122_v49 = vadd.f32 %v6469_v7, %v6384_v13  ;;  %v6386_v22 = vpop.f32.mrf.mxu2  ;;  %v6273_v4 = vpop.f32.mrf.mxu1 }
 0xda8   :  { %v6387_v45 = vadd.f32 %v6386_v22, %v6273_v4 }
 0xdaa   :  { %8625 = vmatmul.msk.f32.gmra.mxu1 %vm28_vm0, %v6133_v17 }
 0xdab   :  { %8673 = vmatmul.msk.f32.gmra.mxu3 %vm28_vm0, %v6135_v5 }
 0xdac   :  { %8706 = vmatmul.msk.f32.vlgmr.msrb.gmra.mxu2 %vm28_vm0, %v13735_v41 }
 0xdae   :  { %v6472_v62 = vpop.f32.mrf.mxu3 }
 0xdaf   :  { %v14130_v35 = vadd.f32 %v6472_v62, %v6387_v45  ;;  %v6703_v61 = vpop.f32.mrf.mxu2  ;;  %v6565_v37 = vpop.f32.mrf.mxu1 }
 0xdb0   :  { %v6613_v39 = vadd.f32 %v6565_v37, %v6475_v46 }
 0xdb1   :  { %15787 = vst [vmem:[#allocation61_spill] sm:$0xff] %v14130_v35 }
 0xdb2   :  { %8682 = vmatmul.msk.f32.vlgmr.msrb.gmra.mxu1 %vm28_vm0, %v13667_v32  ;;  %v6751_v28 = vadd.f32 %v6703_v61, %v6613_v39 }
 0xdb3   :  { %8730 = vmatmul.msk.f32.vlgmr.msrb.gmra.mxu3 %vm28_vm0, %v13714_v24 }
 0xdb4   :  { %8707 = vmatmul.msk.f32.gmra.mxu2 %vm28_vm0, %v13802_v18 }
 0xdb6   :  { %v6805_v60 = vpop.f32.mrf.mxu3 }
 0xdb7   :  { %v14139_v41 = vadd.f32 %v6805_v60, %v6751_v28  ;;  %v6706_v47 = vpop.f32.mrf.mxu2  ;;  %v6568_v8 = vpop.f32.mrf.mxu1 }
 0xdb8   :  { %v6614_v40 = vadd.f32 %v6568_v8, %v14009_v3 }
 0xdba   :  { %8683 = vmatmul.msk.f32.gmra.mxu1 %vm28_vm0, %v13714_v24  ;;  %v6752_v32 = vadd.f32 %v6706_v47, %v6614_v40 }
 0xdbb   :  { %8731 = vmatmul.msk.f32.gmra.mxu3 %vm28_vm0, %v13790_v23 }
 0xdbc   :  { %8708 = vmatmul.msk.f32.gmra.mxu2 %vm28_vm0, %v13834_v30 }
 0xdbe   :  { %v6808_v0 = vpop.f32.mrf.mxu3 }
 0xdbf   :  { %v14148_v18 = vadd.f32 %v6808_v0, %v6752_v32  ;;  %v6709_v31 = vpop.f32.mrf.mxu2  ;;  %v6571_v17 = vpop.f32.mrf.mxu1  ;;  %v6137_v32 = vld [vmem:[#allocation3 + $0x288] sm:$0xff] }
 0xdc0   :  { %v6615_v6 = vadd.f32 %v6571_v17, %v14023_v53  ;;  %v6136_v17 = vld [vmem:[#allocation3 + $0x280] sm:$0xff] }
 0xdc2   :  { %8684 = vmatmul.msk.f32.gmra.mxu1 %vm28_vm0, %v13790_v23  ;;  %v6753_v24 = vadd.f32 %v6709_v31, %v6615_v6  ;;  %v6139_v6 = vld [vmem:[#allocation3 + $0x298] sm:$0xff] }
 0xdc3   :  { %8732 = vmatmul.msk.f32.gmra.mxu3 %vm28_vm0, %v13828_v14 }
 0xdc4   :  { %8709 = vmatmul.msk.f32.gmra.mxu2 %vm28_vm0, %v13864_v11 }
 0xdc6   :  { %v6811_v3 = vpop.f32.mrf.mxu3 }
 0xdc7   :  { %v14157_v30 = vadd.f32 %v6811_v3, %v6753_v24  ;;  %v6712_v13 = vpop.f32.mrf.mxu2  ;;  %v6574_v7 = vpop.f32.mrf.mxu1  ;;  %v6140_v24 = vld [vmem:[#allocation3 + $0x2a0] sm:$0xff] }
 0xdc8   :  { %v6616_v22 = vadd.f32 %v6574_v7, %v14028_v56  ;;  %v8782_v7 = vld [vmem:[%s14988_s2 + $0x540] sm:$0xff] }
 0xdc9   :  { %7556 = vmatpush.msrb.mxu0 %v8782_v7 }
 0xdca   :  { %8685 = vmatmul.msk.f32.gmra.mxu1 %vm28_vm0, %v13828_v14  ;;  %v6754_v23 = vadd.f32 %v6712_v13, %v6616_v22  ;;  %v6141_v13 = vld [vmem:[#allocation3 + $0x2a8] sm:$0xff] }
 0xdcb   :  { %8733 = vmatmul.msk.f32.gmra.mxu3 %vm28_vm0, %v13853_v38 }
 0xdcc   :  { %8710 = vmatmul.msk.f32.gmra.mxu2 %vm28_vm0, %v13878_v50 }
 0xdce   :  { %v6814_v53 = vpop.f32.mrf.mxu3 }
 0xdcf   :  { %v14166_v11 = vadd.f32 %v6814_v53, %v6754_v23  ;;  %v6715_v5 = vpop.f32.mrf.mxu2  ;;  %v6577_v4 = vpop.f32.mrf.mxu1  ;;  %v6142_v53 = vld [vmem:[#allocation3 + $0x2b0] sm:$0xff] }
 0xdd0   :  { %v6617_v43 = vadd.f32 %v6577_v4, %v14042_v54  ;;  %v6143_v4 = vld [vmem:[#allocation3 + $0x2b8] sm:$0xff] }
 0xdd2   :  { %8686 = vmatmul.msk.f32.gmra.mxu1 %vm28_vm0, %v13858_v15  ;;  %v6755_v14 = vadd.f32 %v6715_v5, %v6617_v43 }
 0xdd3   :  { %8734 = vmatmul.msk.f32.gmra.mxu3 %vm28_vm0, %v13874_v1 }
 0xdd4   :  { %8711 = vmatmul.msk.f32.gmra.mxu2 %vm28_vm0, %v13894_v34 }
 0xdd6   :  { %v6817_v38 = vpop.f32.mrf.mxu3 }
 0xdd7   :  { %v14175_v50 = vadd.f32 %v6817_v38, %v6755_v14  ;;  %v6718_v56 = vpop.f32.mrf.mxu2  ;;  %v6580_v45 = vpop.f32.mrf.mxu1  ;;  %v6144_v38 = vld [vmem:[#allocation3 + $0x2c0] sm:$0xff] }
 0xdd8   :  { %v6618_v62 = vadd.f32 %v6580_v45, %v14050_v42 }
 0xdda   :  { %8687 = vmatmul.msk.f32.gmra.mxu1 %vm28_vm0, %v13874_v1  ;;  %v6756_v15 = vadd.f32 %v6718_v56, %v6618_v62 }
 0xddb   :  { %8735 = vmatmul.msk.f32.gmra.mxu3 %vm28_vm0, %v13890_v33 }
 0xddc   :  { %8712 = vmatmul.msk.f32.gmra.mxu2 %vm28_vm0, %v13907_v20 }
 0xdde   :  { %v6820_v54 = vpop.f32.mrf.mxu3 }
 0xddf   :  { %v14184_v34 = vadd.f32 %v6820_v54, %v6756_v15  ;;  %v6721_v61 = vpop.f32.mrf.mxu2  ;;  %v6583_v46 = vpop.f32.mrf.mxu1 }
 0xde0   :  { %v6619_v37 = vadd.f32 %v6583_v46, %v14064_v63 }
 0xde2   :  { %8688 = vmatmul.msk.f32.gmra.mxu1 %vm28_vm0, %v13890_v33  ;;  %v6757_v1 = vadd.f32 %v6721_v61, %v6619_v37 }
 0xde3   :  { %8736 = vmatmul.msk.f32.gmra.mxu3 %vm28_vm0, %v13903_v21 }
 0xde4   :  { %8713 = vmatmul.msk.f32.gmra.mxu2 %vm28_vm0, %v13925_v59 }
 0xde6   :  { %v6823_v42 = vpop.f32.mrf.mxu3 }
 0xde7   :  { %v14193_v20 = vadd.f32 %v6823_v42, %v6757_v1  ;;  %v6724_v39 = vpop.f32.mrf.mxu2  ;;  %v6586_v28 = vpop.f32.mrf.mxu1 }
 0xde8   :  { %v6620_v60 = vadd.f32 %v6586_v28, %v14069_v44  ;;  %v8761_v28 = vld [vmem:[%s14988_s2 + $0x4f8] sm:$0xff] }
 0xde9   :  { %7410 = vmatpush.msra.mxu1 %v8761_v28 }
 0xdea   :  { %8689 = vmatmul.msk.f32.gmra.mxu1 %vm28_vm0, %v13903_v21  ;;  %v6758_v33 = vadd.f32 %v6724_v39, %v6620_v60 }
 0xdeb   :  { %8737 = vmatmul.msk.f32.gmra.mxu3 %vm28_vm0, %v13919_v10 }
 0xdec   :  { %8714 = vmatmul.msk.f32.gmra.mxu2 %vm28_vm0, %v13938_v16 }
 0xdee   :  { %v6826_v63 = vpop.f32.mrf.mxu3 }
 0xdef   :  { %v14202_v59 = vadd.f32 %v6826_v63, %v6758_v33  ;;  %v14204_v47 = vpop.f32.mrf.mxu2  ;;  %v14206_v8 = vpop.f32.mrf.mxu1 }
 0xdf2   :  { %8690 = vmatmul.msk.f32.gmra.mxu1 %vm28_vm0, %v13921_v19 }
 0xdf3   :  { %8738 = vmatmul.msk.f32.gmra.mxu3 %vm28_vm0, %v13931_v55 }
 0xdf4   :  { %8715 = vmatmul.msk.f32.gmra.mxu2 %vm28_vm0, %v13954_v12 }
 0xdf6   :  { %v14214_v21 = vpop.f32.mrf.mxu3 }
 0xdf7   :  { %v14216_v10 = vpop.f32.mrf.mxu2  ;;  %v14218_v16 = vpop.f32.mrf.mxu1 }
 0xdfa   :  { %8691 = vmatmul.msk.f32.gmra.mxu1 %vm28_vm0, %v13931_v55 }
 0xdfb   :  { %8739 = vmatmul.msk.f32.gmra.mxu3 %vm28_vm0, %v13950_v9 }
 0xdfc   :  { %8716 = vmatmul.msk.f32.gmra.mxu2 %vm28_vm0, %v13967_v25 }
 0xdfe   :  { %v14226_v44 = vpop.f32.mrf.mxu3 }
 0xdff   :  { %v14228_v19 = vpop.f32.mrf.mxu2  ;;  %v14230_v12 = vpop.f32.mrf.mxu1 }
 0xe02   :  { %8692 = vmatmul.msk.f32.gmra.mxu1 %vm28_vm0, %v13950_v9 }
 0xe03   :  { %8740 = vmatmul.msk.f32.gmra.mxu3 %vm28_vm0, %v13960_v58 }
 0xe04   :  { %8717 = vmatmul.msk.f32.gmra.mxu2 %vm28_vm0, %v13985_v48  ;;  %v6138_v48 = vld [vmem:[#allocation3 + $0x290] sm:$0xff] }
 0xe06   :  { %v14238_v40 = vpop.f32.mrf.mxu3 }
 0xe07   :  { %v14240_v55 = vpop.f32.mrf.mxu2  ;;  %v14242_v25 = vpop.f32.mrf.mxu1 }
 0xe0a   :  { %8693 = vmatmul.msk.f32.gmra.mxu1 %vm28_vm0, %v13960_v58 }
 0xe0b   :  { %8741 = vmatmul.msk.f32.gmra.mxu3 %vm28_vm0, %v13979_v51 }
 0xe0c   :  { %8718 = vmatmul.msk.f32.gmra.mxu2 %vm28_vm0, %v6137_v32 }
 0xe0e   :  { %v14249_v0 = vpop.f32.mrf.mxu3 }
 0xe0f   :  { %v14251_v9 = vpop.f32.mrf.mxu2  ;;  %v14253_v31 = vpop.f32.mrf.mxu1 }
 0xe12   :  { %8694 = vmatmul.msk.f32.gmra.mxu1 %vm28_vm0, %v6136_v17 }
 0xe13   :  { %8742 = vmatmul.msk.f32.gmra.mxu3 %vm28_vm0, %v6138_v48 }
 0xe14   :  { %8719 = vmatmul.msk.f32.gmra.mxu2 %vm28_vm0, %v6139_v6 }
 0xe16   :  { %v14258_v51 = vpop.f32.mrf.mxu3 }
 0xe17   :  { %v14260_v58 = vpop.f32.mrf.mxu2  ;;  %v14262_v3 = vpop.f32.mrf.mxu1 }
 0xe1a   :  { %8695 = vmatmul.msk.f32.gmra.mxu1 %vm28_vm0, %v6138_v48 }
 0xe1b   :  { %8743 = vmatmul.msk.f32.gmra.mxu3 %vm28_vm0, %v6140_v24 }
 0xe1c   :  { %8720 = vmatmul.msk.f32.gmra.mxu2 %vm28_vm0, %v6141_v13 }
 0xe1e   :  { %v14270_v22 = vpop.f32.mrf.mxu3 }
 0xe1f   :  { %v14272_v23 = vpop.f32.mrf.mxu2  ;;  %v14274_v5 = vpop.f32.mrf.mxu1 }
 0xe22   :  { %8696 = vmatmul.msk.f32.gmra.mxu1 %vm28_vm0, %v6140_v24 }
 0xe23   :  { %8744 = vmatmul.msk.f32.gmra.mxu3 %vm28_vm0, %v6142_v53 }
 0xe24   :  { %8721 = vmatmul.msk.f32.gmra.mxu2 %vm28_vm0, %v6143_v4  ;;  %v8760_v4 = vld [vmem:[%s14988_s2 + $0x4f0] sm:$0xff] }
 0xe25   :  { %7411 = vmatpush.msra.mxu1 %v8760_v4 }
 0xe26   :  { %v14279_v43 = vpop.f32.mrf.mxu3 }
 0xe27   :  { %15788 = vst [vmem:[#allocation62_spill] sm:$0xff] %v14279_v43  ;;  %v14281_v14 = vpop.f32.mrf.mxu2  ;;  %v14283_v56 = vpop.f32.mrf.mxu1 }
 0xe28   :  { %15789 = vst [vmem:[#allocation63_spill] sm:$0xff] %v14281_v14  ;;  %v8757_v14 = vld [vmem:[%s14988_s2 + $0x4d8] sm:$0xff] }
 0xe29   :  { %15790 = vst [vmem:[#allocation64_spill] sm:$0xff] %v14283_v56  ;;  %v8750_v56 = vld [vmem:[%s14988_s2 + $0x4a0] sm:$0xff] }
 0xe2a   :  { %8697 = vmatmul.msk.f32.gmra.mxu1 %vm28_vm0, %v6142_v53 }
 0xe2b   :  { %8745 = vmatmul.msk.f32.gmra.mxu3 %vm28_vm0, %v6144_v38  ;;  %v8753_v38 = vld [vmem:[%s14988_s2 + $0x4b8] sm:$0xff] }
 0xe2c   :  { %7451 = vmatpush.msra.mxu2 %v8753_v38 }
 0xe2e   :  { %v14287_v45 = vpop.f32.mrf.mxu3 }
 0xe2f   :  { %15791 = vst [vmem:[#allocation65_spill] sm:$0xff] %v14287_v45  ;;  %v14289_v62 = vpop.f32.mrf.mxu2  ;;  %v14291_v15 = vpop.f32.mrf.mxu1 }
 0xe36   :  { %v14293_v54 = vpop.f32.mrf.mxu3 }
 0xe37   :  { %v14295_v61 = vpop.f32.mrf.mxu2  ;;  %v6910_v46 = vpop.f32.mrf.mxu1 }
 0xe3e   :  { %v14297_v37 = vpop.f32.mrf.mxu3 }
 0xe3f   :  { %v7015_v1 = vpop.f32.mrf.mxu2  ;;  %v6913_v42 = vpop.f32.mrf.mxu1 }
 0xe40   :  { %v6957_v39 = vadd.f32 %v6913_v42, %v14157_v30 }
 0xe42   :  { %v7059_v60 = vadd.f32 %v7015_v1, %v6957_v39 }
 0xe46   :  { %v7108_v33 = vpop.f32.mrf.mxu3 }
 0xe47   :  { %v14303_v63 = vadd.f32 %v7108_v33, %v7059_v60  ;;  %v7018_v32 = vpop.f32.mrf.mxu2  ;;  %v6916_v48 = vpop.f32.mrf.mxu1 }
 0xe48   :  { %v6958_v17 = vadd.f32 %v6916_v48, %v14166_v11  ;;  %v8759_v48 = vld [vmem:[%s14988_s2 + $0x4e8] sm:$0xff] }
 0xe49   :  { %7412 = vmatpush.msra.mxu1 %v8759_v48 }
 0xe4a   :  { %v7060_v6 = vadd.f32 %v7018_v32, %v6958_v17  ;;  %v8752_v17 = vld [vmem:[%s14988_s2 + $0x4b0] sm:$0xff] }
 0xe4b   :  { %7452 = vmatpush.msra.mxu2 %v8752_v17 }
 0xe4e   :  { %v7111_v24 = vpop.f32.mrf.mxu3 }
 0xe4f   :  { %v14306_v13 = vadd.f32 %v7111_v24, %v7060_v6  ;;  %v7021_v7 = vpop.f32.mrf.mxu2  ;;  %v6919_v53 = vpop.f32.mrf.mxu1 }
 0xe50   :  { %v6959_v30 = vadd.f32 %v6919_v53, %v14175_v50  ;;  %v8777_v50 = vld [vmem:[%s14988_s2 + $0x538] sm:$0xff]  ;;  %v8776_v53 = vld [vmem:[%s14988_s2 + $0x530] sm:$0xff] }
 0xe51   :  { %7495 = vmatpush.msra.mxu3 %v8777_v50 }
 0xe52   :  { %v7061_v1 = vadd.f32 %v7021_v7, %v6959_v30 }
 0xe53   :  { %7496 = vmatpush.msra.mxu3 %v8776_v53  ;;  %v8775_v53 = vld [vmem:[%s14988_s2 + $0x528] sm:$0xff] }
 0xe55   :  { %7497 = vmatpush.msra.mxu3 %v8775_v53  ;;  %v6955_v53 = vadd.f32 %v14291_v15, %v14139_v41  ;;  %v6624_v41 = vadd.f32 %v14242_v25, %v14107_v2 }
 0xe56   :  { %v7114_v11 = vpop.f32.mrf.mxu3 }
 0xe57   :  { %v14315_v42 = vadd.f32 %v7114_v11, %v7061_v1  ;;  %v14317_v39 = vpop.f32.mrf.mxu2  ;;  %v6922_v28 = vpop.f32.mrf.mxu1  ;;  %v8758_v1 = vld [vmem:[%s14988_s2 + $0x4e0] sm:$0xff]  ;;  %v8751_v11 = vld [vmem:[%s14988_s2 + $0x4a8] sm:$0xff] }
 0xe58   :  { %7413 = vmatpush.msra.mxu1 %v8758_v1  ;;  %7453 = vmatpush.msra.mxu2 %v8751_v11  ;;  %v6956_v11 = vadd.f32 %v6910_v46, %v14148_v18  ;;  %v6622_v18 = vadd.f32 %v14218_v16, %v14088_v29  ;;  %v8774_v29 = vld [vmem:[%s14988_s2 + $0x520] sm:$0xff] }
 0xe59   :  { %7498 = vmatpush.msra.mxu3 %v8774_v29 }
 0xe5a   :  { %7414 = vmatpush.msra.mxu1 %v8757_v14  ;;  %7454 = vmatpush.msra.mxu2 %v8750_v56  ;;  %v7058_v43 = vadd.f32 %v14295_v61, %v6956_v11  ;;  %v6623_v14 = vadd.f32 %v14230_v12, %v14102_v27  ;;  %v7057_v56 = vadd.f32 %v14289_v62, %v6955_v53 }
 0xe5b   :  { %v6960_v12 = vadd.f32 %v6922_v28, %v14184_v34  ;;  %v7202_v28 = vmul.f32 %v14306_v13, %v14306_v13  ;;  %v7203_v53 = vmul.f32 %v14315_v42, %v14315_v42 }
 0xe5c   :  { %v14390_v46 = vadd.f32 %v14297_v37, %v7058_v43  ;;  %v14403_v16 = vadd.f32 %v14293_v54, %v7057_v56 }
 0xe5e   :  { %v14322_v60 = vpop.f32.mrf.mxu3  ;;  %v7200_v25 = vmul.f32 %v14390_v46, %v14390_v46 }
 0xe5f   :  { %v14324_v33 = vpop.f32.mrf.mxu2  ;;  %v6925_v32 = vpop.f32.mrf.mxu1 }
 0xe60   :  { %v7216_v54 = vsel %vm28_vm0, %v7200_v25, 0.0 }
 0xe66   :  { %v14332_v6 = vpop.f32.mrf.mxu3 }
 0xe67   :  { %v14334_v24 = vpop.f32.mrf.mxu2  ;;  %v14336_v7 = vpop.f32.mrf.mxu1 }
 0xe68   :  { %v6962_v61 = vadd.f32 %v14336_v7, %v14202_v59 }
 0xe6e   :  { %v14341_v30 = vpop.f32.mrf.mxu3 }
 0xe6f   :  { %v14343_v4 = vpop.f32.mrf.mxu2  ;;  %v6931_v38 = vpop.f32.mrf.mxu1 }
 0xe76   :  { %v14351_v50 = vpop.f32.mrf.mxu3 }
 0xe77   :  { %v14353_v48 = vpop.f32.mrf.mxu2  ;;  %v14355_v17 = vpop.f32.mrf.mxu1 }
 0xe78   :  { %15792 = vst [vmem:[#allocation66_spill] sm:$0xff] %v14353_v48 }
 0xe7e   :  { %v14360_v57 = vpop.f32.mrf.mxu3 }
 0xe7f   :  { %15793 = vst [vmem:[#allocation67_spill] sm:$0xff] %v14360_v57  ;;  %v14362_v45 = vpop.f32.mrf.mxu2  ;;  %v14364_v1 = vpop.f32.mrf.mxu1  ;;  %v6621_v57 = vadd.f32 %v14206_v8, %v14083_v26  ;;  %v6625_v26 = vadd.f32 %v14253_v31, %v14112_v52  ;;  %v6626_v8 = vadd.f32 %v14262_v3, %v14117_v36  ;;  %v6760_v52 = vadd.f32 %v14216_v10, %v6622_v18 }
 0xe80   :  { %15794 = vst [vmem:[#allocation68_spill] sm:$0xff] %v14362_v45  ;;  %v6761_v36 = vadd.f32 %v14228_v19, %v6623_v14  ;;  %v6762_v31 = vadd.f32 %v14240_v55, %v6624_v41  ;;  %v6961_v3 = vadd.f32 %v6925_v32, %v14193_v20  ;;  %v7199_v10 = vmul.f32 %v14403_v16, %v14403_v16 }
 0xe81   :  { %v6759_v27 = vadd.f32 %v14204_v47, %v6621_v57  ;;  %v6763_v57 = vadd.f32 %v14251_v9, %v6625_v26  ;;  %v6764_v47 = vadd.f32 %v14260_v58, %v6626_v8  ;;  %v6862_v62 = vadd.f32 %v14226_v44, %v6760_v52 }
 0xe82   :  { %v7201_v19 = vmul.f32 %v14303_v63, %v14303_v63  ;;  %v6864_v55 = vadd.f32 %v14249_v0, %v6762_v31  ;;  %v7062_v20 = vadd.f32 %v14317_v39, %v6960_v12  ;;  %v6627_v44 = vadd.f32 %v14274_v5, %v14122_v49 }
 0xe83   :  { %v6861_v2 = vadd.f32 %v14214_v21, %v6759_v27  ;;  %v6863_v21 = vadd.f32 %v14238_v40, %v6761_v36  ;;  %v6865_v9 = vadd.f32 %v14258_v51, %v6763_v57  ;;  %v6866_v58 = vadd.f32 %v14270_v22, %v6764_v47  ;;  %v15796_v36 = vld [vmem:[#allocation62_spill] sm:$0xff] }
 0xe84   :  { %v7169_v40 = vsel %vm28_vm0, %v14390_v46, 0.0  ;;  %v7168_v0 = vsel %vm28_vm0, %v14403_v16, 0.0  ;;  %v14439_v51 = vadd.f32 %v14322_v60, %v7062_v20  ;;  %v7063_v22 = vadd.f32 %v14324_v33, %v6961_v3 }
 0xe85   :  { %v6963_v37 = vadd.f32 %v6931_v38, %v6861_v2  ;;  %v7215_v39 = vsel %vm28_vm0, %v7199_v10, 0.0  ;;  %v7171_v49 = vsel %vm28_vm0, %v14303_v63, 0.0  ;;  %v7218_v5 = vsel %vm28_vm0, %v7201_v19, 0.0  ;;  %v15795_v2 = vld [vmem:[#allocation66_spill] sm:$0xff] }
 0xe86   :  { %v14373_v35 = vpop.f32.mrf.mxu3  ;;  %v7170_v59 = vadd.f32 %v7169_v40, %v7168_v0  ;;  %v7217_v32 = vadd.f32 %v7216_v54, %v7215_v39  ;;  %v14449_v7 = vadd.f32 %v14332_v6, %v7063_v22  ;;  %v6964_v60 = vadd.f32 %v14355_v17, %v6862_v62  ;;  %v15797_v62 = vld [vmem:[#allocation67_spill] sm:$0xff] }
 0xe87   :  { %v14377_v45 = vpop.f32.mrf.mxu2  ;;  %v14382_v48 = vpop.f32.mrf.mxu1  ;;  %v6765_v33 = vadd.f32 %v14272_v23, %v6627_v44  ;;  %v7173_v38 = vsel %vm28_vm0, %v14306_v13, 0.0  ;;  %v7064_v18 = vadd.f32 %v14334_v24, %v6962_v61  ;;  %v7204_v41 = vmul.f32 %v14439_v51, %v14439_v51  ;;  %v15798_v19 = vld [vmem:[#allocation68_spill] sm:$0xff] }
 0xe88   :  { %v7172_v14 = vadd.f32 %v7171_v49, %v7170_v59  ;;  %v7219_v56 = vadd.f32 %v7218_v5, %v7217_v32  ;;  %v7065_v6 = vadd.f32 %v14343_v4, %v6963_v37  ;;  %v7220_v17 = vsel %vm28_vm0, %v7202_v28, 0.0  ;;  %v15799_v49 = vld [vmem:[#allocation61_spill] sm:$0xff]  ;;  %v15800_v5 = vld [vmem:[#allocation64_spill] sm:$0xff] }
 0xe89   :  { %v7175_v23 = vsel %vm28_vm0, %v14315_v42, 0.0  ;;  %v14465_v8 = vadd.f32 %v14341_v30, %v7064_v18  ;;  %v6965_v29 = vadd.f32 %v14364_v1, %v6863_v21  ;;  %v7205_v24 = vmul.f32 %v14449_v7, %v14449_v7 }
 0xe8a   :  { %v7174_v27 = vadd.f32 %v7173_v38, %v7172_v14  ;;  %v14471_v12 = vadd.f32 %v14351_v50, %v7065_v6  ;;  %v7066_v4 = vadd.f32 %v15795_v2, %v6964_v60  ;;  %v6867_v25 = vadd.f32 %v15796_v36, %v6765_v33 }
 0xe8b   :  { %v7222_v31 = vsel %vm28_vm0, %v7203_v53, 0.0  ;;  %v7177_v30 = vsel %vm28_vm0, %v14439_v51, 0.0  ;;  %v6966_v57 = vadd.f32 %v14382_v48, %v6864_v55  ;;  %v7221_v1 = vadd.f32 %v7220_v17, %v7219_v56 }
 0xe8c   :  { %v7176_v47 = vadd.f32 %v7175_v23, %v7174_v27  ;;  %v7224_v3 = vsel %vm28_vm0, %v7204_v41, 0.0  ;;  %v14481_v21 = vadd.f32 %v15797_v62, %v7066_v4  ;;  %v7179_v50 = vsel %vm28_vm0, %v14449_v7, 0.0  ;;  %v15801_v4 = vld [vmem:[#allocation63_spill] sm:$0xff] }
 0xe8d   :  { %v7206_v10 = vmul.f32 %v14465_v8, %v14465_v8  ;;  %v7067_v20 = vadd.f32 %v15798_v19, %v6965_v29  ;;  %v7223_v40 = vadd.f32 %v7222_v31, %v7221_v1  ;;  %v7226_v48 = vsel %vm28_vm0, %v7205_v24, 0.0 }
 0xe8e   :  { %v14406_v43 = vpop.f32.mrf.mxu3  ;;  %v7178_v54 = vadd.f32 %v7177_v30, %v7176_v47  ;;  %v7207_v55 = vmul.f32 %v14471_v12, %v14471_v12  ;;  %v7181_v0 = vsel %vm28_vm0, %v14465_v8, 0.0  ;;  %v7068_v37 = vadd.f32 %v14377_v45, %v6966_v57 }
 0xe8f   :  { %v14417_v34 = vpop.f32.mrf.mxu2  ;;  %v6943_v15 = vpop.f32.mrf.mxu1  ;;  %v14494_v22 = vadd.f32 %v14373_v35, %v7067_v20  ;;  %v7208_v59 = vmul.f32 %v14481_v21, %v14481_v21  ;;  %v7228_v60 = vsel %vm28_vm0, %v7206_v10, 0.0  ;;  %v7183_v33 = vsel %vm28_vm0, %v14471_v12, 0.0 }
 0xe90   :  { %v6967_v44 = vadd.f32 %v6943_v15, %v6865_v9  ;;  %v6628_v9 = vadd.f32 %v15800_v5, %v15799_v49  ;;  %v7225_v15 = vadd.f32 %v7224_v3, %v7223_v40  ;;  %v7180_v28 = vadd.f32 %v7179_v50, %v7178_v54  ;;  %v15802_v3 = vld [vmem:[#allocation65_spill] sm:$0xff] }
 0xe91   :  { %v14505_v35 = vadd.f32 %v14406_v43, %v7068_v37  ;;  %v7230_v53 = vsel %vm28_vm0, %v7207_v55, 0.0  ;;  %v7185_v18 = vsel %vm28_vm0, %v14481_v21, 0.0  ;;  %v7209_v56 = vmul.f32 %v14494_v22, %v14494_v22 }
 0xe92   :  { %v7069_v45 = vadd.f32 %v14417_v34, %v6967_v44  ;;  %v7182_v38 = vadd.f32 %v7181_v0, %v7180_v28  ;;  %v7232_v29 = vsel %vm28_vm0, %v7208_v59, 0.0  ;;  %v7187_v34 = vsel %vm28_vm0, %v14494_v22, 0.0 }
 0xe93   :  { %v7210_v27 = vmul.f32 %v14505_v35, %v14505_v35 }
 0xe94   :  { %v7184_v43 = vadd.f32 %v7183_v33, %v7182_v38 }
 0xe95   :  { %v7236_v50 = vsel %vm28_vm0, %v7210_v27, 0.0 }
 0xe96   :  { %v7138_v11 = vpop.f32.mrf.mxu3 }
 0xe97   :  { %v7048_v26 = vpop.f32.mrf.mxu2  ;;  %v6946_v52 = vpop.f32.mrf.mxu1  ;;  %v14513_v41 = vadd.f32 %v7138_v11, %v7069_v45  ;;  %v7186_v11 = vadd.f32 %v7185_v18, %v7184_v43 }
 0xe98   :  { %v6968_v39 = vadd.f32 %v6946_v52, %v6866_v58  ;;  %v7227_v58 = vadd.f32 %v7226_v48, %v7225_v15  ;;  %v6766_v52 = vadd.f32 %v15801_v4, %v6628_v9 }
 0xe99   :  { %v7211_v30 = vmul.f32 %v14513_v41, %v14513_v41  ;;  %v7188_v47 = vadd.f32 %v7187_v34, %v7186_v11  ;;  %v7191_v10 = vsel %vm28_vm0, %v14513_v41, 0.0 }
 0xe9a   :  { %v7070_v6 = vadd.f32 %v7048_v26, %v6968_v39  ;;  %v7229_v23 = vadd.f32 %v7228_v60, %v7227_v58  ;;  %v7234_v26 = vsel %vm28_vm0, %v7209_v56, 0.0  ;;  %v6868_v62 = vadd.f32 %v15802_v3, %v6766_v52 }
 0xe9b   :  { %v7238_v48 = vsel %vm28_vm0, %v7211_v30, 0.0 }
 0xe9c   :  { %v7231_v36 = vadd.f32 %v7230_v53, %v7229_v23 }
 0xe9e   :  { %v7141_v61 = vpop.f32.mrf.mxu3  ;;  %v7233_v1 = vadd.f32 %v7232_v29, %v7231_v36 }
 0xe9f   :  { %v7051_v32 = vpop.f32.mrf.mxu2  ;;  %v6949_v14 = vpop.f32.mrf.mxu1  ;;  %v14520_v24 = vadd.f32 %v7141_v61, %v7070_v6  ;;  %v15803_v6 = vld [vmem:[#allocation158_spill] sm:$0xff] }
 0xea0   :  { %v6969_v17 = vadd.f32 %v6949_v14, %v6867_v25  ;;  %v7189_v25 = vsel %vm28_vm0, %v14505_v35, 0.0  ;;  %v7235_v20 = vadd.f32 %v7234_v26, %v7233_v1 }
 0xea1   :  { %v7212_v19 = vmul.f32 %v14520_v24, %v14520_v24  ;;  %v7190_v44 = vadd.f32 %v7189_v25, %v7188_v47  ;;  %v7193_v55 = vsel %vm28_vm0, %v14520_v24, 0.0 }
 0xea2   :  { %v7071_v2 = vadd.f32 %v7051_v32, %v6969_v17  ;;  %v7237_v37 = vadd.f32 %v7236_v50, %v7235_v20  ;;  %v8749_v20 = vld [vmem:[%s14988_s2 + $0x498] sm:$0xff] }
 0xea3   :  { %v7192_v39 = vadd.f32 %v7191_v10, %v7190_v44  ;;  %v7240_v49 = vsel %vm28_vm0, %v7212_v19, 0.0  ;;  %v8756_v19 = vld [vmem:[%s14988_s2 + $0x4d0] sm:$0xff]  ;;  %v8773_v44 = vld [vmem:[%s14988_s2 + $0x518] sm:$0xff]  ;;  %7455 = vmatpush.msra.mxu2 %v8749_v20  ;;  %v7167_v20 = vld [vmem:[%s14989_s3 + $0x6] sm:$0x1] }
 0xea4   :  { %v7239_v15 = vadd.f32 %v7238_v48, %v7237_v37  ;;  %7415 = vmatpush.msra.mxu1 %v8756_v19  ;;  %v8772_v48 = vld [vmem:[%s14988_s2 + $0x510] sm:$0xff]  ;;  %7499 = vmatpush.msra.mxu3 %v8773_v44  ;;  %v8746_v37 = vld [vmem:[%s14988_s2 + $0x480] sm:$0xff] }
 0xea5   :  { %v7194_v28 = vadd.f32 %v7193_v55, %v7192_v39  ;;  %v8754_v55 = vld [vmem:[%s14988_s2 + $0x4c0] sm:$0xff]  ;;  %v7348_v39 = vld [vmem:[#allocation4 + $0x8] sm:$0xff]  ;;  %v8836_v19 = vld [vmem:[%s14988_s2 + $0x670] sm:$0xff] }
 0xea6   :  { %v7144_v31 = vpop.f32.mrf.mxu3  ;;  %v7241_v33 = vadd.f32 %v7240_v49, %v7239_v15  ;;  %7500 = vmatpush.msra.mxu3 %v8772_v48  ;;  %v8801_v49 = vld [vmem:[%s14988_s2 + $0x5b8] sm:$0xff]  ;;  %v7349_v15 = vld [vmem:[#allocation4 + $0x10] sm:$0xff]  ;;  %v14674_v44 = vld [vmem:[#allocation4 + $0x60] sm:$0xff] }
 0xea7   :  { %v14528_v57 = vadd.f32 %v7144_v31, %v7071_v2  ;;  %v6952_v40 = vpop.f32.mrf.mxu1  ;;  %v7054_v54 = vpop.f32.mrf.mxu2  ;;  %v8806_v48 = vld [vmem:[%s14988_s2 + $0x5c0] sm:$0xff] }
 0xea8   :  { %v6970_v0 = vadd.f32 %v6952_v40, %v6868_v62  ;;  %v8755_v40 = vld [vmem:[%s14988_s2 + $0x4c8] sm:$0xff] }
 0xea9   :  { %v7213_v61 = vmul.f32 %v14528_v57, %v14528_v57  ;;  %v7195_v5 = vsel %vm28_vm0, %v14528_v57, 0.0  ;;  %7416 = vmatpush.msra.mxu1 %v8755_v40 }
 0xeaa   :  { %v7072_v9 = vadd.f32 %v7054_v54, %v6970_v0  ;;  %v7196_v45 = vadd.f32 %v7195_v5, %v7194_v28  ;;  %v8748_v54 = vld [vmem:[%s14988_s2 + $0x490] sm:$0xff]  ;;  %v8771_v0 = vld [vmem:[%s14988_s2 + $0x508] sm:$0xff]  ;;  %v7347_v5 = vld [vmem:[#allocation4] sm:$0xff] }
 0xeab   :  { %v7242_v32 = vsel %vm28_vm0, %v7213_v61, 0.0  ;;  %v8747_v61 = vld [vmem:[%s14988_s2 + $0x488] sm:$0xff]  ;;  %7456 = vmatpush.msra.mxu2 %v8748_v54  ;;  %7417 = vmatpush.msra.mxu1 %v8754_v55  ;;  %v7352_v28 = vld [vmem:[#allocation4 + $0x30] sm:$0xff] }
 0xeac   :  { %v7243_v53 = vadd.f32 %v7242_v32, %v7241_v33  ;;  %7501 = vmatpush.msra.mxu3 %v8771_v0  ;;  %8762 = vmatmul.msk.f32.vlgmr.msra.gmra.mxu1 %vm28_vm0, %v7348_v39  ;;  %v8813_v32 = vld [vmem:[%s14988_s2 + $0x5f8] sm:$0xff]  ;;  %v8820_v55 = vld [vmem:[%s14988_s2 + $0x610] sm:$0xff] }
 0xead   :  { %7457 = vmatpush.msra.mxu2 %v8747_v61  ;;  %7603 = vmatpush.msrb.mxu1 %v8801_v49  ;;  %v8794_v61 = vld [vmem:[%s14988_s2 + $0x580] sm:$0xff] }
 0xeae   :  { %v7147_v59 = vpop.f32.mrf.mxu3  ;;  %8790 = vmatmul.msk.f32.vlgmr.msrb.gmra.mxu0 %vm28_vm0, %v7352_v28  ;;  %v8834_v49 = vld [vmem:[%s14988_s2 + $0x660] sm:$0xff] }
 0xeaf   :  { %v14545_v60 = vadd.f32 %v7147_v59, %v7072_v9  ;;  %v8770_v9 = vld [vmem:[%s14988_s2 + $0x500] sm:$0xff]  ;;  %7458 = vmatpush.msra.mxu2 %v8746_v37  ;;  %v8800_v59 = vld [vmem:[%s14988_s2 + $0x5b0] sm:$0xff]  ;;  %v8819_v37 = vld [vmem:[%s14988_s2 + $0x608] sm:$0xff] }
 0xeb0   :  { %8766 = vmatmul.msk.f32.vlgmr.msra.gmra.mxu2 %vm28_vm0, %v7347_v5  ;;  %7502 = vmatpush.msra.mxu3 %v8770_v9 }
 0xeb1   :  { %v7197_v58 = vsel %vm28_vm0, %v14545_v60, 0.0  ;;  %v7214_v38 = vmul.f32 %v14545_v60, %v14545_v60  ;;  %8778 = vmatmul.msk.f32.vlgmr.msra.gmra.mxu3 %vm28_vm0, %v7349_v15  ;;  %7604 = vmatpush.msrb.mxu1 %v8800_v59 }
 0xeb2   :  { %v7198_v18 = vadd.f32 %v7197_v58, %v7196_v45  ;;  %v8799_v58 = vld [vmem:[%s14988_s2 + $0x5a8] sm:$0xff]  ;;  %7651 = vmatpush.msrb.mxu2 %v8813_v32 }
 0xeb3   :  { %v7244_v14 = vsel %vm28_vm0, %v7214_v38, 0.0  ;;  %v8812_v38 = vld [vmem:[%s14988_s2 + $0x5f0] sm:$0xff]  ;;  %7605 = vmatpush.msrb.mxu1 %v8799_v58 }
 0xeb4   :  { %v7245_v56 = vadd.f32 %v7244_v14, %v7243_v53  ;;  %v7246_v17 = vmul.f32 %v15803_v6, %v7198_v18  ;;  %v7350_v18 = vld [vmem:[#allocation4 + $0x18] sm:$0xff]  ;;  %v8811_v14 = vld [vmem:[%s14988_s2 + $0x5e8] sm:$0xff]  ;;  %7652 = vmatpush.msrb.mxu2 %v8812_v38 }
 0xeb5   :  { %8763 = vmatmul.msk.f32.gmra.mxu1 %vm28_vm0, %v7350_v18  ;;  %v8832_v18 = vld [vmem:[%s14988_s2 + $0x650] sm:$0xff] }
 0xeb6   :  { %v7247_v23 = vsel %vm28_vm0, %v7246_v17, 0.0  ;;  %v7255_v43 = vmul.f32 %v15803_v6, %v7245_v56  ;;  %v8825_v56 = vld [vmem:[%s14988_s2 + $0x638] sm:$0xff]  ;;  %v8798_v17 = vld [vmem:[%s14988_s2 + $0x5a0] sm:$0xff]  ;;  %7653 = vmatpush.msrb.mxu2 %v8811_v14  ;;  %v8848_v14 = vld [vmem:[%s14988_s2 + $0x6b0] sm:$0xff] }
 0xeb7   :  { %v7248_v29 = vrot.slane %v7247_v23, 4  ;;  %7699 = vmatpush.msrb.mxu3 %v8825_v56  ;;  %7606 = vmatpush.msrb.mxu1 %v8798_v17 }
 0xeb8   :  { %v7256_v34 = vsel %vm28_vm0, %v7255_v43, 0.0  ;;  %8767 = vmatmul.msk.f32.gmra.mxu2 %vm28_vm0, %v7349_v15 }
 0xeb9   :  { %v7249_v27 = vadd.f32 %v7248_v29, %v7247_v23  ;;  %v7257_v2 = vrot.slane %v7256_v34, 4  ;;  %v8824_v23 = vld [vmem:[%s14988_s2 + $0x630] sm:$0xff]  ;;  %v7351_v29 = vld [vmem:[#allocation4 + $0x20] sm:$0xff] }
 0xeba   :  { %7700 = vmatpush.msrb.mxu3 %v8824_v23 }
 0xebb   :  { %v7250_v4 = vrot.slane %v7249_v27, 2  ;;  %v7258_v52 = vadd.f32 %v7257_v2, %v7256_v34  ;;  %v8810_v34 = vld [vmem:[%s14988_s2 + $0x5e0] sm:$0xff]  ;;  %v8797_v2 = vld [vmem:[%s14988_s2 + $0x598] sm:$0xff]  ;;  %8779 = vmatmul.msk.f32.gmra.mxu3 %vm28_vm0, %v7351_v29 }
 0xebc   :  { %7654 = vmatpush.msrb.mxu2 %v8810_v34  ;;  %7607 = vmatpush.msrb.mxu1 %v8797_v2 }
 0xebd   :  { %v7251_v36 = vadd.f32 %v7250_v4, %v7249_v27  ;;  %v7259_v11 = vrot.slane %v7258_v52, 2  ;;  %v8823_v4 = vld [vmem:[%s14988_s2 + $0x628] sm:$0xff] }
 0xebe   :  { %7701 = vmatpush.msrb.mxu3 %v8823_v4 }
 0xebf   :  { %v7252_v31 = vrot.slane %v7251_v36, 1  ;;  %v7260_v26 = vadd.f32 %v7259_v11, %v7258_v52  ;;  %v8809_v52 = vld [vmem:[%s14988_s2 + $0x5d8] sm:$0xff] }
 0xec0   :  { %7655 = vmatpush.msrb.mxu2 %v8809_v52 }
 0xec1   :  { %v7253_v25 = vadd.f32 %v7252_v31, %v7251_v36  ;;  %v7261_v30 = vrot.slane %v7260_v26, 1  ;;  %v7166_v36 = vld [vmem:[%s14989_s3 + $0x2] sm:$0x1]  ;;  %v8796_v31 = vld [vmem:[%s14988_s2 + $0x590] sm:$0xff]  ;;  %8768 = vmatmul.msk.f32.gmra.mxu2 %vm28_vm0, %v14674_v44 }
 0xec2   :  { %7608 = vmatpush.msrb.mxu1 %v8796_v31 }
 0xec3   :  { %v14556_v1 = vmul.f32 0.03125, %v7253_v25  ;;  %v7262_v47 = vadd.f32 %v7261_v30, %v7260_v26  ;;  %v8822_v26 = vld [vmem:[%s14988_s2 + $0x620] sm:$0xff]  ;;  %v8808_v25 = vld [vmem:[%s14988_s2 + $0x5d0] sm:$0xff] }
 0xec4   :  { %7702 = vmatpush.msrb.mxu3 %v8822_v26  ;;  %7656 = vmatpush.msrb.mxu2 %v8808_v25 }
 0xec5   :  { %v7263_v3 = vmul.f32 0.03125, %v7262_v47  ;;  %v7264_v62 = vmul.f32 %v14556_v1, %v14556_v1  ;;  %v8795_v47 = vld [vmem:[%s14988_s2 + $0x588] sm:$0xff] }
 0xec6   :  { %7609 = vmatpush.msrb.mxu1 %v8795_v47 }
 0xec7   :  { %v7265_v50 = vsub.f32 %v7263_v3, %v7264_v62  ;;  %v8821_v3 = vld [vmem:[%s14988_s2 + $0x618] sm:$0xff] }
 0xec8   :  { %v8837_v62 = vld [vmem:[%s14988_s2 + $0x678] sm:$0xff]  ;;  %7703 = vmatpush.msrb.mxu3 %v8821_v3  ;;  %7610 = vmatpush.msrb.mxu1 %v8794_v61 }
 0xec9   :  { %v14560_v10 = vadd.f32 0.001, %v7265_v50  ;;  %7747 = vmatpush.msra.mxu0 %v8837_v62 }
 0xeca   :  { %7704 = vmatpush.msrb.mxu3 %v8820_v55 }
 0xecb   :  { %8888 = vrsqrt.f32 %v14560_v10  ;;  %vm7273_vm9 = vweird.f32 %v14560_v10  ;;  %7748 = vmatpush.msra.mxu0 %v8836_v19 }
 0xecc   :  { %7705 = vmatpush.msrb.mxu3 %v8819_v37  ;;  %v8845_v37 = vld [vmem:[%s14988_s2 + $0x698] sm:$0xff] }
 0xed1   :  { %v8889_v33 = vpop.eup %8888 }
 0xed2   :  { %v7268_v45 = vmul.f32 %v8889_v33, %v14560_v10  ;;  %vm7274_vm8 = vweird.f32 %v8889_v33  ;;  %v8807_v10 = vld [vmem:[%s14988_s2 + $0x5c8] sm:$0xff] }
 0xed3   :  { %vm7275_vm10 = vmor %vm7273_vm9, %vm7274_vm8  ;;  %7657 = vmatpush.msrb.mxu2 %v8807_v10 }
 0xed4   :  { %v7269_v53 = vmul.f32 %v8889_v33, %v7268_v45 }
 0xed5   :  { %7658 = vmatpush.msrb.mxu2 %v8806_v48 }
 0xed6   :  { %v7270_v43 = vmul.f32 0.5, %v7269_v53 }
 0xed8   :  { %v7271_v27 = vsub.f32 1.5, %v7270_v43 }
 0xeda   :  { %v7272_v11 = vmul.f32 %v8889_v33, %v7271_v27 }
 0xedc   :  { %v7276_v30 = vsel %vm7275_vm10, %v8889_v33, %v7272_v11 }
 0xedd   :  { %v7277_v50 = vmul.f32 %v7276_v30, %v7166_v36  ;;  %v8830_v36 = vld [vmem:[%s14988_s2 + $0x640] sm:$0xff]  ;;  %v8847_v30 = vld [vmem:[%s14988_s2 + $0x6a8] sm:$0xff] }
 0xedf   :  { %v7278_v40 = vmul.f32 %v7277_v50, %v14556_v1  ;;  %v14677_v54 = vperm.slane %v7277_v50, 0  ;;  %v8835_v1 = vld [vmem:[%s14988_s2 + $0x668] sm:$0xff] }
 0xee0   :  { %7749 = vmatpush.msra.mxu0 %v8835_v1 }
 0xee1   :  { %v7279_v0 = vsub.f32 %v7167_v20, %v7278_v40  ;;  %v7296_v39 = vmul.f32 %v14677_v54, %v14545_v60  ;;  %v7285_v9 = vmul.f32 %v14677_v54, %v14315_v42  ;;  %v7286_v15 = vmul.f32 %v14677_v54, %v14439_v51  ;;  %v8818_v60 = vld [vmem:[%s14988_s2 + $0x600] sm:$0xff]  ;;  %v8833_v51 = vld [vmem:[%s14988_s2 + $0x658] sm:$0xff] }
 0xee2   :  { %v7282_v28 = vmul.f32 %v14677_v54, %v14390_v46  ;;  %v7287_v59 = vmul.f32 %v14677_v54, %v14449_v7  ;;  %v7288_v32 = vmul.f32 %v14677_v54, %v14465_v8  ;;  %v7290_v42 = vmul.f32 %v14677_v54, %v14481_v21  ;;  %v8849_v46 = vld [vmem:[%s14988_s2 + $0x6b8] sm:$0xff]  ;;  %7750 = vmatpush.msra.mxu0 %v8834_v49 }
 0xee3   :  { %v14701_v5 = vperm.slane %v7279_v0, 0  ;;  %7706 = vmatpush.msrb.mxu3 %v8818_v60  ;;  %v7281_v38 = vmul.f32 %v14677_v54, %v14403_v16  ;;  %v7284_v53 = vmul.f32 %v14677_v54, %v14306_v13  ;;  %7792 = vmatpush.msra.mxu1 %v8849_v46  ;;  %v8831_v13 = vld [vmem:[%s14988_s2 + $0x648] sm:$0xff]  ;;  %v7283_v34 = vmul.f32 %v14677_v54, %v14303_v63  ;;  %v8842_v60 = vld [vmem:[%s14988_s2 + $0x680] sm:$0xff] }
 0xee4   :  { %7751 = vmatpush.msra.mxu0 %v8833_v51  ;;  %v7289_v4 = vmul.f32 %v14677_v54, %v14471_v12  ;;  %v7292_v63 = vmul.f32 %v14677_v54, %v14505_v35  ;;  %v7291_v12 = vmul.f32 %v14677_v54, %v14494_v22  ;;  %v8846_v35 = vld [vmem:[%s14988_s2 + $0x6a0] sm:$0xff]  ;;  %v7294_v3 = vmul.f32 %v14677_v54, %v14520_v24 }
 0xee5   :  { %v7313_v33 = vadd.f32 %v14701_v5, %v7296_v39  ;;  %v7302_v45 = vadd.f32 %v14701_v5, %v7285_v9  ;;  %v7303_v7 = vadd.f32 %v14701_v5, %v7286_v15  ;;  %v7299_v8 = vadd.f32 %v14701_v5, %v7282_v28  ;;  %7793 = vmatpush.msra.mxu1 %v8848_v14  ;;  %v8844_v39 = vld [vmem:[%s14988_s2 + $0x690] sm:$0xff]  ;;  %v8843_v28 = vld [vmem:[%s14988_s2 + $0x688] sm:$0xff]  ;;  %v7367_v51 = vld [vmem:[#allocation4 + $0xc0] sm:$0xff] }
 0xee6   :  { %v7304_v58 = vadd.f32 %v14701_v5, %v7287_v59  ;;  %v7305_v21 = vadd.f32 %v14701_v5, %v7288_v32  ;;  %v7307_v43 = vadd.f32 %v14701_v5, %v7290_v42  ;;  %v7298_v16 = vadd.f32 %v14701_v5, %v7281_v38  ;;  %7752 = vmatpush.msra.mxu0 %v8832_v18  ;;  %v7362_v9 = vld [vmem:[#allocation4 + $0x90] sm:$0xff] }
 0xee7   :  { %v7329_v56 = vmax.f32 %v7313_v33, 0.0  ;;  %v7318_v17 = vmax.f32 %v7302_v45, 0.0  ;;  %v7319_v23 = vmax.f32 %v7303_v7, 0.0  ;;  %v7315_v29 = vmax.f32 %v7299_v8, 0.0  ;;  %7794 = vmatpush.msra.mxu1 %v8847_v30 }
 0xee8   :  { %v7320_v27 = vmax.f32 %v7304_v58, 0.0  ;;  %v7301_v2 = vadd.f32 %v14701_v5, %v7284_v53  ;;  %v7321_v52 = vmax.f32 %v7305_v21, 0.0  ;;  %v7300_v11 = vadd.f32 %v14701_v5, %v7283_v34  ;;  %7753 = vmatpush.msra.mxu0 %v8831_v13 }
 0xee9   :  { %7346 = vst.msk [vmem:[#allocation4 + $0xe0] sm:$0xff] %vm28_vm0, %v7329_v56  ;;  %v7323_v31 = vmax.f32 %v7307_v43, 0.0  ;;  %v7306_v26 = vadd.f32 %v14701_v5, %v7289_v4  ;;  %v7314_v25 = vmax.f32 %v7298_v16, 0.0  ;;  %v7309_v47 = vadd.f32 %v14701_v5, %v7292_v63  ;;  %7795 = vmatpush.msra.mxu1 %v8846_v35 }
 0xeea   :  { %7335 = vst.msk [vmem:[#allocation4 + $0x68] sm:$0xff] %vm28_vm0, %v7318_v17  ;;  %v7317_v62 = vmax.f32 %v7301_v2, 0.0  ;;  %7754 = vmatpush.msra.mxu0 %v8830_v36  ;;  %v7308_v22 = vadd.f32 %v14701_v5, %v7291_v12  ;;  %v7293_v50 = vmul.f32 %v14677_v54, %v14513_v41  ;;  %v7316_v10 = vmax.f32 %v7300_v11, 0.0 }
 0xeeb   :  { %7336 = vst.msk [vmem:[#allocation4 + $0x70] sm:$0xff] %vm28_vm0, %v7319_v23  ;;  %v7311_v19 = vadd.f32 %v14701_v5, %v7294_v3  ;;  %v7295_v20 = vmul.f32 %v14677_v54, %v14528_v57  ;;  %v7322_v24 = vmax.f32 %v7306_v26, 0.0  ;;  %v7325_v48 = vmax.f32 %v7309_v47, 0.0  ;;  %7796 = vmatpush.msra.mxu1 %v8845_v37 }
 0xeec   :  { %7332 = vst.msk [vmem:[#allocation4 + $0x40] sm:$0xff] %vm28_vm0, %v7315_v29  ;;  %v7310_v40 = vadd.f32 %v14701_v5, %v7293_v50  ;;  %v7324_v61 = vmax.f32 %v7308_v22, 0.0 }
 0xeed   :  { %7337 = vst.msk [vmem:[#allocation4 + $0x78] sm:$0xff] %vm28_vm0, %v7320_v27  ;;  %v7312_v55 = vadd.f32 %v14701_v5, %v7295_v20  ;;  %v7327_v57 = vmax.f32 %v7311_v19, 0.0  ;;  %7797 = vmatpush.msra.mxu1 %v8844_v39 }
 0xeee   :  { %7338 = vst.msk [vmem:[#allocation4 + $0x80] sm:$0xff] %vm28_vm0, %v7321_v52  ;;  %v7326_v0 = vmax.f32 %v7310_v40, 0.0 }
 0xeef   :  { %7340 = vst.msk [vmem:[#allocation4 + $0xa0] sm:$0xff] %vm28_vm0, %v7323_v31  ;;  %v7328_v49 = vmax.f32 %v7312_v55, 0.0  ;;  %7798 = vmatpush.msra.mxu1 %v8843_v28 }
 0xef0   :  { %7331 = vst.msk [vmem:[#allocation4 + $0x38] sm:$0xff] %vm28_vm0, %v7314_v25  ;;  %v7371_v21 = vld [vmem:[#allocation4 + $0xe0] sm:$0xff] }
 0xef1   :  { %v7358_v41 = vld [vmem:[#allocation4 + $0x68] sm:$0xff]  ;;  %7334 = vst.msk [vmem:[#allocation4 + $0x50] sm:$0xff] %vm28_vm0, %v7317_v62  ;;  %7799 = vmatpush.msra.mxu1 %v8842_v60 }
 0xef2   :  { %8764 = vmatmul.msk.f32.gmra.mxu1 %vm28_vm0, %v7358_v41  ;;  %v7359_v1 = vld [vmem:[#allocation4 + $0x70] sm:$0xff]  ;;  %7333 = vst.msk [vmem:[#allocation4 + $0x48] sm:$0xff] %vm28_vm0, %v7316_v10 }
 0xef3   :  { %8769 = vmatmul.msk.f32.gmra.mxu2 %vm28_vm0, %v7359_v1  ;;  %8780 = vmatmul.msk.f32.gmra.mxu3 %vm28_vm0, %v7359_v1  ;;  %v7354_v54 = vld [vmem:[#allocation4 + $0x40] sm:$0xff]  ;;  %7339 = vst.msk [vmem:[#allocation4 + $0x98] sm:$0xff] %vm28_vm0, %v7322_v24 }
 0xef4   :  { %8791 = vmatmul.msk.f32.gmra.mxu0 %vm28_vm0, %v7354_v54  ;;  %7342 = vst.msk [vmem:[#allocation4 + $0xb0] sm:$0xff] %vm28_vm0, %v7325_v48  ;;  %v7360_v5 = vld [vmem:[#allocation4 + $0x78] sm:$0xff] }
 0xef5   :  { %7341 = vst.msk [vmem:[#allocation4 + $0xa8] sm:$0xff] %vm28_vm0, %v7324_v61  ;;  %v7361_v15 = vld [vmem:[#allocation4 + $0x80] sm:$0xff] }
 0xef6   :  { %7344 = vst.msk [vmem:[#allocation4 + $0xd0] sm:$0xff] %vm28_vm0, %v7327_v57  ;;  %v7364_v42 = vld [vmem:[#allocation4 + $0xa0] sm:$0xff] }
 0xef7   :  { %7343 = vst.msk [vmem:[#allocation4 + $0xc8] sm:$0xff] %vm28_vm0, %v7326_v0  ;;  %v7353_v59 = vld [vmem:[#allocation4 + $0x38] sm:$0xff] }
 0xef8   :  { %7345 = vst.msk [vmem:[#allocation4 + $0xd8] sm:$0xff] %vm28_vm0, %v7328_v49  ;;  %v7356_v32 = vld [vmem:[#allocation4 + $0x50] sm:$0xff] }
 0xef9   :  { %v7355_v46 = vld [vmem:[#allocation4 + $0x48] sm:$0xff] }
 0xefa   :  { %8765 = vmatmul.msk.f32.gmra.mxu1 %vm28_vm0, %v7360_v5  ;;  %v7363_v33 = vld [vmem:[#allocation4 + $0x98] sm:$0xff] }
 0xefb   :  { %8781 = vmatmul.msk.f32.gmra.mxu3 %vm28_vm0, %v7361_v15  ;;  %8814 = vmatmul.msk.f32.vlgmr.msrb.gmra.mxu2 %vm28_vm0, %v7354_v54  ;;  %v7366_v45 = vld [vmem:[#allocation4 + $0xb0] sm:$0xff] }
 0xefc   :  { %8792 = vmatmul.msk.f32.gmra.mxu0 %vm28_vm0, %v7362_v9 }
 0xefd   :  { %v7369_v7 = vld [vmem:[#allocation4 + $0xd0] sm:$0xff] }
 0xefe   :  { %v7368_v8 = vld [vmem:[#allocation4 + $0xc8] sm:$0xff] }
 0xeff   :  { %v7370_v58 = vld [vmem:[#allocation4 + $0xd8] sm:$0xff] }
 0xf02   :  { %8802 = vmatmul.msk.f32.vlgmr.msrb.gmra.mxu1 %vm28_vm0, %v7353_v59 }
 0xf03   :  { %8815 = vmatmul.msk.f32.gmra.mxu2 %vm28_vm0, %v7356_v32  ;;  %8826 = vmatmul.msk.f32.vlgmr.msrb.gmra.mxu3 %vm28_vm0, %v14674_v44  ;;  %v7365_v44 = vld [vmem:[#allocation4 + $0xa8] sm:$0xff] }
 0xf04   :  { %8793 = vmatmul.msk.f32.gmra.mxu0 %vm28_vm0, %v7364_v42 }
 0xf0a   :  { %8803 = vmatmul.msk.f32.gmra.mxu1 %vm28_vm0, %v7355_v46 }
 0xf0b   :  { %8816 = vmatmul.msk.f32.gmra.mxu2 %vm28_vm0, %v7364_v42  ;;  %8827 = vmatmul.msk.f32.gmra.mxu3 %vm28_vm0, %v7359_v1 }
 0xf0c   :  { %8838 = vmatmul.msk.f32.vlgmr.msra.gmra.mxu0 %vm28_vm0, %v7358_v41 }
 0xf12   :  { %8804 = vmatmul.msk.f32.gmra.mxu1 %vm28_vm0, %v7363_v33 }
 0xf13   :  { %8817 = vmatmul.msk.f32.gmra.mxu2 %vm28_vm0, %v7366_v45  ;;  %8828 = vmatmul.msk.f32.gmra.mxu3 %vm28_vm0, %v7367_v51 }
 0xf14   :  { %8839 = vmatmul.msk.f32.gmra.mxu0 %vm28_vm0, %v7360_v5 }
 0xf1a   :  { %8805 = vmatmul.msk.f32.gmra.mxu1 %vm28_vm0, %v7365_v44 }
 0xf1b   :  { %8829 = vmatmul.msk.f32.gmra.mxu3 %vm28_vm0, %v7369_v7 }
 0xf1c   :  { %8840 = vmatmul.msk.f32.gmra.mxu0 %vm28_vm0, %v7368_v8 }
 0xf22   :  { %8850 = vmatmul.msk.f32.vlgmr.msra.gmra.mxu1 %vm28_vm0, %v7359_v1 }
 0xf24   :  { %8841 = vmatmul.msk.f32.gmra.mxu0 %vm28_vm0, %v7370_v58 }
 0xf29   :  { %v7419_v38 = vpop.f32.mrf.mxu1 }
 0xf2a   :  { %8851 = vmatmul.msk.f32.gmra.mxu1 %vm28_vm0, %v7361_v15 }
 0xf2b   :  { %v7558_v56 = vpop.f32.mrf.mxu0 }
 0xf32   :  { %8852 = vmatmul.msk.f32.gmra.mxu1 %vm28_vm0, %v7369_v7  ;;  %v7422_v53 = vpop.f32.mrf.mxu1 }
 0xf33   :  { %v7460_v18 = vpop.f32.mrf.mxu2 }
 0xf34   :  { %v7504_v14 = vpop.f32.mrf.mxu3  ;;  %v7461_v30 = vadd.f32 %v7460_v18, %v7419_v38 }
 0xf36   :  { %v7516_v22 = vadd.f32 %v7504_v14, %v7461_v30 }
 0xf38   :  { %v7570_v40 = vadd.f32 %v7558_v56, %v7516_v22 }
 0xf3a   :  { %8853 = vmatmul.msk.f32.gmra.mxu1 %vm28_vm0, %v7371_v21 }
 0xf3b   :  { %v7463_v23 = vpop.f32.mrf.mxu2 }
 0xf3c   :  { %v7464_v35 = vadd.f32 %v7463_v23, %v7422_v53 }
 0xf3e   :  { %v7507_v43 = vpop.f32.mrf.mxu3 }
 0xf3f   :  { %v7517_v50 = vadd.f32 %v7507_v43, %v7464_v35 }
 0xf44   :  { %v7466_v13 = vpop.f32.mrf.mxu2 }
 0xf6f   :  { %v7425_v17 = vpop.f32.mrf.mxu1 }
 0xf70   :  { %v7467_v62 = vadd.f32 %v7466_v13, %v7425_v17 }
 0xf71   :  { %v7561_v29 = vpop.f32.mrf.mxu0 }
 0xf72   :  { %v7571_v24 = vadd.f32 %v7561_v29, %v7517_v50 }
 0xf76   :  { %v7510_v34 = vpop.f32.mrf.mxu3  ;;  %v7469_v4 = vpop.f32.mrf.mxu2 }
 0xf77   :  { %v7428_v16 = vpop.f32.mrf.mxu1  ;;  %v7518_v10 = vadd.f32 %v7510_v34, %v7467_v62 }
 0xf78   :  { %v7470_v41 = vadd.f32 %v7469_v4, %v7428_v16 }
 0xf79   :  { %v7564_v2 = vpop.f32.mrf.mxu0 }
 0xf7a   :  { %v7572_v48 = vadd.f32 %v7564_v2, %v7518_v10 }
 0xf7e   :  { %v7513_v52 = vpop.f32.mrf.mxu3  ;;  %v7660_v31 = vpop.f32.mrf.mxu2 }
 0xf7f   :  { %v7612_v27 = vpop.f32.mrf.mxu1  ;;  %v7519_v0 = vadd.f32 %v7513_v52, %v7470_v41 }
 0xf80   :  { %v7624_v61 = vadd.f32 %v7612_v27, %v7570_v40 }
 0xf81   :  { %v7567_v11 = vpop.f32.mrf.mxu0 }
 0xf82   :  { %v7672_v49 = vadd.f32 %v7660_v31, %v7624_v61  ;;  %v7573_v28 = vadd.f32 %v7567_v11, %v7519_v0  ;;  %v8861_v0 = vld [vmem:[%s14990_s4 + $0x78] sm:$0xff] }
 0xf83   :  { %7913 = vmatpush.msra.mxu2 %v8861_v0 }
 0xf86   :  { %v7708_v26 = vpop.f32.mrf.mxu3  ;;  %v7663_v47 = vpop.f32.mrf.mxu2 }
 0xf87   :  { %v7615_v36 = vpop.f32.mrf.mxu1  ;;  %v7720_v60 = vadd.f32 %v7708_v26, %v7672_v49  ;;  %v7891_v49 = vld [vmem:[%s14990_s4 + $0x30] sm:$0xff] }
 0xf88   :  { %v7625_v55 = vadd.f32 %v7615_v36, %v7571_v24 }
 0xf89   :  { %v7756_v12 = vpop.f32.mrf.mxu0 }
 0xf8a   :  { %v7673_v37 = vadd.f32 %v7663_v47, %v7625_v55  ;;  %v7768_v46 = vadd.f32 %v7756_v12, %v7720_v60  ;;  %v7889_v60 = vld [vmem:[%s14990_s4 + $0x20] sm:$0xff] }
 0xf8e   :  { %v7711_v3 = vpop.f32.mrf.mxu3  ;;  %v7666_v1 = vpop.f32.mrf.mxu2 }
 0xf8f   :  { %v7618_v63 = vpop.f32.mrf.mxu1  ;;  %v7721_v5 = vadd.f32 %v7711_v3, %v7673_v37  ;;  %v7892_v37 = vld [vmem:[%s14990_s4 + $0x38] sm:$0xff] }
 0xf90   :  { %v7626_v57 = vadd.f32 %v7618_v63, %v7572_v48  ;;  %7936 = vmatpush.msra.mxu3 %v7892_v37 }
 0xf91   :  { %v7759_v19 = vpop.f32.mrf.mxu0 }
 0xf92   :  { %v7674_v9 = vadd.f32 %v7666_v1, %v7626_v57  ;;  %v7769_v32 = vadd.f32 %v7759_v19, %v7721_v5  ;;  %7937 = vmatpush.msra.mxu3 %v7891_v49 }
 0xf96   :  { %v7714_v54 = vpop.f32.mrf.mxu3  ;;  %v7669_v51 = vpop.f32.mrf.mxu2 }
 0xf97   :  { %v7621_v25 = vpop.f32.mrf.mxu1  ;;  %v7722_v59 = vadd.f32 %v7714_v54, %v7674_v9  ;;  %v8859_v9 = vld [vmem:[%s14990_s4 + $0x68] sm:$0xff] }
 0xf98   :  { %v7627_v42 = vadd.f32 %v7621_v25, %v7573_v28  ;;  %v8858_v28 = vld [vmem:[%s14990_s4 + $0x60] sm:$0xff] }
 0xf99   :  { %v7762_v15 = vpop.f32.mrf.mxu0 }
 0xf9a   :  { %v7770_v33 = vadd.f32 %v7762_v15, %v7722_v59  ;;  %v7675_v8 = vadd.f32 %v7669_v51, %v7627_v42  ;;  %v7890_v15 = vld [vmem:[%s14990_s4 + $0x28] sm:$0xff]  ;;  %v8857_v59 = vld [vmem:[%s14990_s4 + $0x58] sm:$0xff]  ;;  %v8856_v42 = vld [vmem:[%s14990_s4 + $0x50] sm:$0xff] }
 0xf9b   :  { %7938 = vmatpush.msra.mxu3 %v7890_v15 }
 0xf9d   :  { %7939 = vmatpush.msra.mxu3 %v7889_v60 }
 0xf9e   :  { %v7717_v44 = vpop.f32.mrf.mxu3 }
 0xf9f   :  { %v7801_v20 = vpop.f32.mrf.mxu1  ;;  %v7723_v38 = vadd.f32 %v7717_v44, %v7675_v8  ;;  %v7886_v44 = vld [vmem:[%s14990_s4 + $0x8] sm:$0xff]  ;;  %v8854_v8 = vld [vmem:[%s14990_s4 + $0x40] sm:$0xff] }
 0xfa0   :  { %v14835_v58 = vadd.f32 %v7801_v20, %v7768_v46  ;;  %v7887_v46 = vld [vmem:[%s14990_s4 + $0x10] sm:$0xff] }
 0xfa1   :  { %v7765_v18 = vpop.f32.mrf.mxu0 }
 0xfa2   :  { %v7826_v14 = vmul.f32 %v14835_v58, %v14835_v58  ;;  %v7771_v23 = vadd.f32 %v7765_v18, %v7723_v38  ;;  %v7819_v43 = vsel %vm28_vm0, %v14835_v58, 0.0  ;;  %v7885_v38 = vld [vmem:[%s14990_s4] sm:$0xff]  ;;  %v8871_v18 = vld [vmem:[%s14990_s4 + $0xb8] sm:$0xff] }
 0xfa4   :  { %v7830_v27 = vsel %vm28_vm0, %v7826_v14, 0.0  ;;  %v8880_v14 = vld [vmem:[%s14990_s4 + $0xf8] sm:$0xff] }
 0xfa7   :  { %v7804_v39 = vpop.f32.mrf.mxu1 }
 0xfa8   :  { %v14833_v45 = vadd.f32 %v7804_v39, %v7769_v32  ;;  %v8860_v39 = vld [vmem:[%s14990_s4 + $0x70] sm:$0xff]  ;;  %v7888_v32 = vld [vmem:[%s14990_s4 + $0x18] sm:$0xff] }
 0xfa9   :  { %7914 = vmatpush.msra.mxu2 %v8860_v39  ;;  %7940 = vmatpush.msra.mxu3 %v7888_v32 }
 0xfaa   :  { %v7827_v53 = vmul.f32 %v14833_v45, %v14833_v45  ;;  %v7820_v56 = vsel %vm28_vm0, %v14833_v45, 0.0 }
 0xfab   :  { %v7821_v13 = vadd.f32 %v7820_v56, %v7819_v43  ;;  %7915 = vmatpush.msra.mxu2 %v8859_v9  ;;  %7941 = vmatpush.msra.mxu3 %v7887_v46 }
 0xfac   :  { %v7831_v29 = vsel %vm28_vm0, %v7827_v53, 0.0 }
 0xfad   :  { %v7832_v52 = vadd.f32 %v7831_v29, %v7830_v27  ;;  %7916 = vmatpush.msra.mxu2 %v8858_v28  ;;  %7942 = vmatpush.msra.mxu3 %v7886_v44  ;;  %v8869_v29 = vld [vmem:[%s14990_s4 + $0xa8] sm:$0xff]  ;;  %v8868_v27 = vld [vmem:[%s14990_s4 + $0xa0] sm:$0xff] }
 0xfaf   :  { %v7807_v7 = vpop.f32.mrf.mxu1  ;;  %7917 = vmatpush.msra.mxu2 %v8857_v59  ;;  %7943 = vmatpush.msra.mxu3 %v7885_v38 }
 0xfb0   :  { %v14837_v21 = vadd.f32 %v7807_v7, %v7770_v33  ;;  %v8855_v33 = vld [vmem:[%s14990_s4 + $0x48] sm:$0xff] }
 0xfb1   :  { %7918 = vmatpush.msra.mxu2 %v8856_v42  ;;  %8001 = vmatpush.msrb.mxu3 %v8880_v14 }
 0xfb2   :  { %v7828_v17 = vmul.f32 %v14837_v21, %v14837_v21  ;;  %v7822_v16 = vsel %vm28_vm0, %v14837_v21, 0.0 }
 0xfb3   :  { %v7823_v36 = vadd.f32 %v7822_v16, %v7821_v13  ;;  %7919 = vmatpush.msra.mxu2 %v8855_v33  ;;  %v8878_v16 = vld [vmem:[%s14990_s4 + $0xe8] sm:$0xff]  ;;  %v7817_v13 = vld [vmem:[%s14989_s3 + $0x3] sm:$0x1] }
 0xfb4   :  { %v7833_v2 = vsel %vm28_vm0, %v7828_v17, 0.0  ;;  %v8870_v17 = vld [vmem:[%s14990_s4 + $0xb0] sm:$0xff] }
 0xfb5   :  { %v7834_v31 = vadd.f32 %v7833_v2, %v7832_v52  ;;  %7920 = vmatpush.msra.mxu2 %v8854_v8  ;;  %v8877_v2 = vld [vmem:[%s14990_s4 + $0xe0] sm:$0xff] }
 0xfb7   :  { %v7810_v34 = vpop.f32.mrf.mxu1  ;;  %7968 = vmatpush.msrb.mxu2 %v8871_v18 }
 0xfb8   :  { %v14854_v4 = vadd.f32 %v7810_v34, %v7771_v23  ;;  %v8879_v23 = vld [vmem:[%s14990_s4 + $0xf0] sm:$0xff] }
 0xfb9   :  { %7969 = vmatpush.msrb.mxu2 %v8870_v17  ;;  %8002 = vmatpush.msrb.mxu3 %v8879_v23 }
 0xfba   :  { %v7824_v11 = vsel %vm28_vm0, %v14854_v4, 0.0  ;;  %v7829_v63 = vmul.f32 %v14854_v4, %v14854_v4 }
 0xfbb   :  { %v7825_v26 = vadd.f32 %v7824_v11, %v7823_v36  ;;  %7970 = vmatpush.msrb.mxu2 %v8869_v29  ;;  %8003 = vmatpush.msrb.mxu3 %v8878_v16  ;;  %v8867_v36 = vld [vmem:[%s14990_s4 + $0x98] sm:$0xff] }
 0xfbc   :  { %v7835_v12 = vsel %vm28_vm0, %v7829_v63, 0.0  ;;  %v8876_v11 = vld [vmem:[%s14990_s4 + $0xd8] sm:$0xff] }
 0xfbd   :  { %v7836_v25 = vadd.f32 %v7835_v12, %v7834_v31  ;;  %v7837_v30 = vmul.f32 %v15803_v6, %v7825_v26  ;;  %7971 = vmatpush.msrb.mxu2 %v8868_v27  ;;  %8004 = vmatpush.msrb.mxu3 %v8877_v2  ;;  %v7818_v31 = vld [vmem:[%s14989_s3 + $0x7] sm:$0x1]  ;;  %v8866_v26 = vld [vmem:[%s14990_s4 + $0x90] sm:$0xff] }
 0xfbf   :  { %v7838_v35 = vsel %vm28_vm0, %v7837_v30, 0.0  ;;  %v7846_v47 = vmul.f32 %v15803_v6, %v7836_v25  ;;  %7972 = vmatpush.msrb.mxu2 %v8867_v36  ;;  %8005 = vmatpush.msrb.mxu3 %v8876_v11  ;;  %v8875_v30 = vld [vmem:[%s14990_s4 + $0xd0] sm:$0xff] }
 0xfc0   :  { %v7839_v3 = vrot.slane %v7838_v35, 4 }
 0xfc1   :  { %v7847_v62 = vsel %vm28_vm0, %v7846_v47, 0.0  ;;  %7973 = vmatpush.msrb.mxu2 %v8866_v26  ;;  %8006 = vmatpush.msrb.mxu3 %v8875_v30 }
 0xfc2   :  { %v7840_v22 = vadd.f32 %v7839_v3, %v7838_v35  ;;  %v7848_v50 = vrot.slane %v7847_v62, 4  ;;  %v8865_v35 = vld [vmem:[%s14990_s4 + $0x88] sm:$0xff] }
 0xfc3   :  { %v8874_v3 = vld [vmem:[%s14990_s4 + $0xc8] sm:$0xff]  ;;  %7974 = vmatpush.msrb.mxu2 %v8865_v35 }
 0xfc4   :  { %v7841_v10 = vrot.slane %v7840_v22, 2  ;;  %v7849_v19 = vadd.f32 %v7848_v50, %v7847_v62  ;;  %v8864_v62 = vld [vmem:[%s14990_s4 + $0x80] sm:$0xff]  ;;  %8007 = vmatpush.msrb.mxu3 %v8874_v3 }
 0xfc5   :  { %7975 = vmatpush.msrb.mxu2 %v8864_v62 }
 0xfc6   :  { %v7842_v20 = vadd.f32 %v7841_v10, %v7840_v22  ;;  %v7850_v24 = vrot.slane %v7849_v19, 2 }
 0xfc8   :  { %v7843_v40 = vrot.slane %v7842_v20, 1  ;;  %v7851_v48 = vadd.f32 %v7850_v24, %v7849_v19  ;;  %v8873_v19 = vld [vmem:[%s14990_s4 + $0xc0] sm:$0xff] }
 0xfc9   :  { %8008 = vmatpush.msrb.mxu3 %v8873_v19 }
 0xfca   :  { %v7844_v55 = vadd.f32 %v7843_v40, %v7842_v20  ;;  %v7852_v41 = vrot.slane %v7851_v48, 1 }
 0xfcc   :  { %v14865_v61 = vmul.f32 0.125, %v7844_v55  ;;  %v7853_v1 = vadd.f32 %v7852_v41, %v7851_v48 }
 0xfce   :  { %v7854_v57 = vmul.f32 0.125, %v7853_v1  ;;  %v7855_v6 = vmul.f32 %v14865_v61, %v14865_v61 }
 0xfd0   :  { %v7856_v54 = vsub.f32 %v7854_v57, %v7855_v6 }
 0xfd2   :  { %v7857_v5 = vadd.f32 0.001, %v7856_v54 }
 0xfd4   :  { %8890 = vrsqrt.f32 %v7857_v5  ;;  %vm7864_vm12 = vweird.f32 %v7857_v5 }
 0xfda   :  { %v8891_v51 = vpop.eup %8890 }
 0xfdb   :  { %v7859_v7 = vmul.f32 %v8891_v51, %v7857_v5  ;;  %vm7865_vm11 = vweird.f32 %v8891_v51 }
 0xfdc   :  { %vm7866_vm13 = vmor %vm7864_vm12, %vm7865_vm11 }
 0xfdd   :  { %v7860_v53 = vmul.f32 %v8891_v51, %v7859_v7 }
 0xfdf   :  { %v7861_v56 = vmul.f32 0.5, %v7860_v53 }
 0xfe1   :  { %v7862_v43 = vsub.f32 1.5, %v7861_v56 }
 0xfe3   :  { %v7863_v34 = vmul.f32 %v8891_v51, %v7862_v43 }
 0xfe5   :  { %v7867_v52 = vsel %vm7866_vm13, %v8891_v51, %v7863_v34 }
 0xfe6   :  { %v7868_v63 = vmul.f32 %v7867_v52, %v7817_v13 }
 0xfe8   :  { %v7869_v12 = vmul.f32 %v7868_v63, %v14865_v61  ;;  %v7871_v25 = vperm.slane %v7868_v63, 0 }
 0xfea   :  { %v7870_v47 = vsub.f32 %v7818_v31, %v7869_v12  ;;  %v7873_v50 = vmul.f32 %v7871_v25, %v14833_v45  ;;  %v7872_v10 = vmul.f32 %v7871_v25, %v14835_v58  ;;  %v7875_v55 = vmul.f32 %v7871_v25, %v14854_v4  ;;  %v8883_v4 = vld [vmem:[%s14991_s5] ss:$0 sm:$0xff] }
 0xfeb   :  { %v7874_v45 = vmul.f32 %v7871_v25, %v14837_v21 }
 0xfec   :  { %v7876_v22 = vperm.slane %v7870_v47, 0 }
 0xfee   :  { %v7878_v20 = vadd.f32 %v7876_v22, %v7873_v50  ;;  %v7877_v24 = vadd.f32 %v7876_v22, %v7872_v10  ;;  %v7880_v58 = vadd.f32 %v7876_v22, %v7875_v55  ;;  %v7879_v41 = vadd.f32 %v7876_v22, %v7874_v45 }
 0xff0   :  { %v7882_v40 = vmax.f32 %v7878_v20, 0.0  ;;  %v7881_v48 = vmax.f32 %v7877_v24, 0.0  ;;  %v7884_v61 = vmax.f32 %v7880_v58, 0.0  ;;  %v7883_v1 = vmax.f32 %v7879_v41, 0.0 }
 0xff2   :  { %8862 = vmatmul.msk.f32.vlgmr.msra.gmra.mxu2 %vm28_vm0, %v7882_v40  ;;  %8863 = vmatmul.msk.f32.vlgmr.msra.gmra.mxu3 %vm28_vm0, %v7881_v48 }
 0xffa   :  { %8872 = vmatmul.msk.f32.vlgmr.msrb.gmra.mxu2 %vm28_vm0, %v7883_v1  ;;  %8881 = vmatmul.msk.f32.vlgmr.msrb.gmra.mxu3 %vm28_vm0, %v7884_v61 }
0x1075   :  { %v7922_v57 = vpop.f32.mrf.mxu2  ;;  %v7945_v6 = vpop.f32.mrf.mxu3 }
0x1076   :  { %v7946_v54 = vadd.f32 %v7945_v6, %v7922_v57 }
0x107d   :  { %v7977_v0 = vpop.f32.mrf.mxu2  ;;  %v8010_v39 = vpop.f32.mrf.mxu3 }
0x107e   :  { %v7980_v37 = vadd.f32 %v7977_v0, %v7946_v54 }
0x1080   :  { %v8013_v49 = vadd.f32 %v8010_v39, %v7980_v37 }
0x1082   :  { %v8018_v21 = vadd.f32 %v8883_v4, %v8013_v49 }
0x1084   :  { %8019 = vst [vmem:[%s14992_s6] sm:$0xff] %v8018_v21 }

</bundles_post_ra>
